<compile_context>
chip_gen: v7x
topology: tpu7x:2x2x1
jax: 0.10.0
libtpu: 0.0.40
codegen_flags: <defaults>
</compile_context>

<pallas_src>
import functools

import jax
import jax.numpy as jnp
from jax.experimental import pallas as pl
from jax.experimental.pallas import tpu as pltpu


# Logical (PyTorch) layer dims and their 128-lane padded counterparts.
LAYER_DIMS = [(784, 1500), (1500, 800), (800, 1500), (1500, 784)]


def _round_up(n, m):
    return ((n + m - 1) // m) * m


def _pad128(n):
    return _round_up(n, 128)


PADDED_DIMS = [(_pad128(a), _pad128(b)) for a, b in LAYER_DIMS]
D_IN = LAYER_DIMS[0][0]          # 784
D_OUT = LAYER_DIMS[-1][1]        # 784
D_IN_PAD = PADDED_DIMS[0][0]     # 896
D_OUT_PAD = PADDED_DIMS[-1][1]   # 896


def _autoencoder_kernel(x_ref,
                        w1_ref, b1_ref, w2_ref, b2_ref,
                        w3_ref, b3_ref, w4_ref, b4_ref,
                        o_ref):
    """Fused 4x (Linear + Sigmoid); bf16 MXU matmuls with f32 accumulation."""

    def layer(h_bf16, w_ref, b_ref):
        z = jnp.dot(h_bf16, w_ref[...], preferred_element_type=jnp.float32)
        z = z + b_ref[...]                    # (tb, Dout) + (1, Dout) broadcast
        return jax.nn.sigmoid(z)              # f32, EUP exp path

    h = x_ref[...]                                              # bf16 (tb, 896)
    h = layer(h, w1_ref, b1_ref).astype(jnp.bfloat16)           # (tb, 1536)
    h = layer(h, w2_ref, b2_ref).astype(jnp.bfloat16)           # (tb, 896)
    h = layer(h, w3_ref, b3_ref).astype(jnp.bfloat16)           # (tb, 1536)
    o_ref[...] = layer(h, w4_ref, b4_ref).astype(o_ref.dtype)   # (tb, 896) f32


def _const_spec(shape):
    """Full-array block whose index never changes across the batch grid."""
    nd = len(shape)
    return pl.BlockSpec(shape, lambda i, _n=nd: (0,) * _n)


def _autoencoder_pallas(x_pad, params_pad, tb):
    """x_pad: (B_pad, 896) bf16, B_pad % tb == 0.
    params_pad: 4x (w bf16 (din_p, dout_p), b f32 (1, dout_p))."""
    b_pad = x_pad.shape[0]
    grid = (b_pad // tb,)

    flat_args = [x_pad]
    in_specs = [pl.BlockSpec((tb, D_IN_PAD), lambda i: (i, 0))]
    for (w, b) in params_pad:
        flat_args += [w, b]
        in_specs += [_const_spec(w.shape), _const_spec(b.shape)]

    return pl.pallas_call(
        _autoencoder_kernel,
        out_shape=jax.ShapeDtypeStruct((b_pad, D_OUT_PAD), jnp.float32),
        grid_spec=pl.GridSpec(
            grid=grid,
            in_specs=in_specs,
            out_specs=pl.BlockSpec((tb, D_OUT_PAD), lambda i: (i, 0)),
        ),
        compiler_params=pltpu.CompilerParams(
            # Sequential batch loop keeps the (constant-index) weight tiles
            # resident in VMEM — they are DMA'd exactly once.
            dimension_semantics=("arbitrary",),
            # ~11 MB bf16 weights (x2 pipeline buffers) + activation tiles;
            # safe on v5e/v6e (128 MiB) and within v7x's 64 MiB physical VMEM.
            vmem_limit_bytes=48 * 1024 * 1024,
        ),
    )(*flat_args)


@functools.partial(jax.jit, static_argnames=("tile_b",))
def autoencoder_forward(x, params_pad, tile_b=256):
    """x: (B, 784) f32 -> (B, 784) f32, matching the PyTorch forward."""
    B = x.shape[0]
    tb = min(tile_b, _round_up(B, 8))        # sublane-aligned batch tile
    b_pad = _round_up(_round_up(B, 8), tb)   # pad batch to a whole number of tiles
    x_pad = jnp.pad(x.astype(jnp.bfloat16),
                    ((0, b_pad - B), (0, D_IN_PAD - D_IN)))
    out_pad = _autoencoder_pallas(x_pad, params_pad, tb)
    return out_pad[:B, :D_OUT]


def init_params(key):
    """nn.Linear-style init U(-1/sqrt(fan_in), +), zero-padded to 128 multiples.

    Returns (padded bf16 params for the kernel, unpadded f32 params for the
    semantic reference)."""
    params_pad, params_f32 = [], []
    for i, ((din, dout), (din_p, dout_p)) in enumerate(zip(LAYER_DIMS, PADDED_DIMS)):
        kw, kb = jax.random.split(jax.random.fold_in(key, i))
        bound = 1.0 / jnp.sqrt(jnp.float32(din))
        w = jax.random.uniform(kw, (din, dout), jnp.float32, -bound, bound)
        b = jax.random.uniform(kb, (1, dout), jnp.float32, -bound, bound)
        w_pad = jnp.zeros((din_p, dout_p), jnp.float32).at[:din, :dout].set(w)
        b_pad = jnp.zeros((1, dout_p), jnp.float32).at[:, :dout].set(b)
        params_pad.append((w_pad.astype(jnp.bfloat16), b_pad))
        params_f32.append((w, b))
    return params_pad, params_f32


def reference_matched(x, params_pad):
    """Pure-JAX reference with identical padding / bf16 casts as the kernel."""
    B = x.shape[0]
    h = jnp.pad(x.astype(jnp.bfloat16), ((0, 0), (0, D_IN_PAD - D_IN)))
    n = len(params_pad)
    for li, (w, b) in enumerate(params_pad):
        z = jnp.dot(h, w, preferred_element_type=jnp.float32) + b
        a = jax.nn.sigmoid(z)
        h = a if li == n - 1 else a.astype(jnp.bfloat16)
    return h[:, :D_OUT]


def reference_f32(x, params_f32):
    """Full-precision reference of the original PyTorch semantics."""
    h = x
    for (w, b) in params_f32:
        h = jax.nn.sigmoid(h @ w + b)
    return h


if __name__ == "__main__":
    key = jax.random.PRNGKey(0)
    kx, kp = jax.random.split(key)

    B = 8
    x = jax.random.uniform(kx, (B, 784), jnp.float32)   # MNIST-like flat input
    params_pad, params_f32 = init_params(kp)

    out = autoencoder_forward(x, params_pad)
    out = jax.block_until_ready(out)
    assert out.shape == (B, 784), out.shape

    # Matched-precision check (same bf16 casts + padding): tight tolerance.
    ref_m = reference_matched(x, params_pad)
    assert jnp.allclose(out, ref_m, atol=2e-3, rtol=2e-3), (
        "matched-precision mismatch, max abs err = "
        f"{float(jnp.max(jnp.abs(out - ref_m)))}")

    # Semantic check vs full-f32 PyTorch-equivalent math: looser tolerance
    # (bf16 weight quantization), sigmoid outputs are in [0, 1].
    ref_f = reference_f32(x, params_f32)
    assert jnp.allclose(out, ref_f, atol=5e-2, rtol=5e-2), (
        "f32-reference mismatch, max abs err = "
        f"{float(jnp.max(jnp.abs(out - ref_f)))}")

    print("KERNEL_OK")
</pallas_src>

<mosaic_0001>
module attributes {stable_mosaic.version = 11 : i64} {
  func.func @_autoencoder_kernel(%arg0: i32, %arg1: memref<8x896xbf16, #tpu.memory_space<vmem>>, %arg2: memref<896x1536xbf16, #tpu.memory_space<vmem>>, %arg3: memref<1x1536xf32, #tpu.memory_space<vmem>>, %arg4: memref<1536x896xbf16, #tpu.memory_space<vmem>>, %arg5: memref<1x896xf32, #tpu.memory_space<vmem>>, %arg6: memref<896x1536xbf16, #tpu.memory_space<vmem>>, %arg7: memref<1x1536xf32, #tpu.memory_space<vmem>>, %arg8: memref<1536x896xbf16, #tpu.memory_space<vmem>>, %arg9: memref<1x896xf32, #tpu.memory_space<vmem>>, %arg10: memref<8x896xf32, #tpu.memory_space<vmem>>) attributes {dimension_semantics = [#tpu.dimension_semantics<arbitrary>], iteration_bounds = array<i64: 1>, scalar_prefetch = 0 : i64, scratch_operands = 0 : i64, tpu.core_type = #tpu.core_type<tc>, window_params = [{transform_indices = @transform_0, window_bounds = array<i64: 8, 896>}, {pipeline_mode = #tpu.pipeline_mode<synchronous>, transform_indices = @transform_1, window_bounds = array<i64: 896, 1536>}, {pipeline_mode = #tpu.pipeline_mode<synchronous>, transform_indices = @transform_2, window_bounds = array<i64: 1, 1536>}, {pipeline_mode = #tpu.pipeline_mode<synchronous>, transform_indices = @transform_3, window_bounds = array<i64: 1536, 896>}, {pipeline_mode = #tpu.pipeline_mode<synchronous>, transform_indices = @transform_4, window_bounds = array<i64: 1, 896>}, {pipeline_mode = #tpu.pipeline_mode<synchronous>, transform_indices = @transform_5, window_bounds = array<i64: 896, 1536>}, {pipeline_mode = #tpu.pipeline_mode<synchronous>, transform_indices = @transform_6, window_bounds = array<i64: 1, 1536>}, {pipeline_mode = #tpu.pipeline_mode<synchronous>, transform_indices = @transform_7, window_bounds = array<i64: 1536, 896>}, {pipeline_mode = #tpu.pipeline_mode<synchronous>, transform_indices = @transform_8, window_bounds = array<i64: 1, 896>}, {transform_indices = @transform_9, window_bounds = array<i64: 8, 896>}]} {
    %c0 = arith.constant 0 : index
    %c0_0 = arith.constant 0 : index
    %0 = vector.load %arg1[%c0, %c0_0] : memref<8x896xbf16, #tpu.memory_space<vmem>>, vector<8x896xbf16>
    %c0_1 = arith.constant 0 : index
    %c0_2 = arith.constant 0 : index
    %1 = vector.load %arg2[%c0_1, %c0_2] : memref<896x1536xbf16, #tpu.memory_space<vmem>>, vector<896x1536xbf16>
    %cst = arith.constant dense<0.000000e+00> : vector<8x1536xf32>
    %2 = tpu.matmul %0, %1, %cst {dimension_numbers = #tpu.dot_dimension_numbers<[1], [0], [0], [1], [0, 0, 1, 1], [], []>} : vector<8x896xbf16>, vector<896x1536xbf16>, vector<8x1536xf32> -> vector<8x1536xf32>
    %c0_3 = arith.constant 0 : index
    %c0_4 = arith.constant 0 : index
    %3 = vector.load %arg3[%c0_3, %c0_4] : memref<1x1536xf32, #tpu.memory_space<vmem>>, vector<1x1536xf32>
    %4 = vector.broadcast %3 : vector<1x1536xf32> to vector<8x1536xf32>
    %5 = arith.addf %2, %4 : vector<8x1536xf32>
    %6 = arith.negf %5 : vector<8x1536xf32>
    %7 = math.exp %6 : vector<8x1536xf32>
    %cst_5 = arith.constant 1.000000e+00 : f32
    %8 = vector.broadcast %cst_5 : f32 to vector<8x1536xf32>
    %9 = arith.addf %8, %7 : vector<8x1536xf32>
    %10 = arith.divf %8, %9 : vector<8x1536xf32>
    %11 = arith.truncf %10 : vector<8x1536xf32> to vector<8x1536xbf16>
    %c0_6 = arith.constant 0 : index
    %c0_7 = arith.constant 0 : index
    %12 = vector.load %arg4[%c0_6, %c0_7] : memref<1536x896xbf16, #tpu.memory_space<vmem>>, vector<1536x896xbf16>
    %cst_8 = arith.constant dense<0.000000e+00> : vector<8x896xf32>
    %13 = tpu.matmul %11, %12, %cst_8 {dimension_numbers = #tpu.dot_dimension_numbers<[1], [0], [0], [1], [0, 0, 1, 1], [], []>} : vector<8x1536xbf16>, vector<1536x896xbf16>, vector<8x896xf32> -> vector<8x896xf32>
    %c0_9 = arith.constant 0 : index
    %c0_10 = arith.constant 0 : index
    %14 = vector.load %arg5[%c0_9, %c0_10] : memref<1x896xf32, #tpu.memory_space<vmem>>, vector<1x896xf32>
    %15 = vector.broadcast %14 : vector<1x896xf32> to vector<8x896xf32>
    %16 = arith.addf %13, %15 : vector<8x896xf32>
    %17 = arith.negf %16 : vector<8x896xf32>
    %18 = math.exp %17 : vector<8x896xf32>
    %cst_11 = arith.constant 1.000000e+00 : f32
    %19 = vector.broadcast %cst_11 : f32 to vector<8x896xf32>
    %20 = arith.addf %19, %18 : vector<8x896xf32>
    %21 = arith.divf %19, %20 : vector<8x896xf32>
    %22 = arith.truncf %21 : vector<8x896xf32> to vector<8x896xbf16>
    %c0_12 = arith.constant 0 : index
    %c0_13 = arith.constant 0 : index
    %23 = vector.load %arg6[%c0_12, %c0_13] : memref<896x1536xbf16, #tpu.memory_space<vmem>>, vector<896x1536xbf16>
    %cst_14 = arith.constant dense<0.000000e+00> : vector<8x1536xf32>
    %24 = tpu.matmul %22, %23, %cst_14 {dimension_numbers = #tpu.dot_dimension_numbers<[1], [0], [0], [1], [0, 0, 1, 1], [], []>} : vector<8x896xbf16>, vector<896x1536xbf16>, vector<8x1536xf32> -> vector<8x1536xf32>
    %c0_15 = arith.constant 0 : index
    %c0_16 = arith.constant 0 : index
    %25 = vector.load %arg7[%c0_15, %c0_16] : memref<1x1536xf32, #tpu.memory_space<vmem>>, vector<1x1536xf32>
    %26 = vector.broadcast %25 : vector<1x1536xf32> to vector<8x1536xf32>
    %27 = arith.addf %24, %26 : vector<8x1536xf32>
    %28 = arith.negf %27 : vector<8x1536xf32>
    %29 = math.exp %28 : vector<8x1536xf32>
    %cst_17 = arith.constant 1.000000e+00 : f32
    %30 = vector.broadcast %cst_17 : f32 to vector<8x1536xf32>
    %31 = arith.addf %30, %29 : vector<8x1536xf32>
    %32 = arith.divf %30, %31 : vector<8x1536xf32>
    %33 = arith.truncf %32 : vector<8x1536xf32> to vector<8x1536xbf16>
    %c0_18 = arith.constant 0 : index
    %c0_19 = arith.constant 0 : index
    %34 = vector.load %arg8[%c0_18, %c0_19] : memref<1536x896xbf16, #tpu.memory_space<vmem>>, vector<1536x896xbf16>
    %cst_20 = arith.constant dense<0.000000e+00> : vector<8x896xf32>
    %35 = tpu.matmul %33, %34, %cst_20 {dimension_numbers = #tpu.dot_dimension_numbers<[1], [0], [0], [1], [0, 0, 1, 1], [], []>} : vector<8x1536xbf16>, vector<1536x896xbf16>, vector<8x896xf32> -> vector<8x896xf32>
    %c0_21 = arith.constant 0 : index
    %c0_22 = arith.constant 0 : index
    %36 = vector.load %arg9[%c0_21, %c0_22] : memref<1x896xf32, #tpu.memory_space<vmem>>, vector<1x896xf32>
    %37 = vector.broadcast %36 : vector<1x896xf32> to vector<8x896xf32>
    %38 = arith.addf %35, %37 : vector<8x896xf32>
    %39 = arith.negf %38 : vector<8x896xf32>
    %40 = math.exp %39 : vector<8x896xf32>
    %cst_23 = arith.constant 1.000000e+00 : f32
    %41 = vector.broadcast %cst_23 : f32 to vector<8x896xf32>
    %42 = arith.addf %41, %40 : vector<8x896xf32>
    %43 = arith.divf %41, %42 : vector<8x896xf32>
    %c0_24 = arith.constant 0 : index
    %c0_25 = arith.constant 0 : index
    %44 = vector.load %arg10[%c0_24, %c0_25] : memref<8x896xf32, #tpu.memory_space<vmem>>, vector<8x896xf32>
    tpu.vector_store %arg10[%c0_24, %c0_25], %43 {strides = array<i32>} : memref<8x896xf32, #tpu.memory_space<vmem>>, vector<8x896xf32>,
    return
  }
  func.func @transform_0(%arg0: i32) -> (i32, i32) {
    %c0_i32 = arith.constant 0 : i32
    %c0_i32_0 = arith.constant 0 : i32
    return %arg0, %c0_i32 : i32, i32
  }
  func.func @transform_1(%arg0: i32) -> (i32, i32) {
    %c0_i32 = arith.constant 0 : i32
    %c0_i32_0 = arith.constant 0 : i32
    %c0_i32_1 = arith.constant 0 : i32
    return %c0_i32, %c0_i32_0 : i32, i32
  }
  func.func @transform_2(%arg0: i32) -> (i32, i32) {
    %c0_i32 = arith.constant 0 : i32
    %c0_i32_0 = arith.constant 0 : i32
    %c0_i32_1 = arith.constant 0 : i32
    return %c0_i32, %c0_i32_0 : i32, i32
  }
  func.func @transform_3(%arg0: i32) -> (i32, i32) {
    %c0_i32 = arith.constant 0 : i32
    %c0_i32_0 = arith.constant 0 : i32
    %c0_i32_1 = arith.constant 0 : i32
    return %c0_i32, %c0_i32_0 : i32, i32
  }
  func.func @transform_4(%arg0: i32) -> (i32, i32) {
    %c0_i32 = arith.constant 0 : i32
    %c0_i32_0 = arith.constant 0 : i32
    %c0_i32_1 = arith.constant 0 : i32
    return %c0_i32, %c0_i32_0 : i32, i32
  }
  func.func @transform_5(%arg0: i32) -> (i32, i32) {
    %c0_i32 = arith.constant 0 : i32
    %c0_i32_0 = arith.constant 0 : i32
    %c0_i32_1 = arith.constant 0 : i32
    return %c0_i32, %c0_i32_0 : i32, i32
  }
  func.func @transform_6(%arg0: i32) -> (i32, i32) {
    %c0_i32 = arith.constant 0 : i32
    %c0_i32_0 = arith.constant 0 : i32
    %c0_i32_1 = arith.constant 0 : i32
    return %c0_i32, %c0_i32_0 : i32, i32
  }
  func.func @transform_7(%arg0: i32) -> (i32, i32) {
    %c0_i32 = arith.constant 0 : i32
    %c0_i32_0 = arith.constant 0 : i32
    %c0_i32_1 = arith.constant 0 : i32
    return %c0_i32, %c0_i32_0 : i32, i32
  }
  func.func @transform_8(%arg0: i32) -> (i32, i32) {
    %c0_i32 = arith.constant 0 : i32
    %c0_i32_0 = arith.constant 0 : i32
    %c0_i32_1 = arith.constant 0 : i32
    return %c0_i32, %c0_i32_0 : i32, i32
  }
  func.func @transform_9(%arg0: i32) -> (i32, i32) {
    %c0_i32 = arith.constant 0 : i32
    %c0_i32_0 = arith.constant 0 : i32
    return %arg0, %c0_i32 : i32, i32
  }
}

</mosaic_0001>

<bundles_post_ra>
// kernel: autoencoder_forward.1
= control target key start
LH: loop header
LB: loop body
LE: loop exit
PB: predicated region body
PF: predicated region fallthrough
CT: control target
= control target key end

     0   :  { %14 = vsyncpa [#allocation3], 0  ;;  %s29383_s0 = inlined_call_operand.vmem [shape: bf16[8,896], index: 0, kind: input, shape index: {}]   ;;  %s29384_s1 = inlined_call_operand.hbm [shape: bf16[896,1536], index: 1, kind: input, shape index: {}]   ;;  %s29385_s2 = inlined_call_operand.hbm [shape: f32[1,1536], index: 2, kind: input, shape index: {}]   ;;  %s29386_s3 = inlined_call_operand.hbm [shape: bf16[1536,896], index: 3, kind: input, shape index: {}]   ;;  %s29387_s4 = inlined_call_operand.hbm [shape: f32[1,896], index: 4, kind: input, shape index: {}]   ;;  %s29388_s5 = inlined_call_operand.hbm [shape: bf16[896,1536], index: 5, kind: input, shape index: {}]   ;;  %s29389_s6 = inlined_call_operand.hbm [shape: f32[1,1536], index: 6, kind: input, shape index: {}]   ;;  %s29390_s7 = inlined_call_operand.hbm [shape: bf16[1536,896], index: 7, kind: input, shape index: {}]   ;;  %s29391_s8 = inlined_call_operand.hbm [shape: f32[1,896], index: 8, kind: input, shape index: {}]   ;;  %s29392_s9 = inlined_call_operand.hbm [shape: f32[8,896], index: 9, kind: output, shape index: {}]  }
   0x1   :  { %15 = vsyncpa [#allocation6], 0 }
   0x2   :  { %16 = vsyncpa [#allocation9], 0 }
   0x3   :  { %17 = vsyncpa [#allocation12], 0 }
   0x4   :  { %18 = vsyncpa [#allocation15], 0 }
   0x5   :  { %19 = vsyncpa [#allocation4], 0  ;;  %s28709_s30 = smov [#allocation5]   ;;  %s28710_s11 = smov [#allocation8]  }
   0x6   :  { %s40_s10 = sshll.u32 %s28709_s30, 4  ;;  %s62_s12 = sshll.u32 %s28710_s11, 4  ;;  %s41_s10 = int_to_ptr.vmem [resolvable:$true] %s40_s10  ;;  %s63_s12 = int_to_ptr.vmem [resolvable:$true] %s62_s12 }
   0x7   :  { %s28499_s15 = scalar_lea.hbm %s29385_s2, 192 }
   0x8   :  { %p28500_p0 = scmp.ne.s32.totalorder %s29385_s2, %s28499_s15  ;;  %p28503_p1 = scmp.lt.u32.totalorder %s28499_s15, %s29385_s2 }
   0xa   :  { %p28505_p2 = pnand %p28503_p1, %p28500_p0 }
   0xc   :  { %28508 = shalt.err (!%p28505_p2)
}
   0xd   :  { %s28509_s20 = scalar_lea.vmem %s41_s10, 192  ;;  %p28514_p4 = scmp.lt.s32.totalorder %s41_s10, %s41_s10 }
   0xe   :  { %p28510_p3 = scmp.ne.s32.totalorder %s41_s10, %s28509_s20  ;;  %p28515_p5 = scmp.lt.s32.totalorder %s28509_s20, %s28509_s20 }
  0x10   :  { %p28516_p6 = por %p28515_p5, %p28514_p4 }
  0x12   :  { %p28517_p7 = pnand %p28516_p6, %p28510_p3 }
  0x14   :  { %28520 = shalt.err (!%p28517_p7)
}
  0x15   :  { %43 = dma.hbm_to_vmem [thread:$0]  %s29385_s2, 192, %s41_s10, [#allocation6]  }
  0x16   :  { %s28521_s25 = scalar_lea.hbm %s29387_s4, 112 }
  0x17   :  { %p28522_p8 = scmp.ne.s32.totalorder %s29387_s4, %s28521_s25  ;;  %p28525_p9 = scmp.lt.u32.totalorder %s28521_s25, %s29387_s4 }
  0x19   :  { %p28527_p10 = pnand %p28525_p9, %p28522_p8 }
  0x1b   :  { %28530 = shalt.err (!%p28527_p10)
}
  0x1c   :  { %s28531_s30 = scalar_lea.vmem %s63_s12, 112  ;;  %s28535_s11 = scalar_lea.vmem %s63_s12, 128 }
  0x1d   :  { %p28532_p11 = scmp.ne.s32.totalorder %s63_s12, %s28531_s30  ;;  %p28536_p12 = scmp.lt.s32.totalorder %s63_s12, %s63_s12 }
  0x1e   :  { %p28537_p13 = scmp.lt.s32.totalorder %s28535_s11, %s28531_s30 }
  0x20   :  { %p28538_p0 = por %p28537_p13, %p28536_p12 }
  0x22   :  { %p28539_p1 = pnand %p28538_p0, %p28532_p11 }
  0x24   :  { %28542 = shalt.err (!%p28539_p1)
}
  0x25   :  { %65 = dma.hbm_to_vmem [thread:$0]  %s29387_s4, 112, %s63_s12, [#allocation9]  }
  0x26   :  { %s28711_s13 = smov [#allocation11]   ;;  %s28712_s15 = smov [#allocation2]  }
  0x27   :  { %s84_s14 = sshll.u32 %s28711_s13, 4  ;;  %s27_s16 = sshll.u32 %s28712_s15, 4  ;;  %s85_s14 = int_to_ptr.vmem [resolvable:$true] %s84_s14  ;;  %s28797_s16 = int_to_ptr.vmem [resolvable:$true] %s27_s16 }
  0x28   :  { %s28543_s19 = scalar_lea.hbm %s29389_s6, 192 }
  0x29   :  { %p28544_p2 = scmp.ne.s32.totalorder %s29389_s6, %s28543_s19  ;;  %p28547_p3 = scmp.lt.u32.totalorder %s28543_s19, %s29389_s6 }
  0x2b   :  { %p28549_p4 = pnand %p28547_p3, %p28544_p2 }
  0x2d   :  { %28552 = shalt.err (!%p28549_p4)
}
  0x2e   :  { %s28553_s4 = scalar_lea.vmem %s85_s14, 192  ;;  %p28558_p6 = scmp.lt.s32.totalorder %s85_s14, %s85_s14 }
  0x2f   :  { %p28554_p5 = scmp.ne.s32.totalorder %s85_s14, %s28553_s4  ;;  %p28559_p7 = scmp.lt.s32.totalorder %s28553_s4, %s28553_s4 }
  0x31   :  { %p28560_p8 = por %p28559_p7, %p28558_p6 }
  0x33   :  { %p28561_p9 = pnand %p28560_p8, %p28554_p5 }
  0x35   :  { %28564 = shalt.err (!%p28561_p9)
}
  0x36   :  { %87 = dma.hbm_to_vmem [thread:$0]  %s29389_s6, 192, %s85_s14, [#allocation12]  }
  0x37   :  { %s28565_s27 = scalar_lea.hbm %s29384_s1, 86016 }
  0x38   :  { %p28566_p10 = scmp.ne.s32.totalorder %s29384_s1, %s28565_s27  ;;  %p28569_p11 = scmp.lt.u32.totalorder %s28565_s27, %s29384_s1 }
  0x3a   :  { %p28571_p12 = pnand %p28569_p11, %p28566_p10 }
  0x3c   :  { %28574 = shalt.err (!%p28571_p12)
}
  0x3d   :  { %s28575_s2 = scalar_lea.vmem %s28797_s16, 86016  ;;  %p28580_p0 = scmp.lt.s32.totalorder %s28797_s16, %s28797_s16 }
  0x3e   :  { %p28576_p13 = scmp.ne.s32.totalorder %s28797_s16, %s28575_s2  ;;  %p28581_p1 = scmp.lt.s32.totalorder %s28575_s2, %s28575_s2 }
  0x40   :  { %p28582_p2 = por %p28581_p1, %p28580_p0 }
  0x42   :  { %p28583_p3 = pnand %p28582_p2, %p28576_p13 }
  0x44   :  { %28586 = shalt.err (!%p28583_p3)
}
  0x45   :  { %s28713_s6 = smov 768   ;;  %s28714_s10 = smov 48  }
  0x46   :  { %33 = dma.hbm_to_vmem [thread:$0]  %s29384_s1, 86016, %s28797_s16, [#allocation3], %s28713_s6, %s28713_s6, %s28714_s10  }
  0x47   :  { %s28715_s15 = smov [#allocation7]   ;;  %s28587_s20 = scalar_lea.hbm %s29386_s3, 86016 }
  0x48   :  { %s49_s17 = sshll.u32 %s28715_s15, 4  ;;  %p28588_p4 = scmp.ne.s32.totalorder %s29386_s3, %s28587_s20  ;;  %s50_s17 = int_to_ptr.vmem [resolvable:$true] %s49_s17 }
  0x49   :  { %p28591_p5 = scmp.lt.u32.totalorder %s28587_s20, %s29386_s3 }
  0x4b   :  { %p28593_p6 = pnand %p28591_p5, %p28588_p4 }
  0x4d   :  { %28596 = shalt.err (!%p28593_p6)
}
  0x4e   :  { %s28597_s12 = scalar_lea.vmem %s50_s17, 86016  ;;  %p28602_p8 = scmp.lt.s32.totalorder %s50_s17, %s50_s17 }
  0x4f   :  { %p28598_p7 = scmp.ne.s32.totalorder %s50_s17, %s28597_s12  ;;  %p28603_p9 = scmp.lt.s32.totalorder %s28597_s12, %s28597_s12 }
  0x51   :  { %p28604_p10 = por %p28603_p9, %p28602_p8 }
  0x53   :  { %p28605_p11 = pnand %p28604_p10, %p28598_p7 }
  0x55   :  { %28608 = shalt.err (!%p28605_p11)
}
  0x56   :  { %s28716_s1 = smov 448   ;;  %s28717_s16 = smov 28  }
  0x57   :  { %55 = dma.hbm_to_vmem [thread:$0]  %s29386_s3, 86016, %s50_s17, [#allocation6], %s28716_s1, %s28716_s1, %s28717_s16  }
  0x58   :  { %s28718_s26 = smov [#allocation10]   ;;  %s28719_s28 = smov [#allocation13]  }
  0x59   :  { %s71_s27 = sshll.u32 %s28718_s26, 4  ;;  %s93_s29 = sshll.u32 %s28719_s28, 4  ;;  %s72_s27 = int_to_ptr.vmem [resolvable:$true] %s71_s27  ;;  %s94_s29 = int_to_ptr.vmem [resolvable:$true] %s93_s29 }
  0x5a   :  { %s28609_s2 = scalar_lea.hbm %s29388_s5, 86016 }
  0x5b   :  { %p28610_p12 = scmp.ne.s32.totalorder %s29388_s5, %s28609_s2  ;;  %p28613_p13 = scmp.lt.u32.totalorder %s28609_s2, %s29388_s5 }
  0x5d   :  { %p28615_p0 = pnand %p28613_p13, %p28610_p12 }
  0x5f   :  { %28618 = shalt.err (!%p28615_p0)
}
  0x60   :  { %s28619_s3 = scalar_lea.vmem %s72_s27, 86016  ;;  %p28624_p2 = scmp.lt.s32.totalorder %s72_s27, %s72_s27 }
  0x61   :  { %p28620_p1 = scmp.ne.s32.totalorder %s72_s27, %s28619_s3  ;;  %p28625_p3 = scmp.lt.s32.totalorder %s28619_s3, %s28619_s3 }
  0x63   :  { %p28626_p4 = por %p28625_p3, %p28624_p2 }
  0x65   :  { %p28627_p5 = pnand %p28626_p4, %p28620_p1 }
  0x67   :  { %28630 = shalt.err (!%p28627_p5)
}
  0x68   :  { %77 = dma.hbm_to_vmem [thread:$0]  %s29388_s5, 86016, %s72_s27, [#allocation9], %s28713_s6, %s28713_s6, %s28714_s10  }
  0x69   :  { %s28631_s22 = scalar_lea.hbm %s29390_s7, 86016 }
  0x6a   :  { %p28632_p6 = scmp.ne.s32.totalorder %s29390_s7, %s28631_s22  ;;  %p28635_p7 = scmp.lt.u32.totalorder %s28631_s22, %s29390_s7 }
  0x6c   :  { %p28637_p8 = pnand %p28635_p7, %p28632_p6 }
  0x6e   :  { %28640 = shalt.err (!%p28637_p8)
}
  0x6f   :  { %s28641_s25 = scalar_lea.vmem %s94_s29, 86016  ;;  %p28646_p10 = scmp.lt.s32.totalorder %s94_s29, %s94_s29 }
  0x70   :  { %p28642_p9 = scmp.ne.s32.totalorder %s94_s29, %s28641_s25  ;;  %p28647_p11 = scmp.lt.s32.totalorder %s28641_s25, %s28641_s25 }
  0x72   :  { %p28648_p12 = por %p28647_p11, %p28646_p10 }
  0x74   :  { %p28649_p13 = pnand %p28648_p12, %p28642_p9 }
  0x76   :  { %28652 = shalt.err (!%p28649_p13)
}
  0x77   :  { %99 = dma.hbm_to_vmem [thread:$0]  %s29390_s7, 86016, %s94_s29, [#allocation12], %s28716_s1, %s28716_s1, %s28717_s16  }
  0x78   :  { %s28720_s10 = smov [#allocation14]   ;;  %s28653_s30 = scalar_lea.hbm %s29391_s8, 112 }
  0x79   :  { %s106_s26 = sshll.u32 %s28720_s10, 4  ;;  %p28654_p0 = scmp.ne.s32.totalorder %s29391_s8, %s28653_s30  ;;  %s107_s26 = int_to_ptr.vmem [resolvable:$true] %s106_s26 }
  0x7a   :  { %p28657_p1 = scmp.lt.u32.totalorder %s28653_s30, %s29391_s8 }
  0x7c   :  { %p28659_p2 = pnand %p28657_p1, %p28654_p0 }
  0x7e   :  { %28662 = shalt.err (!%p28659_p2)
}
  0x7f   :  { %s28663_s15 = scalar_lea.vmem %s107_s26, 112  ;;  %s28667_s7 = scalar_lea.vmem %s107_s26, 128 }
  0x80   :  { %p28664_p3 = scmp.ne.s32.totalorder %s107_s26, %s28663_s15  ;;  %p28668_p4 = scmp.lt.s32.totalorder %s107_s26, %s107_s26 }
  0x81   :  { %p28669_p5 = scmp.lt.s32.totalorder %s28667_s7, %s28663_s15 }
  0x83   :  { %p28670_p6 = por %p28669_p5, %p28668_p4 }
  0x85   :  { %p28671_p7 = pnand %p28670_p6, %p28664_p3 }
  0x87   :  { %28674 = shalt.err (!%p28671_p7)
}
  0x88   :  { %109 = dma.hbm_to_vmem [thread:$0]  %s29391_s8, 112, %s107_s26, [#allocation15]  }
  0x89   :  { %28697 = dma.done.wait [#allocation3], 86016  }
  0x8a   :  { %28698 = vsyncadd [#allocation3], 4294881280 }
  0x8b   :  { %28699 = dma.done.wait [#allocation6], 86208  }
  0x8c   :  { %28700 = vsyncadd [#allocation6], 4294881088 }
  0x8d   :  { %28701 = dma.done.wait [#allocation9], 86128  }
  0x8e   :  { %28702 = vsyncadd [#allocation9], 4294881168 }
  0x8f   :  { %28703 = dma.done.wait [#allocation12], 86208  }
  0x90   :  { %28704 = vsyncadd [#allocation12], 4294881088 }
  0x91   :  { %28705 = dma.done.wait [#allocation15], 112  }
  0x92   :  { %28706 = vsyncadd [#allocation15], 4294967184  ;;  %v24398_v0 = vld [vmem:[#allocation2 + $0x4] ss:$48 sps:$4 sm:$0xff]   ;;  %v24400_v1 = vld [vmem:[#allocation2 + $0xc] ss:$48 sps:$4 sm:$0xff]  }
  0x93   :  { %4260 = vmatprep.subr.bf16.mxu0 %v24398_v0  ;;  %v24402_v2 = vld [vmem:[#allocation2] ss:$48 sps:$4 sm:$0xff]   ;;  %v24403_v3 = vld [vmem:[#allocation2 + $0x8] ss:$48 sps:$4 sm:$0xff]   ;;  %4424 = vmatprep.subr.bf16.mxu1 %v24400_v1  ;;  %v24404_v4 = vld [vmem:[#allocation2 + $0x64] ss:$48 sps:$4 sm:$0xff]  }
  0x94   :  { %4261 = vmatpush1.bf16.msra.mxu0 %v24402_v2  ;;  %4425 = vmatpush1.bf16.msra.mxu1 %v24403_v3  ;;  %v24406_v5 = vld [vmem:[#allocation2 + $0x6c] ss:$48 sps:$4 sm:$0xff]   ;;  %v24408_v6 = vld [vmem:[#allocation2 + $0x60] ss:$48 sps:$4 sm:$0xff]   ;;  %v24409_v7 = vld [vmem:[#allocation2 + $0x68] ss:$48 sps:$4 sm:$0xff]  }
  0x95   :  { %4262 = vmatprep.subr.bf16.mxu0 %v24404_v4  ;;  %4426 = vmatprep.subr.bf16.mxu1 %v24406_v5  ;;  %v24410_v8 = vld [vmem:[#allocation2 + $0xc4] ss:$48 sps:$4 sm:$0xff]   ;;  %v24412_v9 = vld [vmem:[#allocation2 + $0xcc] ss:$48 sps:$4 sm:$0xff]   ;;  %v24414_v10 = vld [vmem:[#allocation2 + $0xc0] ss:$48 sps:$4 sm:$0xff]  }
  0x96   :  { %v24415_v11 = vld [vmem:[#allocation2 + $0xc8] ss:$48 sps:$4 sm:$0xff]   ;;  %v24416_v12 = vld [vmem:[#allocation2 + $0x124] ss:$48 sps:$4 sm:$0xff]   ;;  %v24418_v13 = vld [vmem:[#allocation2 + $0x12c] ss:$48 sps:$4 sm:$0xff]  }
  0x97   :  { %v24420_v14 = vld [vmem:[#allocation2 + $0x120] ss:$48 sps:$4 sm:$0xff]   ;;  %v24421_v15 = vld [vmem:[#allocation2 + $0x128] ss:$48 sps:$4 sm:$0xff]   ;;  %v24422_v16 = vld [vmem:[#allocation2 + $0x184] ss:$48 sps:$4 sm:$0xff]  }
  0x98   :  { %4263 = vmatpush1.bf16.msra.mxu0 %v24408_v6  ;;  %4427 = vmatpush1.bf16.msra.mxu1 %v24409_v7  ;;  %v24424_v17 = vld [vmem:[#allocation2 + $0x18c] ss:$48 sps:$4 sm:$0xff]   ;;  %v24426_v18 = vld [vmem:[#allocation2 + $0x180] ss:$48 sps:$4 sm:$0xff]   ;;  %v24427_v19 = vld [vmem:[#allocation2 + $0x188] ss:$48 sps:$4 sm:$0xff]  }
  0x99   :  { %4264 = vmatprep.subr.bf16.mxu0 %v24410_v8  ;;  %4428 = vmatprep.subr.bf16.mxu1 %v24412_v9  ;;  %v24428_v20 = vld [vmem:[#allocation2 + $0x1e4] ss:$48 sps:$4 sm:$0xff]   ;;  %v24430_v21 = vld [vmem:[#allocation2 + $0x1ec] ss:$48 sps:$4 sm:$0xff]   ;;  %v24432_v22 = vld [vmem:[#allocation2 + $0x1e0] ss:$48 sps:$4 sm:$0xff]  }
  0x9a   :  { %v24433_v23 = vld [vmem:[#allocation2 + $0x1e8] ss:$48 sps:$4 sm:$0xff]   ;;  %v24434_v24 = vld [vmem:[#allocation2 + $0x244] ss:$48 sps:$4 sm:$0xff]   ;;  %v24436_v25 = vld [vmem:[#allocation2 + $0x24c] ss:$48 sps:$4 sm:$0xff]  }
  0x9b   :  { %v24438_v26 = vld [vmem:[#allocation2 + $0x240] ss:$48 sps:$4 sm:$0xff]   ;;  %v24439_v27 = vld [vmem:[#allocation2 + $0x248] ss:$48 sps:$4 sm:$0xff]   ;;  %v24440_v28 = vld [vmem:[#allocation2 + $0x2a4] ss:$48 sps:$4 sm:$0xff]  }
  0x9c   :  { %4265 = vmatpush1.bf16.msra.mxu0 %v24414_v10  ;;  %4429 = vmatpush1.bf16.msra.mxu1 %v24415_v11  ;;  %v24442_v29 = vld [vmem:[#allocation2 + $0x2ac] ss:$48 sps:$4 sm:$0xff]   ;;  %v24444_v30 = vld [vmem:[#allocation2 + $0x2a0] ss:$48 sps:$4 sm:$0xff]   ;;  %v24445_v31 = vld [vmem:[#allocation2 + $0x2a8] ss:$48 sps:$4 sm:$0xff]  }
  0x9d   :  { %4266 = vmatprep.subr.bf16.mxu0 %v24416_v12  ;;  %4430 = vmatprep.subr.bf16.mxu1 %v24418_v13  ;;  %v24446_v32 = vld [vmem:[#allocation2 + $0x304] ss:$48 sps:$4 sm:$0xff]   ;;  %v24448_v33 = vld [vmem:[#allocation2 + $0x30c] ss:$48 sps:$4 sm:$0xff]   ;;  %v24450_v34 = vld [vmem:[#allocation2 + $0x300] ss:$48 sps:$4 sm:$0xff]  }
  0x9e   :  { %v24451_v35 = vld [vmem:[#allocation2 + $0x308] ss:$48 sps:$4 sm:$0xff]   ;;  %v24452_v36 = vld [vmem:[#allocation2 + $0x364] ss:$48 sps:$4 sm:$0xff]   ;;  %v24454_v37 = vld [vmem:[#allocation2 + $0x36c] ss:$48 sps:$4 sm:$0xff]  }
  0x9f   :  { %v24456_v38 = vld [vmem:[#allocation2 + $0x360] ss:$48 sps:$4 sm:$0xff]   ;;  %v24457_v39 = vld [vmem:[#allocation2 + $0x368] ss:$48 sps:$4 sm:$0xff]   ;;  %v24458_v40 = vld [vmem:[#allocation2 + $0x3c4] ss:$48 sps:$4 sm:$0xff]  }
  0xa0   :  { %4267 = vmatpush1.bf16.msra.mxu0 %v24420_v14  ;;  %4431 = vmatpush1.bf16.msra.mxu1 %v24421_v15  ;;  %v24460_v41 = vld [vmem:[#allocation2 + $0x3cc] ss:$48 sps:$4 sm:$0xff]   ;;  %v24462_v42 = vld [vmem:[#allocation2 + $0x3c0] ss:$48 sps:$4 sm:$0xff]   ;;  %v24463_v43 = vld [vmem:[#allocation2 + $0x3c8] ss:$48 sps:$4 sm:$0xff]  }
  0xa1   :  { %4268 = vmatprep.subr.bf16.mxu0 %v24422_v16  ;;  %4432 = vmatprep.subr.bf16.mxu1 %v24424_v17  ;;  %v24464_v44 = vld [vmem:[#allocation2 + $0x424] ss:$48 sps:$4 sm:$0xff]   ;;  %v24466_v45 = vld [vmem:[#allocation2 + $0x42c] ss:$48 sps:$4 sm:$0xff]   ;;  %v24468_v47 = vld [vmem:[#allocation2 + $0x420] ss:$48 sps:$4 sm:$0xff]  }
  0xa2   :  { %v135_v46 = vld [vmem:[%s29383_s0] sm:$0xff]  ;;  %v24469_v49 = vld [vmem:[#allocation2 + $0x428] ss:$48 sps:$4 sm:$0xff]   ;;  %v24472_v51 = vld [vmem:[#allocation2 + $0x48c] ss:$48 sps:$4 sm:$0xff]  }
  0xa3   :  { %v28891_v48 = vcombine.high %v135_v46, %v135_v46  ;;  %v24470_v50 = vld [vmem:[#allocation2 + $0x484] ss:$48 sps:$4 sm:$0xff]   ;;  %v24474_v52 = vld [vmem:[#allocation2 + $0x480] ss:$48 sps:$4 sm:$0xff]   ;;  %v24475_v53 = vld [vmem:[#allocation2 + $0x488] ss:$48 sps:$4 sm:$0xff]   ;;  %v28895_v5 = vcombine.low %v135_v46, %v135_v46 }
  0xa4   :  { %4269 = vmatpush1.bf16.msra.mxu0 %v24426_v18  ;;  %4433 = vmatpush1.bf16.msra.mxu1 %v24427_v19  ;;  %v24476_v54 = vld [vmem:[#allocation2 + $0x4e4] ss:$48 sps:$4 sm:$0xff]   ;;  %v24478_v55 = vld [vmem:[#allocation2 + $0x4ec] ss:$48 sps:$4 sm:$0xff]   ;;  %v24480_v56 = vld [vmem:[#allocation2 + $0x4e0] ss:$48 sps:$4 sm:$0xff]  }
  0xa5   :  { %4270 = vmatprep.subr.bf16.mxu0 %v24428_v20  ;;  %4434 = vmatprep.subr.bf16.mxu1 %v24430_v21  ;;  %v24481_v57 = vld [vmem:[#allocation2 + $0x4e8] ss:$48 sps:$4 sm:$0xff]   ;;  %v24482_v58 = vld [vmem:[#allocation2 + $0x544] ss:$48 sps:$4 sm:$0xff]   ;;  %v24484_v59 = vld [vmem:[#allocation2 + $0x54c] ss:$48 sps:$4 sm:$0xff]  }
  0xa6   :  { %4292 = vmatprep.mubr.bf16.mxu0 %v28891_v48  ;;  %4456 = vmatprep.mubr.bf16.mxu1 %v28891_v48  ;;  %v24486_v60 = vld [vmem:[#allocation2 + $0x540] ss:$48 sps:$4 sm:$0xff]   ;;  %v24487_v61 = vld [vmem:[#allocation2 + $0x548] ss:$48 sps:$4 sm:$0xff]   ;;  %v24488_v62 = vld [vmem:[#allocation2 + $0x5a4] ss:$48 sps:$4 sm:$0xff]  }
  0xa7   :  { %v24490_v63 = vld [vmem:[#allocation2 + $0x5ac] ss:$48 sps:$4 sm:$0xff]   ;;  %v24492_v0 = vld [vmem:[#allocation2 + $0x5a0] ss:$48 sps:$4 sm:$0xff]   ;;  %v24493_v1 = vld [vmem:[#allocation2 + $0x5a8] ss:$48 sps:$4 sm:$0xff]  }
  0xa8   :  { %4271 = vmatpush1.bf16.msra.mxu0 %v24432_v22  ;;  %4435 = vmatpush1.bf16.msra.mxu1 %v24433_v23  ;;  %v24497_v2 = vld [vmem:[#allocation2 + $0x604] ss:$48 sps:$4 sm:$0xff]   ;;  %v24500_v3 = vld [vmem:[#allocation2 + $0x60c] ss:$48 sps:$4 sm:$0xff]   ;;  %v24495_v4 = vld [vmem:[#allocation2 + $0x600] ss:$48 sps:$4 sm:$0xff]  }
  0xa9   :  { %4272 = vmatprep.subr.bf16.mxu0 %v24434_v24  ;;  %4436 = vmatprep.subr.bf16.mxu1 %v24436_v25  ;;  %v24498_v6 = vld [vmem:[#allocation2 + $0x608] ss:$48 sps:$4 sm:$0xff]   ;;  %v24504_v7 = vld [vmem:[#allocation2 + $0x664] ss:$48 sps:$4 sm:$0xff]   ;;  %v24507_v8 = vld [vmem:[#allocation2 + $0x66c] ss:$48 sps:$4 sm:$0xff]  }
  0xaa   :  { %v24502_v9 = vld [vmem:[#allocation2 + $0x660] ss:$48 sps:$4 sm:$0xff]   ;;  %v24505_v10 = vld [vmem:[#allocation2 + $0x668] ss:$48 sps:$4 sm:$0xff]   ;;  %v24510_v11 = vld [vmem:[#allocation2 + $0x6c4] ss:$48 sps:$4 sm:$0xff]  }
  0xab   :  { %v24513_v12 = vld [vmem:[#allocation2 + $0x6cc] ss:$48 sps:$4 sm:$0xff]   ;;  %v24508_v13 = vld [vmem:[#allocation2 + $0x6c0] ss:$48 sps:$4 sm:$0xff]   ;;  %v24511_v14 = vld [vmem:[#allocation2 + $0x6c8] ss:$48 sps:$4 sm:$0xff]  }
  0xac   :  { %4273 = vmatpush1.bf16.msra.mxu0 %v24438_v26  ;;  %4437 = vmatpush1.bf16.msra.mxu1 %v24439_v27  ;;  %v24516_v15 = vld [vmem:[#allocation2 + $0x724] ss:$48 sps:$4 sm:$0xff]   ;;  %v24519_v16 = vld [vmem:[#allocation2 + $0x72c] ss:$48 sps:$4 sm:$0xff]   ;;  %v24514_v17 = vld [vmem:[#allocation2 + $0x720] ss:$48 sps:$4 sm:$0xff]  }
  0xad   :  { %4274 = vmatprep.subr.bf16.mxu0 %v24440_v28  ;;  %4438 = vmatprep.subr.bf16.mxu1 %v24442_v29  ;;  %v24517_v18 = vld [vmem:[#allocation2 + $0x728] ss:$48 sps:$4 sm:$0xff]   ;;  %v24522_v19 = vld [vmem:[#allocation2 + $0x784] ss:$48 sps:$4 sm:$0xff]   ;;  %v24525_v20 = vld [vmem:[#allocation2 + $0x78c] ss:$48 sps:$4 sm:$0xff]  }
  0xae   :  { %v24520_v21 = vld [vmem:[#allocation2 + $0x780] ss:$48 sps:$4 sm:$0xff]   ;;  %v24523_v22 = vld [vmem:[#allocation2 + $0x788] ss:$48 sps:$4 sm:$0xff]   ;;  %v24528_v23 = vld [vmem:[#allocation2 + $0x7e4] ss:$48 sps:$4 sm:$0xff]  }
  0xaf   :  { %v24531_v24 = vld [vmem:[#allocation2 + $0x7ec] ss:$48 sps:$4 sm:$0xff]   ;;  %v24526_v25 = vld [vmem:[#allocation2 + $0x7e0] ss:$48 sps:$4 sm:$0xff]   ;;  %v24529_v26 = vld [vmem:[#allocation2 + $0x7e8] ss:$48 sps:$4 sm:$0xff]  }
  0xb0   :  { %4275 = vmatpush1.bf16.msra.mxu0 %v24444_v30  ;;  %4439 = vmatpush1.bf16.msra.mxu1 %v24445_v31  ;;  %v24534_v27 = vld [vmem:[#allocation2 + $0x844] ss:$48 sps:$4 sm:$0xff]   ;;  %v24537_v28 = vld [vmem:[#allocation2 + $0x84c] ss:$48 sps:$4 sm:$0xff]   ;;  %v24532_v31 = vld [vmem:[#allocation2 + $0x840] ss:$48 sps:$4 sm:$0xff]  }
  0xb1   :  { %4276 = vmatprep.subr.bf16.mxu0 %v24446_v32  ;;  %4440 = vmatprep.subr.bf16.mxu1 %v24448_v33  ;;  %v28902_v29 = vld [vmem:[%s29383_s0 + $0x8] sm:$0xff]  ;;  %v24540_v33 = vld [vmem:[#allocation2 + $0x8a4] ss:$48 sps:$4 sm:$0xff]  }
  0xb2   :  { %v28906_v30 = vcombine.high %v28902_v29, %v28902_v29  ;;  %v24535_v32 = vld [vmem:[#allocation2 + $0x848] ss:$48 sps:$4 sm:$0xff]   ;;  %v24561_v46 = vld [vmem:[#allocation2 + $0x9cc] ss:$48 sps:$4 sm:$0xff]  }
  0xb4   :  { %4277 = vmatpush1.bf16.msra.mxu0 %v24450_v34  ;;  %4441 = vmatpush1.bf16.msra.mxu1 %v24451_v35  ;;  %v24543_v34 = vld [vmem:[#allocation2 + $0x8ac] ss:$48 sps:$4 sm:$0xff]   ;;  %v24538_v35 = vld [vmem:[#allocation2 + $0x8a0] ss:$48 sps:$4 sm:$0xff]  }
  0xb5   :  { %4278 = vmatprep.subr.bf16.mxu0 %v24452_v36  ;;  %4442 = vmatprep.subr.bf16.mxu1 %v24454_v37  ;;  %v24541_v36 = vld [vmem:[#allocation2 + $0x8a8] ss:$48 sps:$4 sm:$0xff]   ;;  %v24546_v37 = vld [vmem:[#allocation2 + $0x904] ss:$48 sps:$4 sm:$0xff]  }
  0xb8   :  { %4279 = vmatpush1.bf16.msra.mxu0 %v24456_v38  ;;  %4443 = vmatpush1.bf16.msra.mxu1 %v24457_v39  ;;  %v24549_v38 = vld [vmem:[#allocation2 + $0x90c] ss:$48 sps:$4 sm:$0xff]   ;;  %v24544_v39 = vld [vmem:[#allocation2 + $0x900] ss:$48 sps:$4 sm:$0xff]  }
  0xb9   :  { %4280 = vmatprep.subr.bf16.mxu0 %v24458_v40  ;;  %4444 = vmatprep.subr.bf16.mxu1 %v24460_v41  ;;  %v24547_v40 = vld [vmem:[#allocation2 + $0x908] ss:$48 sps:$4 sm:$0xff]   ;;  %v24552_v41 = vld [vmem:[#allocation2 + $0x964] ss:$48 sps:$4 sm:$0xff]  }
  0xbc   :  { %4281 = vmatpush1.bf16.msra.mxu0 %v24462_v42  ;;  %4445 = vmatpush1.bf16.msra.mxu1 %v24463_v43  ;;  %v24555_v42 = vld [vmem:[#allocation2 + $0x96c] ss:$48 sps:$4 sm:$0xff]   ;;  %v24550_v43 = vld [vmem:[#allocation2 + $0x960] ss:$48 sps:$4 sm:$0xff]  }
  0xbd   :  { %4282 = vmatprep.subr.bf16.mxu0 %v24464_v44  ;;  %4446 = vmatprep.subr.bf16.mxu1 %v24466_v45  ;;  %v24553_v44 = vld [vmem:[#allocation2 + $0x968] ss:$48 sps:$4 sm:$0xff]   ;;  %v24558_v45 = vld [vmem:[#allocation2 + $0x9c4] ss:$48 sps:$4 sm:$0xff]  }
  0xc0   :  { %4283 = vmatpush1.bf16.msra.mxu0 %v24468_v47  ;;  %4447 = vmatpush1.bf16.msra.mxu1 %v24469_v49  ;;  %v24556_v47 = vld [vmem:[#allocation2 + $0x9c0] ss:$48 sps:$4 sm:$0xff]   ;;  %v24559_v49 = vld [vmem:[#allocation2 + $0x9c8] ss:$48 sps:$4 sm:$0xff]  }
  0xc1   :  { %4284 = vmatprep.subr.bf16.mxu0 %v24470_v50  ;;  %4448 = vmatprep.subr.bf16.mxu1 %v24472_v51  ;;  %v24564_v50 = vld [vmem:[#allocation2 + $0xa24] ss:$48 sps:$4 sm:$0xff]   ;;  %v24567_v51 = vld [vmem:[#allocation2 + $0xa2c] ss:$48 sps:$4 sm:$0xff]  }
  0xc4   :  { %4285 = vmatpush1.bf16.msra.mxu0 %v24474_v52  ;;  %4449 = vmatpush1.bf16.msra.mxu1 %v24475_v53  ;;  %v24562_v52 = vld [vmem:[#allocation2 + $0xa20] ss:$48 sps:$4 sm:$0xff]   ;;  %v24565_v53 = vld [vmem:[#allocation2 + $0xa28] ss:$48 sps:$4 sm:$0xff]  }
  0xc5   :  { %4286 = vmatprep.subr.bf16.mxu0 %v24476_v54  ;;  %4450 = vmatprep.subr.bf16.mxu1 %v24478_v55  ;;  %v24570_v54 = vld [vmem:[#allocation2 + $0xa84] ss:$48 sps:$4 sm:$0xff]   ;;  %v24573_v55 = vld [vmem:[#allocation2 + $0xa8c] ss:$48 sps:$4 sm:$0xff]  }
  0xc8   :  { %4287 = vmatpush1.bf16.msra.mxu0 %v24480_v56  ;;  %4451 = vmatpush1.bf16.msra.mxu1 %v24481_v57  ;;  %v24568_v56 = vld [vmem:[#allocation2 + $0xa80] ss:$48 sps:$4 sm:$0xff]   ;;  %v24571_v57 = vld [vmem:[#allocation2 + $0xa88] ss:$48 sps:$4 sm:$0xff]  }
  0xc9   :  { %4288 = vmatprep.subr.bf16.mxu0 %v24482_v58  ;;  %4452 = vmatprep.subr.bf16.mxu1 %v24484_v59  ;;  %v24576_v58 = vld [vmem:[#allocation2 + $0xae4] ss:$48 sps:$4 sm:$0xff]   ;;  %v24579_v59 = vld [vmem:[#allocation2 + $0xaec] ss:$48 sps:$4 sm:$0xff]  }
  0xcc   :  { %4289 = vmatpush1.bf16.msra.mxu0 %v24486_v60  ;;  %4453 = vmatpush1.bf16.msra.mxu1 %v24487_v61  ;;  %v24574_v60 = vld [vmem:[#allocation2 + $0xae0] ss:$48 sps:$4 sm:$0xff]   ;;  %v24577_v61 = vld [vmem:[#allocation2 + $0xae8] ss:$48 sps:$4 sm:$0xff]  }
  0xcd   :  { %4290 = vmatprep.subr.bf16.mxu0 %v24488_v62  ;;  %4454 = vmatprep.subr.bf16.mxu1 %v24490_v63  ;;  %v24582_v62 = vld [vmem:[#allocation2 + $0xb44] ss:$48 sps:$4 sm:$0xff]   ;;  %v24585_v63 = vld [vmem:[#allocation2 + $0xb4c] ss:$48 sps:$4 sm:$0xff]  }
  0xd0   :  { %4291 = vmatpush1.bf16.msra.mxu0 %v24492_v0  ;;  %4455 = vmatpush1.bf16.msra.mxu1 %v24493_v1  ;;  %v24580_v0 = vld [vmem:[#allocation2 + $0xb40] ss:$48 sps:$4 sm:$0xff]   ;;  %v24583_v1 = vld [vmem:[#allocation2 + $0xb48] ss:$48 sps:$4 sm:$0xff]  }
  0xd1   :  { %4301 = vmatprep.subr.bf16.mxu0 %v24497_v2  ;;  %4465 = vmatprep.subr.bf16.mxu1 %v24500_v3  ;;  %v24588_v2 = vld [vmem:[#allocation2 + $0xba4] ss:$48 sps:$4 sm:$0xff]   ;;  %v24591_v3 = vld [vmem:[#allocation2 + $0xbac] ss:$48 sps:$4 sm:$0xff]  }
  0xd3   :  { %4293 = vmatmul.mubr.bf16.vlgmr.msra.gmra.mrb[0].mxu0 %v28895_v5  ;;  %4457 = vmatmul.mubr.bf16.vlgmr.msra.gmra.mrb[0].mxu1 %v28895_v5 }
  0xd4   :  { %4302 = vmatpush1.bf16.msra.mxu0 %v24495_v4  ;;  %4466 = vmatpush1.bf16.msra.mxu1 %v24498_v6  ;;  %v24586_v4 = vld [vmem:[#allocation2 + $0xba0] ss:$48 sps:$4 sm:$0xff]   ;;  %v24589_v6 = vld [vmem:[#allocation2 + $0xba8] ss:$48 sps:$4 sm:$0xff]  }
  0xd5   :  { %4303 = vmatprep.subr.bf16.mxu0 %v24504_v7  ;;  %4467 = vmatprep.subr.bf16.mxu1 %v24507_v8  ;;  %v24595_v7 = vld [vmem:[#allocation2 + $0xc04] ss:$48 sps:$4 sm:$0xff]   ;;  %v24598_v8 = vld [vmem:[#allocation2 + $0xc0c] ss:$48 sps:$4 sm:$0xff]  }
  0xd6   :  { %4333 = vmatprep.mubr.bf16.mxu0 %v28906_v30  ;;  %4497 = vmatprep.mubr.bf16.mxu1 %v28906_v30 }
  0xd8   :  { %4304 = vmatpush1.bf16.msra.mxu0 %v24502_v9  ;;  %4468 = vmatpush1.bf16.msra.mxu1 %v24505_v10  ;;  %v24593_v9 = vld [vmem:[#allocation2 + $0xc00] ss:$48 sps:$4 sm:$0xff]   ;;  %v28912_v10 = vcombine.low %v28902_v29, %v28902_v29  ;;  %v24621_v29 = vld [vmem:[#allocation2 + $0xd88] ss:$48 sps:$4 sm:$0xff]  }
  0xd9   :  { %4305 = vmatprep.subr.bf16.mxu0 %v24510_v11  ;;  %4469 = vmatprep.subr.bf16.mxu1 %v24513_v12  ;;  %v24596_v11 = vld [vmem:[#allocation2 + $0xc08] ss:$48 sps:$4 sm:$0xff]   ;;  %v24602_v12 = vld [vmem:[#allocation2 + $0xc64] ss:$48 sps:$4 sm:$0xff]  }
  0xdc   :  { %4306 = vmatpush1.bf16.msra.mxu0 %v24508_v13  ;;  %4470 = vmatpush1.bf16.msra.mxu1 %v24511_v14  ;;  %v28917_v13 = vld [vmem:[%s29383_s0 + $0x10] sm:$0xff]  ;;  %v24605_v14 = vld [vmem:[#allocation2 + $0xc6c] ss:$48 sps:$4 sm:$0xff]  }
  0xdd   :  { %4307 = vmatprep.subr.bf16.mxu0 %v24516_v15  ;;  %4471 = vmatprep.subr.bf16.mxu1 %v24519_v16  ;;  %v28921_v15 = vcombine.high %v28917_v13, %v28917_v13  ;;  %v24600_v16 = vld [vmem:[#allocation2 + $0xc60] ss:$48 sps:$4 sm:$0xff]  }
  0xe0   :  { %4308 = vmatpush1.bf16.msra.mxu0 %v24514_v17  ;;  %4472 = vmatpush1.bf16.msra.mxu1 %v24517_v18  ;;  %v24603_v17 = vld [vmem:[#allocation2 + $0xc68] ss:$48 sps:$4 sm:$0xff]   ;;  %v24608_v18 = vld [vmem:[#allocation2 + $0xcc4] ss:$48 sps:$4 sm:$0xff]  }
  0xe1   :  { %4309 = vmatprep.subr.bf16.mxu0 %v24522_v19  ;;  %4473 = vmatprep.subr.bf16.mxu1 %v24525_v20  ;;  %v24611_v19 = vld [vmem:[#allocation2 + $0xccc] ss:$48 sps:$4 sm:$0xff]   ;;  %v24606_v20 = vld [vmem:[#allocation2 + $0xcc0] ss:$48 sps:$4 sm:$0xff]  }
  0xe4   :  { %4310 = vmatpush1.bf16.msra.mxu0 %v24520_v21  ;;  %4474 = vmatpush1.bf16.msra.mxu1 %v24523_v22  ;;  %v24609_v21 = vld [vmem:[#allocation2 + $0xcc8] ss:$48 sps:$4 sm:$0xff]   ;;  %v24614_v22 = vld [vmem:[#allocation2 + $0xd24] ss:$48 sps:$4 sm:$0xff]  }
  0xe5   :  { %4311 = vmatprep.subr.bf16.mxu0 %v24528_v23  ;;  %4475 = vmatprep.subr.bf16.mxu1 %v24531_v24  ;;  %v24617_v23 = vld [vmem:[#allocation2 + $0xd2c] ss:$48 sps:$4 sm:$0xff]   ;;  %v24612_v24 = vld [vmem:[#allocation2 + $0xd20] ss:$48 sps:$4 sm:$0xff]  }
  0xe8   :  { %4312 = vmatpush1.bf16.msra.mxu0 %v24526_v25  ;;  %4476 = vmatpush1.bf16.msra.mxu1 %v24529_v26  ;;  %v24615_v25 = vld [vmem:[#allocation2 + $0xd28] ss:$48 sps:$4 sm:$0xff]   ;;  %v24620_v26 = vld [vmem:[#allocation2 + $0xd84] ss:$48 sps:$4 sm:$0xff]  }
  0xe9   :  { %4313 = vmatprep.subr.bf16.mxu0 %v24534_v27  ;;  %4477 = vmatprep.subr.bf16.mxu1 %v24537_v28  ;;  %v24623_v27 = vld [vmem:[#allocation2 + $0xd8c] ss:$48 sps:$4 sm:$0xff]   ;;  %v24618_v28 = vld [vmem:[#allocation2 + $0xd80] ss:$48 sps:$4 sm:$0xff]  }
  0xec   :  { %4314 = vmatpush1.bf16.msra.mxu0 %v24532_v31  ;;  %4478 = vmatpush1.bf16.msra.mxu1 %v24535_v32  ;;  %v24626_v31 = vld [vmem:[#allocation2 + $0xde4] ss:$48 sps:$4 sm:$0xff]   ;;  %v24629_v32 = vld [vmem:[#allocation2 + $0xdec] ss:$48 sps:$4 sm:$0xff]  }
  0xed   :  { %4315 = vmatprep.subr.bf16.mxu0 %v24540_v33  ;;  %4479 = vmatprep.subr.bf16.mxu1 %v24543_v34  ;;  %v24624_v33 = vld [vmem:[#allocation2 + $0xde0] ss:$48 sps:$4 sm:$0xff]   ;;  %v24627_v34 = vld [vmem:[#allocation2 + $0xde8] ss:$48 sps:$4 sm:$0xff]  }
  0xf0   :  { %4316 = vmatpush1.bf16.msra.mxu0 %v24538_v35  ;;  %4480 = vmatpush1.bf16.msra.mxu1 %v24541_v36  ;;  %v24632_v35 = vld [vmem:[#allocation2 + $0xe44] ss:$48 sps:$4 sm:$0xff]   ;;  %v24635_v36 = vld [vmem:[#allocation2 + $0xe4c] ss:$48 sps:$4 sm:$0xff]  }
  0xf1   :  { %4317 = vmatprep.subr.bf16.mxu0 %v24546_v37  ;;  %4481 = vmatprep.subr.bf16.mxu1 %v24549_v38  ;;  %v24630_v37 = vld [vmem:[#allocation2 + $0xe40] ss:$48 sps:$4 sm:$0xff]   ;;  %v24633_v38 = vld [vmem:[#allocation2 + $0xe48] ss:$48 sps:$4 sm:$0xff]  }
  0xf4   :  { %4318 = vmatpush1.bf16.msra.mxu0 %v24544_v39  ;;  %4482 = vmatpush1.bf16.msra.mxu1 %v24547_v40  ;;  %v24638_v39 = vld [vmem:[#allocation2 + $0xea4] ss:$48 sps:$4 sm:$0xff]   ;;  %v24641_v40 = vld [vmem:[#allocation2 + $0xeac] ss:$48 sps:$4 sm:$0xff]  }
  0xf5   :  { %4319 = vmatprep.subr.bf16.mxu0 %v24552_v41  ;;  %4483 = vmatprep.subr.bf16.mxu1 %v24555_v42  ;;  %v24636_v41 = vld [vmem:[#allocation2 + $0xea0] ss:$48 sps:$4 sm:$0xff]   ;;  %v24639_v42 = vld [vmem:[#allocation2 + $0xea8] ss:$48 sps:$4 sm:$0xff]  }
  0xf8   :  { %4320 = vmatpush1.bf16.msra.mxu0 %v24550_v43  ;;  %4484 = vmatpush1.bf16.msra.mxu1 %v24553_v44  ;;  %v24644_v43 = vld [vmem:[#allocation2 + $0xf04] ss:$48 sps:$4 sm:$0xff]   ;;  %v24647_v44 = vld [vmem:[#allocation2 + $0xf0c] ss:$48 sps:$4 sm:$0xff]  }
  0xf9   :  { %4321 = vmatprep.subr.bf16.mxu0 %v24558_v45  ;;  %4485 = vmatprep.subr.bf16.mxu1 %v24561_v46  ;;  %v24642_v45 = vld [vmem:[#allocation2 + $0xf00] ss:$48 sps:$4 sm:$0xff]   ;;  %v24645_v46 = vld [vmem:[#allocation2 + $0xf08] ss:$48 sps:$4 sm:$0xff]  }
  0xfc   :  { %4322 = vmatpush1.bf16.msra.mxu0 %v24556_v47  ;;  %4486 = vmatpush1.bf16.msra.mxu1 %v24559_v49  ;;  %v24650_v47 = vld [vmem:[#allocation2 + $0xf64] ss:$48 sps:$4 sm:$0xff]   ;;  %v24653_v49 = vld [vmem:[#allocation2 + $0xf6c] ss:$48 sps:$4 sm:$0xff]  }
  0xfd   :  { %4323 = vmatprep.subr.bf16.mxu0 %v24564_v50  ;;  %4487 = vmatprep.subr.bf16.mxu1 %v24567_v51  ;;  %v24648_v50 = vld [vmem:[#allocation2 + $0xf60] ss:$48 sps:$4 sm:$0xff]   ;;  %v24651_v51 = vld [vmem:[#allocation2 + $0xf68] ss:$48 sps:$4 sm:$0xff]  }
 0x100   :  { %4324 = vmatpush1.bf16.msra.mxu0 %v24562_v52  ;;  %4488 = vmatpush1.bf16.msra.mxu1 %v24565_v53  ;;  %v24656_v52 = vld [vmem:[#allocation2 + $0xfc4] ss:$48 sps:$4 sm:$0xff]   ;;  %v24659_v53 = vld [vmem:[#allocation2 + $0xfcc] ss:$48 sps:$4 sm:$0xff]  }
 0x101   :  { %4325 = vmatprep.subr.bf16.mxu0 %v24570_v54  ;;  %4489 = vmatprep.subr.bf16.mxu1 %v24573_v55  ;;  %v24654_v54 = vld [vmem:[#allocation2 + $0xfc0] ss:$48 sps:$4 sm:$0xff]   ;;  %v24657_v55 = vld [vmem:[#allocation2 + $0xfc8] ss:$48 sps:$4 sm:$0xff]  }
 0x104   :  { %4326 = vmatpush1.bf16.msra.mxu0 %v24568_v56  ;;  %4490 = vmatpush1.bf16.msra.mxu1 %v24571_v57  ;;  %v24662_v56 = vld [vmem:[#allocation2 + $0x1024] ss:$48 sps:$4 sm:$0xff]   ;;  %v24665_v57 = vld [vmem:[#allocation2 + $0x102c] ss:$48 sps:$4 sm:$0xff]  }
 0x105   :  { %4327 = vmatprep.subr.bf16.mxu0 %v24576_v58  ;;  %4491 = vmatprep.subr.bf16.mxu1 %v24579_v59  ;;  %v24660_v58 = vld [vmem:[#allocation2 + $0x1020] ss:$48 sps:$4 sm:$0xff]   ;;  %v24663_v59 = vld [vmem:[#allocation2 + $0x1028] ss:$48 sps:$4 sm:$0xff]  }
 0x108   :  { %4328 = vmatpush1.bf16.msra.mxu0 %v24574_v60  ;;  %4492 = vmatpush1.bf16.msra.mxu1 %v24577_v61  ;;  %v24668_v60 = vld [vmem:[#allocation2 + $0x1084] ss:$48 sps:$4 sm:$0xff]   ;;  %v24671_v61 = vld [vmem:[#allocation2 + $0x108c] ss:$48 sps:$4 sm:$0xff]  }
 0x109   :  { %4329 = vmatprep.subr.bf16.mxu0 %v24582_v62  ;;  %4493 = vmatprep.subr.bf16.mxu1 %v24585_v63  ;;  %v24666_v62 = vld [vmem:[#allocation2 + $0x1080] ss:$48 sps:$4 sm:$0xff]   ;;  %v24669_v63 = vld [vmem:[#allocation2 + $0x1088] ss:$48 sps:$4 sm:$0xff]  }
 0x10c   :  { %4330 = vmatpush1.bf16.msra.mxu0 %v24580_v0  ;;  %4494 = vmatpush1.bf16.msra.mxu1 %v24583_v1  ;;  %v24674_v0 = vld [vmem:[#allocation2 + $0x10e4] ss:$48 sps:$4 sm:$0xff]   ;;  %v24677_v1 = vld [vmem:[#allocation2 + $0x10ec] ss:$48 sps:$4 sm:$0xff]  }
 0x10d   :  { %4331 = vmatprep.subr.bf16.mxu0 %v24588_v2  ;;  %4495 = vmatprep.subr.bf16.mxu1 %v24591_v3  ;;  %v24672_v2 = vld [vmem:[#allocation2 + $0x10e0] ss:$48 sps:$4 sm:$0xff]   ;;  %v24675_v3 = vld [vmem:[#allocation2 + $0x10e8] ss:$48 sps:$4 sm:$0xff]  }
 0x110   :  { %4332 = vmatpush1.bf16.msra.mxu0 %v24586_v4  ;;  %4496 = vmatpush1.bf16.msra.mxu1 %v24589_v6  ;;  %v24680_v4 = vld [vmem:[#allocation2 + $0x1144] ss:$48 sps:$4 sm:$0xff]   ;;  %v24683_v6 = vld [vmem:[#allocation2 + $0x114c] ss:$48 sps:$4 sm:$0xff]  }
 0x111   :  { %4342 = vmatprep.subr.bf16.mxu0 %v24595_v7  ;;  %4506 = vmatprep.subr.bf16.mxu1 %v24598_v8  ;;  %v24678_v7 = vld [vmem:[#allocation2 + $0x1140] ss:$48 sps:$4 sm:$0xff]   ;;  %v24681_v8 = vld [vmem:[#allocation2 + $0x1148] ss:$48 sps:$4 sm:$0xff]  }
 0x113   :  { %4334 = vmatmul.mubr.bf16.vlgmr.msra.gmra.mrb[0].mxu0 %v28912_v10  ;;  %4498 = vmatmul.mubr.bf16.vlgmr.msra.gmra.mrb[0].mxu1 %v28912_v10 }
 0x114   :  { %4343 = vmatpush1.bf16.msra.mxu0 %v24593_v9  ;;  %4507 = vmatpush1.bf16.msra.mxu1 %v24596_v11  ;;  %v24686_v9 = vld [vmem:[#allocation2 + $0x11a4] ss:$48 sps:$4 sm:$0xff]   ;;  %v24689_v11 = vld [vmem:[#allocation2 + $0x11ac] ss:$48 sps:$4 sm:$0xff]  }
 0x115   :  { %4344 = vmatprep.subr.bf16.mxu0 %v24602_v12  ;;  %4508 = vmatprep.subr.bf16.mxu1 %v24605_v14  ;;  %v24684_v12 = vld [vmem:[#allocation2 + $0x11a0] ss:$48 sps:$4 sm:$0xff]   ;;  %v24687_v14 = vld [vmem:[#allocation2 + $0x11a8] ss:$48 sps:$4 sm:$0xff]  }
 0x116   :  { %4374 = vmatprep.mubr.bf16.mxu0 %v28921_v15  ;;  %4538 = vmatprep.mubr.bf16.mxu1 %v28921_v15 }
 0x118   :  { %4345 = vmatpush1.bf16.msra.mxu0 %v24600_v16  ;;  %4509 = vmatpush1.bf16.msra.mxu1 %v24603_v17  ;;  %v24693_v16 = vld [vmem:[#allocation2 + $0x1204] ss:$48 sps:$4 sm:$0xff]   ;;  %v24696_v17 = vld [vmem:[#allocation2 + $0x120c] ss:$48 sps:$4 sm:$0xff]  }
 0x119   :  { %4346 = vmatprep.subr.bf16.mxu0 %v24608_v18  ;;  %4510 = vmatprep.subr.bf16.mxu1 %v24611_v19  ;;  %v24691_v18 = vld [vmem:[#allocation2 + $0x1200] ss:$48 sps:$4 sm:$0xff]   ;;  %v28929_v19 = vcombine.low %v28917_v13, %v28917_v13  ;;  %v24709_v13 = vld [vmem:[#allocation2 + $0x12cc] ss:$48 sps:$4 sm:$0xff]  }
 0x11c   :  { %4347 = vmatpush1.bf16.msra.mxu0 %v24606_v20  ;;  %4511 = vmatpush1.bf16.msra.mxu1 %v24609_v21  ;;  %v24694_v20 = vld [vmem:[#allocation2 + $0x1208] ss:$48 sps:$4 sm:$0xff]   ;;  %v24700_v21 = vld [vmem:[#allocation2 + $0x1264] ss:$48 sps:$4 sm:$0xff]  }
 0x11d   :  { %4348 = vmatprep.subr.bf16.mxu0 %v24614_v22  ;;  %4512 = vmatprep.subr.bf16.mxu1 %v24617_v23  ;;  %v24703_v22 = vld [vmem:[#allocation2 + $0x126c] ss:$48 sps:$4 sm:$0xff]   ;;  %v24698_v23 = vld [vmem:[#allocation2 + $0x1260] ss:$48 sps:$4 sm:$0xff]  }
 0x120   :  { %4349 = vmatpush1.bf16.msra.mxu0 %v24612_v24  ;;  %4513 = vmatpush1.bf16.msra.mxu1 %v24615_v25  ;;  %v24701_v24 = vld [vmem:[#allocation2 + $0x1268] ss:$48 sps:$4 sm:$0xff]   ;;  %v24706_v25 = vld [vmem:[#allocation2 + $0x12c4] ss:$48 sps:$4 sm:$0xff]  }
 0x121   :  { %4350 = vmatprep.subr.bf16.mxu0 %v24620_v26  ;;  %4514 = vmatprep.subr.bf16.mxu1 %v24623_v27  ;;  %v28721_v26 = vmov 0   ;;  %v24704_v27 = vld [vmem:[#allocation2 + $0x12c0] ss:$48 sps:$4 sm:$0xff]  }
 0x124   :  { %4351 = vmatpush1.bf16.msra.mxu0 %v24618_v28  ;;  %4515 = vmatpush1.bf16.msra.mxu1 %v24621_v29  ;;  %v24707_v28 = vld [vmem:[#allocation2 + $0x12c8] ss:$48 sps:$4 sm:$0xff]   ;;  %v24712_v29 = vld [vmem:[#allocation2 + $0x1324] ss:$48 sps:$4 sm:$0xff]  }
 0x125   :  { %4352 = vmatprep.subr.bf16.mxu0 %v24626_v31  ;;  %4516 = vmatprep.subr.bf16.mxu1 %v24629_v32  ;;  %v24715_v31 = vld [vmem:[#allocation2 + $0x132c] ss:$48 sps:$4 sm:$0xff]   ;;  %v24710_v32 = vld [vmem:[#allocation2 + $0x1320] ss:$48 sps:$4 sm:$0xff]  }
 0x128   :  { %4353 = vmatpush1.bf16.msra.mxu0 %v24624_v33  ;;  %4517 = vmatpush1.bf16.msra.mxu1 %v24627_v34  ;;  %v24713_v33 = vld [vmem:[#allocation2 + $0x1328] ss:$48 sps:$4 sm:$0xff]   ;;  %v24718_v34 = vld [vmem:[#allocation2 + $0x1384] ss:$48 sps:$4 sm:$0xff]  }
 0x129   :  { %4354 = vmatprep.subr.bf16.mxu0 %v24632_v35  ;;  %4518 = vmatprep.subr.bf16.mxu1 %v24635_v36  ;;  %v24721_v35 = vld [vmem:[#allocation2 + $0x138c] ss:$48 sps:$4 sm:$0xff]   ;;  %v24716_v36 = vld [vmem:[#allocation2 + $0x1380] ss:$48 sps:$4 sm:$0xff]  }
 0x12c   :  { %4355 = vmatpush1.bf16.msra.mxu0 %v24630_v37  ;;  %4519 = vmatpush1.bf16.msra.mxu1 %v24633_v38  ;;  %v24719_v37 = vld [vmem:[#allocation2 + $0x1388] ss:$48 sps:$4 sm:$0xff]   ;;  %v24724_v38 = vld [vmem:[#allocation2 + $0x13e4] ss:$48 sps:$4 sm:$0xff]  }
 0x12d   :  { %4356 = vmatprep.subr.bf16.mxu0 %v24638_v39  ;;  %4520 = vmatprep.subr.bf16.mxu1 %v24641_v40  ;;  %v24727_v39 = vld [vmem:[#allocation2 + $0x13ec] ss:$48 sps:$4 sm:$0xff]   ;;  %v24722_v40 = vld [vmem:[#allocation2 + $0x13e0] ss:$48 sps:$4 sm:$0xff]  }
 0x130   :  { %4357 = vmatpush1.bf16.msra.mxu0 %v24636_v41  ;;  %4521 = vmatpush1.bf16.msra.mxu1 %v24639_v42  ;;  %v24725_v41 = vld [vmem:[#allocation2 + $0x13e8] ss:$48 sps:$4 sm:$0xff]   ;;  %v24730_v42 = vld [vmem:[#allocation2 + $0x1444] ss:$48 sps:$4 sm:$0xff]  }
 0x131   :  { %4358 = vmatprep.subr.bf16.mxu0 %v24644_v43  ;;  %4522 = vmatprep.subr.bf16.mxu1 %v24647_v44  ;;  %v24733_v43 = vld [vmem:[#allocation2 + $0x144c] ss:$48 sps:$4 sm:$0xff]   ;;  %v24728_v44 = vld [vmem:[#allocation2 + $0x1440] ss:$48 sps:$4 sm:$0xff]  }
 0x134   :  { %4359 = vmatpush1.bf16.msra.mxu0 %v24642_v45  ;;  %4523 = vmatpush1.bf16.msra.mxu1 %v24645_v46  ;;  %v24731_v45 = vld [vmem:[#allocation2 + $0x1448] ss:$48 sps:$4 sm:$0xff]   ;;  %v24736_v46 = vld [vmem:[#allocation2 + $0x14a4] ss:$48 sps:$4 sm:$0xff]  }
 0x135   :  { %4360 = vmatprep.subr.bf16.mxu0 %v24650_v47  ;;  %4524 = vmatprep.subr.bf16.mxu1 %v24653_v49  ;;  %v24739_v47 = vld [vmem:[#allocation2 + $0x14ac] ss:$48 sps:$4 sm:$0xff]   ;;  %v24734_v49 = vld [vmem:[#allocation2 + $0x14a0] ss:$48 sps:$4 sm:$0xff]  }
 0x138   :  { %4361 = vmatpush1.bf16.msra.mxu0 %v24648_v50  ;;  %4525 = vmatpush1.bf16.msra.mxu1 %v24651_v51  ;;  %v24737_v50 = vld [vmem:[#allocation2 + $0x14a8] ss:$48 sps:$4 sm:$0xff]   ;;  %v24743_v51 = vld [vmem:[#allocation2 + $0x14] ss:$48 sps:$4 sm:$0xff]  }
 0x139   :  { %4362 = vmatprep.subr.bf16.mxu0 %v24656_v52  ;;  %4526 = vmatprep.subr.bf16.mxu1 %v24659_v53  ;;  %v24746_v52 = vld [vmem:[#allocation2 + $0x1c] ss:$48 sps:$4 sm:$0xff]   ;;  %v24740_v53 = vld [vmem:[%s29383_s0 + $0x18] ss:$0 sps:$4 sm:$0xff]  }
 0x13c   :  { %4363 = vmatpush1.bf16.msra.mxu0 %v24654_v54  ;;  %4527 = vmatpush1.bf16.msra.mxu1 %v24657_v55  ;;  %v24741_v54 = vld [vmem:[#allocation2 + $0x10] ss:$48 sps:$4 sm:$0xff]   ;;  %v24744_v55 = vld [vmem:[#allocation2 + $0x18] ss:$48 sps:$4 sm:$0xff]  }
 0x13d   :  { %4364 = vmatprep.subr.bf16.mxu0 %v24662_v56  ;;  %4528 = vmatprep.subr.bf16.mxu1 %v24665_v57  ;;  %v24749_v56 = vld [vmem:[#allocation2 + $0x74] ss:$48 sps:$4 sm:$0xff]   ;;  %v24752_v57 = vld [vmem:[#allocation2 + $0x7c] ss:$48 sps:$4 sm:$0xff]  }
 0x140   :  { %4365 = vmatpush1.bf16.msra.mxu0 %v24660_v58  ;;  %4529 = vmatpush1.bf16.msra.mxu1 %v24663_v59  ;;  %v24747_v58 = vld [vmem:[#allocation2 + $0x70] ss:$48 sps:$4 sm:$0xff]   ;;  %v24750_v59 = vld [vmem:[#allocation2 + $0x78] ss:$48 sps:$4 sm:$0xff]  }
 0x141   :  { %4366 = vmatprep.subr.bf16.mxu0 %v24668_v60  ;;  %4530 = vmatprep.subr.bf16.mxu1 %v24671_v61  ;;  %v24755_v60 = vld [vmem:[#allocation2 + $0xd4] ss:$48 sps:$4 sm:$0xff]   ;;  %v24758_v61 = vld [vmem:[#allocation2 + $0xdc] ss:$48 sps:$4 sm:$0xff]  }
 0x144   :  { %4367 = vmatpush1.bf16.msra.mxu0 %v24666_v62  ;;  %4531 = vmatpush1.bf16.msra.mxu1 %v24669_v63  ;;  %v24753_v62 = vld [vmem:[#allocation2 + $0xd0] ss:$48 sps:$4 sm:$0xff]   ;;  %v24756_v63 = vld [vmem:[#allocation2 + $0xd8] ss:$48 sps:$4 sm:$0xff]  }
 0x145   :  { %4368 = vmatprep.subr.bf16.mxu0 %v24674_v0  ;;  %4532 = vmatprep.subr.bf16.mxu1 %v24677_v1  ;;  %v24761_v0 = vld [vmem:[#allocation2 + $0x134] ss:$48 sps:$4 sm:$0xff]   ;;  %v24764_v1 = vld [vmem:[#allocation2 + $0x13c] ss:$48 sps:$4 sm:$0xff]  }
 0x148   :  { %4369 = vmatpush1.bf16.msra.mxu0 %v24672_v2  ;;  %4533 = vmatpush1.bf16.msra.mxu1 %v24675_v3  ;;  %v24759_v2 = vld [vmem:[#allocation2 + $0x130] ss:$48 sps:$4 sm:$0xff]   ;;  %v24762_v3 = vld [vmem:[#allocation2 + $0x138] ss:$48 sps:$4 sm:$0xff]  }
 0x149   :  { %4370 = vmatprep.subr.bf16.mxu0 %v24680_v4  ;;  %4534 = vmatprep.subr.bf16.mxu1 %v24683_v6  ;;  %v24767_v4 = vld [vmem:[#allocation2 + $0x194] ss:$48 sps:$4 sm:$0xff]   ;;  %v24770_v6 = vld [vmem:[#allocation2 + $0x19c] ss:$48 sps:$4 sm:$0xff]  }
 0x14c   :  { %4371 = vmatpush1.bf16.msra.mxu0 %v24678_v7  ;;  %4535 = vmatpush1.bf16.msra.mxu1 %v24681_v8  ;;  %v24765_v7 = vld [vmem:[#allocation2 + $0x190] ss:$48 sps:$4 sm:$0xff]   ;;  %v24768_v8 = vld [vmem:[#allocation2 + $0x198] ss:$48 sps:$4 sm:$0xff]  }
 0x14d   :  { %4372 = vmatprep.subr.bf16.mxu0 %v24686_v9  ;;  %4536 = vmatprep.subr.bf16.mxu1 %v24689_v11  ;;  %v24773_v9 = vld [vmem:[#allocation2 + $0x1f4] ss:$48 sps:$4 sm:$0xff]   ;;  %v24776_v11 = vld [vmem:[#allocation2 + $0x1fc] ss:$48 sps:$4 sm:$0xff]  }
 0x150   :  { %4373 = vmatpush1.bf16.msra.mxu0 %v24684_v12  ;;  %4537 = vmatpush1.bf16.msra.mxu1 %v24687_v14  ;;  %v24771_v12 = vld [vmem:[#allocation2 + $0x1f0] ss:$48 sps:$4 sm:$0xff]   ;;  %v24774_v14 = vld [vmem:[#allocation2 + $0x1f8] ss:$48 sps:$4 sm:$0xff]  }
 0x151   :  { %4383 = vmatprep.subr.bf16.mxu0 %v24693_v16  ;;  %4547 = vmatprep.subr.bf16.mxu1 %v24696_v17  ;;  %v24779_v16 = vld [vmem:[#allocation2 + $0x254] ss:$48 sps:$4 sm:$0xff]   ;;  %v24782_v17 = vld [vmem:[#allocation2 + $0x25c] ss:$48 sps:$4 sm:$0xff]  }
 0x153   :  { %4375 = vmatmul.mubr.bf16.vlgmr.msra.gmra.mrb[0].mxu0 %v28929_v19  ;;  %4539 = vmatmul.mubr.bf16.vlgmr.msra.gmra.mrb[0].mxu1 %v28929_v19 }
 0x154   :  { %4384 = vmatpush1.bf16.msra.mxu0 %v24691_v18  ;;  %4548 = vmatpush1.bf16.msra.mxu1 %v24694_v20  ;;  %v24777_v18 = vld [vmem:[#allocation2 + $0x250] ss:$48 sps:$4 sm:$0xff]   ;;  %v24780_v20 = vld [vmem:[#allocation2 + $0x258] ss:$48 sps:$4 sm:$0xff]  }
 0x155   :  { %4385 = vmatprep.subr.bf16.mxu0 %v24700_v21  ;;  %4549 = vmatprep.subr.bf16.mxu1 %v24703_v22  ;;  %v24785_v21 = vld [vmem:[#allocation2 + $0x2b4] ss:$48 sps:$4 sm:$0xff]   ;;  %v24788_v22 = vld [vmem:[#allocation2 + $0x2bc] ss:$48 sps:$4 sm:$0xff]  }
 0x156   :  { %4415 = vmatprep.mubr.bf16.mxu0 %v28721_v26  ;;  %4579 = vmatprep.mubr.bf16.mxu1 %v28721_v26 }
 0x158   :  { %4386 = vmatpush1.bf16.msra.mxu0 %v24698_v23  ;;  %4550 = vmatpush1.bf16.msra.mxu1 %v24701_v24  ;;  %v24783_v23 = vld [vmem:[#allocation2 + $0x2b0] ss:$48 sps:$4 sm:$0xff]   ;;  %v24786_v24 = vld [vmem:[#allocation2 + $0x2b8] ss:$48 sps:$4 sm:$0xff]  }
 0x159   :  { %4387 = vmatprep.subr.bf16.mxu0 %v24706_v25  ;;  %4551 = vmatprep.subr.bf16.mxu1 %v24709_v13  ;;  %v24791_v25 = vld [vmem:[#allocation2 + $0x314] ss:$48 sps:$4 sm:$0xff]   ;;  %v24794_v13 = vld [vmem:[#allocation2 + $0x31c] ss:$48 sps:$4 sm:$0xff]  }
 0x15c   :  { %4388 = vmatpush1.bf16.msra.mxu0 %v24704_v27  ;;  %4552 = vmatpush1.bf16.msra.mxu1 %v24707_v28  ;;  %v24789_v27 = vld [vmem:[#allocation2 + $0x310] ss:$48 sps:$4 sm:$0xff]   ;;  %v24792_v28 = vld [vmem:[#allocation2 + $0x318] ss:$48 sps:$4 sm:$0xff]  }
 0x15d   :  { %4389 = vmatprep.subr.bf16.mxu0 %v24712_v29  ;;  %4553 = vmatprep.subr.bf16.mxu1 %v24715_v31  ;;  %v24797_v29 = vld [vmem:[#allocation2 + $0x374] ss:$48 sps:$4 sm:$0xff]   ;;  %v24800_v31 = vld [vmem:[#allocation2 + $0x37c] ss:$48 sps:$4 sm:$0xff]  }
 0x160   :  { %4390 = vmatpush1.bf16.msra.mxu0 %v24710_v32  ;;  %4554 = vmatpush1.bf16.msra.mxu1 %v24713_v33  ;;  %v24795_v32 = vld [vmem:[#allocation2 + $0x370] ss:$48 sps:$4 sm:$0xff]   ;;  %v24798_v33 = vld [vmem:[#allocation2 + $0x378] ss:$48 sps:$4 sm:$0xff]  }
 0x161   :  { %4391 = vmatprep.subr.bf16.mxu0 %v24718_v34  ;;  %4555 = vmatprep.subr.bf16.mxu1 %v24721_v35  ;;  %v24803_v34 = vld [vmem:[#allocation2 + $0x3d4] ss:$48 sps:$4 sm:$0xff]   ;;  %v24806_v35 = vld [vmem:[#allocation2 + $0x3dc] ss:$48 sps:$4 sm:$0xff]  }
 0x164   :  { %4392 = vmatpush1.bf16.msra.mxu0 %v24716_v36  ;;  %4556 = vmatpush1.bf16.msra.mxu1 %v24719_v37  ;;  %v24801_v36 = vld [vmem:[#allocation2 + $0x3d0] ss:$48 sps:$4 sm:$0xff]   ;;  %v24804_v37 = vld [vmem:[#allocation2 + $0x3d8] ss:$48 sps:$4 sm:$0xff]  }
 0x165   :  { %4393 = vmatprep.subr.bf16.mxu0 %v24724_v38  ;;  %4557 = vmatprep.subr.bf16.mxu1 %v24727_v39  ;;  %v24809_v38 = vld [vmem:[#allocation2 + $0x434] ss:$48 sps:$4 sm:$0xff]   ;;  %v24812_v39 = vld [vmem:[#allocation2 + $0x43c] ss:$48 sps:$4 sm:$0xff]  }
 0x168   :  { %4394 = vmatpush1.bf16.msra.mxu0 %v24722_v40  ;;  %4558 = vmatpush1.bf16.msra.mxu1 %v24725_v41  ;;  %v24807_v40 = vld [vmem:[#allocation2 + $0x430] ss:$48 sps:$4 sm:$0xff]   ;;  %v24810_v41 = vld [vmem:[#allocation2 + $0x438] ss:$48 sps:$4 sm:$0xff]  }
 0x169   :  { %4395 = vmatprep.subr.bf16.mxu0 %v24730_v42  ;;  %4559 = vmatprep.subr.bf16.mxu1 %v24733_v43  ;;  %v24815_v42 = vld [vmem:[#allocation2 + $0x494] ss:$48 sps:$4 sm:$0xff]   ;;  %v24818_v43 = vld [vmem:[#allocation2 + $0x49c] ss:$48 sps:$4 sm:$0xff]  }
 0x16c   :  { %4396 = vmatpush1.bf16.msra.mxu0 %v24728_v44  ;;  %4560 = vmatpush1.bf16.msra.mxu1 %v24731_v45  ;;  %v24813_v44 = vld [vmem:[#allocation2 + $0x490] ss:$48 sps:$4 sm:$0xff]   ;;  %v24816_v45 = vld [vmem:[#allocation2 + $0x498] ss:$48 sps:$4 sm:$0xff]  }
 0x16d   :  { %4397 = vmatprep.subr.bf16.mxu0 %v24736_v46  ;;  %4561 = vmatprep.subr.bf16.mxu1 %v24739_v47  ;;  %v24821_v46 = vld [vmem:[#allocation2 + $0x4f4] ss:$48 sps:$4 sm:$0xff]   ;;  %v24824_v47 = vld [vmem:[#allocation2 + $0x4fc] ss:$48 sps:$4 sm:$0xff]  }
 0x170   :  { %4398 = vmatpush1.bf16.msra.mxu0 %v24734_v49  ;;  %4562 = vmatpush1.bf16.msra.mxu1 %v24737_v50  ;;  %v24819_v49 = vld [vmem:[#allocation2 + $0x4f0] ss:$48 sps:$4 sm:$0xff]   ;;  %v24822_v50 = vld [vmem:[#allocation2 + $0x4f8] ss:$48 sps:$4 sm:$0xff]  }
 0x171   :  { %4588 = vmatprep.subr.bf16.mxu0 %v24743_v51  ;;  %4752 = vmatprep.subr.bf16.mxu1 %v24746_v52  ;;  %v24827_v51 = vld [vmem:[#allocation2 + $0x554] ss:$48 sps:$4 sm:$0xff]   ;;  %v24830_v52 = vld [vmem:[#allocation2 + $0x55c] ss:$48 sps:$4 sm:$0xff]  }
 0x173   :  { %4416 = vmatmul.mubr.bf16.vlgmr.msra.gmra.mrb[0].mxu0 %v24740_v53  ;;  %4580 = vmatmul.mubr.bf16.vlgmr.msra.gmra.mrb[0].mxu1 %v24740_v53  ;;  %v24825_v53 = vld [vmem:[#allocation2 + $0x550] ss:$48 sps:$4 sm:$0xff]  }
 0x174   :  { %4589 = vmatpush1.bf16.msra.mxu0 %v24741_v54  ;;  %4753 = vmatpush1.bf16.msra.mxu1 %v24744_v55  ;;  %v24828_v54 = vld [vmem:[#allocation2 + $0x558] ss:$48 sps:$4 sm:$0xff]   ;;  %v24833_v55 = vld [vmem:[#allocation2 + $0x5b4] ss:$48 sps:$4 sm:$0xff]  }
 0x175   :  { %4590 = vmatprep.subr.bf16.mxu0 %v24749_v56  ;;  %4754 = vmatprep.subr.bf16.mxu1 %v24752_v57  ;;  %v24836_v56 = vld [vmem:[#allocation2 + $0x5bc] ss:$48 sps:$4 sm:$0xff]   ;;  %v24831_v57 = vld [vmem:[#allocation2 + $0x5b0] ss:$48 sps:$4 sm:$0xff]  }
 0x176   :  { %4620 = vmatprep.mubr.bf16.mxu0 %v28891_v48  ;;  %4784 = vmatprep.mubr.bf16.mxu1 %v28891_v48 }
 0x178   :  { %4591 = vmatpush1.bf16.msra.mxu0 %v24747_v58  ;;  %4755 = vmatpush1.bf16.msra.mxu1 %v24750_v59  ;;  %v24834_v58 = vld [vmem:[#allocation2 + $0x5b8] ss:$48 sps:$4 sm:$0xff]   ;;  %v24839_v59 = vld [vmem:[#allocation2 + $0x614] ss:$48 sps:$4 sm:$0xff]  }
 0x179   :  { %4592 = vmatprep.subr.bf16.mxu0 %v24755_v60  ;;  %4756 = vmatprep.subr.bf16.mxu1 %v24758_v61  ;;  %v24842_v60 = vld [vmem:[#allocation2 + $0x61c] ss:$48 sps:$4 sm:$0xff]   ;;  %v24837_v61 = vld [vmem:[#allocation2 + $0x610] ss:$48 sps:$4 sm:$0xff]  }
 0x17c   :  { %4593 = vmatpush1.bf16.msra.mxu0 %v24753_v62  ;;  %4757 = vmatpush1.bf16.msra.mxu1 %v24756_v63  ;;  %v24840_v62 = vld [vmem:[#allocation2 + $0x618] ss:$48 sps:$4 sm:$0xff]   ;;  %v24845_v63 = vld [vmem:[#allocation2 + $0x674] ss:$48 sps:$4 sm:$0xff]  }
 0x17d   :  { %4594 = vmatprep.subr.bf16.mxu0 %v24761_v0  ;;  %4758 = vmatprep.subr.bf16.mxu1 %v24764_v1  ;;  %v24848_v0 = vld [vmem:[#allocation2 + $0x67c] ss:$48 sps:$4 sm:$0xff]   ;;  %v24843_v1 = vld [vmem:[#allocation2 + $0x670] ss:$48 sps:$4 sm:$0xff]  }
 0x180   :  { %4595 = vmatpush1.bf16.msra.mxu0 %v24759_v2  ;;  %4759 = vmatpush1.bf16.msra.mxu1 %v24762_v3  ;;  %v24846_v2 = vld [vmem:[#allocation2 + $0x678] ss:$48 sps:$4 sm:$0xff]   ;;  %v24851_v3 = vld [vmem:[#allocation2 + $0x6d4] ss:$48 sps:$4 sm:$0xff]  }
 0x181   :  { %4596 = vmatprep.subr.bf16.mxu0 %v24767_v4  ;;  %4760 = vmatprep.subr.bf16.mxu1 %v24770_v6  ;;  %v24854_v4 = vld [vmem:[#allocation2 + $0x6dc] ss:$48 sps:$4 sm:$0xff]   ;;  %v24849_v6 = vld [vmem:[#allocation2 + $0x6d0] ss:$48 sps:$4 sm:$0xff]  }
 0x184   :  { %4597 = vmatpush1.bf16.msra.mxu0 %v24765_v7  ;;  %4761 = vmatpush1.bf16.msra.mxu1 %v24768_v8  ;;  %v24852_v7 = vld [vmem:[#allocation2 + $0x6d8] ss:$48 sps:$4 sm:$0xff]   ;;  %v24857_v8 = vld [vmem:[#allocation2 + $0x734] ss:$48 sps:$4 sm:$0xff]  }
 0x185   :  { %4598 = vmatprep.subr.bf16.mxu0 %v24773_v9  ;;  %4762 = vmatprep.subr.bf16.mxu1 %v24776_v11  ;;  %v24860_v9 = vld [vmem:[#allocation2 + $0x73c] ss:$48 sps:$4 sm:$0xff]   ;;  %v24855_v11 = vld [vmem:[#allocation2 + $0x730] ss:$48 sps:$4 sm:$0xff]  }
 0x188   :  { %4599 = vmatpush1.bf16.msra.mxu0 %v24771_v12  ;;  %4763 = vmatpush1.bf16.msra.mxu1 %v24774_v14  ;;  %v24858_v12 = vld [vmem:[#allocation2 + $0x738] ss:$48 sps:$4 sm:$0xff]   ;;  %v24863_v14 = vld [vmem:[#allocation2 + $0x794] ss:$48 sps:$4 sm:$0xff]  }
 0x189   :  { %4600 = vmatprep.subr.bf16.mxu0 %v24779_v16  ;;  %4764 = vmatprep.subr.bf16.mxu1 %v24782_v17  ;;  %v24866_v16 = vld [vmem:[#allocation2 + $0x79c] ss:$48 sps:$4 sm:$0xff]   ;;  %v24861_v17 = vld [vmem:[#allocation2 + $0x790] ss:$48 sps:$4 sm:$0xff]  }
 0x18c   :  { %4601 = vmatpush1.bf16.msra.mxu0 %v24777_v18  ;;  %4765 = vmatpush1.bf16.msra.mxu1 %v24780_v20  ;;  %v24864_v18 = vld [vmem:[#allocation2 + $0x798] ss:$48 sps:$4 sm:$0xff]   ;;  %v24869_v20 = vld [vmem:[#allocation2 + $0x7f4] ss:$48 sps:$4 sm:$0xff]  }
 0x18d   :  { %4602 = vmatprep.subr.bf16.mxu0 %v24785_v21  ;;  %4766 = vmatprep.subr.bf16.mxu1 %v24788_v22  ;;  %v24872_v21 = vld [vmem:[#allocation2 + $0x7fc] ss:$48 sps:$4 sm:$0xff]   ;;  %v24867_v22 = vld [vmem:[#allocation2 + $0x7f0] ss:$48 sps:$4 sm:$0xff]  }
 0x190   :  { %4603 = vmatpush1.bf16.msra.mxu0 %v24783_v23  ;;  %4767 = vmatpush1.bf16.msra.mxu1 %v24786_v24  ;;  %v24870_v23 = vld [vmem:[#allocation2 + $0x7f8] ss:$48 sps:$4 sm:$0xff]   ;;  %v24875_v24 = vld [vmem:[#allocation2 + $0x854] ss:$48 sps:$4 sm:$0xff]  }
 0x191   :  { %4604 = vmatprep.subr.bf16.mxu0 %v24791_v25  ;;  %4768 = vmatprep.subr.bf16.mxu1 %v24794_v13  ;;  %v24878_v25 = vld [vmem:[#allocation2 + $0x85c] ss:$48 sps:$4 sm:$0xff]   ;;  %v24873_v13 = vld [vmem:[#allocation2 + $0x850] ss:$48 sps:$4 sm:$0xff]  }
 0x194   :  { %4605 = vmatpush1.bf16.msra.mxu0 %v24789_v27  ;;  %4769 = vmatpush1.bf16.msra.mxu1 %v24792_v28  ;;  %v24876_v27 = vld [vmem:[#allocation2 + $0x858] ss:$48 sps:$4 sm:$0xff]   ;;  %v24881_v28 = vld [vmem:[#allocation2 + $0x8b4] ss:$48 sps:$4 sm:$0xff]  }
 0x195   :  { %4606 = vmatprep.subr.bf16.mxu0 %v24797_v29  ;;  %4770 = vmatprep.subr.bf16.mxu1 %v24800_v31  ;;  %v24884_v29 = vld [vmem:[#allocation2 + $0x8bc] ss:$48 sps:$4 sm:$0xff]   ;;  %v24879_v31 = vld [vmem:[#allocation2 + $0x8b0] ss:$48 sps:$4 sm:$0xff]  }
 0x198   :  { %4607 = vmatpush1.bf16.msra.mxu0 %v24795_v32  ;;  %4771 = vmatpush1.bf16.msra.mxu1 %v24798_v33  ;;  %v24882_v32 = vld [vmem:[#allocation2 + $0x8b8] ss:$48 sps:$4 sm:$0xff]   ;;  %v24887_v33 = vld [vmem:[#allocation2 + $0x914] ss:$48 sps:$4 sm:$0xff]  }
 0x199   :  { %4608 = vmatprep.subr.bf16.mxu0 %v24803_v34  ;;  %4772 = vmatprep.subr.bf16.mxu1 %v24806_v35  ;;  %v24890_v34 = vld [vmem:[#allocation2 + $0x91c] ss:$48 sps:$4 sm:$0xff]   ;;  %v24885_v35 = vld [vmem:[#allocation2 + $0x910] ss:$48 sps:$4 sm:$0xff]  }
 0x19c   :  { %4609 = vmatpush1.bf16.msra.mxu0 %v24801_v36  ;;  %4773 = vmatpush1.bf16.msra.mxu1 %v24804_v37  ;;  %v24888_v36 = vld [vmem:[#allocation2 + $0x918] ss:$48 sps:$4 sm:$0xff]   ;;  %v24893_v37 = vld [vmem:[#allocation2 + $0x974] ss:$48 sps:$4 sm:$0xff]  }
 0x19d   :  { %4610 = vmatprep.subr.bf16.mxu0 %v24809_v38  ;;  %4774 = vmatprep.subr.bf16.mxu1 %v24812_v39  ;;  %v24896_v38 = vld [vmem:[#allocation2 + $0x97c] ss:$48 sps:$4 sm:$0xff]   ;;  %v24891_v39 = vld [vmem:[#allocation2 + $0x970] ss:$48 sps:$4 sm:$0xff]  }
 0x1a0   :  { %4611 = vmatpush1.bf16.msra.mxu0 %v24807_v40  ;;  %4775 = vmatpush1.bf16.msra.mxu1 %v24810_v41  ;;  %v24894_v40 = vld [vmem:[#allocation2 + $0x978] ss:$48 sps:$4 sm:$0xff]   ;;  %v24899_v41 = vld [vmem:[#allocation2 + $0x9d4] ss:$48 sps:$4 sm:$0xff]  }
 0x1a1   :  { %4612 = vmatprep.subr.bf16.mxu0 %v24815_v42  ;;  %4776 = vmatprep.subr.bf16.mxu1 %v24818_v43  ;;  %v24902_v42 = vld [vmem:[#allocation2 + $0x9dc] ss:$48 sps:$4 sm:$0xff]   ;;  %v24897_v43 = vld [vmem:[#allocation2 + $0x9d0] ss:$48 sps:$4 sm:$0xff]  }
 0x1a4   :  { %4613 = vmatpush1.bf16.msra.mxu0 %v24813_v44  ;;  %4777 = vmatpush1.bf16.msra.mxu1 %v24816_v45  ;;  %v24900_v44 = vld [vmem:[#allocation2 + $0x9d8] ss:$48 sps:$4 sm:$0xff]   ;;  %v24905_v45 = vld [vmem:[#allocation2 + $0xa34] ss:$48 sps:$4 sm:$0xff]  }
 0x1a5   :  { %4614 = vmatprep.subr.bf16.mxu0 %v24821_v46  ;;  %4778 = vmatprep.subr.bf16.mxu1 %v24824_v47  ;;  %v24908_v46 = vld [vmem:[#allocation2 + $0xa3c] ss:$48 sps:$4 sm:$0xff]   ;;  %v24903_v47 = vld [vmem:[#allocation2 + $0xa30] ss:$48 sps:$4 sm:$0xff]  }
 0x1a8   :  { %4615 = vmatpush1.bf16.msra.mxu0 %v24819_v49  ;;  %4779 = vmatpush1.bf16.msra.mxu1 %v24822_v50  ;;  %v24906_v49 = vld [vmem:[#allocation2 + $0xa38] ss:$48 sps:$4 sm:$0xff]   ;;  %v24911_v50 = vld [vmem:[#allocation2 + $0xa94] ss:$48 sps:$4 sm:$0xff]  }
 0x1a9   :  { %4616 = vmatprep.subr.bf16.mxu0 %v24827_v51  ;;  %4780 = vmatprep.subr.bf16.mxu1 %v24830_v52  ;;  %v24914_v51 = vld [vmem:[#allocation2 + $0xa9c] ss:$48 sps:$4 sm:$0xff]   ;;  %v24909_v52 = vld [vmem:[#allocation2 + $0xa90] ss:$48 sps:$4 sm:$0xff]  }
 0x1ac   :  { %4617 = vmatpush1.bf16.msra.mxu0 %v24825_v53  ;;  %4781 = vmatpush1.bf16.msra.mxu1 %v24828_v54  ;;  %v24912_v53 = vld [vmem:[#allocation2 + $0xa98] ss:$48 sps:$4 sm:$0xff]   ;;  %v24917_v54 = vld [vmem:[#allocation2 + $0xaf4] ss:$48 sps:$4 sm:$0xff]  }
 0x1ad   :  { %4618 = vmatprep.subr.bf16.mxu0 %v24833_v55  ;;  %4782 = vmatprep.subr.bf16.mxu1 %v24836_v56  ;;  %v24920_v55 = vld [vmem:[#allocation2 + $0xafc] ss:$48 sps:$4 sm:$0xff]   ;;  %v24915_v56 = vld [vmem:[#allocation2 + $0xaf0] ss:$48 sps:$4 sm:$0xff]  }
 0x1b0   :  { %4619 = vmatpush1.bf16.msra.mxu0 %v24831_v57  ;;  %4783 = vmatpush1.bf16.msra.mxu1 %v24834_v58  ;;  %v24918_v57 = vld [vmem:[#allocation2 + $0xaf8] ss:$48 sps:$4 sm:$0xff]   ;;  %v24923_v58 = vld [vmem:[#allocation2 + $0xb54] ss:$48 sps:$4 sm:$0xff]  }
 0x1b1   :  { %4629 = vmatprep.subr.bf16.mxu0 %v24839_v59  ;;  %4793 = vmatprep.subr.bf16.mxu1 %v24842_v60  ;;  %v24926_v59 = vld [vmem:[#allocation2 + $0xb5c] ss:$48 sps:$4 sm:$0xff]   ;;  %v24921_v60 = vld [vmem:[#allocation2 + $0xb50] ss:$48 sps:$4 sm:$0xff]  }
 0x1b3   :  { %4621 = vmatmul.mubr.bf16.vlgmr.msra.gmra.mrb[4].mxu0 %v28895_v5  ;;  %4785 = vmatmul.mubr.bf16.vlgmr.msra.gmra.mrb[4].mxu1 %v28895_v5 }
 0x1b4   :  { %4630 = vmatpush1.bf16.msra.mxu0 %v24837_v61  ;;  %4794 = vmatpush1.bf16.msra.mxu1 %v24840_v62  ;;  %v24924_v61 = vld [vmem:[#allocation2 + $0xb58] ss:$48 sps:$4 sm:$0xff]   ;;  %v24929_v62 = vld [vmem:[#allocation2 + $0xbb4] ss:$48 sps:$4 sm:$0xff]  }
 0x1b5   :  { %4631 = vmatprep.subr.bf16.mxu0 %v24845_v63  ;;  %4795 = vmatprep.subr.bf16.mxu1 %v24848_v0  ;;  %v24932_v63 = vld [vmem:[#allocation2 + $0xbbc] ss:$48 sps:$4 sm:$0xff]   ;;  %v24927_v0 = vld [vmem:[#allocation2 + $0xbb0] ss:$48 sps:$4 sm:$0xff]  }
 0x1b6   :  { %4661 = vmatprep.mubr.bf16.mxu0 %v28906_v30  ;;  %4825 = vmatprep.mubr.bf16.mxu1 %v28906_v30 }
 0x1b8   :  { %4632 = vmatpush1.bf16.msra.mxu0 %v24843_v1  ;;  %4796 = vmatpush1.bf16.msra.mxu1 %v24846_v2  ;;  %v24930_v1 = vld [vmem:[#allocation2 + $0xbb8] ss:$48 sps:$4 sm:$0xff]   ;;  %v24935_v2 = vld [vmem:[#allocation2 + $0xc14] ss:$48 sps:$4 sm:$0xff]  }
 0x1b9   :  { %4633 = vmatprep.subr.bf16.mxu0 %v24851_v3  ;;  %4797 = vmatprep.subr.bf16.mxu1 %v24854_v4  ;;  %v24938_v3 = vld [vmem:[#allocation2 + $0xc1c] ss:$48 sps:$4 sm:$0xff]   ;;  %v24933_v4 = vld [vmem:[#allocation2 + $0xc10] ss:$48 sps:$4 sm:$0xff]  }
 0x1bc   :  { %4634 = vmatpush1.bf16.msra.mxu0 %v24849_v6  ;;  %4798 = vmatpush1.bf16.msra.mxu1 %v24852_v7  ;;  %v24936_v6 = vld [vmem:[#allocation2 + $0xc18] ss:$48 sps:$4 sm:$0xff]   ;;  %v24941_v7 = vld [vmem:[#allocation2 + $0xc74] ss:$48 sps:$4 sm:$0xff]  }
 0x1bd   :  { %4635 = vmatprep.subr.bf16.mxu0 %v24857_v8  ;;  %4799 = vmatprep.subr.bf16.mxu1 %v24860_v9  ;;  %v24944_v8 = vld [vmem:[#allocation2 + $0xc7c] ss:$48 sps:$4 sm:$0xff]   ;;  %v24939_v9 = vld [vmem:[#allocation2 + $0xc70] ss:$48 sps:$4 sm:$0xff]  }
 0x1c0   :  { %4636 = vmatpush1.bf16.msra.mxu0 %v24855_v11  ;;  %4800 = vmatpush1.bf16.msra.mxu1 %v24858_v12  ;;  %v24942_v11 = vld [vmem:[#allocation2 + $0xc78] ss:$48 sps:$4 sm:$0xff]   ;;  %v24947_v12 = vld [vmem:[#allocation2 + $0xcd4] ss:$48 sps:$4 sm:$0xff]  }
 0x1c1   :  { %4637 = vmatprep.subr.bf16.mxu0 %v24863_v14  ;;  %4801 = vmatprep.subr.bf16.mxu1 %v24866_v16  ;;  %v24950_v14 = vld [vmem:[#allocation2 + $0xcdc] ss:$48 sps:$4 sm:$0xff]   ;;  %v24945_v16 = vld [vmem:[#allocation2 + $0xcd0] ss:$48 sps:$4 sm:$0xff]  }
 0x1c4   :  { %4638 = vmatpush1.bf16.msra.mxu0 %v24861_v17  ;;  %4802 = vmatpush1.bf16.msra.mxu1 %v24864_v18  ;;  %v24948_v17 = vld [vmem:[#allocation2 + $0xcd8] ss:$48 sps:$4 sm:$0xff]   ;;  %v24953_v18 = vld [vmem:[#allocation2 + $0xd34] ss:$48 sps:$4 sm:$0xff]  }
 0x1c5   :  { %4639 = vmatprep.subr.bf16.mxu0 %v24869_v20  ;;  %4803 = vmatprep.subr.bf16.mxu1 %v24872_v21  ;;  %v24956_v20 = vld [vmem:[#allocation2 + $0xd3c] ss:$48 sps:$4 sm:$0xff]   ;;  %v24951_v21 = vld [vmem:[#allocation2 + $0xd30] ss:$48 sps:$4 sm:$0xff]  }
 0x1c8   :  { %4640 = vmatpush1.bf16.msra.mxu0 %v24867_v22  ;;  %4804 = vmatpush1.bf16.msra.mxu1 %v24870_v23  ;;  %v24954_v22 = vld [vmem:[#allocation2 + $0xd38] ss:$48 sps:$4 sm:$0xff]   ;;  %v24959_v23 = vld [vmem:[#allocation2 + $0xd94] ss:$48 sps:$4 sm:$0xff]  }
 0x1c9   :  { %4641 = vmatprep.subr.bf16.mxu0 %v24875_v24  ;;  %4805 = vmatprep.subr.bf16.mxu1 %v24878_v25  ;;  %v24962_v24 = vld [vmem:[#allocation2 + $0xd9c] ss:$48 sps:$4 sm:$0xff]   ;;  %v24957_v25 = vld [vmem:[#allocation2 + $0xd90] ss:$48 sps:$4 sm:$0xff]  }
 0x1cc   :  { %4642 = vmatpush1.bf16.msra.mxu0 %v24873_v13  ;;  %4806 = vmatpush1.bf16.msra.mxu1 %v24876_v27  ;;  %v24960_v13 = vld [vmem:[#allocation2 + $0xd98] ss:$48 sps:$4 sm:$0xff]   ;;  %v24965_v27 = vld [vmem:[#allocation2 + $0xdf4] ss:$48 sps:$4 sm:$0xff]  }
 0x1cd   :  { %4643 = vmatprep.subr.bf16.mxu0 %v24881_v28  ;;  %4807 = vmatprep.subr.bf16.mxu1 %v24884_v29  ;;  %v24968_v28 = vld [vmem:[#allocation2 + $0xdfc] ss:$48 sps:$4 sm:$0xff]   ;;  %v24963_v29 = vld [vmem:[#allocation2 + $0xdf0] ss:$48 sps:$4 sm:$0xff]  }
 0x1d0   :  { %4644 = vmatpush1.bf16.msra.mxu0 %v24879_v31  ;;  %4808 = vmatpush1.bf16.msra.mxu1 %v24882_v32  ;;  %v24966_v31 = vld [vmem:[#allocation2 + $0xdf8] ss:$48 sps:$4 sm:$0xff]   ;;  %v24971_v32 = vld [vmem:[#allocation2 + $0xe54] ss:$48 sps:$4 sm:$0xff]  }
 0x1d1   :  { %4645 = vmatprep.subr.bf16.mxu0 %v24887_v33  ;;  %4809 = vmatprep.subr.bf16.mxu1 %v24890_v34  ;;  %v24974_v33 = vld [vmem:[#allocation2 + $0xe5c] ss:$48 sps:$4 sm:$0xff]   ;;  %v24969_v34 = vld [vmem:[#allocation2 + $0xe50] ss:$48 sps:$4 sm:$0xff]  }
 0x1d4   :  { %4646 = vmatpush1.bf16.msra.mxu0 %v24885_v35  ;;  %4810 = vmatpush1.bf16.msra.mxu1 %v24888_v36  ;;  %v24972_v35 = vld [vmem:[#allocation2 + $0xe58] ss:$48 sps:$4 sm:$0xff]   ;;  %v24977_v36 = vld [vmem:[#allocation2 + $0xeb4] ss:$48 sps:$4 sm:$0xff]  }
 0x1d5   :  { %4647 = vmatprep.subr.bf16.mxu0 %v24893_v37  ;;  %4811 = vmatprep.subr.bf16.mxu1 %v24896_v38  ;;  %v24980_v37 = vld [vmem:[#allocation2 + $0xebc] ss:$48 sps:$4 sm:$0xff]   ;;  %v24975_v38 = vld [vmem:[#allocation2 + $0xeb0] ss:$48 sps:$4 sm:$0xff]  }
 0x1d8   :  { %4648 = vmatpush1.bf16.msra.mxu0 %v24891_v39  ;;  %4812 = vmatpush1.bf16.msra.mxu1 %v24894_v40  ;;  %v24978_v39 = vld [vmem:[#allocation2 + $0xeb8] ss:$48 sps:$4 sm:$0xff]   ;;  %v24983_v40 = vld [vmem:[#allocation2 + $0xf14] ss:$48 sps:$4 sm:$0xff]  }
 0x1d9   :  { %4649 = vmatprep.subr.bf16.mxu0 %v24899_v41  ;;  %4813 = vmatprep.subr.bf16.mxu1 %v24902_v42  ;;  %v24986_v41 = vld [vmem:[#allocation2 + $0xf1c] ss:$48 sps:$4 sm:$0xff]   ;;  %v24981_v42 = vld [vmem:[#allocation2 + $0xf10] ss:$48 sps:$4 sm:$0xff]  }
 0x1dc   :  { %4650 = vmatpush1.bf16.msra.mxu0 %v24897_v43  ;;  %4814 = vmatpush1.bf16.msra.mxu1 %v24900_v44  ;;  %v24984_v43 = vld [vmem:[#allocation2 + $0xf18] ss:$48 sps:$4 sm:$0xff]   ;;  %v24989_v44 = vld [vmem:[#allocation2 + $0xf74] ss:$48 sps:$4 sm:$0xff]  }
 0x1dd   :  { %4651 = vmatprep.subr.bf16.mxu0 %v24905_v45  ;;  %4815 = vmatprep.subr.bf16.mxu1 %v24908_v46  ;;  %v24992_v45 = vld [vmem:[#allocation2 + $0xf7c] ss:$48 sps:$4 sm:$0xff]   ;;  %v24987_v46 = vld [vmem:[#allocation2 + $0xf70] ss:$48 sps:$4 sm:$0xff]  }
 0x1e0   :  { %4652 = vmatpush1.bf16.msra.mxu0 %v24903_v47  ;;  %4816 = vmatpush1.bf16.msra.mxu1 %v24906_v49  ;;  %v24990_v47 = vld [vmem:[#allocation2 + $0xf78] ss:$48 sps:$4 sm:$0xff]   ;;  %v24995_v49 = vld [vmem:[#allocation2 + $0xfd4] ss:$48 sps:$4 sm:$0xff]  }
 0x1e1   :  { %4653 = vmatprep.subr.bf16.mxu0 %v24911_v50  ;;  %4817 = vmatprep.subr.bf16.mxu1 %v24914_v51  ;;  %v24998_v50 = vld [vmem:[#allocation2 + $0xfdc] ss:$48 sps:$4 sm:$0xff]   ;;  %v24993_v51 = vld [vmem:[#allocation2 + $0xfd0] ss:$48 sps:$4 sm:$0xff]  }
 0x1e4   :  { %4654 = vmatpush1.bf16.msra.mxu0 %v24909_v52  ;;  %4818 = vmatpush1.bf16.msra.mxu1 %v24912_v53  ;;  %v24996_v52 = vld [vmem:[#allocation2 + $0xfd8] ss:$48 sps:$4 sm:$0xff]   ;;  %v25001_v53 = vld [vmem:[#allocation2 + $0x1034] ss:$48 sps:$4 sm:$0xff]  }
 0x1e5   :  { %4655 = vmatprep.subr.bf16.mxu0 %v24917_v54  ;;  %4819 = vmatprep.subr.bf16.mxu1 %v24920_v55  ;;  %v25004_v54 = vld [vmem:[#allocation2 + $0x103c] ss:$48 sps:$4 sm:$0xff]   ;;  %v24999_v55 = vld [vmem:[#allocation2 + $0x1030] ss:$48 sps:$4 sm:$0xff]  }
 0x1e8   :  { %4656 = vmatpush1.bf16.msra.mxu0 %v24915_v56  ;;  %4820 = vmatpush1.bf16.msra.mxu1 %v24918_v57  ;;  %v25002_v56 = vld [vmem:[#allocation2 + $0x1038] ss:$48 sps:$4 sm:$0xff]   ;;  %v25007_v57 = vld [vmem:[#allocation2 + $0x1094] ss:$48 sps:$4 sm:$0xff]  }
 0x1e9   :  { %4657 = vmatprep.subr.bf16.mxu0 %v24923_v58  ;;  %4821 = vmatprep.subr.bf16.mxu1 %v24926_v59  ;;  %v25010_v58 = vld [vmem:[#allocation2 + $0x109c] ss:$48 sps:$4 sm:$0xff]   ;;  %v25005_v59 = vld [vmem:[#allocation2 + $0x1090] ss:$48 sps:$4 sm:$0xff]  }
 0x1ec   :  { %4658 = vmatpush1.bf16.msra.mxu0 %v24921_v60  ;;  %4822 = vmatpush1.bf16.msra.mxu1 %v24924_v61  ;;  %v25008_v60 = vld [vmem:[#allocation2 + $0x1098] ss:$48 sps:$4 sm:$0xff]   ;;  %v25013_v61 = vld [vmem:[#allocation2 + $0x10f4] ss:$48 sps:$4 sm:$0xff]  }
 0x1ed   :  { %4659 = vmatprep.subr.bf16.mxu0 %v24929_v62  ;;  %4823 = vmatprep.subr.bf16.mxu1 %v24932_v63  ;;  %v25016_v62 = vld [vmem:[#allocation2 + $0x10fc] ss:$48 sps:$4 sm:$0xff]   ;;  %v25011_v63 = vld [vmem:[#allocation2 + $0x10f0] ss:$48 sps:$4 sm:$0xff]  }
 0x1f0   :  { %4660 = vmatpush1.bf16.msra.mxu0 %v24927_v0  ;;  %4824 = vmatpush1.bf16.msra.mxu1 %v24930_v1  ;;  %v25014_v0 = vld [vmem:[#allocation2 + $0x10f8] ss:$48 sps:$4 sm:$0xff]   ;;  %v25019_v1 = vld [vmem:[#allocation2 + $0x1154] ss:$48 sps:$4 sm:$0xff]  }
 0x1f1   :  { %4670 = vmatprep.subr.bf16.mxu0 %v24935_v2  ;;  %4834 = vmatprep.subr.bf16.mxu1 %v24938_v3  ;;  %v25022_v2 = vld [vmem:[#allocation2 + $0x115c] ss:$48 sps:$4 sm:$0xff]   ;;  %v25017_v3 = vld [vmem:[#allocation2 + $0x1150] ss:$48 sps:$4 sm:$0xff]  }
 0x1f3   :  { %4662 = vmatmul.mubr.bf16.vlgmr.msra.gmra.mrb[4].mxu0 %v28912_v10  ;;  %4826 = vmatmul.mubr.bf16.vlgmr.msra.gmra.mrb[4].mxu1 %v28912_v10 }
 0x1f4   :  { %4671 = vmatpush1.bf16.msra.mxu0 %v24933_v4  ;;  %4835 = vmatpush1.bf16.msra.mxu1 %v24936_v6  ;;  %v25020_v4 = vld [vmem:[#allocation2 + $0x1158] ss:$48 sps:$4 sm:$0xff]   ;;  %v25025_v6 = vld [vmem:[#allocation2 + $0x11b4] ss:$48 sps:$4 sm:$0xff]  }
 0x1f5   :  { %4672 = vmatprep.subr.bf16.mxu0 %v24941_v7  ;;  %4836 = vmatprep.subr.bf16.mxu1 %v24944_v8  ;;  %v25028_v7 = vld [vmem:[#allocation2 + $0x11bc] ss:$48 sps:$4 sm:$0xff]   ;;  %v25023_v8 = vld [vmem:[#allocation2 + $0x11b0] ss:$48 sps:$4 sm:$0xff]  }
 0x1f6   :  { %4702 = vmatprep.mubr.bf16.mxu0 %v28921_v15  ;;  %4866 = vmatprep.mubr.bf16.mxu1 %v28921_v15 }
 0x1f8   :  { %4673 = vmatpush1.bf16.msra.mxu0 %v24939_v9  ;;  %4837 = vmatpush1.bf16.msra.mxu1 %v24942_v11  ;;  %v25026_v9 = vld [vmem:[#allocation2 + $0x11b8] ss:$48 sps:$4 sm:$0xff]   ;;  %v25031_v11 = vld [vmem:[#allocation2 + $0x1214] ss:$48 sps:$4 sm:$0xff]  }
 0x1f9   :  { %4674 = vmatprep.subr.bf16.mxu0 %v24947_v12  ;;  %4838 = vmatprep.subr.bf16.mxu1 %v24950_v14  ;;  %v25034_v12 = vld [vmem:[#allocation2 + $0x121c] ss:$48 sps:$4 sm:$0xff]   ;;  %v25029_v14 = vld [vmem:[#allocation2 + $0x1210] ss:$48 sps:$4 sm:$0xff]  }
 0x1fc   :  { %4675 = vmatpush1.bf16.msra.mxu0 %v24945_v16  ;;  %4839 = vmatpush1.bf16.msra.mxu1 %v24948_v17  ;;  %v25032_v16 = vld [vmem:[#allocation2 + $0x1218] ss:$48 sps:$4 sm:$0xff]   ;;  %v25037_v17 = vld [vmem:[#allocation2 + $0x1274] ss:$48 sps:$4 sm:$0xff]  }
 0x1fd   :  { %4676 = vmatprep.subr.bf16.mxu0 %v24953_v18  ;;  %4840 = vmatprep.subr.bf16.mxu1 %v24956_v20  ;;  %v25040_v18 = vld [vmem:[#allocation2 + $0x127c] ss:$48 sps:$4 sm:$0xff]   ;;  %v25035_v20 = vld [vmem:[#allocation2 + $0x1270] ss:$48 sps:$4 sm:$0xff]  }
 0x200   :  { %4677 = vmatpush1.bf16.msra.mxu0 %v24951_v21  ;;  %4841 = vmatpush1.bf16.msra.mxu1 %v24954_v22  ;;  %v25038_v21 = vld [vmem:[#allocation2 + $0x1278] ss:$48 sps:$4 sm:$0xff]   ;;  %v25043_v22 = vld [vmem:[#allocation2 + $0x12d4] ss:$48 sps:$4 sm:$0xff]  }
 0x201   :  { %4678 = vmatprep.subr.bf16.mxu0 %v24959_v23  ;;  %4842 = vmatprep.subr.bf16.mxu1 %v24962_v24  ;;  %v25046_v23 = vld [vmem:[#allocation2 + $0x12dc] ss:$48 sps:$4 sm:$0xff]   ;;  %v25041_v24 = vld [vmem:[#allocation2 + $0x12d0] ss:$48 sps:$4 sm:$0xff]  }
 0x204   :  { %4679 = vmatpush1.bf16.msra.mxu0 %v24957_v25  ;;  %4843 = vmatpush1.bf16.msra.mxu1 %v24960_v13  ;;  %v25044_v25 = vld [vmem:[#allocation2 + $0x12d8] ss:$48 sps:$4 sm:$0xff]   ;;  %v25049_v13 = vld [vmem:[#allocation2 + $0x1334] ss:$48 sps:$4 sm:$0xff]  }
 0x205   :  { %4680 = vmatprep.subr.bf16.mxu0 %v24965_v27  ;;  %4844 = vmatprep.subr.bf16.mxu1 %v24968_v28  ;;  %v25052_v27 = vld [vmem:[#allocation2 + $0x133c] ss:$48 sps:$4 sm:$0xff]   ;;  %v25047_v28 = vld [vmem:[#allocation2 + $0x1330] ss:$48 sps:$4 sm:$0xff]  }
 0x208   :  { %4681 = vmatpush1.bf16.msra.mxu0 %v24963_v29  ;;  %4845 = vmatpush1.bf16.msra.mxu1 %v24966_v31  ;;  %v25050_v29 = vld [vmem:[#allocation2 + $0x1338] ss:$48 sps:$4 sm:$0xff]   ;;  %v25055_v31 = vld [vmem:[#allocation2 + $0x1394] ss:$48 sps:$4 sm:$0xff]  }
 0x209   :  { %4682 = vmatprep.subr.bf16.mxu0 %v24971_v32  ;;  %4846 = vmatprep.subr.bf16.mxu1 %v24974_v33  ;;  %v25058_v32 = vld [vmem:[#allocation2 + $0x139c] ss:$48 sps:$4 sm:$0xff]   ;;  %v25053_v33 = vld [vmem:[#allocation2 + $0x1390] ss:$48 sps:$4 sm:$0xff]  }
 0x20c   :  { %4683 = vmatpush1.bf16.msra.mxu0 %v24969_v34  ;;  %4847 = vmatpush1.bf16.msra.mxu1 %v24972_v35  ;;  %v25056_v34 = vld [vmem:[#allocation2 + $0x1398] ss:$48 sps:$4 sm:$0xff]   ;;  %v25061_v35 = vld [vmem:[#allocation2 + $0x13f4] ss:$48 sps:$4 sm:$0xff]  }
 0x20d   :  { %4684 = vmatprep.subr.bf16.mxu0 %v24977_v36  ;;  %4848 = vmatprep.subr.bf16.mxu1 %v24980_v37  ;;  %v25064_v36 = vld [vmem:[#allocation2 + $0x13fc] ss:$48 sps:$4 sm:$0xff]   ;;  %v25059_v37 = vld [vmem:[#allocation2 + $0x13f0] ss:$48 sps:$4 sm:$0xff]  }
 0x210   :  { %4685 = vmatpush1.bf16.msra.mxu0 %v24975_v38  ;;  %4849 = vmatpush1.bf16.msra.mxu1 %v24978_v39  ;;  %v25062_v38 = vld [vmem:[#allocation2 + $0x13f8] ss:$48 sps:$4 sm:$0xff]   ;;  %v25067_v39 = vld [vmem:[#allocation2 + $0x1454] ss:$48 sps:$4 sm:$0xff]  }
 0x211   :  { %4686 = vmatprep.subr.bf16.mxu0 %v24983_v40  ;;  %4850 = vmatprep.subr.bf16.mxu1 %v24986_v41  ;;  %v25070_v40 = vld [vmem:[#allocation2 + $0x145c] ss:$48 sps:$4 sm:$0xff]  }
 0x214   :  { %4687 = vmatpush1.bf16.msra.mxu0 %v24981_v42  ;;  %4851 = vmatpush1.bf16.msra.mxu1 %v24984_v43 }
 0x215   :  { %4688 = vmatprep.subr.bf16.mxu0 %v24989_v44  ;;  %4852 = vmatprep.subr.bf16.mxu1 %v24992_v45 }
 0x218   :  { %4689 = vmatpush1.bf16.msra.mxu0 %v24987_v46  ;;  %4853 = vmatpush1.bf16.msra.mxu1 %v24990_v47  ;;  %v25065_v47 = vld [vmem:[#allocation2 + $0x1450] ss:$48 sps:$4 sm:$0xff]  }
 0x219   :  { %4690 = vmatprep.subr.bf16.mxu0 %v24995_v49  ;;  %4854 = vmatprep.subr.bf16.mxu1 %v24998_v50  ;;  %v25068_v49 = vld [vmem:[#allocation2 + $0x1458] ss:$48 sps:$4 sm:$0xff]  }
 0x21c   :  { %4691 = vmatpush1.bf16.msra.mxu0 %v24993_v51  ;;  %4855 = vmatpush1.bf16.msra.mxu1 %v24996_v52  ;;  %v25073_v52 = vld [vmem:[#allocation2 + $0x14b4] ss:$48 sps:$4 sm:$0xff]  }
 0x21d   :  { %4692 = vmatprep.subr.bf16.mxu0 %v25001_v53  ;;  %4856 = vmatprep.subr.bf16.mxu1 %v25004_v54  ;;  %v25076_v53 = vld [vmem:[#allocation2 + $0x14bc] ss:$48 sps:$4 sm:$0xff]   ;;  %v25071_v54 = vld [vmem:[#allocation2 + $0x14b0] ss:$48 sps:$4 sm:$0xff]  }
 0x220   :  { %4693 = vmatpush1.bf16.msra.mxu0 %v24999_v55  ;;  %4857 = vmatpush1.bf16.msra.mxu1 %v25002_v56  ;;  %v25074_v55 = vld [vmem:[#allocation2 + $0x14b8] ss:$48 sps:$4 sm:$0xff]   ;;  %v25079_v56 = vld [vmem:[#allocation2 + $0x24] ss:$48 sps:$4 sm:$0xff]  }
 0x221   :  { %4694 = vmatprep.subr.bf16.mxu0 %v25007_v57  ;;  %4858 = vmatprep.subr.bf16.mxu1 %v25010_v58  ;;  %v25082_v57 = vld [vmem:[#allocation2 + $0x2c] ss:$48 sps:$4 sm:$0xff]   ;;  %v25077_v58 = vld [vmem:[#allocation2 + $0x20] ss:$48 sps:$4 sm:$0xff]  }
 0x224   :  { %4695 = vmatpush1.bf16.msra.mxu0 %v25005_v59  ;;  %4859 = vmatpush1.bf16.msra.mxu1 %v25008_v60  ;;  %v25080_v59 = vld [vmem:[#allocation2 + $0x28] ss:$48 sps:$4 sm:$0xff]   ;;  %v25085_v60 = vld [vmem:[#allocation2 + $0x84] ss:$48 sps:$4 sm:$0xff]  }
 0x225   :  { %4696 = vmatprep.subr.bf16.mxu0 %v25013_v61  ;;  %4860 = vmatprep.subr.bf16.mxu1 %v25016_v62  ;;  %v25088_v61 = vld [vmem:[#allocation2 + $0x8c] ss:$48 sps:$4 sm:$0xff]   ;;  %v28493_v62 = vld [vmem:[%s29383_s0 + $0x18] ss:$0 sps:$4 sm:$0xff]  }
 0x228   :  { %4697 = vmatpush1.bf16.msra.mxu0 %v25011_v63  ;;  %4861 = vmatpush1.bf16.msra.mxu1 %v25014_v0  ;;  %v25083_v63 = vld [vmem:[#allocation2 + $0x80] ss:$48 sps:$4 sm:$0xff]   ;;  %v25086_v0 = vld [vmem:[#allocation2 + $0x88] ss:$48 sps:$4 sm:$0xff]  }
 0x229   :  { %4698 = vmatprep.subr.bf16.mxu0 %v25019_v1  ;;  %4862 = vmatprep.subr.bf16.mxu1 %v25022_v2  ;;  %v25091_v1 = vld [vmem:[#allocation2 + $0xe4] ss:$48 sps:$4 sm:$0xff]   ;;  %v25094_v2 = vld [vmem:[#allocation2 + $0xec] ss:$48 sps:$4 sm:$0xff]  }
 0x22c   :  { %4699 = vmatpush1.bf16.msra.mxu0 %v25017_v3  ;;  %4863 = vmatpush1.bf16.msra.mxu1 %v25020_v4  ;;  %v25089_v3 = vld [vmem:[#allocation2 + $0xe0] ss:$48 sps:$4 sm:$0xff]   ;;  %v25092_v4 = vld [vmem:[#allocation2 + $0xe8] ss:$48 sps:$4 sm:$0xff]  }
 0x22d   :  { %4700 = vmatprep.subr.bf16.mxu0 %v25025_v6  ;;  %4864 = vmatprep.subr.bf16.mxu1 %v25028_v7  ;;  %v25097_v6 = vld [vmem:[#allocation2 + $0x144] ss:$48 sps:$4 sm:$0xff]   ;;  %v25100_v7 = vld [vmem:[#allocation2 + $0x14c] ss:$48 sps:$4 sm:$0xff]  }
 0x230   :  { %4701 = vmatpush1.bf16.msra.mxu0 %v25023_v8  ;;  %4865 = vmatpush1.bf16.msra.mxu1 %v25026_v9  ;;  %v25095_v8 = vld [vmem:[#allocation2 + $0x140] ss:$48 sps:$4 sm:$0xff]   ;;  %v25098_v9 = vld [vmem:[#allocation2 + $0x148] ss:$48 sps:$4 sm:$0xff]  }
 0x231   :  { %4711 = vmatprep.subr.bf16.mxu0 %v25031_v11  ;;  %4875 = vmatprep.subr.bf16.mxu1 %v25034_v12  ;;  %v25103_v11 = vld [vmem:[#allocation2 + $0x1a4] ss:$48 sps:$4 sm:$0xff]   ;;  %v25106_v12 = vld [vmem:[#allocation2 + $0x1ac] ss:$48 sps:$4 sm:$0xff]  }
 0x233   :  { %4703 = vmatmul.mubr.bf16.vlgmr.msra.gmra.mrb[4].mxu0 %v28929_v19  ;;  %4867 = vmatmul.mubr.bf16.vlgmr.msra.gmra.mrb[4].mxu1 %v28929_v19 }
 0x234   :  { %4712 = vmatpush1.bf16.msra.mxu0 %v25029_v14  ;;  %4876 = vmatpush1.bf16.msra.mxu1 %v25032_v16  ;;  %v25101_v14 = vld [vmem:[#allocation2 + $0x1a0] ss:$48 sps:$4 sm:$0xff]   ;;  %v25109_v16 = vld [vmem:[#allocation2 + $0x204] ss:$48 sps:$4 sm:$0xff]  }
 0x235   :  { %4713 = vmatprep.subr.bf16.mxu0 %v25037_v17  ;;  %4877 = vmatprep.subr.bf16.mxu1 %v25040_v18  ;;  %v25112_v17 = vld [vmem:[#allocation2 + $0x20c] ss:$48 sps:$4 sm:$0xff]   ;;  %v25107_v18 = vld [vmem:[#allocation2 + $0x200] ss:$48 sps:$4 sm:$0xff]  }
 0x236   :  { %4743 = vmatprep.mubr.bf16.mxu0 %v28721_v26  ;;  %4907 = vmatprep.mubr.bf16.mxu1 %v28721_v26 }
 0x238   :  { %4714 = vmatpush1.bf16.msra.mxu0 %v25035_v20  ;;  %4878 = vmatpush1.bf16.msra.mxu1 %v25038_v21  ;;  %v25110_v20 = vld [vmem:[#allocation2 + $0x208] ss:$48 sps:$4 sm:$0xff]   ;;  %v25115_v21 = vld [vmem:[#allocation2 + $0x264] ss:$48 sps:$4 sm:$0xff]  }
 0x239   :  { %4715 = vmatprep.subr.bf16.mxu0 %v25043_v22  ;;  %4879 = vmatprep.subr.bf16.mxu1 %v25046_v23  ;;  %v25118_v22 = vld [vmem:[#allocation2 + $0x26c] ss:$48 sps:$4 sm:$0xff]   ;;  %v25113_v23 = vld [vmem:[#allocation2 + $0x260] ss:$48 sps:$4 sm:$0xff]  }
 0x23c   :  { %4716 = vmatpush1.bf16.msra.mxu0 %v25041_v24  ;;  %4880 = vmatpush1.bf16.msra.mxu1 %v25044_v25  ;;  %v25116_v24 = vld [vmem:[#allocation2 + $0x268] ss:$48 sps:$4 sm:$0xff]   ;;  %v25121_v25 = vld [vmem:[#allocation2 + $0x2c4] ss:$48 sps:$4 sm:$0xff]  }
 0x23d   :  { %4717 = vmatprep.subr.bf16.mxu0 %v25049_v13  ;;  %4881 = vmatprep.subr.bf16.mxu1 %v25052_v27  ;;  %v25124_v13 = vld [vmem:[#allocation2 + $0x2cc] ss:$48 sps:$4 sm:$0xff]   ;;  %v25119_v27 = vld [vmem:[#allocation2 + $0x2c0] ss:$48 sps:$4 sm:$0xff]  }
 0x240   :  { %4718 = vmatpush1.bf16.msra.mxu0 %v25047_v28  ;;  %4882 = vmatpush1.bf16.msra.mxu1 %v25050_v29  ;;  %v25122_v28 = vld [vmem:[#allocation2 + $0x2c8] ss:$48 sps:$4 sm:$0xff]   ;;  %v25127_v29 = vld [vmem:[#allocation2 + $0x324] ss:$48 sps:$4 sm:$0xff]  }
 0x241   :  { %4719 = vmatprep.subr.bf16.mxu0 %v25055_v31  ;;  %4883 = vmatprep.subr.bf16.mxu1 %v25058_v32  ;;  %v25130_v31 = vld [vmem:[#allocation2 + $0x32c] ss:$48 sps:$4 sm:$0xff]   ;;  %v25125_v32 = vld [vmem:[#allocation2 + $0x320] ss:$48 sps:$4 sm:$0xff]  }
 0x244   :  { %4720 = vmatpush1.bf16.msra.mxu0 %v25053_v33  ;;  %4884 = vmatpush1.bf16.msra.mxu1 %v25056_v34  ;;  %v25128_v33 = vld [vmem:[#allocation2 + $0x328] ss:$48 sps:$4 sm:$0xff]   ;;  %v25133_v34 = vld [vmem:[#allocation2 + $0x384] ss:$48 sps:$4 sm:$0xff]  }
 0x245   :  { %4721 = vmatprep.subr.bf16.mxu0 %v25061_v35  ;;  %4885 = vmatprep.subr.bf16.mxu1 %v25064_v36  ;;  %v25136_v35 = vld [vmem:[#allocation2 + $0x38c] ss:$48 sps:$4 sm:$0xff]   ;;  %v25131_v36 = vld [vmem:[#allocation2 + $0x380] ss:$48 sps:$4 sm:$0xff]  }
 0x246   :  { %v28952_v41 = vpop.f32.mrb[0].mxu0  ;;  %v28954_v42 = vpop.f32.mrb[0].mxu1 }
 0x247   :  { %v28956_v43 = vpop.f32.mrb[1].mxu0  ;;  %v28958_v44 = vpop.f32.mrb[1].mxu1 }
 0x248   :  { %v4421_v45 = vpop.f32.mrb[2].mxu0  ;;  %v4585_v46 = vpop.f32.mrb[2].mxu1  ;;  %4722 = vmatpush1.bf16.msra.mxu0 %v25059_v37  ;;  %4886 = vmatpush1.bf16.msra.mxu1 %v25062_v38  ;;  %v25134_v37 = vld [vmem:[#allocation2 + $0x388] ss:$48 sps:$4 sm:$0xff]   ;;  %v25139_v38 = vld [vmem:[#allocation2 + $0x3e4] ss:$48 sps:$4 sm:$0xff]  }
 0x249   :  { %v4422_v50 = vpop.f32.mrb[3].mxu0  ;;  %v4586_v51 = vpop.f32.mrb[3].mxu1  ;;  %4723 = vmatprep.subr.bf16.mxu0 %v25067_v39  ;;  %4887 = vmatprep.subr.bf16.mxu1 %v25070_v40  ;;  %v25142_v39 = vld [vmem:[#allocation2 + $0x3ec] ss:$48 sps:$4 sm:$0xff]   ;;  %v25137_v40 = vld [vmem:[#allocation2 + $0x3e0] ss:$48 sps:$4 sm:$0xff]  }
 0x24a   :  { %v25140_v45 = vld [vmem:[#allocation2 + $0x3e8] ss:$48 sps:$4 sm:$0xff]   ;;  %v25145_v46 = vld [vmem:[#allocation2 + $0x444] ss:$48 sps:$4 sm:$0xff]  }
 0x24b   :  { %v25146_v50 = vld [vmem:[#allocation2 + $0x448] ss:$48 sps:$4 sm:$0xff]   ;;  %v25151_v51 = vld [vmem:[#allocation2 + $0x4a4] ss:$48 sps:$4 sm:$0xff]  }
 0x24c   :  { %4724 = vmatpush1.bf16.msra.mxu0 %v25065_v47  ;;  %4888 = vmatpush1.bf16.msra.mxu1 %v25068_v49  ;;  %v25148_v47 = vld [vmem:[#allocation2 + $0x44c] ss:$48 sps:$4 sm:$0xff]   ;;  %v25143_v49 = vld [vmem:[#allocation2 + $0x440] ss:$48 sps:$4 sm:$0xff]  }
 0x24d   :  { %4725 = vmatprep.subr.bf16.mxu0 %v25073_v52  ;;  %4889 = vmatprep.subr.bf16.mxu1 %v25076_v53  ;;  %v25154_v52 = vld [vmem:[#allocation2 + $0x4ac] ss:$48 sps:$4 sm:$0xff]   ;;  %v25149_v53 = vld [vmem:[#allocation2 + $0x4a0] ss:$48 sps:$4 sm:$0xff]  }
 0x250   :  { %4726 = vmatpush1.bf16.msra.mxu0 %v25071_v54  ;;  %4890 = vmatpush1.bf16.msra.mxu1 %v25074_v55  ;;  %v25152_v54 = vld [vmem:[#allocation2 + $0x4a8] ss:$48 sps:$4 sm:$0xff]   ;;  %v25157_v55 = vld [vmem:[#allocation2 + $0x504] ss:$48 sps:$4 sm:$0xff]  }
 0x251   :  { %4916 = vmatprep.subr.bf16.mxu0 %v25079_v56  ;;  %5080 = vmatprep.subr.bf16.mxu1 %v25082_v57  ;;  %v25160_v56 = vld [vmem:[#allocation2 + $0x50c] ss:$48 sps:$4 sm:$0xff]   ;;  %v25155_v57 = vld [vmem:[#allocation2 + $0x500] ss:$48 sps:$4 sm:$0xff]  }
 0x253   :  { %4744 = vmatmul.mubr.bf16.vlgmr.msra.gmra.mrb[4].mxu0 %v28493_v62  ;;  %4908 = vmatmul.mubr.bf16.vlgmr.msra.gmra.mrb[4].mxu1 %v28493_v62  ;;  %v25164_v62 = vld [vmem:[#allocation2 + $0x568] ss:$48 sps:$4 sm:$0xff]  }
 0x254   :  { %4917 = vmatpush1.bf16.msra.mxu0 %v25077_v58  ;;  %5081 = vmatpush1.bf16.msra.mxu1 %v25080_v59  ;;  %v25158_v58 = vld [vmem:[#allocation2 + $0x508] ss:$48 sps:$4 sm:$0xff]   ;;  %v25163_v59 = vld [vmem:[#allocation2 + $0x564] ss:$48 sps:$4 sm:$0xff]  }
 0x255   :  { %4918 = vmatprep.subr.bf16.mxu0 %v25085_v60  ;;  %5082 = vmatprep.subr.bf16.mxu1 %v25088_v61  ;;  %v25166_v60 = vld [vmem:[#allocation2 + $0x56c] ss:$48 sps:$4 sm:$0xff]   ;;  %v25161_v61 = vld [vmem:[#allocation2 + $0x560] ss:$48 sps:$4 sm:$0xff]  }
 0x256   :  { %4948 = vmatprep.mubr.bf16.mxu0 %v28891_v48  ;;  %5112 = vmatprep.mubr.bf16.mxu1 %v28891_v48  ;;  %v25104_v48 = vld [vmem:[#allocation2 + $0x1a8] ss:$48 sps:$4 sm:$0xff]  }
 0x258   :  { %4919 = vmatpush1.bf16.msra.mxu0 %v25083_v63  ;;  %5083 = vmatpush1.bf16.msra.mxu1 %v25086_v0  ;;  %v25169_v63 = vld [vmem:[#allocation2 + $0x5c4] ss:$48 sps:$4 sm:$0xff]   ;;  %v25172_v0 = vld [vmem:[#allocation2 + $0x5cc] ss:$48 sps:$4 sm:$0xff]  }
 0x259   :  { %4920 = vmatprep.subr.bf16.mxu0 %v25091_v1  ;;  %5084 = vmatprep.subr.bf16.mxu1 %v25094_v2  ;;  %v25167_v1 = vld [vmem:[#allocation2 + $0x5c0] ss:$48 sps:$4 sm:$0xff]   ;;  %v25170_v2 = vld [vmem:[#allocation2 + $0x5c8] ss:$48 sps:$4 sm:$0xff]  }
 0x25c   :  { %4921 = vmatpush1.bf16.msra.mxu0 %v25089_v3  ;;  %5085 = vmatpush1.bf16.msra.mxu1 %v25092_v4  ;;  %v25175_v3 = vld [vmem:[#allocation2 + $0x624] ss:$48 sps:$4 sm:$0xff]   ;;  %v25178_v4 = vld [vmem:[#allocation2 + $0x62c] ss:$48 sps:$4 sm:$0xff]  }
 0x25d   :  { %4922 = vmatprep.subr.bf16.mxu0 %v25097_v6  ;;  %5086 = vmatprep.subr.bf16.mxu1 %v25100_v7  ;;  %v25173_v6 = vld [vmem:[#allocation2 + $0x620] ss:$48 sps:$4 sm:$0xff]   ;;  %v25176_v7 = vld [vmem:[#allocation2 + $0x628] ss:$48 sps:$4 sm:$0xff]  }
 0x260   :  { %4923 = vmatpush1.bf16.msra.mxu0 %v25095_v8  ;;  %5087 = vmatpush1.bf16.msra.mxu1 %v25098_v9  ;;  %v25181_v8 = vld [vmem:[#allocation2 + $0x684] ss:$48 sps:$4 sm:$0xff]   ;;  %v25184_v9 = vld [vmem:[#allocation2 + $0x68c] ss:$48 sps:$4 sm:$0xff]  }
 0x261   :  { %4924 = vmatprep.subr.bf16.mxu0 %v25103_v11  ;;  %5088 = vmatprep.subr.bf16.mxu1 %v25106_v12  ;;  %v25179_v11 = vld [vmem:[#allocation2 + $0x680] ss:$48 sps:$4 sm:$0xff]   ;;  %v25182_v12 = vld [vmem:[#allocation2 + $0x688] ss:$48 sps:$4 sm:$0xff]  }
 0x264   :  { %4925 = vmatpush1.bf16.msra.mxu0 %v25101_v14  ;;  %5089 = vmatpush1.bf16.msra.mxu1 %v25104_v48  ;;  %v25187_v14 = vld [vmem:[#allocation2 + $0x6e4] ss:$48 sps:$4 sm:$0xff]   ;;  %v25190_v48 = vld [vmem:[#allocation2 + $0x6ec] ss:$48 sps:$4 sm:$0xff]  }
 0x265   :  { %4926 = vmatprep.subr.bf16.mxu0 %v25109_v16  ;;  %5090 = vmatprep.subr.bf16.mxu1 %v25112_v17  ;;  %v25185_v16 = vld [vmem:[#allocation2 + $0x6e0] ss:$48 sps:$4 sm:$0xff]   ;;  %v25188_v17 = vld [vmem:[#allocation2 + $0x6e8] ss:$48 sps:$4 sm:$0xff]  }
 0x268   :  { %4927 = vmatpush1.bf16.msra.mxu0 %v25107_v18  ;;  %5091 = vmatpush1.bf16.msra.mxu1 %v25110_v20  ;;  %v25193_v18 = vld [vmem:[#allocation2 + $0x744] ss:$48 sps:$4 sm:$0xff]   ;;  %v25191_v20 = vld [vmem:[#allocation2 + $0x740] ss:$48 sps:$4 sm:$0xff]  }
 0x269   :  { %4928 = vmatprep.subr.bf16.mxu0 %v25115_v21  ;;  %5092 = vmatprep.subr.bf16.mxu1 %v25118_v22  ;;  %v25194_v21 = vld [vmem:[#allocation2 + $0x748] ss:$48 sps:$4 sm:$0xff]   ;;  %v25199_v22 = vld [vmem:[#allocation2 + $0x7a4] ss:$48 sps:$4 sm:$0xff]  }
 0x26c   :  { %4929 = vmatpush1.bf16.msra.mxu0 %v25113_v23  ;;  %5093 = vmatpush1.bf16.msra.mxu1 %v25116_v24  ;;  %v25202_v23 = vld [vmem:[#allocation2 + $0x7ac] ss:$48 sps:$4 sm:$0xff]   ;;  %v25197_v24 = vld [vmem:[#allocation2 + $0x7a0] ss:$48 sps:$4 sm:$0xff]  }
 0x26d   :  { %4930 = vmatprep.subr.bf16.mxu0 %v25121_v25  ;;  %5094 = vmatprep.subr.bf16.mxu1 %v25124_v13  ;;  %v25205_v25 = vld [vmem:[#allocation2 + $0x804] ss:$48 sps:$4 sm:$0xff]   ;;  %v25208_v13 = vld [vmem:[#allocation2 + $0x80c] ss:$48 sps:$4 sm:$0xff]  }
 0x270   :  { %4931 = vmatpush1.bf16.msra.mxu0 %v25119_v27  ;;  %5095 = vmatpush1.bf16.msra.mxu1 %v25122_v28  ;;  %v25203_v27 = vld [vmem:[#allocation2 + $0x800] ss:$48 sps:$4 sm:$0xff]   ;;  %v25206_v28 = vld [vmem:[#allocation2 + $0x808] ss:$48 sps:$4 sm:$0xff]  }
 0x271   :  { %4932 = vmatprep.subr.bf16.mxu0 %v25127_v29  ;;  %5096 = vmatprep.subr.bf16.mxu1 %v25130_v31  ;;  %v25211_v29 = vld [vmem:[#allocation2 + $0x864] ss:$48 sps:$4 sm:$0xff]   ;;  %v25214_v31 = vld [vmem:[#allocation2 + $0x86c] ss:$48 sps:$4 sm:$0xff]  }
 0x274   :  { %4933 = vmatpush1.bf16.msra.mxu0 %v25125_v32  ;;  %5097 = vmatpush1.bf16.msra.mxu1 %v25128_v33  ;;  %v25209_v32 = vld [vmem:[#allocation2 + $0x860] ss:$48 sps:$4 sm:$0xff]   ;;  %v25212_v33 = vld [vmem:[#allocation2 + $0x868] ss:$48 sps:$4 sm:$0xff]  }
 0x275   :  { %4934 = vmatprep.subr.bf16.mxu0 %v25133_v34  ;;  %5098 = vmatprep.subr.bf16.mxu1 %v25136_v35  ;;  %v25217_v34 = vld [vmem:[#allocation2 + $0x8c4] ss:$48 sps:$4 sm:$0xff]   ;;  %v25220_v35 = vld [vmem:[#allocation2 + $0x8cc] ss:$48 sps:$4 sm:$0xff]  }
 0x278   :  { %4935 = vmatpush1.bf16.msra.mxu0 %v25131_v36  ;;  %5099 = vmatpush1.bf16.msra.mxu1 %v25134_v37  ;;  %v25215_v36 = vld [vmem:[#allocation2 + $0x8c0] ss:$48 sps:$4 sm:$0xff]   ;;  %v25218_v37 = vld [vmem:[#allocation2 + $0x8c8] ss:$48 sps:$4 sm:$0xff]  }
 0x279   :  { %4936 = vmatprep.subr.bf16.mxu0 %v25139_v38  ;;  %5100 = vmatprep.subr.bf16.mxu1 %v25142_v39  ;;  %v25223_v38 = vld [vmem:[#allocation2 + $0x924] ss:$48 sps:$4 sm:$0xff]   ;;  %v25226_v39 = vld [vmem:[#allocation2 + $0x92c] ss:$48 sps:$4 sm:$0xff]  }
 0x27c   :  { %4937 = vmatpush1.bf16.msra.mxu0 %v25137_v40  ;;  %5101 = vmatpush1.bf16.msra.mxu1 %v25140_v45  ;;  %v25221_v40 = vld [vmem:[#allocation2 + $0x920] ss:$48 sps:$4 sm:$0xff]   ;;  %v25224_v45 = vld [vmem:[#allocation2 + $0x928] ss:$48 sps:$4 sm:$0xff]  }
 0x27d   :  { %4938 = vmatprep.subr.bf16.mxu0 %v25145_v46  ;;  %5102 = vmatprep.subr.bf16.mxu1 %v25148_v47  ;;  %v25229_v46 = vld [vmem:[#allocation2 + $0x984] ss:$48 sps:$4 sm:$0xff]   ;;  %v25232_v47 = vld [vmem:[#allocation2 + $0x98c] ss:$48 sps:$4 sm:$0xff]  }
 0x280   :  { %4939 = vmatpush1.bf16.msra.mxu0 %v25143_v49  ;;  %5103 = vmatpush1.bf16.msra.mxu1 %v25146_v50  ;;  %v25227_v49 = vld [vmem:[#allocation2 + $0x980] ss:$48 sps:$4 sm:$0xff]   ;;  %v25230_v50 = vld [vmem:[#allocation2 + $0x988] ss:$48 sps:$4 sm:$0xff]  }
 0x281   :  { %4940 = vmatprep.subr.bf16.mxu0 %v25151_v51  ;;  %5104 = vmatprep.subr.bf16.mxu1 %v25154_v52  ;;  %v25235_v51 = vld [vmem:[#allocation2 + $0x9e4] ss:$48 sps:$4 sm:$0xff]   ;;  %v25238_v52 = vld [vmem:[#allocation2 + $0x9ec] ss:$48 sps:$4 sm:$0xff]  }
 0x284   :  { %4941 = vmatpush1.bf16.msra.mxu0 %v25149_v53  ;;  %5105 = vmatpush1.bf16.msra.mxu1 %v25152_v54  ;;  %v25233_v53 = vld [vmem:[#allocation2 + $0x9e0] ss:$48 sps:$4 sm:$0xff]   ;;  %v25236_v54 = vld [vmem:[#allocation2 + $0x9e8] ss:$48 sps:$4 sm:$0xff]  }
 0x285   :  { %4942 = vmatprep.subr.bf16.mxu0 %v25157_v55  ;;  %5106 = vmatprep.subr.bf16.mxu1 %v25160_v56  ;;  %v25241_v55 = vld [vmem:[#allocation2 + $0xa44] ss:$48 sps:$4 sm:$0xff]   ;;  %v25244_v56 = vld [vmem:[#allocation2 + $0xa4c] ss:$48 sps:$4 sm:$0xff]  }
 0x288   :  { %4943 = vmatpush1.bf16.msra.mxu0 %v25155_v57  ;;  %5107 = vmatpush1.bf16.msra.mxu1 %v25158_v58  ;;  %v25239_v57 = vld [vmem:[#allocation2 + $0xa40] ss:$48 sps:$4 sm:$0xff]   ;;  %v25242_v58 = vld [vmem:[#allocation2 + $0xa48] ss:$48 sps:$4 sm:$0xff]  }
 0x289   :  { %4944 = vmatprep.subr.bf16.mxu0 %v25163_v59  ;;  %5108 = vmatprep.subr.bf16.mxu1 %v25166_v60  ;;  %v25247_v59 = vld [vmem:[#allocation2 + $0xaa4] ss:$48 sps:$4 sm:$0xff]   ;;  %v25250_v60 = vld [vmem:[#allocation2 + $0xaac] ss:$48 sps:$4 sm:$0xff]  }
 0x28c   :  { %4945 = vmatpush1.bf16.msra.mxu0 %v25161_v61  ;;  %5109 = vmatpush1.bf16.msra.mxu1 %v25164_v62  ;;  %v25245_v61 = vld [vmem:[#allocation2 + $0xaa0] ss:$48 sps:$4 sm:$0xff]   ;;  %v25248_v62 = vld [vmem:[#allocation2 + $0xaa8] ss:$48 sps:$4 sm:$0xff]  }
 0x28d   :  { %4946 = vmatprep.subr.bf16.mxu0 %v25169_v63  ;;  %5110 = vmatprep.subr.bf16.mxu1 %v25172_v0  ;;  %v25253_v63 = vld [vmem:[#allocation2 + $0xb04] ss:$48 sps:$4 sm:$0xff]   ;;  %v25256_v0 = vld [vmem:[#allocation2 + $0xb0c] ss:$48 sps:$4 sm:$0xff]  }
 0x290   :  { %4947 = vmatpush1.bf16.msra.mxu0 %v25167_v1  ;;  %5111 = vmatpush1.bf16.msra.mxu1 %v25170_v2  ;;  %v25251_v1 = vld [vmem:[#allocation2 + $0xb00] ss:$48 sps:$4 sm:$0xff]   ;;  %v25254_v2 = vld [vmem:[#allocation2 + $0xb08] ss:$48 sps:$4 sm:$0xff]  }
 0x291   :  { %4957 = vmatprep.subr.bf16.mxu0 %v25175_v3  ;;  %5121 = vmatprep.subr.bf16.mxu1 %v25178_v4  ;;  %v25259_v3 = vld [vmem:[#allocation2 + $0xb64] ss:$48 sps:$4 sm:$0xff]   ;;  %v25262_v4 = vld [vmem:[#allocation2 + $0xb6c] ss:$48 sps:$4 sm:$0xff]  }
 0x293   :  { %4949 = vmatmul.mubr.bf16.vlgmr.msra.gmra.mrb[8].mxu0 %v28895_v5  ;;  %5113 = vmatmul.mubr.bf16.vlgmr.msra.gmra.mrb[8].mxu1 %v28895_v5  ;;  %v25196_v5 = vld [vmem:[#allocation2 + $0x74c] ss:$48 sps:$4 sm:$0xff]  }
 0x294   :  { %4958 = vmatpush1.bf16.msra.mxu0 %v25173_v6  ;;  %5122 = vmatpush1.bf16.msra.mxu1 %v25176_v7  ;;  %v25257_v6 = vld [vmem:[#allocation2 + $0xb60] ss:$48 sps:$4 sm:$0xff]   ;;  %v25260_v7 = vld [vmem:[#allocation2 + $0xb68] ss:$48 sps:$4 sm:$0xff]  }
 0x295   :  { %4959 = vmatprep.subr.bf16.mxu0 %v25181_v8  ;;  %5123 = vmatprep.subr.bf16.mxu1 %v25184_v9  ;;  %v25265_v8 = vld [vmem:[#allocation2 + $0xbc4] ss:$48 sps:$4 sm:$0xff]   ;;  %v25268_v9 = vld [vmem:[#allocation2 + $0xbcc] ss:$48 sps:$4 sm:$0xff]  }
 0x296   :  { %4989 = vmatprep.mubr.bf16.mxu0 %v28906_v30  ;;  %5153 = vmatprep.mubr.bf16.mxu1 %v28906_v30  ;;  %v25200_v30 = vld [vmem:[#allocation2 + $0x7a8] ss:$48 sps:$4 sm:$0xff]  }
 0x298   :  { %4960 = vmatpush1.bf16.msra.mxu0 %v25179_v11  ;;  %5124 = vmatpush1.bf16.msra.mxu1 %v25182_v12  ;;  %v25263_v11 = vld [vmem:[#allocation2 + $0xbc0] ss:$48 sps:$4 sm:$0xff]   ;;  %v25266_v12 = vld [vmem:[#allocation2 + $0xbc8] ss:$48 sps:$4 sm:$0xff]  }
 0x299   :  { %4961 = vmatprep.subr.bf16.mxu0 %v25187_v14  ;;  %5125 = vmatprep.subr.bf16.mxu1 %v25190_v48  ;;  %v25271_v14 = vld [vmem:[#allocation2 + $0xc24] ss:$48 sps:$4 sm:$0xff]   ;;  %v25274_v48 = vld [vmem:[#allocation2 + $0xc2c] ss:$48 sps:$4 sm:$0xff]  }
 0x29c   :  { %4962 = vmatpush1.bf16.msra.mxu0 %v25185_v16  ;;  %5126 = vmatpush1.bf16.msra.mxu1 %v25188_v17  ;;  %v25269_v16 = vld [vmem:[#allocation2 + $0xc20] ss:$48 sps:$4 sm:$0xff]   ;;  %v25272_v17 = vld [vmem:[#allocation2 + $0xc28] ss:$48 sps:$4 sm:$0xff]  }
 0x29d   :  { %4963 = vmatprep.subr.bf16.mxu0 %v25193_v18  ;;  %5127 = vmatprep.subr.bf16.mxu1 %v25196_v5  ;;  %v25277_v18 = vld [vmem:[#allocation2 + $0xc84] ss:$48 sps:$4 sm:$0xff]   ;;  %v25280_v5 = vld [vmem:[#allocation2 + $0xc8c] ss:$48 sps:$4 sm:$0xff]  }
 0x2a0   :  { %4964 = vmatpush1.bf16.msra.mxu0 %v25191_v20  ;;  %5128 = vmatpush1.bf16.msra.mxu1 %v25194_v21  ;;  %v25275_v20 = vld [vmem:[#allocation2 + $0xc80] ss:$48 sps:$4 sm:$0xff]   ;;  %v25278_v21 = vld [vmem:[#allocation2 + $0xc88] ss:$48 sps:$4 sm:$0xff]  }
 0x2a1   :  { %4965 = vmatprep.subr.bf16.mxu0 %v25199_v22  ;;  %5129 = vmatprep.subr.bf16.mxu1 %v25202_v23  ;;  %v25283_v22 = vld [vmem:[#allocation2 + $0xce4] ss:$48 sps:$4 sm:$0xff]   ;;  %v25286_v23 = vld [vmem:[#allocation2 + $0xcec] ss:$48 sps:$4 sm:$0xff]  }
 0x2a4   :  { %4966 = vmatpush1.bf16.msra.mxu0 %v25197_v24  ;;  %5130 = vmatpush1.bf16.msra.mxu1 %v25200_v30  ;;  %v25281_v24 = vld [vmem:[#allocation2 + $0xce0] ss:$48 sps:$4 sm:$0xff]   ;;  %v25284_v30 = vld [vmem:[#allocation2 + $0xce8] ss:$48 sps:$4 sm:$0xff]  }
 0x2a5   :  { %4967 = vmatprep.subr.bf16.mxu0 %v25205_v25  ;;  %5131 = vmatprep.subr.bf16.mxu1 %v25208_v13  ;;  %v25289_v25 = vld [vmem:[#allocation2 + $0xd44] ss:$48 sps:$4 sm:$0xff]   ;;  %v25292_v13 = vld [vmem:[#allocation2 + $0xd4c] ss:$48 sps:$4 sm:$0xff]  }
 0x2a8   :  { %4968 = vmatpush1.bf16.msra.mxu0 %v25203_v27  ;;  %5132 = vmatpush1.bf16.msra.mxu1 %v25206_v28  ;;  %v25287_v27 = vld [vmem:[#allocation2 + $0xd40] ss:$48 sps:$4 sm:$0xff]   ;;  %v25295_v28 = vld [vmem:[#allocation2 + $0xda4] ss:$48 sps:$4 sm:$0xff]  }
 0x2a9   :  { %4969 = vmatprep.subr.bf16.mxu0 %v25211_v29  ;;  %5133 = vmatprep.subr.bf16.mxu1 %v25214_v31  ;;  %v25298_v29 = vld [vmem:[#allocation2 + $0xdac] ss:$48 sps:$4 sm:$0xff]   ;;  %v25293_v31 = vld [vmem:[#allocation2 + $0xda0] ss:$48 sps:$4 sm:$0xff]  }
 0x2ac   :  { %4970 = vmatpush1.bf16.msra.mxu0 %v25209_v32  ;;  %5134 = vmatpush1.bf16.msra.mxu1 %v25212_v33  ;;  %v25296_v32 = vld [vmem:[#allocation2 + $0xda8] ss:$48 sps:$4 sm:$0xff]   ;;  %v25304_v33 = vld [vmem:[#allocation2 + $0xe0c] ss:$48 sps:$4 sm:$0xff]  }
 0x2ad   :  { %4971 = vmatprep.subr.bf16.mxu0 %v25217_v34  ;;  %5135 = vmatprep.subr.bf16.mxu1 %v25220_v35  ;;  %v25299_v34 = vld [vmem:[#allocation2 + $0xe00] ss:$48 sps:$4 sm:$0xff]   ;;  %v25302_v35 = vld [vmem:[#allocation2 + $0xe08] ss:$48 sps:$4 sm:$0xff]  }
 0x2b0   :  { %4972 = vmatpush1.bf16.msra.mxu0 %v25215_v36  ;;  %5136 = vmatpush1.bf16.msra.mxu1 %v25218_v37  ;;  %v25307_v36 = vld [vmem:[#allocation2 + $0xe64] ss:$48 sps:$4 sm:$0xff]   ;;  %v25310_v37 = vld [vmem:[#allocation2 + $0xe6c] ss:$48 sps:$4 sm:$0xff]  }
 0x2b1   :  { %4973 = vmatprep.subr.bf16.mxu0 %v25223_v38  ;;  %5137 = vmatprep.subr.bf16.mxu1 %v25226_v39  ;;  %v25305_v38 = vld [vmem:[#allocation2 + $0xe60] ss:$48 sps:$4 sm:$0xff]   ;;  %v25308_v39 = vld [vmem:[#allocation2 + $0xe68] ss:$48 sps:$4 sm:$0xff]  }
 0x2b4   :  { %4974 = vmatpush1.bf16.msra.mxu0 %v25221_v40  ;;  %5138 = vmatpush1.bf16.msra.mxu1 %v25224_v45  ;;  %v25313_v40 = vld [vmem:[#allocation2 + $0xec4] ss:$48 sps:$4 sm:$0xff]   ;;  %v25316_v45 = vld [vmem:[#allocation2 + $0xecc] ss:$48 sps:$4 sm:$0xff]  }
 0x2b5   :  { %4975 = vmatprep.subr.bf16.mxu0 %v25229_v46  ;;  %5139 = vmatprep.subr.bf16.mxu1 %v25232_v47  ;;  %v25311_v46 = vld [vmem:[#allocation2 + $0xec0] ss:$48 sps:$4 sm:$0xff]   ;;  %v25314_v47 = vld [vmem:[#allocation2 + $0xec8] ss:$48 sps:$4 sm:$0xff]  }
 0x2b8   :  { %4976 = vmatpush1.bf16.msra.mxu0 %v25227_v49  ;;  %5140 = vmatpush1.bf16.msra.mxu1 %v25230_v50  ;;  %v25319_v49 = vld [vmem:[#allocation2 + $0xf24] ss:$48 sps:$4 sm:$0xff]   ;;  %v25322_v50 = vld [vmem:[#allocation2 + $0xf2c] ss:$48 sps:$4 sm:$0xff]  }
 0x2b9   :  { %4977 = vmatprep.subr.bf16.mxu0 %v25235_v51  ;;  %5141 = vmatprep.subr.bf16.mxu1 %v25238_v52  ;;  %v25317_v51 = vld [vmem:[#allocation2 + $0xf20] ss:$48 sps:$4 sm:$0xff]   ;;  %v25320_v52 = vld [vmem:[#allocation2 + $0xf28] ss:$48 sps:$4 sm:$0xff]  }
 0x2bc   :  { %4978 = vmatpush1.bf16.msra.mxu0 %v25233_v53  ;;  %5142 = vmatpush1.bf16.msra.mxu1 %v25236_v54  ;;  %v25325_v53 = vld [vmem:[#allocation2 + $0xf84] ss:$48 sps:$4 sm:$0xff]   ;;  %v25328_v54 = vld [vmem:[#allocation2 + $0xf8c] ss:$48 sps:$4 sm:$0xff]  }
 0x2bd   :  { %4979 = vmatprep.subr.bf16.mxu0 %v25241_v55  ;;  %5143 = vmatprep.subr.bf16.mxu1 %v25244_v56  ;;  %v25323_v55 = vld [vmem:[#allocation2 + $0xf80] ss:$48 sps:$4 sm:$0xff]   ;;  %v25326_v56 = vld [vmem:[#allocation2 + $0xf88] ss:$48 sps:$4 sm:$0xff]  }
 0x2c0   :  { %4980 = vmatpush1.bf16.msra.mxu0 %v25239_v57  ;;  %5144 = vmatpush1.bf16.msra.mxu1 %v25242_v58  ;;  %v25331_v57 = vld [vmem:[#allocation2 + $0xfe4] ss:$48 sps:$4 sm:$0xff]   ;;  %v25334_v58 = vld [vmem:[#allocation2 + $0xfec] ss:$48 sps:$4 sm:$0xff]  }
 0x2c1   :  { %4981 = vmatprep.subr.bf16.mxu0 %v25247_v59  ;;  %5145 = vmatprep.subr.bf16.mxu1 %v25250_v60  ;;  %v25329_v59 = vld [vmem:[#allocation2 + $0xfe0] ss:$48 sps:$4 sm:$0xff]   ;;  %v25332_v60 = vld [vmem:[#allocation2 + $0xfe8] ss:$48 sps:$4 sm:$0xff]  }
 0x2c4   :  { %4982 = vmatpush1.bf16.msra.mxu0 %v25245_v61  ;;  %5146 = vmatpush1.bf16.msra.mxu1 %v25248_v62  ;;  %v25337_v61 = vld [vmem:[#allocation2 + $0x1044] ss:$48 sps:$4 sm:$0xff]   ;;  %v25340_v62 = vld [vmem:[#allocation2 + $0x104c] ss:$48 sps:$4 sm:$0xff]  }
 0x2c5   :  { %4983 = vmatprep.subr.bf16.mxu0 %v25253_v63  ;;  %5147 = vmatprep.subr.bf16.mxu1 %v25256_v0  ;;  %v25335_v63 = vld [vmem:[#allocation2 + $0x1040] ss:$48 sps:$4 sm:$0xff]   ;;  %v25338_v0 = vld [vmem:[#allocation2 + $0x1048] ss:$48 sps:$4 sm:$0xff]  }
 0x2c8   :  { %4984 = vmatpush1.bf16.msra.mxu0 %v25251_v1  ;;  %5148 = vmatpush1.bf16.msra.mxu1 %v25254_v2  ;;  %v815_v1 = vlaneseq  ;;  %v25343_v2 = vld [vmem:[#allocation2 + $0x10a4] ss:$48 sps:$4 sm:$0xff]  }
 0x2c9   :  { %4985 = vmatprep.subr.bf16.mxu0 %v25259_v3  ;;  %5149 = vmatprep.subr.bf16.mxu1 %v25262_v4  ;;  %v25346_v3 = vld [vmem:[#allocation2 + $0x10ac] ss:$48 sps:$4 sm:$0xff]   ;;  %v25341_v4 = vld [vmem:[#allocation2 + $0x10a0] ss:$48 sps:$4 sm:$0xff]  }
 0x2cc   :  { %4986 = vmatpush1.bf16.msra.mxu0 %v25257_v6  ;;  %5150 = vmatpush1.bf16.msra.mxu1 %v25260_v7  ;;  %v25344_v6 = vld [vmem:[#allocation2 + $0x10a8] ss:$48 sps:$4 sm:$0xff]   ;;  %v28973_v7 = vshrl.u32 %v815_v1, 7 }
 0x2cd   :  { %4987 = vmatprep.subr.bf16.mxu0 %v25265_v8  ;;  %5151 = vmatprep.subr.bf16.mxu1 %v25268_v9  ;;  %v25349_v8 = vld [vmem:[#allocation2 + $0x1104] ss:$48 sps:$4 sm:$0xff]   ;;  %v25352_v9 = vld [vmem:[#allocation2 + $0x110c] ss:$48 sps:$4 sm:$0xff]  }
 0x2d0   :  { %4988 = vmatpush1.bf16.msra.mxu0 %v25263_v11  ;;  %5152 = vmatpush1.bf16.msra.mxu1 %v25266_v12  ;;  %v25347_v11 = vld [vmem:[#allocation2 + $0x1100] ss:$48 sps:$4 sm:$0xff]   ;;  %v25350_v12 = vld [vmem:[#allocation2 + $0x1108] ss:$48 sps:$4 sm:$0xff]  }
 0x2d1   :  { %4998 = vmatprep.subr.bf16.mxu0 %v25271_v14  ;;  %5162 = vmatprep.subr.bf16.mxu1 %v25274_v48  ;;  %v28976_v14 = vsub.s32 1, %v28973_v7  ;;  %v28978_v48 = vld [vmem:[#allocation5] sm:$0xff] }
 0x2d3   :  { %4990 = vmatmul.mubr.bf16.vlgmr.msra.gmra.mrb[8].mxu0 %v28912_v10  ;;  %5154 = vmatmul.mubr.bf16.vlgmr.msra.gmra.mrb[8].mxu1 %v28912_v10  ;;  %v25290_v10 = vld [vmem:[#allocation2 + $0xd48] ss:$48 sps:$4 sm:$0xff]  }
 0x2d4   :  { %4999 = vmatpush1.bf16.msra.mxu0 %v25269_v16  ;;  %5163 = vmatpush1.bf16.msra.mxu1 %v25272_v17  ;;  %v25355_v16 = vld [vmem:[#allocation2 + $0x1164] ss:$48 sps:$4 sm:$0xff]   ;;  %v25358_v17 = vld [vmem:[#allocation2 + $0x116c] ss:$48 sps:$4 sm:$0xff]  }
 0x2d5   :  { %5000 = vmatprep.subr.bf16.mxu0 %v25277_v18  ;;  %5164 = vmatprep.subr.bf16.mxu1 %v25280_v5  ;;  %v25353_v18 = vld [vmem:[#allocation2 + $0x1160] ss:$48 sps:$4 sm:$0xff]   ;;  %v25356_v5 = vld [vmem:[#allocation2 + $0x1168] ss:$48 sps:$4 sm:$0xff]  }
 0x2d6   :  { %5030 = vmatprep.mubr.bf16.mxu0 %v28921_v15  ;;  %5194 = vmatprep.mubr.bf16.mxu1 %v28921_v15  ;;  %v25301_v15 = vld [vmem:[#allocation2 + $0xe04] ss:$48 sps:$4 sm:$0xff]  }
 0x2d8   :  { %5001 = vmatpush1.bf16.msra.mxu0 %v25275_v20  ;;  %5165 = vmatpush1.bf16.msra.mxu1 %v25278_v21  ;;  %v822_v20 = vrot.slane %v28978_v48, %v28976_v14  ;;  %v25361_v21 = vld [vmem:[#allocation2 + $0x11c4] ss:$48 sps:$4 sm:$0xff]  }
 0x2d9   :  { %5002 = vmatprep.subr.bf16.mxu0 %v25283_v22  ;;  %5166 = vmatprep.subr.bf16.mxu1 %v25286_v23  ;;  %v25364_v22 = vld [vmem:[#allocation2 + $0x11cc] ss:$48 sps:$4 sm:$0xff]   ;;  %v25359_v23 = vld [vmem:[#allocation2 + $0x11c0] ss:$48 sps:$4 sm:$0xff]  }
 0x2dc   :  { %5003 = vmatpush1.bf16.msra.mxu0 %v25281_v24  ;;  %5167 = vmatpush1.bf16.msra.mxu1 %v25284_v30  ;;  %v25362_v24 = vld [vmem:[#allocation2 + $0x11c8] ss:$48 sps:$4 sm:$0xff]   ;;  %v24085_v30 = vadd.f32 %v28956_v43, %v822_v20  ;;  %v25379_v43 = vld [vmem:[#allocation2 + $0x12e4] ss:$48 sps:$4 sm:$0xff]  }
 0x2dd   :  { %5004 = vmatprep.subr.bf16.mxu0 %v25289_v25  ;;  %5168 = vmatprep.subr.bf16.mxu1 %v25292_v13  ;;  %v25367_v25 = vld [vmem:[#allocation2 + $0x1224] ss:$48 sps:$4 sm:$0xff]   ;;  %v25370_v13 = vld [vmem:[#allocation2 + $0x122c] ss:$48 sps:$4 sm:$0xff]   ;;  %v28494_v20 = vld [vmem:[%s29383_s0 + $0x18] ss:$0 sps:$4 sm:$0xff]  }
 0x2de   :  { %s28722_s0 = smov [#allocation16]  }
 0x2df   :  { %s21074_s24 = sshll.u32 %s28722_s0, 4  ;;  %s21075_s24 = int_to_ptr.vmem [resolvable:$true] %s21074_s24 }
 0x2e0   :  { %5005 = vmatpush1.bf16.msra.mxu0 %v25287_v27  ;;  %5169 = vmatpush1.bf16.msra.mxu1 %v25290_v10  ;;  %v25365_v27 = vld [vmem:[#allocation2 + $0x1220] ss:$48 sps:$4 sm:$0xff]   ;;  %v25368_v10 = vld [vmem:[#allocation2 + $0x1228] ss:$48 sps:$4 sm:$0xff]   ;;  %s28675_s25 = scalar_lea.vmem %s21075_s24, 896  ;;  %p28680_p9 = scmp.lt.s32.totalorder %s21075_s24, %s21075_s24 }
 0x2e1   :  { %5006 = vmatprep.subr.bf16.mxu0 %v25295_v28  ;;  %5170 = vmatprep.subr.bf16.mxu1 %v25298_v29  ;;  %v21767_v28 = vmul.f32 -1.442695, %v24085_v30  ;;  %v25373_v29 = vld [vmem:[#allocation2 + $0x1284] ss:$48 sps:$4 sm:$0xff]   ;;  %v25425_v30 = vld [vmem:[#allocation7 + $0x70] ss:$28 sps:$4 sm:$0xff]   ;;  %p28676_p8 = scmp.ne.s32.totalorder %s21075_s24, %s28675_s25  ;;  %p28681_p10 = scmp.lt.s32.totalorder %s28675_s25, %s28675_s25 }
 0x2e3   :  { %28341 = vpow2.f32 %v21767_v28  ;;  %v25434_v28 = vld [vmem:[#allocation7 + $0xb0] ss:$28 sps:$4 sm:$0xff]   ;;  %p28682_p11 = por %p28681_p10, %p28680_p9 }
 0x2e4   :  { %5007 = vmatpush1.bf16.msra.mxu0 %v25293_v31  ;;  %5171 = vmatpush1.bf16.msra.mxu1 %v25296_v32  ;;  %v25376_v31 = vld [vmem:[#allocation2 + $0x128c] ss:$48 sps:$4 sm:$0xff]   ;;  %v25371_v32 = vld [vmem:[#allocation2 + $0x1280] ss:$48 sps:$4 sm:$0xff]  }
 0x2e5   :  { %5008 = vmatprep.subr.bf16.mxu0 %v25301_v15  ;;  %5172 = vmatprep.subr.bf16.mxu1 %v25304_v33  ;;  %v25374_v15 = vld [vmem:[#allocation2 + $0x1288] ss:$48 sps:$4 sm:$0xff]   ;;  %v25382_v33 = vld [vmem:[#allocation2 + $0x12ec] ss:$48 sps:$4 sm:$0xff]   ;;  %p28683_p12 = pnand %p28682_p11, %p28676_p8 }
 0x2e8   :  { %5009 = vmatpush1.bf16.msra.mxu0 %v25299_v34  ;;  %5173 = vmatpush1.bf16.msra.mxu1 %v25302_v35  ;;  %v25377_v34 = vld [vmem:[#allocation2 + $0x12e0] ss:$48 sps:$4 sm:$0xff]   ;;  %v25380_v35 = vld [vmem:[#allocation2 + $0x12e8] ss:$48 sps:$4 sm:$0xff]  }
 0x2e9   :  { %5010 = vmatprep.subr.bf16.mxu0 %v25307_v36  ;;  %5174 = vmatprep.subr.bf16.mxu1 %v25310_v37  ;;  %v25385_v36 = vld [vmem:[#allocation2 + $0x1344] ss:$48 sps:$4 sm:$0xff]   ;;  %v25388_v37 = vld [vmem:[#allocation2 + $0x134c] ss:$48 sps:$4 sm:$0xff]  }
 0x2ec   :  { %5011 = vmatpush1.bf16.msra.mxu0 %v25305_v38  ;;  %5175 = vmatpush1.bf16.msra.mxu1 %v25308_v39  ;;  %v25386_v38 = vld [vmem:[#allocation2 + $0x1348] ss:$48 sps:$4 sm:$0xff]   ;;  %v25391_v39 = vld [vmem:[#allocation2 + $0x13a4] ss:$48 sps:$4 sm:$0xff]  }
 0x2ed   :  { %5012 = vmatprep.subr.bf16.mxu0 %v25313_v40  ;;  %5176 = vmatprep.subr.bf16.mxu1 %v25316_v45  ;;  %v25394_v40 = vld [vmem:[#allocation2 + $0x13ac] ss:$48 sps:$4 sm:$0xff]   ;;  %v28342_v45 = vpop.eup %28341 }
 0x2f0   :  { %5013 = vmatpush1.bf16.msra.mxu0 %v25311_v46  ;;  %5177 = vmatpush1.bf16.msra.mxu1 %v25314_v47  ;;  %v25389_v46 = vld [vmem:[#allocation2 + $0x13a0] ss:$48 sps:$4 sm:$0xff]   ;;  %v25392_v47 = vld [vmem:[#allocation2 + $0x13a8] ss:$48 sps:$4 sm:$0xff]  }
 0x2f1   :  { %5014 = vmatprep.subr.bf16.mxu0 %v25319_v49  ;;  %5178 = vmatprep.subr.bf16.mxu1 %v25322_v50  ;;  %v5281_v49 = vadd.f32 1.0, %v28342_v45  ;;  %v25397_v50 = vld [vmem:[#allocation2 + $0x1404] ss:$48 sps:$4 sm:$0xff]  }
 0x2f3   :  { %28343 = vrcp.f32 %v5281_v49  ;;  %v25457_v49 = vld [vmem:[#allocation7 + $0x18c] ss:$28 sps:$4 sm:$0xff]  }
 0x2f4   :  { %5015 = vmatpush1.bf16.msra.mxu0 %v25317_v51  ;;  %5179 = vmatpush1.bf16.msra.mxu1 %v25320_v52  ;;  %v25400_v51 = vld [vmem:[#allocation2 + $0x140c] ss:$48 sps:$4 sm:$0xff]   ;;  %v25395_v52 = vld [vmem:[#allocation2 + $0x1400] ss:$48 sps:$4 sm:$0xff]  }
 0x2f5   :  { %5016 = vmatprep.subr.bf16.mxu0 %v25325_v53  ;;  %5180 = vmatprep.subr.bf16.mxu1 %v25328_v54  ;;  %v25398_v53 = vld [vmem:[#allocation2 + $0x1408] ss:$48 sps:$4 sm:$0xff]   ;;  %v25403_v54 = vld [vmem:[#allocation2 + $0x1464] ss:$48 sps:$4 sm:$0xff]  }
 0x2f8   :  { %5017 = vmatpush1.bf16.msra.mxu0 %v25323_v55  ;;  %5181 = vmatpush1.bf16.msra.mxu1 %v25326_v56  ;;  %v25406_v55 = vld [vmem:[#allocation2 + $0x146c] ss:$48 sps:$4 sm:$0xff]  }
 0x2f9   :  { %5018 = vmatprep.subr.bf16.mxu0 %v25331_v57  ;;  %5182 = vmatprep.subr.bf16.mxu1 %v25334_v58  ;;  %v25401_v58 = vld [vmem:[#allocation2 + $0x1460] ss:$48 sps:$4 sm:$0xff]  }
 0x2fc   :  { %5019 = vmatpush1.bf16.msra.mxu0 %v25329_v59  ;;  %5183 = vmatpush1.bf16.msra.mxu1 %v25332_v60  ;;  %v25404_v59 = vld [vmem:[#allocation2 + $0x1468] ss:$48 sps:$4 sm:$0xff]  }
 0x2fd   :  { %5020 = vmatprep.subr.bf16.mxu0 %v25337_v61  ;;  %5184 = vmatprep.subr.bf16.mxu1 %v25340_v62 }
 0x300   :  { %5021 = vmatpush1.bf16.msra.mxu0 %v25335_v63  ;;  %5185 = vmatpush1.bf16.msra.mxu1 %v25338_v0 }
 0x301   :  { %5022 = vmatprep.subr.bf16.mxu0 %v25343_v2  ;;  %5186 = vmatprep.subr.bf16.mxu1 %v25346_v3  ;;  %v25409_v2 = vld [vmem:[#allocation2 + $0x14c4] ss:$48 sps:$4 sm:$0xff]   ;;  %v25412_v3 = vld [vmem:[#allocation2 + $0x14cc] ss:$48 sps:$4 sm:$0xff]  }
 0x304   :  { %5023 = vmatpush1.bf16.msra.mxu0 %v25341_v4  ;;  %5187 = vmatpush1.bf16.msra.mxu1 %v25344_v6  ;;  %v25407_v4 = vld [vmem:[#allocation2 + $0x14c0] ss:$48 sps:$4 sm:$0xff]   ;;  %v25410_v6 = vld [vmem:[#allocation2 + $0x14c8] ss:$48 sps:$4 sm:$0xff]  }
 0x305   :  { %5024 = vmatprep.subr.bf16.mxu0 %v25349_v8  ;;  %5188 = vmatprep.subr.bf16.mxu1 %v25352_v9  ;;  %v25415_v8 = vld [vmem:[#allocation7 + $0x4] ss:$28 sps:$4 sm:$0xff]   ;;  %v25418_v9 = vld [vmem:[#allocation7 + $0xc] ss:$28 sps:$4 sm:$0xff]  }
 0x308   :  { %5025 = vmatpush1.bf16.msra.mxu0 %v25347_v11  ;;  %5189 = vmatpush1.bf16.msra.mxu1 %v25350_v12  ;;  %v25413_v11 = vld [vmem:[#allocation7] ss:$28 sps:$4 sm:$0xff]   ;;  %v28344_v12 = vpop.eup %28343 }
 0x309   :  { %5026 = vmatprep.subr.bf16.mxu0 %v25355_v16  ;;  %5190 = vmatprep.subr.bf16.mxu1 %v25358_v17  ;;  %v25416_v16 = vld [vmem:[#allocation7 + $0x8] ss:$28 sps:$4 sm:$0xff]   ;;  %v25421_v17 = vld [vmem:[#allocation7 + $0x3c] ss:$28 sps:$4 sm:$0xff]  }
 0x30c   :  { %5027 = vmatpush1.bf16.msra.mxu0 %v25353_v18  ;;  %5191 = vmatpush1.bf16.msra.mxu1 %v25356_v5  ;;  %v25424_v18 = vld [vmem:[#allocation7 + $0x44] ss:$28 sps:$4 sm:$0xff]   ;;  %v28995_v5 = vpack.c.bf16 %v28344_v12, %v28344_v12  ;;  %v25482_v12 = vld [vmem:[#allocation7 + $0x270] ss:$28 sps:$4 sm:$0xff]  }
 0x30d   :  { %5028 = vmatprep.subr.bf16.mxu0 %v25361_v21  ;;  %5192 = vmatprep.subr.bf16.mxu1 %v25364_v22  ;;  %v25419_v21 = vld [vmem:[#allocation7 + $0x38] ss:$28 sps:$4 sm:$0xff]   ;;  %v25422_v22 = vld [vmem:[#allocation7 + $0x40] ss:$28 sps:$4 sm:$0xff]  }
 0x310   :  { %5029 = vmatpush1.bf16.msra.mxu0 %v25359_v23  ;;  %5193 = vmatpush1.bf16.msra.mxu1 %v25362_v24  ;;  %v25427_v23 = vld [vmem:[#allocation7 + $0x74] ss:$28 sps:$4 sm:$0xff]   ;;  %v25430_v24 = vld [vmem:[#allocation7 + $0x7c] ss:$28 sps:$4 sm:$0xff]  }
 0x311   :  { %5039 = vmatprep.subr.bf16.mxu0 %v25367_v25  ;;  %5203 = vmatprep.subr.bf16.mxu1 %v25370_v13  ;;  %v25428_v25 = vld [vmem:[#allocation7 + $0x78] ss:$28 sps:$4 sm:$0xff]   ;;  %v25433_v13 = vld [vmem:[#allocation7 + $0xac] ss:$28 sps:$4 sm:$0xff]  }
 0x313   :  { %5031 = vmatmul.mubr.bf16.vlgmr.msra.gmra.mrb[8].mxu0 %v28929_v19  ;;  %5195 = vmatmul.mubr.bf16.vlgmr.msra.gmra.mrb[8].mxu1 %v28929_v19  ;;  %v25383_v19 = vld [vmem:[#allocation2 + $0x1340] ss:$48 sps:$4 sm:$0xff]  }
 0x314   :  { %5040 = vmatpush1.bf16.msra.mxu0 %v25365_v27  ;;  %5204 = vmatpush1.bf16.msra.mxu1 %v25368_v10  ;;  %v25431_v27 = vld [vmem:[#allocation7 + $0xa8] ss:$28 sps:$4 sm:$0xff]   ;;  %v25436_v10 = vld [vmem:[#allocation7 + $0xb4] ss:$28 sps:$4 sm:$0xff]  }
 0x315   :  { %5041 = vmatprep.subr.bf16.mxu0 %v25373_v29  ;;  %5205 = vmatprep.subr.bf16.mxu1 %v25376_v31  ;;  %v25439_v29 = vld [vmem:[#allocation7 + $0xe4] ss:$28 sps:$4 sm:$0xff]  }
 0x316   :  { %5071 = vmatprep.mubr.bf16.mxu0 %v28721_v26  ;;  %5235 = vmatprep.mubr.bf16.mxu1 %v28721_v26  ;;  %v25437_v31 = vld [vmem:[#allocation7 + $0xe0] ss:$28 sps:$4 sm:$0xff]  }
 0x318   :  { %5042 = vmatpush1.bf16.msra.mxu0 %v25371_v32  ;;  %5206 = vmatpush1.bf16.msra.mxu1 %v25374_v15  ;;  %v25442_v32 = vld [vmem:[#allocation7 + $0xec] ss:$28 sps:$4 sm:$0xff]   ;;  %v29003_v15 = vsub.s32 0, %v28973_v7 }
 0x319   :  { %5043 = vmatprep.subr.bf16.mxu0 %v25379_v43  ;;  %5207 = vmatprep.subr.bf16.mxu1 %v25382_v33  ;;  %v25440_v43 = vld [vmem:[#allocation7 + $0xe8] ss:$28 sps:$4 sm:$0xff]   ;;  %v25445_v33 = vld [vmem:[#allocation7 + $0x11c] ss:$28 sps:$4 sm:$0xff]  }
 0x31c   :  { %5044 = vmatpush1.bf16.msra.mxu0 %v25377_v34  ;;  %5208 = vmatpush1.bf16.msra.mxu1 %v25380_v35  ;;  %v25443_v34 = vld [vmem:[#allocation7 + $0x118] ss:$28 sps:$4 sm:$0xff]   ;;  %v25448_v35 = vld [vmem:[#allocation7 + $0x124] ss:$28 sps:$4 sm:$0xff]  }
 0x31d   :  { %5045 = vmatprep.subr.bf16.mxu0 %v25385_v36  ;;  %5209 = vmatprep.subr.bf16.mxu1 %v25388_v37  ;;  %v818_v36 = vrot.slane %v28978_v48, %v29003_v15  ;;  %v29008_v37 = vsub.s32 3, %v28973_v7 }
 0x31f   :  { %v24084_v45 = vadd.f32 %v28952_v41, %v818_v36  ;;  %v25461_v41 = vld [vmem:[#allocation7 + $0x1c0] ss:$28 sps:$4 sm:$0xff]  }
 0x320   :  { %5046 = vmatpush1.bf16.msra.mxu0 %v25383_v19  ;;  %5210 = vmatpush1.bf16.msra.mxu1 %v25386_v38  ;;  %v25446_v19 = vld [vmem:[#allocation7 + $0x120] ss:$28 sps:$4 sm:$0xff]   ;;  %v25451_v38 = vld [vmem:[#allocation7 + $0x154] ss:$28 sps:$4 sm:$0xff]  }
 0x321   :  { %5047 = vmatprep.subr.bf16.mxu0 %v25391_v39  ;;  %5211 = vmatprep.subr.bf16.mxu1 %v25394_v40  ;;  %v25449_v39 = vld [vmem:[#allocation7 + $0x150] ss:$28 sps:$4 sm:$0xff]   ;;  %v25454_v40 = vld [vmem:[#allocation7 + $0x15c] ss:$28 sps:$4 sm:$0xff]  }
 0x322   :  { %v25509_v36 = vld [vmem:[#allocation7 + $0x380] ss:$28 sps:$4 sm:$0xff]  }
 0x324   :  { %5048 = vmatpush1.bf16.msra.mxu0 %v25389_v46  ;;  %5212 = vmatpush1.bf16.msra.mxu1 %v25392_v47  ;;  %v830_v46 = vrot.slane %v28978_v48, %v29008_v37  ;;  %v25452_v47 = vld [vmem:[#allocation7 + $0x158] ss:$28 sps:$4 sm:$0xff]  }
 0x325   :  { %5049 = vmatprep.subr.bf16.mxu0 %v25397_v50  ;;  %5213 = vmatprep.subr.bf16.mxu1 %v25400_v51  ;;  %v25455_v50 = vld [vmem:[#allocation7 + $0x188] ss:$28 sps:$4 sm:$0xff]   ;;  %v25460_v51 = vld [vmem:[#allocation7 + $0x194] ss:$28 sps:$4 sm:$0xff]  }
 0x326   :  { %v28987_v56 = vpop.f32.mrb[4].mxu0  ;;  %v28989_v57 = vpop.f32.mrb[4].mxu1 }
 0x327   :  { %v28991_v60 = vpop.f32.mrb[5].mxu0  ;;  %v28993_v61 = vpop.f32.mrb[5].mxu1 }
 0x328   :  { %v4749_v62 = vpop.f32.mrb[6].mxu0  ;;  %v4913_v63 = vpop.f32.mrb[6].mxu1  ;;  %5050 = vmatpush1.bf16.msra.mxu0 %v25395_v52  ;;  %5214 = vmatpush1.bf16.msra.mxu1 %v25398_v53  ;;  %v21766_v52 = vmul.f32 -1.442695, %v24084_v45  ;;  %v24087_v53 = vadd.f32 %v28958_v44, %v830_v46  ;;  %v25470_v44 = vld [vmem:[#allocation7 + $0x200] ss:$28 sps:$4 sm:$0xff]  }
 0x329   :  { %v4750_v0 = vpop.f32.mrb[7].mxu0  ;;  %v4914_v1 = vpop.f32.mrb[7].mxu1  ;;  %5051 = vmatprep.subr.bf16.mxu0 %v25403_v54  ;;  %5215 = vmatprep.subr.bf16.mxu1 %v25406_v55  ;;  %v25458_v54 = vld [vmem:[#allocation7 + $0x190] ss:$28 sps:$4 sm:$0xff]   ;;  %v25463_v55 = vld [vmem:[#allocation7 + $0x1c4] ss:$28 sps:$4 sm:$0xff]  }
 0x32a   :  { %v21769_v48 = vmul.f32 -1.442695, %v24087_v53  ;;  %v25469_v62 = vld [vmem:[#allocation7 + $0x1fc] ss:$28 sps:$4 sm:$0xff]   ;;  %28345 = vpow2.f32 %v21766_v52  ;;  %v25472_v0 = vld [vmem:[#allocation7 + $0x204] ss:$28 sps:$4 sm:$0xff]  }
 0x32b   :  { %v25467_v63 = vld [vmem:[#allocation7 + $0x1f8] ss:$28 sps:$4 sm:$0xff]   ;;  %v25521_v53 = vld [vmem:[#allocation7 + $0x3f0] ss:$28 sps:$4 sm:$0xff]  }
 0x32c   :  { %5052 = vmatpush1.bf16.msra.mxu0 %v25401_v58  ;;  %5216 = vmatpush1.bf16.msra.mxu1 %v25404_v59  ;;  %v25466_v58 = vld [vmem:[#allocation7 + $0x1cc] ss:$28 sps:$4 sm:$0xff]   ;;  %28347 = vpow2.f32 %v21769_v48  ;;  %v25475_v1 = vld [vmem:[#allocation7 + $0x234] ss:$28 sps:$4 sm:$0xff]   ;;  %v25526_v52 = vld [vmem:[#allocation7 + $0x3fc] ss:$28 sps:$4 sm:$0xff]  }
 0x32d   :  { %5053 = vmatprep.subr.bf16.mxu0 %v25409_v2  ;;  %5217 = vmatprep.subr.bf16.mxu1 %v25412_v3  ;;  %v25464_v59 = vld [vmem:[#allocation7 + $0x1c8] ss:$28 sps:$4 sm:$0xff]   ;;  %v25473_v2 = vld [vmem:[#allocation7 + $0x230] ss:$28 sps:$4 sm:$0xff]   ;;  %v25478_v3 = vld [vmem:[#allocation7 + $0x23c] ss:$28 sps:$4 sm:$0xff]  }
 0x32e   :  { %v25530_v48 = vld [vmem:[#allocation7 + $0x430] ss:$28 sps:$4 sm:$0xff]  }
 0x330   :  { %5054 = vmatpush1.bf16.msra.mxu0 %v25407_v4  ;;  %5218 = vmatpush1.bf16.msra.mxu1 %v25410_v6  ;;  %v25476_v4 = vld [vmem:[#allocation7 + $0x238] ss:$28 sps:$4 sm:$0xff]   ;;  %v25481_v6 = vld [vmem:[#allocation7 + $0x26c] ss:$28 sps:$4 sm:$0xff]  }
 0x331   :  { %9589 = vmatprep.subr.bf16.mxu0 %v25415_v8  ;;  %9835 = vmatprep.subr.bf16.mxu1 %v25418_v9  ;;  %v25479_v8 = vld [vmem:[#allocation7 + $0x268] ss:$28 sps:$4 sm:$0xff]   ;;  %v25484_v9 = vld [vmem:[#allocation7 + $0x274] ss:$28 sps:$4 sm:$0xff]  }
 0x333   :  { %5072 = vmatmul.mubr.bf16.vlgmr.msra.gmra.mrb[8].mxu0 %v28494_v20  ;;  %5236 = vmatmul.mubr.bf16.vlgmr.msra.gmra.mrb[8].mxu1 %v28494_v20 }
 0x334   :  { %9590 = vmatpush1.bf16.msra.mxu0 %v25413_v11  ;;  %9621 = vmatprep.mubr.bf16.mxu0 %v28995_v5  ;;  %v28346_v11 = vpop.eup %28345 }
 0x335   :  { %9836 = vmatpush1.bf16.msra.mxu1 %v25416_v16  ;;  %9867 = vmatprep.mubr.bf16.mxu1 %v28995_v5  ;;  %v25487_v16 = vld [vmem:[#allocation7 + $0x2a4] ss:$28 sps:$4 sm:$0xff]  }
 0x336   :  { %9591 = vmatprep.subr.bf16.mxu0 %v25421_v17  ;;  %9837 = vmatprep.subr.bf16.mxu1 %v25424_v18  ;;  %v25485_v17 = vld [vmem:[#allocation7 + $0x2a0] ss:$28 sps:$4 sm:$0xff]   ;;  %v25490_v18 = vld [vmem:[#allocation7 + $0x2ac] ss:$28 sps:$4 sm:$0xff]   ;;  %v28348_v20 = vpop.eup %28347 }
 0x338   :  { %9592 = vmatpush1.bf16.msra.mxu0 %v25419_v21  ;;  %v5280_v21 = vadd.f32 1.0, %v28346_v11  ;;  %v29028_v11 = vld [vmem:[#allocation5] sm:$0xff] }
 0x339   :  { %9838 = vmatpush1.bf16.msra.mxu1 %v25422_v22  ;;  %9593 = vmatprep.subr.bf16.mxu0 %v25427_v23  ;;  %v25488_v22 = vld [vmem:[#allocation7 + $0x2a8] ss:$28 sps:$4 sm:$0xff]   ;;  %v25493_v23 = vld [vmem:[#allocation7 + $0x2dc] ss:$28 sps:$4 sm:$0xff]  }
 0x33a   :  { %9839 = vmatprep.subr.bf16.mxu1 %v25430_v24  ;;  %v5283_v24 = vadd.f32 1.0, %v28348_v20  ;;  %28349 = vrcp.f32 %v5280_v21  ;;  %v25556_v20 = vld [vmem:[#allocation7 + $0x514] ss:$28 sps:$4 sm:$0xff]  }
 0x33c   :  { %9594 = vmatpush1.bf16.msra.mxu0 %v25425_v30  ;;  %v25491_v30 = vld [vmem:[#allocation7 + $0x2d8] ss:$28 sps:$4 sm:$0xff]   ;;  %28351 = vrcp.f32 %v5283_v24  ;;  %v25554_v24 = vld [vmem:[#allocation7 + $0x510] ss:$28 sps:$4 sm:$0xff]  }
 0x33d   :  { %9840 = vmatpush1.bf16.msra.mxu1 %v25428_v25  ;;  %9595 = vmatprep.subr.bf16.mxu0 %v25433_v13  ;;  %v25496_v25 = vld [vmem:[#allocation7 + $0x2e4] ss:$28 sps:$4 sm:$0xff]  }
 0x33e   :  { %9841 = vmatprep.subr.bf16.mxu1 %v25436_v10  ;;  %v25494_v13 = vld [vmem:[#allocation7 + $0x2e0] ss:$28 sps:$4 sm:$0xff]   ;;  %v25497_v10 = vld [vmem:[#allocation7 + $0x310] ss:$28 sps:$4 sm:$0xff]  }
 0x340   :  { %9596 = vmatpush1.bf16.msra.mxu0 %v25431_v27  ;;  %v25499_v27 = vld [vmem:[#allocation7 + $0x314] ss:$28 sps:$4 sm:$0xff]  }
 0x341   :  { %9842 = vmatpush1.bf16.msra.mxu1 %v25434_v28  ;;  %9597 = vmatprep.subr.bf16.mxu0 %v25439_v29  ;;  %v25502_v28 = vld [vmem:[#allocation7 + $0x31c] ss:$28 sps:$4 sm:$0xff]  }
 0x342   :  { %9843 = vmatprep.subr.bf16.mxu1 %v25442_v32  ;;  %v25500_v29 = vld [vmem:[#allocation7 + $0x318] ss:$28 sps:$4 sm:$0xff]   ;;  %v25503_v32 = vld [vmem:[#allocation7 + $0x348] ss:$28 sps:$4 sm:$0xff]  }
 0x344   :  { %9598 = vmatpush1.bf16.msra.mxu0 %v25437_v31  ;;  %v25505_v31 = vld [vmem:[#allocation7 + $0x34c] ss:$28 sps:$4 sm:$0xff]  }
 0x345   :  { %9844 = vmatpush1.bf16.msra.mxu1 %v25440_v43  ;;  %9599 = vmatprep.subr.bf16.mxu0 %v25445_v33  ;;  %v25508_v43 = vld [vmem:[#allocation7 + $0x354] ss:$28 sps:$4 sm:$0xff]  }
 0x346   :  { %9845 = vmatprep.subr.bf16.mxu1 %v25448_v35  ;;  %v25506_v33 = vld [vmem:[#allocation7 + $0x350] ss:$28 sps:$4 sm:$0xff]   ;;  %v28350_v35 = vpop.eup %28349 }
 0x347   :  { %v29014_v45 = vpack.c.bf16 %v28350_v35, %v28350_v35  ;;  %v25572_v35 = vld [vmem:[#allocation7 + $0x5b8] ss:$28 sps:$4 sm:$0xff]  }
 0x348   :  { %9600 = vmatpush1.bf16.msra.mxu0 %v25443_v34  ;;  %v25511_v34 = vld [vmem:[#allocation7 + $0x384] ss:$28 sps:$4 sm:$0xff]  }
 0x349   :  { %9846 = vmatpush1.bf16.msra.mxu1 %v25446_v19  ;;  %9601 = vmatprep.subr.bf16.mxu0 %v25451_v38  ;;  %v25514_v19 = vld [vmem:[#allocation7 + $0x38c] ss:$28 sps:$4 sm:$0xff]  }
 0x34a   :  { %9847 = vmatprep.subr.bf16.mxu1 %v25454_v40  ;;  %v25512_v38 = vld [vmem:[#allocation7 + $0x388] ss:$28 sps:$4 sm:$0xff]   ;;  %v25517_v40 = vld [vmem:[#allocation7 + $0x3bc] ss:$28 sps:$4 sm:$0xff]  }
 0x34c   :  { %9602 = vmatpush1.bf16.msra.mxu0 %v25449_v39  ;;  %v28352_v39 = vpop.eup %28351 }
 0x34d   :  { %9848 = vmatpush1.bf16.msra.mxu1 %v25452_v47  ;;  %9603 = vmatprep.subr.bf16.mxu0 %v25457_v49  ;;  %v29017_v46 = vpack.c.bf16 %v28352_v39, %v28352_v39  ;;  %v25515_v47 = vld [vmem:[#allocation7 + $0x3b8] ss:$28 sps:$4 sm:$0xff]   ;;  %v25518_v49 = vld [vmem:[#allocation7 + $0x3c0] ss:$28 sps:$4 sm:$0xff]  }
 0x34e   :  { %9849 = vmatprep.subr.bf16.mxu1 %v25460_v51  ;;  %v25523_v51 = vld [vmem:[#allocation7 + $0x3f4] ss:$28 sps:$4 sm:$0xff]  }
 0x350   :  { %9604 = vmatpush1.bf16.msra.mxu0 %v25455_v50  ;;  %v25520_v50 = vld [vmem:[#allocation7 + $0x3c4] ss:$28 sps:$4 sm:$0xff]  }
 0x351   :  { %9850 = vmatpush1.bf16.msra.mxu1 %v25458_v54  ;;  %9605 = vmatprep.subr.bf16.mxu0 %v25463_v55  ;;  %v25524_v54 = vld [vmem:[#allocation7 + $0x3f8] ss:$28 sps:$4 sm:$0xff]   ;;  %v25529_v55 = vld [vmem:[#allocation7 + $0x42c] ss:$28 sps:$4 sm:$0xff]  }
 0x352   :  { %9851 = vmatprep.subr.bf16.mxu1 %v25466_v58  ;;  %v25532_v58 = vld [vmem:[#allocation7 + $0x434] ss:$28 sps:$4 sm:$0xff]  }
 0x354   :  { %9606 = vmatpush1.bf16.msra.mxu0 %v25461_v41  ;;  %v25527_v41 = vld [vmem:[#allocation7 + $0x428] ss:$28 sps:$4 sm:$0xff]  }
 0x355   :  { %9852 = vmatpush1.bf16.msra.mxu1 %v25464_v59  ;;  %9607 = vmatprep.subr.bf16.mxu0 %v25469_v62  ;;  %v25535_v59 = vld [vmem:[#allocation7 + $0x464] ss:$28 sps:$4 sm:$0xff]  }
 0x356   :  { %9853 = vmatprep.subr.bf16.mxu1 %v25472_v0  ;;  %v25533_v62 = vld [vmem:[#allocation7 + $0x460] ss:$28 sps:$4 sm:$0xff]   ;;  %v25536_v0 = vld [vmem:[#allocation7 + $0x468] ss:$28 sps:$4 sm:$0xff]  }
 0x358   :  { %9608 = vmatpush1.bf16.msra.mxu0 %v25467_v63  ;;  %v25538_v63 = vld [vmem:[#allocation7 + $0x46c] ss:$28 sps:$4 sm:$0xff]  }
 0x359   :  { %9854 = vmatpush1.bf16.msra.mxu1 %v25470_v44  ;;  %9609 = vmatprep.subr.bf16.mxu0 %v25475_v1  ;;  %v25541_v44 = vld [vmem:[#allocation7 + $0x49c] ss:$28 sps:$4 sm:$0xff]   ;;  %v29023_v1 = vsub.s32 2, %v28973_v7 }
 0x35a   :  { %9855 = vmatprep.subr.bf16.mxu1 %v25478_v3  ;;  %v25544_v3 = vld [vmem:[#allocation7 + $0x4a4] ss:$28 sps:$4 sm:$0xff]  }
 0x35c   :  { %9610 = vmatpush1.bf16.msra.mxu0 %v25473_v2  ;;  %v25539_v2 = vld [vmem:[#allocation7 + $0x498] ss:$28 sps:$4 sm:$0xff]  }
 0x35d   :  { %9856 = vmatpush1.bf16.msra.mxu1 %v25476_v4  ;;  %9611 = vmatprep.subr.bf16.mxu0 %v25481_v6  ;;  %v25542_v4 = vld [vmem:[#allocation7 + $0x4a0] ss:$28 sps:$4 sm:$0xff]   ;;  %v25547_v6 = vld [vmem:[#allocation7 + $0x4d4] ss:$28 sps:$4 sm:$0xff]  }
 0x35e   :  { %9857 = vmatprep.subr.bf16.mxu1 %v25484_v9  ;;  %v25550_v9 = vld [vmem:[#allocation7 + $0x4dc] ss:$28 sps:$4 sm:$0xff]  }
 0x360   :  { %9612 = vmatpush1.bf16.msra.mxu0 %v25479_v8  ;;  %v29026_v8 = vsub.s32 5, %v28973_v7 }
 0x361   :  { %9858 = vmatpush1.bf16.msra.mxu1 %v25482_v12  ;;  %9613 = vmatprep.subr.bf16.mxu0 %v25487_v16  ;;  %v826_v12 = vrot.slane %v29028_v11, %v29023_v1  ;;  %v25545_v16 = vld [vmem:[#allocation7 + $0x4d0] ss:$28 sps:$4 sm:$0xff]  }
 0x362   :  { %9859 = vmatprep.subr.bf16.mxu1 %v25490_v18  ;;  %v25553_v18 = vld [vmem:[#allocation7 + $0x50c] ss:$28 sps:$4 sm:$0xff]   ;;  %v838_v21 = vrot.slane %v29028_v11, %v29026_v8 }
 0x364   :  { %9614 = vmatpush1.bf16.msra.mxu0 %v25485_v17  ;;  %v25548_v17 = vld [vmem:[#allocation7 + $0x4d8] ss:$28 sps:$4 sm:$0xff]  }
 0x365   :  { %9860 = vmatpush1.bf16.msra.mxu1 %v25488_v22  ;;  %9615 = vmatprep.subr.bf16.mxu0 %v25493_v23  ;;  %v24086_v22 = vadd.f32 %v28954_v42, %v826_v12  ;;  %v25551_v23 = vld [vmem:[#allocation7 + $0x508] ss:$28 sps:$4 sm:$0xff]   ;;  %v25563_v42 = vld [vmem:[#allocation7 + $0x578] ss:$28 sps:$4 sm:$0xff]   ;;  %v25605_v12 = vld [vmem:[#allocation7 + $0x700] ss:$28 sps:$4 sm:$0xff]  }
 0x366   :  { %9861 = vmatprep.subr.bf16.mxu1 %v25496_v25  ;;  %v25562_v25 = vld [vmem:[#allocation7 + $0x54c] ss:$28 sps:$4 sm:$0xff]  }
 0x368   :  { %9616 = vmatpush1.bf16.msra.mxu0 %v25491_v30  ;;  %v25559_v30 = vld [vmem:[#allocation7 + $0x544] ss:$28 sps:$4 sm:$0xff]  }
 0x369   :  { %9862 = vmatpush1.bf16.msra.mxu1 %v25494_v13  ;;  %9617 = vmatprep.subr.bf16.mxu0 %v25499_v27  ;;  %v24089_v13 = vadd.f32 %v28991_v60, %v838_v21  ;;  %v21768_v27 = vmul.f32 -1.442695, %v24086_v22  ;;  %v25569_v60 = vld [vmem:[#allocation7 + $0x5b0] ss:$28 sps:$4 sm:$0xff]  }
 0x36a   :  { %9863 = vmatprep.subr.bf16.mxu1 %v25502_v28  ;;  %v25560_v28 = vld [vmem:[#allocation7 + $0x548] ss:$28 sps:$4 sm:$0xff]  }
 0x36b   :  { %28353 = vpow2.f32 %v21768_v27  ;;  %v25617_v27 = vld [vmem:[#allocation7 + $0x770] ss:$28 sps:$4 sm:$0xff]  }
 0x36c   :  { %9618 = vmatpush1.bf16.msra.mxu0 %v25497_v10  ;;  %v25557_v10 = vld [vmem:[#allocation7 + $0x540] ss:$28 sps:$4 sm:$0xff]  }
 0x36d   :  { %9864 = vmatpush1.bf16.msra.mxu1 %v25500_v29  ;;  %9619 = vmatprep.subr.bf16.mxu0 %v25505_v31  ;;  %v25565_v29 = vld [vmem:[#allocation7 + $0x57c] ss:$28 sps:$4 sm:$0xff]   ;;  %v25568_v31 = vld [vmem:[#allocation7 + $0x584] ss:$28 sps:$4 sm:$0xff]  }
 0x36e   :  { %9865 = vmatprep.subr.bf16.mxu1 %v25508_v43  ;;  %v25566_v43 = vld [vmem:[#allocation7 + $0x580] ss:$28 sps:$4 sm:$0xff]  }
 0x370   :  { %9620 = vmatpush1.bf16.msra.mxu0 %v25503_v32  ;;  %v21771_v32 = vmul.f32 -1.442695, %v24089_v13  ;;  %v25622_v13 = vld [vmem:[#allocation7 + $0x77c] ss:$28 sps:$4 sm:$0xff]  }
 0x371   :  { %9866 = vmatpush1.bf16.msra.mxu1 %v25506_v33  ;;  %9630 = vmatprep.subr.bf16.mxu0 %v25511_v34  ;;  %v25571_v33 = vld [vmem:[#allocation7 + $0x5b4] ss:$28 sps:$4 sm:$0xff]   ;;  %v25574_v34 = vld [vmem:[#allocation7 + $0x5bc] ss:$28 sps:$4 sm:$0xff]  }
 0x372   :  { %9876 = vmatprep.subr.bf16.mxu1 %v25514_v19  ;;  %28355 = vpow2.f32 %v21771_v32  ;;  %v25580_v19 = vld [vmem:[#allocation7 + $0x5f4] ss:$28 sps:$4 sm:$0xff]  }
 0x373   :  { %9622 = vmatmul.mubr.bf16.vlgmr.msra.gmra.mrb[12].mxu0 %v29014_v45  ;;  %v25626_v32 = vld [vmem:[#allocation7 + $0x7b0] ss:$28 sps:$4 sm:$0xff]  }
 0x374   :  { %9868 = vmatmul.mubr.bf16.vlgmr.msra.gmra.mrb[12].mxu1 %v29014_v45  ;;  %9631 = vmatpush1.bf16.msra.mxu0 %v25509_v36  ;;  %v25577_v36 = vld [vmem:[#allocation7 + $0x5ec] ss:$28 sps:$4 sm:$0xff]  }
 0x375   :  { %9662 = vmatprep.mubr.bf16.mxu0 %v29017_v46  ;;  %9877 = vmatpush1.bf16.msra.mxu1 %v25512_v38  ;;  %v25575_v38 = vld [vmem:[#allocation7 + $0x5e8] ss:$28 sps:$4 sm:$0xff]   ;;  %v28354_v39 = vpop.eup %28353 }
 0x376   :  { %9908 = vmatprep.mubr.bf16.mxu1 %v29017_v46  ;;  %9632 = vmatprep.subr.bf16.mxu0 %v25517_v40  ;;  %v25578_v40 = vld [vmem:[#allocation7 + $0x5f0] ss:$28 sps:$4 sm:$0xff]  }
 0x377   :  { %9878 = vmatprep.subr.bf16.mxu1 %v25520_v50  ;;  %v25586_v50 = vld [vmem:[#allocation7 + $0x62c] ss:$28 sps:$4 sm:$0xff]  }
 0x378   :  { %9633 = vmatpush1.bf16.msra.mxu0 %v25515_v47  ;;  %v25583_v47 = vld [vmem:[#allocation7 + $0x624] ss:$28 sps:$4 sm:$0xff]  }
 0x379   :  { %9879 = vmatpush1.bf16.msra.mxu1 %v25518_v49  ;;  %9634 = vmatprep.subr.bf16.mxu0 %v25523_v51  ;;  %v25581_v49 = vld [vmem:[#allocation7 + $0x620] ss:$28 sps:$4 sm:$0xff]  }
 0x37a   :  { %9880 = vmatprep.subr.bf16.mxu1 %v25526_v52  ;;  %v5282_v52 = vadd.f32 1.0, %v28354_v39  ;;  %v25638_v39 = vld [vmem:[#allocation7 + $0x820] ss:$28 sps:$4 sm:$0xff]  }
 0x37c   :  { %9635 = vmatpush1.bf16.msra.mxu0 %v25521_v53  ;;  %v28356_v51 = vpop.eup %28355  ;;  %v25584_v53 = vld [vmem:[#allocation7 + $0x628] ss:$28 sps:$4 sm:$0xff]   ;;  %28357 = vrcp.f32 %v5282_v52  ;;  %v25644_v52 = vld [vmem:[#allocation7 + $0x858] ss:$28 sps:$4 sm:$0xff]  }
 0x37d   :  { %9881 = vmatpush1.bf16.msra.mxu1 %v25524_v54  ;;  %9636 = vmatprep.subr.bf16.mxu0 %v25529_v55  ;;  %v25589_v54 = vld [vmem:[#allocation7 + $0x65c] ss:$28 sps:$4 sm:$0xff]   ;;  %v5285_v55 = vadd.f32 1.0, %v28356_v51 }
 0x37e   :  { %9882 = vmatprep.subr.bf16.mxu1 %v25532_v58  ;;  %v25592_v58 = vld [vmem:[#allocation7 + $0x664] ss:$28 sps:$4 sm:$0xff]  }
 0x37f   :  { %28359 = vrcp.f32 %v5285_v55  ;;  %v25652_v55 = vld [vmem:[#allocation7 + $0x894] ss:$28 sps:$4 sm:$0xff]  }
 0x380   :  { %9637 = vmatpush1.bf16.msra.mxu0 %v25527_v41  ;;  %v25587_v41 = vld [vmem:[#allocation7 + $0x658] ss:$28 sps:$4 sm:$0xff]  }
 0x381   :  { %9883 = vmatpush1.bf16.msra.mxu1 %v25530_v48  ;;  %9638 = vmatprep.subr.bf16.mxu0 %v25535_v59  ;;  %v25590_v48 = vld [vmem:[#allocation7 + $0x660] ss:$28 sps:$4 sm:$0xff]   ;;  %v25595_v59 = vld [vmem:[#allocation7 + $0x694] ss:$28 sps:$4 sm:$0xff]  }
 0x382   :  { %9884 = vmatprep.subr.bf16.mxu1 %v25538_v63  ;;  %v25598_v63 = vld [vmem:[#allocation7 + $0x69c] ss:$28 sps:$4 sm:$0xff]  }
 0x384   :  { %9639 = vmatpush1.bf16.msra.mxu0 %v25533_v62  ;;  %v25593_v62 = vld [vmem:[#allocation7 + $0x690] ss:$28 sps:$4 sm:$0xff]  }
 0x385   :  { %9885 = vmatpush1.bf16.msra.mxu1 %v25536_v0  ;;  %9640 = vmatprep.subr.bf16.mxu0 %v25541_v44  ;;  %v25596_v0 = vld [vmem:[#allocation7 + $0x698] ss:$28 sps:$4 sm:$0xff]   ;;  %v25601_v44 = vld [vmem:[#allocation7 + $0x6cc] ss:$28 sps:$4 sm:$0xff]  }
 0x386   :  { %9886 = vmatprep.subr.bf16.mxu1 %v25544_v3  ;;  %v25604_v3 = vld [vmem:[#allocation7 + $0x6d4] ss:$28 sps:$4 sm:$0xff]  }
 0x388   :  { %9641 = vmatpush1.bf16.msra.mxu0 %v25539_v2  ;;  %v25599_v2 = vld [vmem:[#allocation7 + $0x6c8] ss:$28 sps:$4 sm:$0xff]  }
 0x389   :  { %9887 = vmatpush1.bf16.msra.mxu1 %v25542_v4  ;;  %9642 = vmatprep.subr.bf16.mxu0 %v25547_v6  ;;  %v25602_v4 = vld [vmem:[#allocation7 + $0x6d0] ss:$28 sps:$4 sm:$0xff]   ;;  %v25607_v6 = vld [vmem:[#allocation7 + $0x704] ss:$28 sps:$4 sm:$0xff]  }
 0x38a   :  { %9888 = vmatprep.subr.bf16.mxu1 %v25550_v9  ;;  %v28358_v9 = vpop.eup %28357 }
 0x38b   :  { %v29036_v21 = vpack.c.bf16 %v28358_v9, %v28358_v9  ;;  %v25670_v9 = vld [vmem:[#allocation7 + $0x93c] ss:$28 sps:$4 sm:$0xff]  }
 0x38c   :  { %9643 = vmatpush1.bf16.msra.mxu0 %v25545_v16  ;;  %v25610_v16 = vld [vmem:[#allocation7 + $0x70c] ss:$28 sps:$4 sm:$0xff]  }
 0x38d   :  { %9889 = vmatpush1.bf16.msra.mxu1 %v25548_v17  ;;  %9644 = vmatprep.subr.bf16.mxu0 %v25553_v18  ;;  %v25608_v17 = vld [vmem:[#allocation7 + $0x708] ss:$28 sps:$4 sm:$0xff]   ;;  %v28360_v18 = vpop.eup %28359 }
 0x38e   :  { %9890 = vmatprep.subr.bf16.mxu1 %v25556_v20  ;;  %v25613_v20 = vld [vmem:[#allocation7 + $0x73c] ss:$28 sps:$4 sm:$0xff]   ;;  %v29039_v22 = vpack.c.bf16 %v28360_v18, %v28360_v18  ;;  %v25676_v18 = vld [vmem:[#allocation7 + $0x974] ss:$28 sps:$4 sm:$0xff]  }
 0x390   :  { %9645 = vmatpush1.bf16.msra.mxu0 %v25551_v23  ;;  %v25611_v23 = vld [vmem:[#allocation7 + $0x738] ss:$28 sps:$4 sm:$0xff]  }
 0x391   :  { %9891 = vmatpush1.bf16.msra.mxu1 %v25554_v24  ;;  %9646 = vmatprep.subr.bf16.mxu0 %v25559_v30  ;;  %v25614_v24 = vld [vmem:[#allocation7 + $0x740] ss:$28 sps:$4 sm:$0xff]  }
 0x392   :  { %9892 = vmatprep.subr.bf16.mxu1 %v25562_v25  ;;  %v25616_v30 = vld [vmem:[#allocation7 + $0x744] ss:$28 sps:$4 sm:$0xff]   ;;  %v25619_v25 = vld [vmem:[#allocation7 + $0x774] ss:$28 sps:$4 sm:$0xff]  }
 0x394   :  { %9647 = vmatpush1.bf16.msra.mxu0 %v25557_v10  ;;  %v25620_v10 = vld [vmem:[#allocation7 + $0x778] ss:$28 sps:$4 sm:$0xff]  }
 0x395   :  { %9893 = vmatpush1.bf16.msra.mxu1 %v25560_v28  ;;  %9648 = vmatprep.subr.bf16.mxu0 %v25565_v29  ;;  %v25625_v28 = vld [vmem:[#allocation7 + $0x7ac] ss:$28 sps:$4 sm:$0xff]  }
 0x396   :  { %9894 = vmatprep.subr.bf16.mxu1 %v25568_v31  ;;  %v25623_v29 = vld [vmem:[#allocation7 + $0x7a8] ss:$28 sps:$4 sm:$0xff]   ;;  %v25628_v31 = vld [vmem:[#allocation7 + $0x7b4] ss:$28 sps:$4 sm:$0xff]  }
 0x398   :  { %9649 = vmatpush1.bf16.msra.mxu0 %v25563_v42  ;;  %v25631_v42 = vld [vmem:[#allocation7 + $0x7e4] ss:$28 sps:$4 sm:$0xff]  }
 0x399   :  { %9895 = vmatpush1.bf16.msra.mxu1 %v25566_v43  ;;  %9650 = vmatprep.subr.bf16.mxu0 %v25571_v33  ;;  %v25629_v43 = vld [vmem:[#allocation7 + $0x7e0] ss:$28 sps:$4 sm:$0xff]   ;;  %v25634_v33 = vld [vmem:[#allocation7 + $0x7ec] ss:$28 sps:$4 sm:$0xff]  }
 0x39a   :  { %9896 = vmatprep.subr.bf16.mxu1 %v25574_v34  ;;  %v25632_v34 = vld [vmem:[#allocation7 + $0x7e8] ss:$28 sps:$4 sm:$0xff]  }
 0x39c   :  { %9651 = vmatpush1.bf16.msra.mxu0 %v25569_v60  ;;  %v25637_v60 = vld [vmem:[#allocation7 + $0x81c] ss:$28 sps:$4 sm:$0xff]  }
 0x39d   :  { %9897 = vmatpush1.bf16.msra.mxu1 %v25572_v35  ;;  %9652 = vmatprep.subr.bf16.mxu0 %v25577_v36  ;;  %v25635_v35 = vld [vmem:[#allocation7 + $0x818] ss:$28 sps:$4 sm:$0xff]   ;;  %v25640_v36 = vld [vmem:[#allocation7 + $0x824] ss:$28 sps:$4 sm:$0xff]  }
 0x39e   :  { %9898 = vmatprep.subr.bf16.mxu1 %v25580_v19  ;;  %v29045_v19 = vsub.s32 4, %v28973_v7 }
 0x3a0   :  { %9653 = vmatpush1.bf16.msra.mxu0 %v25575_v38  ;;  %v845_v38 = vsub.s32 7, %v28973_v7 }
 0x3a1   :  { %9899 = vmatpush1.bf16.msra.mxu1 %v25578_v40  ;;  %9654 = vmatprep.subr.bf16.mxu0 %v25583_v47  ;;  %v25643_v40 = vld [vmem:[#allocation7 + $0x854] ss:$28 sps:$4 sm:$0xff]  }
 0x3a2   :  { %9900 = vmatprep.subr.bf16.mxu1 %v25586_v50  ;;  %v25641_v47 = vld [vmem:[#allocation7 + $0x850] ss:$28 sps:$4 sm:$0xff]   ;;  %v834_v50 = vrot.slane %v29028_v11, %v29045_v19  ;;  %v846_v51 = vrot.slane %v29028_v11, %v845_v38 }
 0x3a4   :  { %9655 = vmatpush1.bf16.msra.mxu0 %v25581_v49  ;;  %v25646_v49 = vld [vmem:[#allocation7 + $0x85c] ss:$28 sps:$4 sm:$0xff]  }
 0x3a5   :  { %9901 = vmatpush1.bf16.msra.mxu1 %v25584_v53  ;;  %9656 = vmatprep.subr.bf16.mxu0 %v25589_v54  ;;  %v25649_v53 = vld [vmem:[#allocation7 + $0x88c] ss:$28 sps:$4 sm:$0xff]  }
 0x3a6   :  { %9902 = vmatprep.subr.bf16.mxu1 %v25592_v58  ;;  %v25647_v54 = vld [vmem:[#allocation7 + $0x888] ss:$28 sps:$4 sm:$0xff]   ;;  %v24091_v58 = vadd.f32 %v28993_v61, %v846_v51  ;;  %v25662_v61 = vld [vmem:[#allocation7 + $0x900] ss:$28 sps:$4 sm:$0xff]  }
 0x3a7   :  { %v25706_v51 = vld [vmem:[#allocation7 + $0xa8c] ss:$28 sps:$4 sm:$0xff]  }
 0x3a8   :  { %9657 = vmatpush1.bf16.msra.mxu0 %v25587_v41  ;;  %v24088_v41 = vadd.f32 %v28987_v56, %v834_v50  ;;  %v25664_v56 = vld [vmem:[#allocation7 + $0x904] ss:$28 sps:$4 sm:$0xff]  }
 0x3a9   :  { %9903 = vmatpush1.bf16.msra.mxu1 %v25590_v48  ;;  %9658 = vmatprep.subr.bf16.mxu0 %v25595_v59  ;;  %v25650_v48 = vld [vmem:[#allocation7 + $0x890] ss:$28 sps:$4 sm:$0xff]   ;;  %v25655_v59 = vld [vmem:[#allocation7 + $0x8c4] ss:$28 sps:$4 sm:$0xff]  }
 0x3aa   :  { %9904 = vmatprep.subr.bf16.mxu1 %v25598_v63  ;;  %v25658_v63 = vld [vmem:[#allocation7 + $0x8cc] ss:$28 sps:$4 sm:$0xff]   ;;  %v21770_v11 = vmul.f32 -1.442695, %v24088_v41  ;;  %v25701_v50 = vld [vmem:[#allocation7 + $0xa80] ss:$28 sps:$4 sm:$0xff]  }
 0x3ac   :  { %9659 = vmatpush1.bf16.msra.mxu0 %v25593_v62  ;;  %v25653_v62 = vld [vmem:[#allocation7 + $0x8c0] ss:$28 sps:$4 sm:$0xff]   ;;  %28361 = vpow2.f32 %v21770_v11  ;;  %v25713_v11 = vld [vmem:[#allocation7 + $0xaf0] ss:$28 sps:$4 sm:$0xff]  }
 0x3ad   :  { %9905 = vmatpush1.bf16.msra.mxu1 %v25596_v0  ;;  %9660 = vmatprep.subr.bf16.mxu0 %v25601_v44  ;;  %v21773_v0 = vmul.f32 -1.442695, %v24091_v58  ;;  %v25656_v44 = vld [vmem:[#allocation7 + $0x8c8] ss:$28 sps:$4 sm:$0xff]   ;;  %v25707_v58 = vld [vmem:[#allocation7 + $0xab8] ss:$28 sps:$4 sm:$0xff]  }
 0x3ae   :  { %9906 = vmatprep.subr.bf16.mxu1 %v25604_v3  ;;  %v25659_v3 = vld [vmem:[#allocation7 + $0x8f8] ss:$28 sps:$4 sm:$0xff]  }
 0x3af   :  { %28363 = vpow2.f32 %v21773_v0  ;;  %v25716_v0 = vld [vmem:[#allocation7 + $0xaf8] ss:$28 sps:$4 sm:$0xff]  }
 0x3b0   :  { %9661 = vmatpush1.bf16.msra.mxu0 %v25599_v2  ;;  %v25661_v2 = vld [vmem:[#allocation7 + $0x8fc] ss:$28 sps:$4 sm:$0xff]  }
 0x3b1   :  { %9907 = vmatpush1.bf16.msra.mxu1 %v25602_v4  ;;  %9671 = vmatprep.subr.bf16.mxu0 %v25607_v6  ;;  %v25667_v4 = vld [vmem:[#allocation7 + $0x934] ss:$28 sps:$4 sm:$0xff]  }
 0x3b2   :  { %9917 = vmatprep.subr.bf16.mxu1 %v25610_v16  ;;  %v25665_v6 = vld [vmem:[#allocation7 + $0x930] ss:$28 sps:$4 sm:$0xff]  }
 0x3b3   :  { %9663 = vmatmul.mubr.bf16.vlgmr.msra.gmra.mrb[12].mxu0 %v29036_v21  ;;  %v25673_v16 = vld [vmem:[#allocation7 + $0x96c] ss:$28 sps:$4 sm:$0xff]  }
 0x3b4   :  { %9909 = vmatmul.mubr.bf16.vlgmr.msra.gmra.mrb[12].mxu1 %v29036_v21  ;;  %9672 = vmatpush1.bf16.msra.mxu0 %v25605_v12  ;;  %v25668_v12 = vld [vmem:[#allocation7 + $0x938] ss:$28 sps:$4 sm:$0xff]  }
 0x3b5   :  { %9703 = vmatprep.mubr.bf16.mxu0 %v29039_v22  ;;  %9918 = vmatpush1.bf16.msra.mxu1 %v25608_v17  ;;  %v25671_v17 = vld [vmem:[#allocation7 + $0x968] ss:$28 sps:$4 sm:$0xff]  }
 0x3b6   :  { %9949 = vmatprep.mubr.bf16.mxu1 %v29039_v22  ;;  %9673 = vmatprep.subr.bf16.mxu0 %v25613_v20  ;;  %v28362_v20 = vpop.eup %28361 }
 0x3b7   :  { %9919 = vmatprep.subr.bf16.mxu1 %v25616_v30  ;;  %v25677_v30 = vld [vmem:[#allocation7 + $0x9a0] ss:$28 sps:$4 sm:$0xff]  }
 0x3b8   :  { %9674 = vmatpush1.bf16.msra.mxu0 %v25611_v23  ;;  %v25674_v23 = vld [vmem:[#allocation7 + $0x970] ss:$28 sps:$4 sm:$0xff]  }
 0x3b9   :  { %9920 = vmatpush1.bf16.msra.mxu1 %v25614_v24  ;;  %9675 = vmatprep.subr.bf16.mxu0 %v25619_v25  ;;  %v25679_v24 = vld [vmem:[#allocation7 + $0x9a4] ss:$28 sps:$4 sm:$0xff]   ;;  %v25682_v25 = vld [vmem:[#allocation7 + $0x9ac] ss:$28 sps:$4 sm:$0xff]  }
 0x3ba   :  { %9921 = vmatprep.subr.bf16.mxu1 %v25622_v13  ;;  %v28364_v13 = vpop.eup %28363 }
 0x3bc   :  { %9676 = vmatpush1.bf16.msra.mxu0 %v25617_v27  ;;  %v5284_v27 = vadd.f32 1.0, %v28362_v20  ;;  %v29066_v20 = vsub.s32 6, %v28973_v7  ;;  %v27626_v7 = vld [vmem:[#allocation13 + $0x8cc] ss:$28 sps:$4 sm:$0xff]  }
 0x3bd   :  { %9922 = vmatpush1.bf16.msra.mxu1 %v25620_v10  ;;  %9677 = vmatprep.subr.bf16.mxu0 %v25625_v28  ;;  %v25680_v10 = vld [vmem:[#allocation7 + $0x9a8] ss:$28 sps:$4 sm:$0xff]   ;;  %v25685_v28 = vld [vmem:[#allocation7 + $0x9dc] ss:$28 sps:$4 sm:$0xff]  }
 0x3be   :  { %9923 = vmatprep.subr.bf16.mxu1 %v25628_v31  ;;  %v25683_v31 = vld [vmem:[#allocation7 + $0x9d8] ss:$28 sps:$4 sm:$0xff]   ;;  %28365 = vrcp.f32 %v5284_v27 }
 0x3c0   :  { %9678 = vmatpush1.bf16.msra.mxu0 %v25623_v29  ;;  %v5287_v29 = vadd.f32 1.0, %v28364_v13  ;;  %v25742_v13 = vld [vmem:[#allocation7 + $0xbdc] ss:$28 sps:$4 sm:$0xff]  }
 0x3c1   :  { %9924 = vmatpush1.bf16.msra.mxu1 %v25626_v32  ;;  %9679 = vmatprep.subr.bf16.mxu0 %v25631_v42  ;;  %v25688_v32 = vld [vmem:[#allocation7 + $0x9e4] ss:$28 sps:$4 sm:$0xff]  }
 0x3c2   :  { %9925 = vmatprep.subr.bf16.mxu1 %v25634_v33  ;;  %v25686_v42 = vld [vmem:[#allocation7 + $0x9e0] ss:$28 sps:$4 sm:$0xff]   ;;  %28367 = vrcp.f32 %v5287_v29  ;;  %v25689_v33 = vld [vmem:[#allocation7 + $0xa10] ss:$28 sps:$4 sm:$0xff]   ;;  %v28496_v29 = vld [vmem:[#allocation5] sm:$0xff] }
 0x3c4   :  { %9680 = vmatpush1.bf16.msra.mxu0 %v25629_v43  ;;  %v25691_v43 = vld [vmem:[#allocation7 + $0xa14] ss:$28 sps:$4 sm:$0xff]  }
 0x3c5   :  { %9926 = vmatpush1.bf16.msra.mxu1 %v25632_v34  ;;  %9681 = vmatprep.subr.bf16.mxu0 %v25637_v60  ;;  %v25694_v34 = vld [vmem:[#allocation7 + $0xa1c] ss:$28 sps:$4 sm:$0xff]  }
 0x3c6   :  { %9927 = vmatprep.subr.bf16.mxu1 %v25640_v36  ;;  %v25692_v60 = vld [vmem:[#allocation7 + $0xa18] ss:$28 sps:$4 sm:$0xff]   ;;  %v25695_v36 = vld [vmem:[#allocation7 + $0xa48] ss:$28 sps:$4 sm:$0xff]  }
 0x3c8   :  { %9682 = vmatpush1.bf16.msra.mxu0 %v25635_v35  ;;  %v25697_v35 = vld [vmem:[#allocation7 + $0xa4c] ss:$28 sps:$4 sm:$0xff]  }
 0x3c9   :  { %9928 = vmatpush1.bf16.msra.mxu1 %v25638_v39  ;;  %9683 = vmatprep.subr.bf16.mxu0 %v25643_v40  ;;  %v25700_v39 = vld [vmem:[#allocation7 + $0xa54] ss:$28 sps:$4 sm:$0xff]  }
 0x3ca   :  { %9929 = vmatprep.subr.bf16.mxu1 %v25646_v49  ;;  %v25698_v40 = vld [vmem:[#allocation7 + $0xa50] ss:$28 sps:$4 sm:$0xff]   ;;  %v28366_v49 = vpop.eup %28365 }
 0x3cc   :  { %9684 = vmatpush1.bf16.msra.mxu0 %v25641_v47  ;;  %v25703_v47 = vld [vmem:[#allocation7 + $0xa84] ss:$28 sps:$4 sm:$0xff]  }
 0x3cd   :  { %9930 = vmatpush1.bf16.msra.mxu1 %v25644_v52  ;;  %9685 = vmatprep.subr.bf16.mxu0 %v25649_v53  ;;  %v25704_v52 = vld [vmem:[#allocation7 + $0xa88] ss:$28 sps:$4 sm:$0xff]   ;;  %v28368_v53 = vpop.eup %28367 }
 0x3ce   :  { %9931 = vmatprep.subr.bf16.mxu1 %v25652_v55  ;;  %v29055_v55 = vpack.c.bf16 %v28366_v49, %v28366_v49  ;;  %v29058_v41 = vpack.c.bf16 %v28368_v53, %v28368_v53  ;;  %v25748_v49 = vld [vmem:[#allocation7 + $0xc14] ss:$28 sps:$4 sm:$0xff]  }
 0x3cf   :  { %v25746_v53 = vld [vmem:[#allocation7 + $0xc10] ss:$28 sps:$4 sm:$0xff]  }
 0x3d0   :  { %9686 = vmatpush1.bf16.msra.mxu0 %v25647_v54  ;;  %v25709_v54 = vld [vmem:[#allocation7 + $0xabc] ss:$28 sps:$4 sm:$0xff]  }
 0x3d1   :  { %9932 = vmatpush1.bf16.msra.mxu1 %v25650_v48  ;;  %9687 = vmatprep.subr.bf16.mxu0 %v25655_v59  ;;  %v25710_v48 = vld [vmem:[#allocation7 + $0xac0] ss:$28 sps:$4 sm:$0xff]  }
 0x3d2   :  { %9933 = vmatprep.subr.bf16.mxu1 %v25658_v63  ;;  %v25712_v59 = vld [vmem:[#allocation7 + $0xac4] ss:$28 sps:$4 sm:$0xff]   ;;  %v25718_v63 = vld [vmem:[#allocation7 + $0xafc] ss:$28 sps:$4 sm:$0xff]  }
 0x3d4   :  { %9688 = vmatpush1.bf16.msra.mxu0 %v25653_v62  ;;  %v25715_v62 = vld [vmem:[#allocation7 + $0xaf4] ss:$28 sps:$4 sm:$0xff]  }
 0x3d5   :  { %9934 = vmatpush1.bf16.msra.mxu1 %v25656_v44  ;;  %9689 = vmatprep.subr.bf16.mxu0 %v25661_v2  ;;  %v25721_v44 = vld [vmem:[#allocation7 + $0xb2c] ss:$28 sps:$4 sm:$0xff]  }
 0x3d6   :  { %9935 = vmatprep.subr.bf16.mxu1 %v25664_v56  ;;  %v25719_v2 = vld [vmem:[#allocation7 + $0xb28] ss:$28 sps:$4 sm:$0xff]   ;;  %v25722_v56 = vld [vmem:[#allocation7 + $0xb30] ss:$28 sps:$4 sm:$0xff]  }
 0x3d8   :  { %9690 = vmatpush1.bf16.msra.mxu0 %v25659_v3  ;;  %v25724_v3 = vld [vmem:[#allocation7 + $0xb34] ss:$28 sps:$4 sm:$0xff]  }
 0x3d9   :  { %9936 = vmatpush1.bf16.msra.mxu1 %v25662_v61  ;;  %9691 = vmatprep.subr.bf16.mxu0 %v25667_v4  ;;  %v25727_v61 = vld [vmem:[#allocation7 + $0xb64] ss:$28 sps:$4 sm:$0xff]   ;;  %v25730_v4 = vld [vmem:[#allocation7 + $0xb6c] ss:$28 sps:$4 sm:$0xff]  }
 0x3da   :  { %9937 = vmatprep.subr.bf16.mxu1 %v25670_v9  ;;  %v29063_v9 = vld [vmem:[#allocation5 + $0x8] sm:$0xf] }
 0x3dc   :  { %9692 = vmatpush1.bf16.msra.mxu0 %v25665_v6  ;;  %v25725_v6 = vld [vmem:[#allocation7 + $0xb60] ss:$28 sps:$4 sm:$0xff]  }
 0x3dd   :  { %9938 = vmatpush1.bf16.msra.mxu1 %v25668_v12  ;;  %9693 = vmatprep.subr.bf16.mxu0 %v25673_v16  ;;  %v25728_v12 = vld [vmem:[#allocation7 + $0xb68] ss:$28 sps:$4 sm:$0xff]   ;;  %v25733_v16 = vld [vmem:[#allocation7 + $0xb9c] ss:$28 sps:$4 sm:$0xff]  }
 0x3de   :  { %9939 = vmatprep.subr.bf16.mxu1 %v25676_v18  ;;  %v25731_v18 = vld [vmem:[#allocation7 + $0xb98] ss:$28 sps:$4 sm:$0xff]  }
 0x3e0   :  { %9694 = vmatpush1.bf16.msra.mxu0 %v25671_v17  ;;  %v25736_v17 = vld [vmem:[#allocation7 + $0xba4] ss:$28 sps:$4 sm:$0xff]  }
 0x3e1   :  { %9940 = vmatpush1.bf16.msra.mxu1 %v25674_v23  ;;  %9695 = vmatprep.subr.bf16.mxu0 %v25679_v24  ;;  %v858_v23 = vrot.slane %v29063_v9, %v29023_v1  ;;  %v862_v24 = vrot.slane %v29063_v9, %v29008_v37 }
 0x3e2   :  { %9941 = vmatprep.subr.bf16.mxu1 %v25682_v25  ;;  %v25739_v25 = vld [vmem:[#allocation7 + $0xbd4] ss:$28 sps:$4 sm:$0xff]  }
 0x3e4   :  { %9696 = vmatpush1.bf16.msra.mxu0 %v25677_v30  ;;  %v25734_v30 = vld [vmem:[#allocation7 + $0xba0] ss:$28 sps:$4 sm:$0xff]  }
 0x3e5   :  { %9942 = vmatpush1.bf16.msra.mxu1 %v25680_v10  ;;  %9697 = vmatprep.subr.bf16.mxu0 %v25685_v28  ;;  %v25737_v28 = vld [vmem:[#allocation7 + $0xbd0] ss:$28 sps:$4 sm:$0xff]  }
 0x3e6   :  { %9943 = vmatprep.subr.bf16.mxu1 %v25688_v32 }
 0x3e8   :  { %9698 = vmatpush1.bf16.msra.mxu0 %v25683_v31  ;;  %v842_v31 = vrot.slane %v28496_v29, %v29066_v20  ;;  %v25779_v29 = vld [vmem:[#allocation7 + $0xd58] ss:$28 sps:$4 sm:$0xff]  }
 0x3e9   :  { %9944 = vmatpush1.bf16.msra.mxu1 %v25686_v42  ;;  %9699 = vmatprep.subr.bf16.mxu0 %v25691_v43 }
 0x3ea   :  { %9945 = vmatprep.subr.bf16.mxu1 %v25694_v34 }
 0x3ec   :  { %9700 = vmatpush1.bf16.msra.mxu0 %v25689_v33 }
 0x3ed   :  { %9946 = vmatpush1.bf16.msra.mxu1 %v25692_v60  ;;  %9701 = vmatprep.subr.bf16.mxu0 %v25697_v35  ;;  %v854_v35 = vrot.slane %v29063_v9, %v28976_v14 }
 0x3ee   :  { %9947 = vmatprep.subr.bf16.mxu1 %v25700_v39 }
 0x3f0   :  { %9702 = vmatpush1.bf16.msra.mxu0 %v25695_v36 }
 0x3f1   :  { %9948 = vmatpush1.bf16.msra.mxu1 %v25698_v40  ;;  %9712 = vmatprep.subr.bf16.mxu0 %v25703_v47  ;;  %v25740_v40 = vld [vmem:[#allocation7 + $0xbd8] ss:$28 sps:$4 sm:$0xff]   ;;  %v25745_v47 = vld [vmem:[#allocation7 + $0xc0c] ss:$28 sps:$4 sm:$0xff]  }
 0x3f2   :  { %9958 = vmatprep.subr.bf16.mxu1 %v25706_v51  ;;  %v25743_v51 = vld [vmem:[#allocation7 + $0xc08] ss:$28 sps:$4 sm:$0xff]  }
 0x3f3   :  { %9704 = vmatmul.mubr.bf16.vlgmr.msra.gmra.mrb[12].mxu0 %v29055_v55 }
 0x3f4   :  { %9950 = vmatmul.mubr.bf16.vlgmr.msra.gmra.mrb[12].mxu1 %v29055_v55  ;;  %9713 = vmatpush1.bf16.msra.mxu0 %v25701_v50  ;;  %v24090_v50 = vadd.f32 %v28989_v57, %v842_v31  ;;  %v25755_v57 = vld [vmem:[#allocation7 + $0xc78] ss:$28 sps:$4 sm:$0xff]   ;;  %v25784_v31 = vld [vmem:[#allocation7 + $0xd64] ss:$28 sps:$4 sm:$0xff]  }
 0x3f5   :  { %9744 = vmatprep.mubr.bf16.mxu0 %v29058_v41  ;;  %9959 = vmatpush1.bf16.msra.mxu1 %v25704_v52 }
 0x3f6   :  { %9990 = vmatprep.mubr.bf16.mxu1 %v29058_v41  ;;  %9714 = vmatprep.subr.bf16.mxu0 %v25709_v54  ;;  %v25751_v54 = vld [vmem:[#allocation7 + $0xc44] ss:$28 sps:$4 sm:$0xff]  }
 0x3f7   :  { %9960 = vmatprep.subr.bf16.mxu1 %v25712_v59  ;;  %v21772_v59 = vmul.f32 -1.442695, %v24090_v50 }
 0x3f8   :  { %9715 = vmatpush1.bf16.msra.mxu0 %v25707_v58  ;;  %v25754_v58 = vld [vmem:[#allocation7 + $0xc4c] ss:$28 sps:$4 sm:$0xff]  }
 0x3f9   :  { %9961 = vmatpush1.bf16.msra.mxu1 %v25710_v48  ;;  %9716 = vmatprep.subr.bf16.mxu0 %v25715_v62  ;;  %v25749_v48 = vld [vmem:[#allocation7 + $0xc40] ss:$28 sps:$4 sm:$0xff]   ;;  %v25752_v62 = vld [vmem:[#allocation7 + $0xc48] ss:$28 sps:$4 sm:$0xff]   ;;  %28369 = vpow2.f32 %v21772_v59 }
 0x3fa   :  { %9962 = vmatprep.subr.bf16.mxu1 %v25718_v63 }
 0x3fc   :  { %9717 = vmatpush1.bf16.msra.mxu0 %v25713_v11  ;;  %v25757_v11 = vld [vmem:[#allocation7 + $0xc7c] ss:$28 sps:$4 sm:$0xff]  }
 0x3fd   :  { %9963 = vmatpush1.bf16.msra.mxu1 %v25716_v0  ;;  %9718 = vmatprep.subr.bf16.mxu0 %v25721_v44  ;;  %v25760_v0 = vld [vmem:[#allocation7 + $0xc84] ss:$28 sps:$4 sm:$0xff]  }
 0x3fe   :  { %9964 = vmatprep.subr.bf16.mxu1 %v25724_v3  ;;  %v25758_v44 = vld [vmem:[#allocation7 + $0xc80] ss:$28 sps:$4 sm:$0xff]   ;;  %v25761_v3 = vld [vmem:[#allocation7 + $0xcb0] ss:$28 sps:$4 sm:$0xff]  }
 0x400   :  { %9719 = vmatpush1.bf16.msra.mxu0 %v25719_v2  ;;  %v25763_v2 = vld [vmem:[#allocation7 + $0xcb4] ss:$28 sps:$4 sm:$0xff]  }
 0x401   :  { %9965 = vmatpush1.bf16.msra.mxu1 %v25722_v56  ;;  %9720 = vmatprep.subr.bf16.mxu0 %v25727_v61  ;;  %v25766_v56 = vld [vmem:[#allocation7 + $0xcbc] ss:$28 sps:$4 sm:$0xff]  }
 0x402   :  { %9966 = vmatprep.subr.bf16.mxu1 %v25730_v4  ;;  %v25764_v61 = vld [vmem:[#allocation7 + $0xcb8] ss:$28 sps:$4 sm:$0xff]   ;;  %v25769_v4 = vld [vmem:[#allocation7 + $0xcec] ss:$28 sps:$4 sm:$0xff]  }
 0x404   :  { %9721 = vmatpush1.bf16.msra.mxu0 %v25725_v6  ;;  %v25767_v6 = vld [vmem:[#allocation7 + $0xce8] ss:$28 sps:$4 sm:$0xff]  }
 0x405   :  { %9967 = vmatpush1.bf16.msra.mxu1 %v25728_v12  ;;  %9722 = vmatprep.subr.bf16.mxu0 %v25733_v16  ;;  %v25772_v12 = vld [vmem:[#allocation7 + $0xcf4] ss:$28 sps:$4 sm:$0xff]   ;;  %v28370_v16 = vpop.eup %28369 }
 0x406   :  { %v29072_v27 = vpop.f32.mrb[8].mxu0  ;;  %v5237_v10 = vpop.f32.mrb[8].mxu1  ;;  %9968 = vmatprep.subr.bf16.mxu1 %v25736_v17  ;;  %v25770_v17 = vld [vmem:[#allocation7 + $0xcf0] ss:$28 sps:$4 sm:$0xff]  }
 0x407   :  { %v29075_v32 = vadd.f32 %v5237_v10, %v858_v23  ;;  %v5075_v42 = vpop.f32.mrb[9].mxu0  ;;  %v5239_v43 = vpop.f32.mrb[9].mxu1  ;;  %v25773_v23 = vld [vmem:[#allocation7 + $0xd20] ss:$28 sps:$4 sm:$0xff]  }
 0x408   :  { %v29077_v33 = vadd.f32 %v5239_v43, %v862_v24  ;;  %v5077_v34 = vpop.f32.mrb[10].mxu0  ;;  %v5241_v60 = vpop.f32.mrb[10].mxu1  ;;  %9723 = vmatpush1.bf16.msra.mxu0 %v25731_v18  ;;  %v24093_v52 = vadd.f32 %v5075_v42, %v854_v35  ;;  %v25775_v18 = vld [vmem:[#allocation7 + $0xd24] ss:$28 sps:$4 sm:$0xff]   ;;  %v25778_v24 = vld [vmem:[#allocation7 + $0xd2c] ss:$28 sps:$4 sm:$0xff]  }
 0x409   :  { %9969 = vmatpush1.bf16.msra.mxu1 %v25734_v30  ;;  %v5078_v36 = vpop.f32.mrb[11].mxu0  ;;  %v5242_v39 = vpop.f32.mrb[11].mxu1  ;;  %9724 = vmatprep.subr.bf16.mxu0 %v25739_v25  ;;  %v5286_v25 = vadd.f32 1.0, %v28370_v16  ;;  %v25781_v10 = vld [vmem:[#allocation7 + $0xd5c] ss:$28 sps:$4 sm:$0xff]  }
 0x40a   :  { %9970 = vmatprep.subr.bf16.mxu1 %v25742_v13  ;;  %v21775_v63 = vmul.f32 -1.442695, %v24093_v52  ;;  %v25776_v13 = vld [vmem:[#allocation7 + $0xd28] ss:$28 sps:$4 sm:$0xff]   ;;  %v25782_v42 = vld [vmem:[#allocation7 + $0xd60] ss:$28 sps:$4 sm:$0xff]  }
 0x40b   :  { %v25787_v43 = vld [vmem:[#allocation7 + $0xd94] ss:$28 sps:$4 sm:$0xff]   ;;  %v25790_v60 = vld [vmem:[#allocation7 + $0xd9c] ss:$28 sps:$4 sm:$0xff]   ;;  %v25793_v36 = vld [vmem:[#allocation7 + $0xdcc] ss:$28 sps:$4 sm:$0xff]  }
 0x40c   :  { %9725 = vmatpush1.bf16.msra.mxu0 %v25737_v28  ;;  %28371 = vpow2.f32 %v21775_v63  ;;  %v25785_v34 = vld [vmem:[#allocation7 + $0xd90] ss:$28 sps:$4 sm:$0xff]   ;;  %v25788_v35 = vld [vmem:[#allocation7 + $0xd98] ss:$28 sps:$4 sm:$0xff]   ;;  %v25791_v39 = vld [vmem:[#allocation7 + $0xdc8] ss:$28 sps:$4 sm:$0xff]  }
 0x40d   :  { %9971 = vmatpush1.bf16.msra.mxu1 %v25740_v40  ;;  %9726 = vmatprep.subr.bf16.mxu0 %v25745_v47  ;;  %28373 = vrcp.f32 %v5286_v25  ;;  %v25796_v40 = vld [vmem:[#allocation7 + $0xdd4] ss:$28 sps:$4 sm:$0xff]   ;;  %v25802_v52 = vld [vmem:[#allocation7 + $0xe0c] ss:$28 sps:$4 sm:$0xff]   ;;  %v25808_v63 = vld [vmem:[#allocation7 + $0xe44] ss:$28 sps:$4 sm:$0xff]  }
 0x40e   :  { %9972 = vmatprep.subr.bf16.mxu1 %v25748_v49  ;;  %v25794_v47 = vld [vmem:[#allocation7 + $0xdd0] ss:$28 sps:$4 sm:$0xff]   ;;  %v25799_v49 = vld [vmem:[#allocation7 + $0xe04] ss:$28 sps:$4 sm:$0xff]  }
 0x40f   :  { %v25821_v16 = vld [vmem:[#allocation7 + $0xee0] ss:$28 sps:$4 sm:$0xff]   ;;  %v25835_v25 = vld [vmem:[#allocation7 + $0xf54] ss:$28 sps:$4 sm:$0xff]  }
 0x410   :  { %9727 = vmatpush1.bf16.msra.mxu0 %v25743_v51  ;;  %v25797_v51 = vld [vmem:[#allocation7 + $0xe00] ss:$28 sps:$4 sm:$0xff]  }
 0x411   :  { %9973 = vmatpush1.bf16.msra.mxu1 %v25746_v53  ;;  %9728 = vmatprep.subr.bf16.mxu0 %v25751_v54  ;;  %v25800_v53 = vld [vmem:[#allocation7 + $0xe08] ss:$28 sps:$4 sm:$0xff]  }
 0x412   :  { %9974 = vmatprep.subr.bf16.mxu1 %v25754_v58  ;;  %v25805_v58 = vld [vmem:[#allocation7 + $0xe3c] ss:$28 sps:$4 sm:$0xff]  }
 0x414   :  { %9729 = vmatpush1.bf16.msra.mxu0 %v25749_v48 }
 0x415   :  { %9975 = vmatpush1.bf16.msra.mxu1 %v25752_v62  ;;  %9730 = vmatprep.subr.bf16.mxu0 %v25757_v11  ;;  %v25803_v62 = vld [vmem:[#allocation7 + $0xe38] ss:$28 sps:$4 sm:$0xff]   ;;  %v25806_v11 = vld [vmem:[#allocation7 + $0xe40] ss:$28 sps:$4 sm:$0xff]  }
 0x416   :  { %9976 = vmatprep.subr.bf16.mxu1 %v25760_v0  ;;  %v28372_v30 = vpop.eup %28371  ;;  %v25811_v0 = vld [vmem:[#allocation7 + $0xe74] ss:$28 sps:$4 sm:$0xff]  }
 0x417   :  { %v5289_v28 = vadd.f32 1.0, %v28372_v30  ;;  %v28374_v50 = vpop.eup %28373  ;;  %v25830_v30 = vld [vmem:[#allocation7 + $0xf20] ss:$28 sps:$4 sm:$0xff]  }
 0x418   :  { %9731 = vmatpush1.bf16.msra.mxu0 %v25755_v57  ;;  %v29082_v48 = vpack.c.bf16 %v28374_v50, %v28374_v50  ;;  %v25814_v57 = vld [vmem:[#allocation7 + $0xe7c] ss:$28 sps:$4 sm:$0xff]   ;;  %v25856_v50 = vld [vmem:[#allocation7 + $0x1004] ss:$28 sps:$4 sm:$0xff]  }
 0x419   :  { %9977 = vmatpush1.bf16.msra.mxu1 %v25758_v44  ;;  %9732 = vmatprep.subr.bf16.mxu0 %v25763_v2  ;;  %28375 = vrcp.f32 %v5289_v28  ;;  %v25809_v44 = vld [vmem:[#allocation7 + $0xe70] ss:$28 sps:$4 sm:$0xff]   ;;  %v25812_v2 = vld [vmem:[#allocation7 + $0xe78] ss:$28 sps:$4 sm:$0xff]  }
 0x41a   :  { %9978 = vmatprep.subr.bf16.mxu1 %v25766_v56  ;;  %v25820_v56 = vld [vmem:[#allocation7 + $0xeb4] ss:$28 sps:$4 sm:$0xff]  }
 0x41b   :  { %v25833_v28 = vld [vmem:[#allocation7 + $0xf50] ss:$28 sps:$4 sm:$0xff]  }
 0x41c   :  { %9733 = vmatpush1.bf16.msra.mxu0 %v25761_v3  ;;  %v25817_v3 = vld [vmem:[#allocation7 + $0xeac] ss:$28 sps:$4 sm:$0xff]  }
 0x41d   :  { %9979 = vmatpush1.bf16.msra.mxu1 %v25764_v61  ;;  %9734 = vmatprep.subr.bf16.mxu0 %v25769_v4  ;;  %v25815_v61 = vld [vmem:[#allocation7 + $0xea8] ss:$28 sps:$4 sm:$0xff]   ;;  %v25818_v4 = vld [vmem:[#allocation7 + $0xeb0] ss:$28 sps:$4 sm:$0xff]  }
 0x41e   :  { %9980 = vmatprep.subr.bf16.mxu1 %v25772_v12  ;;  %v25826_v12 = vld [vmem:[#allocation7 + $0xeec] ss:$28 sps:$4 sm:$0xff]  }
 0x420   :  { %9735 = vmatpush1.bf16.msra.mxu0 %v25767_v6  ;;  %v25823_v6 = vld [vmem:[#allocation7 + $0xee4] ss:$28 sps:$4 sm:$0xff]  }
 0x421   :  { %9981 = vmatpush1.bf16.msra.mxu1 %v25770_v17  ;;  %9736 = vmatprep.subr.bf16.mxu0 %v25775_v18  ;;  %v25824_v17 = vld [vmem:[#allocation7 + $0xee8] ss:$28 sps:$4 sm:$0xff]   ;;  %v25829_v18 = vld [vmem:[#allocation7 + $0xf1c] ss:$28 sps:$4 sm:$0xff]  }
 0x422   :  { %9982 = vmatprep.subr.bf16.mxu1 %v25778_v24  ;;  %v25827_v24 = vld [vmem:[#allocation7 + $0xf18] ss:$28 sps:$4 sm:$0xff]  }
 0x423   :  { %v28376_v54 = vpop.eup %28375 }
 0x424   :  { %9737 = vmatpush1.bf16.msra.mxu0 %v25773_v23  ;;  %v29085_v59 = vpack.c.bf16 %v28376_v54, %v28376_v54  ;;  %v25832_v23 = vld [vmem:[#allocation7 + $0xf24] ss:$28 sps:$4 sm:$0xff]   ;;  %v25857_v54 = vld [vmem:[#allocation7 + $0x1030] ss:$28 sps:$4 sm:$0xff]  }
 0x425   :  { %9983 = vmatpush1.bf16.msra.mxu1 %v25776_v13  ;;  %9738 = vmatprep.subr.bf16.mxu0 %v25781_v10  ;;  %v25838_v13 = vld [vmem:[#allocation7 + $0xf5c] ss:$28 sps:$4 sm:$0xff]   ;;  %v850_v10 = vrot.slane %v29063_v9, %v29003_v15 }
 0x426   :  { %9984 = vmatprep.subr.bf16.mxu1 %v25784_v31  ;;  %v25841_v31 = vld [vmem:[#allocation7 + $0xf8c] ss:$28 sps:$4 sm:$0xff]  }
 0x428   :  { %9739 = vmatpush1.bf16.msra.mxu0 %v25779_v29  ;;  %v25836_v29 = vld [vmem:[#allocation7 + $0xf58] ss:$28 sps:$4 sm:$0xff]  }
 0x429   :  { %9985 = vmatpush1.bf16.msra.mxu1 %v25782_v42  ;;  %9740 = vmatprep.subr.bf16.mxu0 %v25787_v43  ;;  %v25844_v42 = vld [vmem:[#allocation7 + $0xf94] ss:$28 sps:$4 sm:$0xff]   ;;  %v24092_v43 = vadd.f32 %v29072_v27, %v850_v10  ;;  %v25887_v10 = vld [vmem:[#allocation7 + $0x1148] ss:$28 sps:$4 sm:$0xff]  }
 0x42a   :  { %9986 = vmatprep.subr.bf16.mxu1 %v25790_v60  ;;  %v25842_v60 = vld [vmem:[#allocation7 + $0xf90] ss:$28 sps:$4 sm:$0xff]   ;;  %v25851_v27 = vld [vmem:[#allocation7 + $0xff8] ss:$28 sps:$4 sm:$0xff]  }
 0x42b   :  { %v21774_v9 = vmul.f32 -1.442695, %v24092_v43  ;;  %v25893_v43 = vld [vmem:[#allocation7 + $0x1180] ss:$28 sps:$4 sm:$0xff]  }
 0x42c   :  { %9741 = vmatpush1.bf16.msra.mxu0 %v25785_v34  ;;  %v25839_v34 = vld [vmem:[#allocation7 + $0xf88] ss:$28 sps:$4 sm:$0xff]  }
 0x42d   :  { %9987 = vmatpush1.bf16.msra.mxu1 %v25788_v35  ;;  %9742 = vmatprep.subr.bf16.mxu0 %v25793_v36  ;;  %v25847_v35 = vld [vmem:[#allocation7 + $0xfc4] ss:$28 sps:$4 sm:$0xff]   ;;  %v25850_v36 = vld [vmem:[#allocation7 + $0xfcc] ss:$28 sps:$4 sm:$0xff]   ;;  %28377 = vpow2.f32 %v21774_v9  ;;  %v25899_v9 = vld [vmem:[#allocation7 + $0x11b8] ss:$28 sps:$4 sm:$0xff]  }
 0x42e   :  { %9988 = vmatprep.subr.bf16.mxu1 %v25796_v40  ;;  %v25848_v40 = vld [vmem:[#allocation7 + $0xfc8] ss:$28 sps:$4 sm:$0xff]  }
 0x430   :  { %9743 = vmatpush1.bf16.msra.mxu0 %v25791_v39  ;;  %v25845_v39 = vld [vmem:[#allocation7 + $0xfc0] ss:$28 sps:$4 sm:$0xff]  }
 0x431   :  { %9989 = vmatpush1.bf16.msra.mxu1 %v25794_v47  ;;  %9753 = vmatprep.subr.bf16.mxu0 %v25799_v49  ;;  %v25853_v47 = vld [vmem:[#allocation7 + $0xffc] ss:$28 sps:$4 sm:$0xff]   ;;  %v21777_v49 = vmul.f32 -1.442695, %v29077_v33  ;;  %v25865_v33 = vld [vmem:[#allocation7 + $0x106c] ss:$28 sps:$4 sm:$0xff]  }
 0x432   :  { %9999 = vmatprep.subr.bf16.mxu1 %v25802_v52  ;;  %v25859_v52 = vld [vmem:[#allocation7 + $0x1034] ss:$28 sps:$4 sm:$0xff]  }
 0x433   :  { %9745 = vmatmul.mubr.bf16.vlgmr.msra.gmra.mrb[12].mxu0 %v29082_v48  ;;  %28379 = vpow2.f32 %v21777_v49  ;;  %v25907_v49 = vld [vmem:[#allocation7 + $0x11f4] ss:$28 sps:$4 sm:$0xff]  }
 0x434   :  { %9991 = vmatmul.mubr.bf16.vlgmr.msra.gmra.mrb[12].mxu1 %v29082_v48  ;;  %9754 = vmatpush1.bf16.msra.mxu0 %v25797_v51  ;;  %v25854_v51 = vld [vmem:[#allocation7 + $0x1000] ss:$28 sps:$4 sm:$0xff]  }
 0x435   :  { %9785 = vmatprep.mubr.bf16.mxu0 %v29085_v59  ;;  %10000 = vmatpush1.bf16.msra.mxu1 %v25800_v53  ;;  %v25862_v53 = vld [vmem:[#allocation7 + $0x103c] ss:$28 sps:$4 sm:$0xff]  }
 0x436   :  { %10031 = vmatprep.mubr.bf16.mxu1 %v29085_v59  ;;  %9755 = vmatprep.subr.bf16.mxu0 %v25805_v58  ;;  %v25860_v58 = vld [vmem:[#allocation7 + $0x1038] ss:$28 sps:$4 sm:$0xff]  }
 0x437   :  { %10001 = vmatprep.subr.bf16.mxu1 %v25808_v63  ;;  %v25863_v63 = vld [vmem:[#allocation7 + $0x1068] ss:$28 sps:$4 sm:$0xff]  }
 0x438   :  { %9756 = vmatpush1.bf16.msra.mxu0 %v25803_v62  ;;  %v25868_v62 = vld [vmem:[#allocation7 + $0x1074] ss:$28 sps:$4 sm:$0xff]  }
 0x439   :  { %10002 = vmatpush1.bf16.msra.mxu1 %v25806_v11  ;;  %9757 = vmatprep.subr.bf16.mxu0 %v25811_v0  ;;  %v28378_v11 = vpop.eup %28377  ;;  %v25866_v0 = vld [vmem:[#allocation7 + $0x1070] ss:$28 sps:$4 sm:$0xff]  }
 0x43a   :  { %10003 = vmatprep.subr.bf16.mxu1 %v25814_v57  ;;  %v25871_v57 = vld [vmem:[#allocation7 + $0x10a4] ss:$28 sps:$4 sm:$0xff]  }
 0x43c   :  { %9758 = vmatpush1.bf16.msra.mxu0 %v25809_v44  ;;  %v25874_v44 = vld [vmem:[#allocation7 + $0x10ac] ss:$28 sps:$4 sm:$0xff]  }
 0x43d   :  { %10004 = vmatpush1.bf16.msra.mxu1 %v25812_v2  ;;  %9759 = vmatprep.subr.bf16.mxu0 %v25817_v3  ;;  %v28380_v2 = vpop.eup %28379  ;;  %v5288_v3 = vadd.f32 1.0, %v28378_v11  ;;  %v25920_v11 = vld [vmem:[#allocation7 + $0x1268] ss:$28 sps:$4 sm:$0xff]  }
 0x43e   :  { %10005 = vmatprep.subr.bf16.mxu1 %v25820_v56  ;;  %v25869_v56 = vld [vmem:[#allocation7 + $0x10a0] ss:$28 sps:$4 sm:$0xff]  }
 0x43f   :  { %28381 = vrcp.f32 %v5288_v3  ;;  %v25931_v3 = vld [vmem:[#allocation7 + $0x12d4] ss:$28 sps:$4 sm:$0xff]  }
 0x440   :  { %9760 = vmatpush1.bf16.msra.mxu0 %v25815_v61  ;;  %v25872_v61 = vld [vmem:[#allocation7 + $0x10a8] ss:$28 sps:$4 sm:$0xff]  }
 0x441   :  { %10006 = vmatpush1.bf16.msra.mxu1 %v25818_v4  ;;  %9761 = vmatprep.subr.bf16.mxu0 %v25823_v6  ;;  %v25877_v4 = vld [vmem:[#allocation7 + $0x10dc] ss:$28 sps:$4 sm:$0xff]   ;;  %v25880_v6 = vld [vmem:[#allocation7 + $0x10e4] ss:$28 sps:$4 sm:$0xff]  }
 0x442   :  { %10007 = vmatprep.subr.bf16.mxu1 %v25826_v12  ;;  %v5291_v12 = vadd.f32 1.0, %v28380_v2  ;;  %v25926_v2 = vld [vmem:[#allocation7 + $0x12a0] ss:$28 sps:$4 sm:$0xff]  }
 0x444   :  { %9762 = vmatpush1.bf16.msra.mxu0 %v25821_v16  ;;  %v25875_v16 = vld [vmem:[#allocation7 + $0x10d8] ss:$28 sps:$4 sm:$0xff]   ;;  %28383 = vrcp.f32 %v5291_v12 }
 0x445   :  { %10008 = vmatpush1.bf16.msra.mxu1 %v25824_v17  ;;  %9763 = vmatprep.subr.bf16.mxu0 %v25829_v18  ;;  %v25878_v17 = vld [vmem:[#allocation7 + $0x10e0] ss:$28 sps:$4 sm:$0xff]   ;;  %v25883_v18 = vld [vmem:[#allocation7 + $0x1114] ss:$28 sps:$4 sm:$0xff]  }
 0x446   :  { %10009 = vmatprep.subr.bf16.mxu1 %v25832_v23  ;;  %v25886_v23 = vld [vmem:[#allocation7 + $0x111c] ss:$28 sps:$4 sm:$0xff]   ;;  %v25940_v12 = vld [vmem:[#allocation7 + $0x1314] ss:$28 sps:$4 sm:$0xff]  }
 0x448   :  { %9764 = vmatpush1.bf16.msra.mxu0 %v25827_v24  ;;  %v25881_v24 = vld [vmem:[#allocation7 + $0x1110] ss:$28 sps:$4 sm:$0xff]  }
 0x449   :  { %10010 = vmatpush1.bf16.msra.mxu1 %v25830_v30  ;;  %9765 = vmatprep.subr.bf16.mxu0 %v25835_v25  ;;  %v25884_v30 = vld [vmem:[#allocation7 + $0x1118] ss:$28 sps:$4 sm:$0xff]   ;;  %v25889_v25 = vld [vmem:[#allocation7 + $0x114c] ss:$28 sps:$4 sm:$0xff]  }
 0x44a   :  { %10011 = vmatprep.subr.bf16.mxu1 %v25838_v13  ;;  %v25892_v13 = vld [vmem:[#allocation7 + $0x1154] ss:$28 sps:$4 sm:$0xff]  }
 0x44c   :  { %9766 = vmatpush1.bf16.msra.mxu0 %v25833_v28  ;;  %v25890_v28 = vld [vmem:[#allocation7 + $0x1150] ss:$28 sps:$4 sm:$0xff]  }
 0x44d   :  { %10012 = vmatpush1.bf16.msra.mxu1 %v25836_v29  ;;  %9767 = vmatprep.subr.bf16.mxu0 %v25841_v31  ;;  %v25895_v29 = vld [vmem:[#allocation7 + $0x1184] ss:$28 sps:$4 sm:$0xff]   ;;  %v25898_v31 = vld [vmem:[#allocation7 + $0x118c] ss:$28 sps:$4 sm:$0xff]  }
 0x44e   :  { %10013 = vmatprep.subr.bf16.mxu1 %v25844_v42  ;;  %v28382_v42 = vpop.eup %28381 }
 0x450   :  { %9768 = vmatpush1.bf16.msra.mxu0 %v25839_v34  ;;  %v25896_v34 = vld [vmem:[#allocation7 + $0x1188] ss:$28 sps:$4 sm:$0xff]  }
 0x451   :  { %10014 = vmatpush1.bf16.msra.mxu1 %v25842_v60  ;;  %9769 = vmatprep.subr.bf16.mxu0 %v25847_v35  ;;  %v28384_v60 = vpop.eup %28383  ;;  %v25901_v35 = vld [vmem:[#allocation7 + $0x11bc] ss:$28 sps:$4 sm:$0xff]  }
 0x452   :  { %10015 = vmatprep.subr.bf16.mxu1 %v25850_v36  ;;  %v29094_v36 = vpack.c.bf16 %v28382_v42, %v28382_v42  ;;  %v25958_v42 = vld [vmem:[#allocation7 + $0x13bc] ss:$28 sps:$4 sm:$0xff]  }
 0x454   :  { %9770 = vmatpush1.bf16.msra.mxu0 %v25845_v39  ;;  %v29097_v39 = vpack.c.bf16 %v28384_v60, %v28384_v60  ;;  %v25964_v60 = vld [vmem:[#allocation7 + $0x13f4] ss:$28 sps:$4 sm:$0xff]  }
 0x455   :  { %10016 = vmatpush1.bf16.msra.mxu1 %v25848_v40  ;;  %9771 = vmatprep.subr.bf16.mxu0 %v25853_v47  ;;  %v25902_v40 = vld [vmem:[#allocation7 + $0x11c0] ss:$28 sps:$4 sm:$0xff]  }
 0x456   :  { %10017 = vmatprep.subr.bf16.mxu1 %v25856_v50  ;;  %v25904_v47 = vld [vmem:[#allocation7 + $0x11c4] ss:$28 sps:$4 sm:$0xff]   ;;  %v25910_v50 = vld [vmem:[#allocation7 + $0x11fc] ss:$28 sps:$4 sm:$0xff]  }
 0x458   :  { %9772 = vmatpush1.bf16.msra.mxu0 %v25851_v27  ;;  %v25905_v27 = vld [vmem:[#allocation7 + $0x11f0] ss:$28 sps:$4 sm:$0xff]  }
 0x459   :  { %10018 = vmatpush1.bf16.msra.mxu1 %v25854_v51  ;;  %9773 = vmatprep.subr.bf16.mxu0 %v25859_v52  ;;  %v25908_v51 = vld [vmem:[#allocation7 + $0x11f8] ss:$28 sps:$4 sm:$0xff]   ;;  %v25913_v52 = vld [vmem:[#allocation7 + $0x122c] ss:$28 sps:$4 sm:$0xff]  }
 0x45a   :  { %10019 = vmatprep.subr.bf16.mxu1 %v25862_v53  ;;  %v25916_v53 = vld [vmem:[#allocation7 + $0x1234] ss:$28 sps:$4 sm:$0xff]  }
 0x45c   :  { %9774 = vmatpush1.bf16.msra.mxu0 %v25857_v54  ;;  %v25911_v54 = vld [vmem:[#allocation7 + $0x1228] ss:$28 sps:$4 sm:$0xff]  }
 0x45d   :  { %10020 = vmatpush1.bf16.msra.mxu1 %v25860_v58  ;;  %9775 = vmatprep.subr.bf16.mxu0 %v25865_v33  ;;  %v25914_v58 = vld [vmem:[#allocation7 + $0x1230] ss:$28 sps:$4 sm:$0xff]   ;;  %v25919_v33 = vld [vmem:[#allocation7 + $0x1264] ss:$28 sps:$4 sm:$0xff]  }
 0x45e   :  { %10021 = vmatprep.subr.bf16.mxu1 %v25868_v62  ;;  %v25922_v62 = vld [vmem:[#allocation7 + $0x126c] ss:$28 sps:$4 sm:$0xff]  }
 0x460   :  { %9776 = vmatpush1.bf16.msra.mxu0 %v25863_v63  ;;  %v25917_v63 = vld [vmem:[#allocation7 + $0x1260] ss:$28 sps:$4 sm:$0xff]  }
 0x461   :  { %10022 = vmatpush1.bf16.msra.mxu1 %v25866_v0  ;;  %9777 = vmatprep.subr.bf16.mxu0 %v25871_v57  ;;  %v25925_v0 = vld [vmem:[#allocation7 + $0x129c] ss:$28 sps:$4 sm:$0xff]   ;;  %v25928_v57 = vld [vmem:[#allocation7 + $0x12a4] ss:$28 sps:$4 sm:$0xff]  }
 0x462   :  { %10023 = vmatprep.subr.bf16.mxu1 %v25874_v44  ;;  %v25923_v44 = vld [vmem:[#allocation7 + $0x1298] ss:$28 sps:$4 sm:$0xff]  }
 0x464   :  { %9778 = vmatpush1.bf16.msra.mxu0 %v25869_v56  ;;  %v25934_v56 = vld [vmem:[#allocation7 + $0x12dc] ss:$28 sps:$4 sm:$0xff]  }
 0x465   :  { %10024 = vmatpush1.bf16.msra.mxu1 %v25872_v61  ;;  %9779 = vmatprep.subr.bf16.mxu0 %v25877_v4  ;;  %v25929_v61 = vld [vmem:[#allocation7 + $0x12d0] ss:$28 sps:$4 sm:$0xff]   ;;  %v25932_v4 = vld [vmem:[#allocation7 + $0x12d8] ss:$28 sps:$4 sm:$0xff]  }
 0x466   :  { %10025 = vmatprep.subr.bf16.mxu1 %v25880_v6  ;;  %v25937_v6 = vld [vmem:[#allocation7 + $0x130c] ss:$28 sps:$4 sm:$0xff]  }
 0x468   :  { %9780 = vmatpush1.bf16.msra.mxu0 %v25875_v16  ;;  %v25935_v16 = vld [vmem:[#allocation7 + $0x1308] ss:$28 sps:$4 sm:$0xff]  }
 0x469   :  { %10026 = vmatpush1.bf16.msra.mxu1 %v25878_v17  ;;  %9781 = vmatprep.subr.bf16.mxu0 %v25883_v18  ;;  %v25938_v17 = vld [vmem:[#allocation7 + $0x1310] ss:$28 sps:$4 sm:$0xff]   ;;  %v25943_v18 = vld [vmem:[#allocation7 + $0x1344] ss:$28 sps:$4 sm:$0xff]  }
 0x46a   :  { %10027 = vmatprep.subr.bf16.mxu1 %v25886_v23  ;;  %v25946_v23 = vld [vmem:[#allocation7 + $0x134c] ss:$28 sps:$4 sm:$0xff]  }
 0x46c   :  { %9782 = vmatpush1.bf16.msra.mxu0 %v25881_v24  ;;  %v25941_v24 = vld [vmem:[#allocation7 + $0x1340] ss:$28 sps:$4 sm:$0xff]  }
 0x46d   :  { %10028 = vmatpush1.bf16.msra.mxu1 %v25884_v30  ;;  %9783 = vmatprep.subr.bf16.mxu0 %v25889_v25  ;;  %v21776_v30 = vmul.f32 -1.442695, %v29075_v32  ;;  %v25944_v25 = vld [vmem:[#allocation7 + $0x1348] ss:$28 sps:$4 sm:$0xff]   ;;  %v25956_v32 = vld [vmem:[#allocation7 + $0x13b8] ss:$28 sps:$4 sm:$0xff]  }
 0x46e   :  { %10029 = vmatprep.subr.bf16.mxu1 %v25892_v13  ;;  %v25949_v13 = vld [vmem:[#allocation7 + $0x137c] ss:$28 sps:$4 sm:$0xff]  }
 0x46f   :  { %28385 = vpow2.f32 %v21776_v30  ;;  %v26002_v30 = vld [vmem:[#allocation7 + $0x248] ss:$28 sps:$4 sm:$0xff]  }
 0x470   :  { %9784 = vmatpush1.bf16.msra.mxu0 %v25887_v10  ;;  %v25952_v10 = vld [vmem:[#allocation7 + $0x1384] ss:$28 sps:$4 sm:$0xff]  }
 0x471   :  { %10030 = vmatpush1.bf16.msra.mxu1 %v25890_v28  ;;  %9794 = vmatprep.subr.bf16.mxu0 %v25895_v29  ;;  %v25947_v28 = vld [vmem:[#allocation7 + $0x1378] ss:$28 sps:$4 sm:$0xff]   ;;  %v25950_v29 = vld [vmem:[#allocation7 + $0x1380] ss:$28 sps:$4 sm:$0xff]  }
 0x472   :  { %10040 = vmatprep.subr.bf16.mxu1 %v25898_v31  ;;  %v25955_v31 = vld [vmem:[#allocation7 + $0x13b4] ss:$28 sps:$4 sm:$0xff]  }
 0x473   :  { %9786 = vmatmul.mubr.bf16.vlgmr.msra.gmra.mrb[12].mxu0 %v29094_v36 }
 0x474   :  { %10032 = vmatmul.mubr.bf16.vlgmr.msra.gmra.mrb[12].mxu1 %v29094_v36  ;;  %9795 = vmatpush1.bf16.msra.mxu0 %v25893_v43  ;;  %v25953_v43 = vld [vmem:[#allocation7 + $0x13b0] ss:$28 sps:$4 sm:$0xff]  }
 0x475   :  { %9826 = vmatprep.mubr.bf16.mxu0 %v29097_v39  ;;  %10041 = vmatpush1.bf16.msra.mxu1 %v25896_v34  ;;  %v25961_v34 = vld [vmem:[#allocation7 + $0x13ec] ss:$28 sps:$4 sm:$0xff]  }
 0x476   :  { %10072 = vmatprep.mubr.bf16.mxu1 %v29097_v39  ;;  %9796 = vmatprep.subr.bf16.mxu0 %v25901_v35  ;;  %v25959_v35 = vld [vmem:[#allocation7 + $0x13e8] ss:$28 sps:$4 sm:$0xff]  }
 0x477   :  { %10042 = vmatprep.subr.bf16.mxu1 %v25904_v47  ;;  %v25967_v47 = vld [vmem:[#allocation7 + $0x1424] ss:$28 sps:$4 sm:$0xff]  }
 0x478   :  { %9797 = vmatpush1.bf16.msra.mxu0 %v25899_v9 }
 0x479   :  { %10043 = vmatpush1.bf16.msra.mxu1 %v25902_v40  ;;  %9798 = vmatprep.subr.bf16.mxu0 %v25907_v49  ;;  %v28386_v9 = vpop.eup %28385  ;;  %v25962_v40 = vld [vmem:[#allocation7 + $0x13f0] ss:$28 sps:$4 sm:$0xff]  }
 0x47a   :  { %10044 = vmatprep.subr.bf16.mxu1 %v25910_v50  ;;  %v25970_v49 = vld [vmem:[#allocation7 + $0x142c] ss:$28 sps:$4 sm:$0xff]   ;;  %v5290_v50 = vadd.f32 1.0, %v28386_v9 }
 0x47b   :  { %v26018_v9 = vld [vmem:[#allocation7 + $0x130] ss:$28 sps:$4 sm:$0xff]  }
 0x47c   :  { %9799 = vmatpush1.bf16.msra.mxu0 %v25905_v27  ;;  %v25965_v27 = vld [vmem:[#allocation7 + $0x1420] ss:$28 sps:$4 sm:$0xff]   ;;  %28387 = vrcp.f32 %v5290_v50  ;;  %v26023_v50 = vld [vmem:[#allocation7 + $0x168] ss:$28 sps:$4 sm:$0xff]  }
 0x47d   :  { %10045 = vmatpush1.bf16.msra.mxu1 %v25908_v51  ;;  %9800 = vmatprep.subr.bf16.mxu0 %v25913_v52  ;;  %v25968_v51 = vld [vmem:[#allocation7 + $0x1428] ss:$28 sps:$4 sm:$0xff]   ;;  %v25973_v52 = vld [vmem:[#allocation7 + $0x145c] ss:$28 sps:$4 sm:$0xff]  }
 0x47e   :  { %10046 = vmatprep.subr.bf16.mxu1 %v25916_v53  ;;  %v25976_v53 = vld [vmem:[#allocation7 + $0x1464] ss:$28 sps:$4 sm:$0xff]  }
 0x480   :  { %9801 = vmatpush1.bf16.msra.mxu0 %v25911_v54  ;;  %v25971_v54 = vld [vmem:[#allocation7 + $0x1458] ss:$28 sps:$4 sm:$0xff]  }
 0x481   :  { %10047 = vmatpush1.bf16.msra.mxu1 %v25914_v58  ;;  %9802 = vmatprep.subr.bf16.mxu0 %v25919_v33  ;;  %v25974_v58 = vld [vmem:[#allocation7 + $0x1460] ss:$28 sps:$4 sm:$0xff]   ;;  %v25979_v33 = vld [vmem:[#allocation7 + $0x1494] ss:$28 sps:$4 sm:$0xff]  }
 0x482   :  { %10048 = vmatprep.subr.bf16.mxu1 %v25922_v62  ;;  %v25982_v62 = vld [vmem:[#allocation7 + $0x149c] ss:$28 sps:$4 sm:$0xff]  }
 0x484   :  { %9803 = vmatpush1.bf16.msra.mxu0 %v25917_v63  ;;  %v25977_v63 = vld [vmem:[#allocation7 + $0x1490] ss:$28 sps:$4 sm:$0xff]  }
 0x485   :  { %10049 = vmatpush1.bf16.msra.mxu1 %v25920_v11  ;;  %9804 = vmatprep.subr.bf16.mxu0 %v25925_v0  ;;  %v25980_v11 = vld [vmem:[#allocation7 + $0x1498] ss:$28 sps:$4 sm:$0xff]   ;;  %v25985_v0 = vld [vmem:[#allocation7 + $0x14cc] ss:$28 sps:$4 sm:$0xff]  }
 0x486   :  { %10050 = vmatprep.subr.bf16.mxu1 %v25928_v57  ;;  %v25988_v57 = vld [vmem:[#allocation7 + $0x14d4] ss:$28 sps:$4 sm:$0xff]  }
 0x488   :  { %9805 = vmatpush1.bf16.msra.mxu0 %v25923_v44  ;;  %v25983_v44 = vld [vmem:[#allocation7 + $0x14c8] ss:$28 sps:$4 sm:$0xff]  }
 0x489   :  { %10051 = vmatpush1.bf16.msra.mxu1 %v25926_v2  ;;  %9806 = vmatprep.subr.bf16.mxu0 %v25931_v3  ;;  %v25986_v2 = vld [vmem:[#allocation7 + $0x14d0] ss:$28 sps:$4 sm:$0xff]  }
 0x48a   :  { %10052 = vmatprep.subr.bf16.mxu1 %v25934_v56  ;;  %v25991_v3 = vld [vmem:[#allocation7 + $0x14] ss:$28 sps:$4 sm:$0xff]  }
 0x48b   :  { %v25992_v56 = vld [vmem:[#allocation7 + $0x1d8] ss:$28 sps:$4 sm:$0xff]  }
 0x48c   :  { %9807 = vmatpush1.bf16.msra.mxu0 %v25929_v61  ;;  %v28388_v61 = vpop.eup %28387 }
 0x48d   :  { %10053 = vmatpush1.bf16.msra.mxu1 %v25932_v4  ;;  %9808 = vmatprep.subr.bf16.mxu0 %v25937_v6  ;;  %v25989_v4 = vld [vmem:[#allocation7 + $0x10] ss:$28 sps:$4 sm:$0xff]   ;;  %v25993_v6 = vld [vmem:[#allocation7 + $0x18] ss:$28 sps:$4 sm:$0xff]  }
 0x48e   :  { %10054 = vmatprep.subr.bf16.mxu1 %v25940_v12  ;;  %v25996_v12 = vld [vmem:[#allocation7 + $0x4c] ss:$28 sps:$4 sm:$0xff]  }
 0x490   :  { %9809 = vmatpush1.bf16.msra.mxu0 %v25935_v16  ;;  %v29103_v16 = vpack.c.bf16 %v28388_v61, %v28388_v61  ;;  %v26046_v61 = vld [vmem:[#allocation7 + $0x27c] ss:$28 sps:$4 sm:$0xff]  }
 0x491   :  { %10055 = vmatpush1.bf16.msra.mxu1 %v25938_v17  ;;  %9810 = vmatprep.subr.bf16.mxu0 %v25943_v18  ;;  %v25994_v17 = vld [vmem:[#allocation7 + $0x48] ss:$28 sps:$4 sm:$0xff]   ;;  %v25997_v18 = vld [vmem:[#allocation7 + $0x210] ss:$28 sps:$4 sm:$0xff]  }
 0x492   :  { %10056 = vmatprep.subr.bf16.mxu1 %v25946_v23  ;;  %v25998_v23 = vld [vmem:[#allocation7 + $0x50] ss:$28 sps:$4 sm:$0xff]  }
 0x494   :  { %9811 = vmatpush1.bf16.msra.mxu0 %v25941_v24  ;;  %v26001_v24 = vld [vmem:[#allocation7 + $0x84] ss:$28 sps:$4 sm:$0xff]  }
 0x495   :  { %10057 = vmatpush1.bf16.msra.mxu1 %v25944_v25  ;;  %9812 = vmatprep.subr.bf16.mxu0 %v25949_v13  ;;  %v25999_v25 = vld [vmem:[#allocation7 + $0x80] ss:$28 sps:$4 sm:$0xff]   ;;  %v26003_v13 = vld [vmem:[#allocation7 + $0x88] ss:$28 sps:$4 sm:$0xff]  }
 0x496   :  { %10058 = vmatprep.subr.bf16.mxu1 %v25952_v10  ;;  %v26006_v10 = vld [vmem:[#allocation7 + $0xbc] ss:$28 sps:$4 sm:$0xff]  }
 0x498   :  { %9813 = vmatpush1.bf16.msra.mxu0 %v25947_v28  ;;  %v26007_v28 = vld [vmem:[#allocation7 + $0x280] ss:$28 sps:$4 sm:$0xff]  }
 0x499   :  { %10059 = vmatpush1.bf16.msra.mxu1 %v25950_v29  ;;  %9814 = vmatprep.subr.bf16.mxu0 %v25955_v31  ;;  %v26004_v29 = vld [vmem:[#allocation7 + $0xb8] ss:$28 sps:$4 sm:$0xff]   ;;  %v26008_v31 = vld [vmem:[#allocation7 + $0xc0] ss:$28 sps:$4 sm:$0xff]  }
 0x49a   :  { %10060 = vmatprep.subr.bf16.mxu1 %v25958_v42  ;;  %v26011_v42 = vld [vmem:[#allocation7 + $0xf4] ss:$28 sps:$4 sm:$0xff]  }
 0x49c   :  { %9815 = vmatpush1.bf16.msra.mxu0 %v25953_v43  ;;  %v26012_v43 = vld [vmem:[#allocation7 + $0x2b8] ss:$28 sps:$4 sm:$0xff]  }
 0x49d   :  { %10061 = vmatpush1.bf16.msra.mxu1 %v25956_v32  ;;  %9816 = vmatprep.subr.bf16.mxu0 %v25961_v34  ;;  %v26013_v32 = vld [vmem:[#allocation7 + $0xf8] ss:$28 sps:$4 sm:$0xff]   ;;  %v26016_v34 = vld [vmem:[#allocation7 + $0x12c] ss:$28 sps:$4 sm:$0xff]  }
 0x49e   :  { %10062 = vmatprep.subr.bf16.mxu1 %v25964_v60  ;;  %v26017_v60 = vld [vmem:[#allocation7 + $0x2f0] ss:$28 sps:$4 sm:$0xff]  }
 0x4a0   :  { %9817 = vmatpush1.bf16.msra.mxu0 %v25959_v35  ;;  %v26014_v35 = vld [vmem:[#allocation7 + $0x128] ss:$28 sps:$4 sm:$0xff]  }
 0x4a1   :  { %10063 = vmatpush1.bf16.msra.mxu1 %v25962_v40  ;;  %9818 = vmatprep.subr.bf16.mxu0 %v25967_v47  ;;  %v26021_v40 = vld [vmem:[#allocation7 + $0x164] ss:$28 sps:$4 sm:$0xff]  }
 0x4a2   :  { %10064 = vmatprep.subr.bf16.mxu1 %v25970_v49  ;;  %v26022_v47 = vld [vmem:[#allocation7 + $0x328] ss:$28 sps:$4 sm:$0xff]   ;;  %v26019_v49 = vld [vmem:[#allocation7 + $0x160] ss:$28 sps:$4 sm:$0xff]  }
 0x4a4   :  { %9819 = vmatpush1.bf16.msra.mxu0 %v25965_v27  ;;  %v26026_v27 = vld [vmem:[#allocation7 + $0x19c] ss:$28 sps:$4 sm:$0xff]  }
 0x4a5   :  { %10065 = vmatpush1.bf16.msra.mxu1 %v25968_v51  ;;  %9820 = vmatprep.subr.bf16.mxu0 %v25973_v52  ;;  %v26027_v51 = vld [vmem:[#allocation7 + $0x360] ss:$28 sps:$4 sm:$0xff]   ;;  %v26024_v52 = vld [vmem:[#allocation7 + $0x198] ss:$28 sps:$4 sm:$0xff]  }
 0x4a6   :  { %10066 = vmatprep.subr.bf16.mxu1 %v25976_v53  ;;  %v26028_v53 = vld [vmem:[#allocation7 + $0x1a0] ss:$28 sps:$4 sm:$0xff]  }
 0x4a8   :  { %9821 = vmatpush1.bf16.msra.mxu0 %v25971_v54  ;;  %v26031_v54 = vld [vmem:[#allocation7 + $0x1d4] ss:$28 sps:$4 sm:$0xff]  }
 0x4a9   :  { %10067 = vmatpush1.bf16.msra.mxu1 %v25974_v58  ;;  %9822 = vmatprep.subr.bf16.mxu0 %v25979_v33  ;;  %v26032_v58 = vld [vmem:[#allocation7 + $0x558] ss:$28 sps:$4 sm:$0xff]   ;;  %v26029_v33 = vld [vmem:[#allocation7 + $0x1d0] ss:$28 sps:$4 sm:$0xff]  }
 0x4aa   :  { %10068 = vmatprep.subr.bf16.mxu1 %v25982_v62  ;;  %v26033_v62 = vld [vmem:[#allocation7 + $0x398] ss:$28 sps:$4 sm:$0xff]  }
 0x4ac   :  { %9823 = vmatpush1.bf16.msra.mxu0 %v25977_v63  ;;  %v26036_v63 = vld [vmem:[#allocation7 + $0x20c] ss:$28 sps:$4 sm:$0xff]  }
 0x4ad   :  { %10069 = vmatpush1.bf16.msra.mxu1 %v25980_v11  ;;  %9824 = vmatprep.subr.bf16.mxu0 %v25985_v0  ;;  %v26037_v11 = vld [vmem:[#allocation7 + $0x590] ss:$28 sps:$4 sm:$0xff]   ;;  %v26034_v0 = vld [vmem:[#allocation7 + $0x208] ss:$28 sps:$4 sm:$0xff]  }
 0x4ae   :  { %10070 = vmatprep.subr.bf16.mxu1 %v25988_v57  ;;  %v26038_v57 = vld [vmem:[#allocation7 + $0x3d0] ss:$28 sps:$4 sm:$0xff]  }
 0x4b0   :  { %9825 = vmatpush1.bf16.msra.mxu0 %v25983_v44  ;;  %v26041_v44 = vld [vmem:[#allocation7 + $0x244] ss:$28 sps:$4 sm:$0xff]  }
 0x4b1   :  { %10071 = vmatpush1.bf16.msra.mxu1 %v25986_v2  ;;  %10081 = vmatprep.subr.bf16.mxu0 %v25991_v3  ;;  %v26042_v2 = vld [vmem:[#allocation7 + $0x5c8] ss:$28 sps:$4 sm:$0xff]   ;;  %v26039_v3 = vld [vmem:[#allocation7 + $0x240] ss:$28 sps:$4 sm:$0xff]  }
 0x4b2   :  { %23820 = vmatprep.subr.bf16.mxu1 %v25992_v56  ;;  %v26043_v56 = vld [vmem:[#allocation7 + $0x408] ss:$28 sps:$4 sm:$0xff]  }
 0x4b3   :  { %9827 = vmatmul.mubr.bf16.vlgmr.msra.gmra.mrb[12].mxu0 %v29103_v16 }
 0x4b4   :  { %10073 = vmatmul.mubr.bf16.vlgmr.msra.gmra.mrb[12].mxu1 %v29103_v16  ;;  %10082 = vmatpush1.bf16.msra.mxu0 %v25989_v4  ;;  %v26047_v4 = vld [vmem:[#allocation7 + $0x600] ss:$28 sps:$4 sm:$0xff]  }
 0x4b5   :  { %10113 = vmatprep.mubr.bf16.mxu0 %v28995_v5  ;;  %23821 = vmatpush3.bf16.msra.mxu1 %v25993_v6  ;;  %v26044_v6 = vld [vmem:[#allocation7 + $0x278] ss:$28 sps:$4 sm:$0xff]  }
 0x4b6   :  { %10359 = vmatprep.mubr.bf16.mxu1 %v28995_v5  ;;  %10083 = vmatprep.subr.bf16.mxu0 %v25996_v12  ;;  %v26009_v5 = vld [vmem:[#allocation7 + $0xf0] ss:$28 sps:$4 sm:$0xff]   ;;  %v26048_v12 = vld [vmem:[#allocation7 + $0x440] ss:$28 sps:$4 sm:$0xff]  }
 0x4b7   :  { %23822 = vmatprep.subr.bf16.mxu1 %v25997_v18  ;;  %v26052_v18 = vld [vmem:[#allocation7 + $0x638] ss:$28 sps:$4 sm:$0xff]  }
 0x4b8   :  { %10084 = vmatpush1.bf16.msra.mxu0 %v25994_v17  ;;  %v26051_v17 = vld [vmem:[#allocation7 + $0x2b4] ss:$28 sps:$4 sm:$0xff]  }
 0x4b9   :  { %23823 = vmatpush3.bf16.msra.mxu1 %v25998_v23  ;;  %10085 = vmatprep.subr.bf16.mxu0 %v26001_v24  ;;  %v26049_v23 = vld [vmem:[#allocation7 + $0x2b0] ss:$28 sps:$4 sm:$0xff]   ;;  %v26053_v24 = vld [vmem:[#allocation7 + $0x478] ss:$28 sps:$4 sm:$0xff]  }
 0x4ba   :  { %23824 = vmatprep.subr.bf16.mxu1 %v26002_v30  ;;  %v26056_v30 = vld [vmem:[#allocation7 + $0x2ec] ss:$28 sps:$4 sm:$0xff]  }
 0x4bc   :  { %10086 = vmatpush1.bf16.msra.mxu0 %v25999_v25  ;;  %v26057_v25 = vld [vmem:[#allocation7 + $0x670] ss:$28 sps:$4 sm:$0xff]  }
 0x4bd   :  { %23825 = vmatpush3.bf16.msra.mxu1 %v26003_v13  ;;  %10087 = vmatprep.subr.bf16.mxu0 %v26006_v10  ;;  %v26054_v13 = vld [vmem:[#allocation7 + $0x2e8] ss:$28 sps:$4 sm:$0xff]   ;;  %v26058_v10 = vld [vmem:[#allocation7 + $0x4b0] ss:$28 sps:$4 sm:$0xff]  }
 0x4be   :  { %23826 = vmatprep.subr.bf16.mxu1 %v26007_v28  ;;  %v26061_v28 = vld [vmem:[#allocation7 + $0x324] ss:$28 sps:$4 sm:$0xff]  }
 0x4c0   :  { %10088 = vmatpush1.bf16.msra.mxu0 %v26004_v29  ;;  %v26062_v29 = vld [vmem:[#allocation7 + $0x6a8] ss:$28 sps:$4 sm:$0xff]  }
 0x4c1   :  { %23827 = vmatpush3.bf16.msra.mxu1 %v26008_v31  ;;  %10089 = vmatprep.subr.bf16.mxu0 %v26011_v42  ;;  %v26059_v31 = vld [vmem:[#allocation7 + $0x320] ss:$28 sps:$4 sm:$0xff]   ;;  %v26063_v42 = vld [vmem:[#allocation7 + $0x4e8] ss:$28 sps:$4 sm:$0xff]  }
 0x4c2   :  { %23828 = vmatprep.subr.bf16.mxu1 %v26012_v43  ;;  %v26066_v43 = vld [vmem:[#allocation7 + $0x35c] ss:$28 sps:$4 sm:$0xff]  }
 0x4c4   :  { %10090 = vmatpush1.bf16.msra.mxu0 %v26009_v5  ;;  %v26067_v5 = vld [vmem:[#allocation7 + $0x6e0] ss:$28 sps:$4 sm:$0xff]  }
 0x4c5   :  { %23829 = vmatpush3.bf16.msra.mxu1 %v26013_v32  ;;  %10091 = vmatprep.subr.bf16.mxu0 %v26016_v34  ;;  %v26064_v32 = vld [vmem:[#allocation7 + $0x358] ss:$28 sps:$4 sm:$0xff]   ;;  %v26068_v34 = vld [vmem:[#allocation7 + $0x520] ss:$28 sps:$4 sm:$0xff]  }
 0x4c6   :  { %23830 = vmatprep.subr.bf16.mxu1 %v26017_v60  ;;  %v26071_v60 = vld [vmem:[#allocation7 + $0x394] ss:$28 sps:$4 sm:$0xff]  }
 0x4c8   :  { %10092 = vmatpush1.bf16.msra.mxu0 %v26014_v35  ;;  %v26072_v35 = vld [vmem:[#allocation7 + $0x8d8] ss:$28 sps:$4 sm:$0xff]  }
 0x4c9   :  { %23831 = vmatpush3.bf16.msra.mxu1 %v26018_v9  ;;  %10093 = vmatprep.subr.bf16.mxu0 %v26021_v40  ;;  %v26069_v9 = vld [vmem:[#allocation7 + $0x390] ss:$28 sps:$4 sm:$0xff]   ;;  %v26073_v40 = vld [vmem:[#allocation7 + $0x718] ss:$28 sps:$4 sm:$0xff]  }
 0x4ca   :  { %23832 = vmatprep.subr.bf16.mxu1 %v26022_v47  ;;  %v26076_v47 = vld [vmem:[#allocation7 + $0x3cc] ss:$28 sps:$4 sm:$0xff]  }
 0x4cc   :  { %10094 = vmatpush1.bf16.msra.mxu0 %v26019_v49  ;;  %v26077_v49 = vld [vmem:[#allocation7 + $0x910] ss:$28 sps:$4 sm:$0xff]  }
 0x4cd   :  { %23833 = vmatpush3.bf16.msra.mxu1 %v26023_v50  ;;  %10095 = vmatprep.subr.bf16.mxu0 %v26026_v27  ;;  %v26074_v50 = vld [vmem:[#allocation7 + $0x3c8] ss:$28 sps:$4 sm:$0xff]   ;;  %v26078_v27 = vld [vmem:[#allocation7 + $0x750] ss:$28 sps:$4 sm:$0xff]  }
 0x4ce   :  { %23834 = vmatprep.subr.bf16.mxu1 %v26027_v51  ;;  %v26081_v51 = vld [vmem:[#allocation7 + $0x404] ss:$28 sps:$4 sm:$0xff]  }
 0x4d0   :  { %10096 = vmatpush1.bf16.msra.mxu0 %v26024_v52  ;;  %v26079_v52 = vld [vmem:[#allocation7 + $0x400] ss:$28 sps:$4 sm:$0xff]  }
 0x4d1   :  { %23835 = vmatpush3.bf16.msra.mxu1 %v26028_v53  ;;  %10097 = vmatprep.subr.bf16.mxu0 %v26031_v54  ;;  %v26082_v53 = vld [vmem:[#allocation7 + $0x948] ss:$28 sps:$4 sm:$0xff]   ;;  %v26086_v54 = vld [vmem:[#allocation7 + $0x43c] ss:$28 sps:$4 sm:$0xff]  }
 0x4d2   :  { %23842 = vmatprep.subr.bf16.mxu1 %v26032_v58  ;;  %v26084_v58 = vld [vmem:[#allocation7 + $0x438] ss:$28 sps:$4 sm:$0xff]  }
 0x4d4   :  { %10360 = vmatmul.mubr.bf16.vlgmr.msra.gmra.mrb[16].mxu1 %v29014_v45  ;;  %10098 = vmatpush1.bf16.msra.mxu0 %v26029_v33  ;;  %v26087_v33 = vld [vmem:[#allocation7 + $0x980] ss:$28 sps:$4 sm:$0xff]  }
 0x4d5   :  { %23843 = vmatpush3.bf16.msra.mxu1 %v26033_v62  ;;  %10399 = vmatprep.mubr.bf16.mxu1 %v29017_v46  ;;  %v26091_v62 = vld [vmem:[#allocation7 + $0x474] ss:$28 sps:$4 sm:$0xff]  }
 0x4d6   :  { %10099 = vmatprep.subr.bf16.mxu0 %v26036_v63  ;;  %23844 = vmatprep.subr.bf16.mxu1 %v26037_v11  ;;  %v26089_v63 = vld [vmem:[#allocation7 + $0x470] ss:$28 sps:$4 sm:$0xff]   ;;  %v26092_v11 = vld [vmem:[#allocation7 + $0x9b8] ss:$28 sps:$4 sm:$0xff]  }
 0x4d8   :  { %10100 = vmatpush1.bf16.msra.mxu0 %v26034_v0  ;;  %v26093_v0 = vld [vmem:[#allocation7 + $0x7f8] ss:$28 sps:$4 sm:$0xff]  }
 0x4d9   :  { %23845 = vmatpush3.bf16.msra.mxu1 %v26038_v57  ;;  %10101 = vmatprep.subr.bf16.mxu0 %v26041_v44  ;;  %v26096_v57 = vld [vmem:[#allocation7 + $0x4ac] ss:$28 sps:$4 sm:$0xff]  }
 0x4da   :  { %23846 = vmatprep.subr.bf16.mxu1 %v26042_v2  ;;  %v26094_v44 = vld [vmem:[#allocation7 + $0x4a8] ss:$28 sps:$4 sm:$0xff]   ;;  %v26097_v2 = vld [vmem:[#allocation7 + $0x9f0] ss:$28 sps:$4 sm:$0xff]  }
 0x4dc   :  { %10102 = vmatpush1.bf16.msra.mxu0 %v26039_v3  ;;  %v26098_v3 = vld [vmem:[#allocation7 + $0x830] ss:$28 sps:$4 sm:$0xff]  }
 0x4dd   :  { %23847 = vmatpush3.bf16.msra.mxu1 %v26043_v56  ;;  %10103 = vmatprep.subr.bf16.mxu0 %v26046_v61  ;;  %v26101_v56 = vld [vmem:[#allocation7 + $0x4e4] ss:$28 sps:$4 sm:$0xff]  }
 0x4de   :  { %23848 = vmatprep.subr.bf16.mxu1 %v26047_v4  ;;  %v26102_v61 = vld [vmem:[#allocation7 + $0xa28] ss:$28 sps:$4 sm:$0xff]   ;;  %v26099_v4 = vld [vmem:[#allocation7 + $0x4e0] ss:$28 sps:$4 sm:$0xff]  }
 0x4e0   :  { %10104 = vmatpush1.bf16.msra.mxu0 %v26044_v6  ;;  %v26103_v6 = vld [vmem:[#allocation7 + $0x868] ss:$28 sps:$4 sm:$0xff]  }
 0x4e1   :  { %23849 = vmatpush3.bf16.msra.mxu1 %v26048_v12  ;;  %10105 = vmatprep.subr.bf16.mxu0 %v26051_v17  ;;  %v26106_v12 = vld [vmem:[#allocation7 + $0x51c] ss:$28 sps:$4 sm:$0xff]  }
 0x4e2   :  { %23850 = vmatprep.subr.bf16.mxu1 %v26052_v18  ;;  %v26107_v17 = vld [vmem:[#allocation7 + $0xa60] ss:$28 sps:$4 sm:$0xff]   ;;  %v26104_v18 = vld [vmem:[#allocation7 + $0x518] ss:$28 sps:$4 sm:$0xff]  }
 0x4e4   :  { %10106 = vmatpush1.bf16.msra.mxu0 %v26049_v23  ;;  %v26108_v23 = vld [vmem:[#allocation7 + $0x8a0] ss:$28 sps:$4 sm:$0xff]  }
 0x4e5   :  { %23851 = vmatpush3.bf16.msra.mxu1 %v26053_v24  ;;  %10107 = vmatprep.subr.bf16.mxu0 %v26056_v30  ;;  %v26111_v24 = vld [vmem:[#allocation7 + $0x554] ss:$28 sps:$4 sm:$0xff]  }
 0x4e6   :  { %23852 = vmatprep.subr.bf16.mxu1 %v26057_v25  ;;  %v26112_v30 = vld [vmem:[#allocation7 + $0xc58] ss:$28 sps:$4 sm:$0xff]   ;;  %v26109_v25 = vld [vmem:[#allocation7 + $0x550] ss:$28 sps:$4 sm:$0xff]  }
 0x4e8   :  { %10108 = vmatpush1.bf16.msra.mxu0 %v26054_v13  ;;  %v26113_v13 = vld [vmem:[#allocation7 + $0xa98] ss:$28 sps:$4 sm:$0xff]  }
 0x4e9   :  { %23853 = vmatpush3.bf16.msra.mxu1 %v26058_v10  ;;  %10109 = vmatprep.subr.bf16.mxu0 %v26061_v28  ;;  %v26116_v10 = vld [vmem:[#allocation7 + $0x58c] ss:$28 sps:$4 sm:$0xff]  }
 0x4ea   :  { %23854 = vmatprep.subr.bf16.mxu1 %v26062_v29  ;;  %v26117_v28 = vld [vmem:[#allocation7 + $0xc90] ss:$28 sps:$4 sm:$0xff]   ;;  %v26114_v29 = vld [vmem:[#allocation7 + $0x588] ss:$28 sps:$4 sm:$0xff]  }
 0x4ec   :  { %10110 = vmatpush1.bf16.msra.mxu0 %v26059_v31  ;;  %v26118_v31 = vld [vmem:[#allocation7 + $0xad0] ss:$28 sps:$4 sm:$0xff]  }
 0x4ed   :  { %23855 = vmatpush3.bf16.msra.mxu1 %v26063_v42  ;;  %10111 = vmatprep.subr.bf16.mxu0 %v26066_v43  ;;  %v26121_v42 = vld [vmem:[#allocation7 + $0x5c4] ss:$28 sps:$4 sm:$0xff]  }
 0x4ee   :  { %23856 = vmatprep.subr.bf16.mxu1 %v26067_v5  ;;  %v26122_v43 = vld [vmem:[#allocation7 + $0xcc8] ss:$28 sps:$4 sm:$0xff]   ;;  %v26119_v5 = vld [vmem:[#allocation7 + $0x5c0] ss:$28 sps:$4 sm:$0xff]  }
 0x4f0   :  { %10112 = vmatpush1.bf16.msra.mxu0 %v26064_v32  ;;  %v26123_v32 = vld [vmem:[#allocation7 + $0xb08] ss:$28 sps:$4 sm:$0xff]  }
 0x4f1   :  { %23857 = vmatpush3.bf16.msra.mxu1 %v26068_v34  ;;  %10122 = vmatprep.subr.bf16.mxu0 %v26071_v60  ;;  %v26126_v34 = vld [vmem:[#allocation7 + $0x5fc] ss:$28 sps:$4 sm:$0xff]  }
 0x4f2   :  { %23864 = vmatprep.subr.bf16.mxu1 %v26072_v35  ;;  %v26127_v60 = vld [vmem:[#allocation7 + $0xd00] ss:$28 sps:$4 sm:$0xff]   ;;  %v26124_v35 = vld [vmem:[#allocation7 + $0x5f8] ss:$28 sps:$4 sm:$0xff]  }
 0x4f3   :  { %10114 = vmatmul.mubr.bf16.vlgmr.msra.gmra.mrb[16].mxu0 %v29014_v45  ;;  %v26083_v45 = vld [vmem:[#allocation7 + $0x788] ss:$28 sps:$4 sm:$0xff]  }
 0x4f4   :  { %10400 = vmatmul.mubr.bf16.vlgmr.msra.gmra.mrb[20].mxu1 %v29036_v21  ;;  %10123 = vmatpush1.bf16.msra.mxu0 %v26069_v9  ;;  %v26128_v9 = vld [vmem:[#allocation7 + $0xb40] ss:$28 sps:$4 sm:$0xff]  }
 0x4f5   :  { %10154 = vmatprep.mubr.bf16.mxu0 %v29017_v46  ;;  %23865 = vmatpush3.bf16.msra.mxu1 %v26073_v40  ;;  %v26088_v46 = vld [vmem:[#allocation7 + $0x7c0] ss:$28 sps:$4 sm:$0xff]   ;;  %v26131_v40 = vld [vmem:[#allocation7 + $0x634] ss:$28 sps:$4 sm:$0xff]  }
 0x4f6   :  { %10439 = vmatprep.mubr.bf16.mxu1 %v29039_v22  ;;  %10124 = vmatprep.subr.bf16.mxu0 %v26076_v47  ;;  %v26132_v47 = vld [vmem:[#allocation7 + $0xd38] ss:$28 sps:$4 sm:$0xff]  }
 0x4f7   :  { %23866 = vmatprep.subr.bf16.mxu1 %v26077_v49  ;;  %v26129_v49 = vld [vmem:[#allocation7 + $0x630] ss:$28 sps:$4 sm:$0xff]  }
 0x4f8   :  { %10125 = vmatpush1.bf16.msra.mxu0 %v26074_v50  ;;  %v26133_v50 = vld [vmem:[#allocation7 + $0xb78] ss:$28 sps:$4 sm:$0xff]  }
 0x4f9   :  { %23867 = vmatpush3.bf16.msra.mxu1 %v26078_v27  ;;  %10126 = vmatprep.subr.bf16.mxu0 %v26081_v51  ;;  %v26136_v27 = vld [vmem:[#allocation7 + $0x66c] ss:$28 sps:$4 sm:$0xff]  }
 0x4fa   :  { %23868 = vmatprep.subr.bf16.mxu1 %v26082_v53  ;;  %v26137_v51 = vld [vmem:[#allocation7 + $0xd70] ss:$28 sps:$4 sm:$0xff]  }
 0x4fb   :  { %v26138_v53 = vld [vmem:[#allocation7 + $0xbb0] ss:$28 sps:$4 sm:$0xff]  }
 0x4fc   :  { %10127 = vmatpush1.bf16.msra.mxu0 %v26079_v52  ;;  %v26134_v52 = vld [vmem:[#allocation7 + $0x668] ss:$28 sps:$4 sm:$0xff]  }
 0x4fd   :  { %23869 = vmatpush3.bf16.msra.mxu1 %v26083_v45  ;;  %10128 = vmatprep.subr.bf16.mxu0 %v26086_v54  ;;  %v26141_v45 = vld [vmem:[#allocation7 + $0x6a4] ss:$28 sps:$4 sm:$0xff]  }
 0x4fe   :  { %23870 = vmatprep.subr.bf16.mxu1 %v26087_v33  ;;  %v26142_v54 = vld [vmem:[#allocation7 + $0xda8] ss:$28 sps:$4 sm:$0xff]  }
 0x4ff   :  { %v26143_v33 = vld [vmem:[#allocation7 + $0xbe8] ss:$28 sps:$4 sm:$0xff]  }
 0x500   :  { %10129 = vmatpush1.bf16.msra.mxu0 %v26084_v58  ;;  %v26139_v58 = vld [vmem:[#allocation7 + $0x6a0] ss:$28 sps:$4 sm:$0xff]  }
 0x501   :  { %23871 = vmatpush3.bf16.msra.mxu1 %v26088_v46  ;;  %10130 = vmatprep.subr.bf16.mxu0 %v26091_v62  ;;  %v26146_v46 = vld [vmem:[#allocation7 + $0x6dc] ss:$28 sps:$4 sm:$0xff]  }
 0x502   :  { %23872 = vmatprep.subr.bf16.mxu1 %v26092_v11  ;;  %v26147_v62 = vld [vmem:[#allocation7 + $0xde0] ss:$28 sps:$4 sm:$0xff]  }
 0x503   :  { %v26148_v11 = vld [vmem:[#allocation7 + $0xc20] ss:$28 sps:$4 sm:$0xff]  }
 0x504   :  { %10131 = vmatpush1.bf16.msra.mxu0 %v26089_v63  ;;  %v26144_v63 = vld [vmem:[#allocation7 + $0x6d8] ss:$28 sps:$4 sm:$0xff]  }
 0x505   :  { %23873 = vmatpush3.bf16.msra.mxu1 %v26093_v0  ;;  %10132 = vmatprep.subr.bf16.mxu0 %v26096_v57  ;;  %v26151_v0 = vld [vmem:[#allocation7 + $0x714] ss:$28 sps:$4 sm:$0xff]  }
 0x506   :  { %23874 = vmatprep.subr.bf16.mxu1 %v26097_v2  ;;  %v26149_v57 = vld [vmem:[#allocation7 + $0x710] ss:$28 sps:$4 sm:$0xff]   ;;  %v26153_v2 = vld [vmem:[#allocation7 + $0xe18] ss:$28 sps:$4 sm:$0xff]  }
 0x508   :  { %10133 = vmatpush1.bf16.msra.mxu0 %v26094_v44  ;;  %v26152_v44 = vld [vmem:[#allocation7 + $0xfd8] ss:$28 sps:$4 sm:$0xff]  }
 0x509   :  { %23875 = vmatpush3.bf16.msra.mxu1 %v26098_v3  ;;  %10134 = vmatprep.subr.bf16.mxu0 %v26101_v56  ;;  %v26156_v3 = vld [vmem:[#allocation7 + $0x74c] ss:$28 sps:$4 sm:$0xff]  }
 0x50a   :  { %23876 = vmatprep.subr.bf16.mxu1 %v26102_v61  ;;  %v26154_v56 = vld [vmem:[#allocation7 + $0x748] ss:$28 sps:$4 sm:$0xff]   ;;  %v26157_v61 = vld [vmem:[#allocation7 + $0x1010] ss:$28 sps:$4 sm:$0xff]  }
 0x50c   :  { %10135 = vmatpush1.bf16.msra.mxu0 %v26099_v4  ;;  %v26158_v4 = vld [vmem:[#allocation7 + $0xe50] ss:$28 sps:$4 sm:$0xff]  }
 0x50d   :  { %23877 = vmatpush3.bf16.msra.mxu1 %v26103_v6  ;;  %10136 = vmatprep.subr.bf16.mxu0 %v26106_v12  ;;  %v26161_v6 = vld [vmem:[#allocation7 + $0x784] ss:$28 sps:$4 sm:$0xff]  }
 0x50e   :  { %23878 = vmatprep.subr.bf16.mxu1 %v26107_v17  ;;  %v26162_v12 = vld [vmem:[#allocation7 + $0x1048] ss:$28 sps:$4 sm:$0xff]   ;;  %v26159_v17 = vld [vmem:[#allocation7 + $0x780] ss:$28 sps:$4 sm:$0xff]  }
 0x510   :  { %10137 = vmatpush1.bf16.msra.mxu0 %v26104_v18  ;;  %v26166_v18 = vld [vmem:[#allocation7 + $0x7bc] ss:$28 sps:$4 sm:$0xff]  }
 0x511   :  { %23879 = vmatpush3.bf16.msra.mxu1 %v26108_v23  ;;  %10138 = vmatprep.subr.bf16.mxu0 %v26111_v24  ;;  %v26164_v23 = vld [vmem:[#allocation7 + $0x7b8] ss:$28 sps:$4 sm:$0xff]   ;;  %v26167_v24 = vld [vmem:[#allocation7 + $0x1080] ss:$28 sps:$4 sm:$0xff]  }
 0x512   :  { %23886 = vmatprep.subr.bf16.mxu1 %v26112_v30  ;;  %v26168_v30 = vld [vmem:[#allocation7 + $0xec0] ss:$28 sps:$4 sm:$0xff]  }
 0x514   :  { %10440 = vmatmul.mubr.bf16.vlgmr.msra.gmra.mrb[24].mxu1 %v29055_v55  ;;  %10139 = vmatpush1.bf16.msra.mxu0 %v26109_v25  ;;  %v26169_v25 = vld [vmem:[#allocation7 + $0x7f0] ss:$28 sps:$4 sm:$0xff]  }
 0x515   :  { %23887 = vmatpush3.bf16.msra.mxu1 %v26113_v13  ;;  %10479 = vmatprep.mubr.bf16.mxu1 %v29058_v41  ;;  %v26172_v13 = vld [vmem:[#allocation7 + $0x10b8] ss:$28 sps:$4 sm:$0xff]  }
 0x516   :  { %10140 = vmatprep.subr.bf16.mxu0 %v26116_v10  ;;  %23888 = vmatprep.subr.bf16.mxu1 %v26117_v28  ;;  %v26173_v10 = vld [vmem:[#allocation7 + $0xef8] ss:$28 sps:$4 sm:$0xff]   ;;  %v26176_v28 = vld [vmem:[#allocation7 + $0x82c] ss:$28 sps:$4 sm:$0xff]  }
 0x518   :  { %10141 = vmatpush1.bf16.msra.mxu0 %v26114_v29  ;;  %v26174_v29 = vld [vmem:[#allocation7 + $0x828] ss:$28 sps:$4 sm:$0xff]  }
 0x519   :  { %23889 = vmatpush3.bf16.msra.mxu1 %v26118_v31  ;;  %10142 = vmatprep.subr.bf16.mxu0 %v26121_v42  ;;  %v26177_v31 = vld [vmem:[#allocation7 + $0x10f0] ss:$28 sps:$4 sm:$0xff]  }
 0x51a   :  { %23890 = vmatprep.subr.bf16.mxu1 %v26122_v43  ;;  %v26178_v42 = vld [vmem:[#allocation7 + $0xf30] ss:$28 sps:$4 sm:$0xff]   ;;  %v26181_v43 = vld [vmem:[#allocation7 + $0x864] ss:$28 sps:$4 sm:$0xff]  }
 0x51c   :  { %10143 = vmatpush1.bf16.msra.mxu0 %v26119_v5  ;;  %v26182_v5 = vld [vmem:[#allocation7 + $0x1128] ss:$28 sps:$4 sm:$0xff]  }
 0x51d   :  { %23891 = vmatpush3.bf16.msra.mxu1 %v26123_v32  ;;  %10144 = vmatprep.subr.bf16.mxu0 %v26126_v34  ;;  %v26179_v32 = vld [vmem:[#allocation7 + $0x860] ss:$28 sps:$4 sm:$0xff]   ;;  %v26183_v34 = vld [vmem:[#allocation7 + $0xf68] ss:$28 sps:$4 sm:$0xff]  }
 0x51e   :  { %23892 = vmatprep.subr.bf16.mxu1 %v26127_v60  ;;  %v26186_v60 = vld [vmem:[#allocation7 + $0x89c] ss:$28 sps:$4 sm:$0xff]  }
 0x520   :  { %10145 = vmatpush1.bf16.msra.mxu0 %v26124_v35  ;;  %v26187_v35 = vld [vmem:[#allocation7 + $0x1160] ss:$28 sps:$4 sm:$0xff]  }
 0x521   :  { %23893 = vmatpush3.bf16.msra.mxu1 %v26128_v9  ;;  %10146 = vmatprep.subr.bf16.mxu0 %v26131_v40  ;;  %v26184_v9 = vld [vmem:[#allocation7 + $0x898] ss:$28 sps:$4 sm:$0xff]   ;;  %v26188_v40 = vld [vmem:[#allocation7 + $0xfa0] ss:$28 sps:$4 sm:$0xff]  }
 0x522   :  { %23894 = vmatprep.subr.bf16.mxu1 %v26132_v47  ;;  %v26191_v47 = vld [vmem:[#allocation7 + $0x8d4] ss:$28 sps:$4 sm:$0xff]  }
 0x524   :  { %10147 = vmatpush1.bf16.msra.mxu0 %v26129_v49  ;;  %v26189_v49 = vld [vmem:[#allocation7 + $0x8d0] ss:$28 sps:$4 sm:$0xff]  }
 0x525   :  { %23895 = vmatpush3.bf16.msra.mxu1 %v26133_v50  ;;  %10148 = vmatprep.subr.bf16.mxu0 %v26136_v27  ;;  %v26192_v50 = vld [vmem:[#allocation7 + $0x1358] ss:$28 sps:$4 sm:$0xff]  }
 0x526   :  { %23896 = vmatprep.subr.bf16.mxu1 %v26137_v51  ;;  %v26193_v27 = vld [vmem:[#allocation7 + $0x1198] ss:$28 sps:$4 sm:$0xff]   ;;  %v26196_v51 = vld [vmem:[#allocation7 + $0x90c] ss:$28 sps:$4 sm:$0xff]  }
 0x528   :  { %10149 = vmatpush1.bf16.msra.mxu0 %v26134_v52  ;;  %v26194_v52 = vld [vmem:[#allocation7 + $0x908] ss:$28 sps:$4 sm:$0xff]  }
 0x529   :  { %23897 = vmatpush3.bf16.msra.mxu1 %v26138_v53  ;;  %10150 = vmatprep.subr.bf16.mxu0 %v26141_v45  ;;  %v26197_v53 = vld [vmem:[#allocation7 + $0x1390] ss:$28 sps:$4 sm:$0xff]  }
 0x52a   :  { %23898 = vmatprep.subr.bf16.mxu1 %v26142_v54  ;;  %v26198_v45 = vld [vmem:[#allocation7 + $0x11d0] ss:$28 sps:$4 sm:$0xff]   ;;  %v26201_v54 = vld [vmem:[#allocation7 + $0x944] ss:$28 sps:$4 sm:$0xff]  }
 0x52c   :  { %10151 = vmatpush1.bf16.msra.mxu0 %v26139_v58  ;;  %v26199_v58 = vld [vmem:[#allocation7 + $0x940] ss:$28 sps:$4 sm:$0xff]  }
 0x52d   :  { %23899 = vmatpush3.bf16.msra.mxu1 %v26143_v33  ;;  %10152 = vmatprep.subr.bf16.mxu0 %v26146_v46  ;;  %v26202_v33 = vld [vmem:[#allocation7 + $0x13c8] ss:$28 sps:$4 sm:$0xff]  }
 0x52e   :  { %23900 = vmatprep.subr.bf16.mxu1 %v26147_v62  ;;  %v26203_v46 = vld [vmem:[#allocation7 + $0x1208] ss:$28 sps:$4 sm:$0xff]   ;;  %v26206_v62 = vld [vmem:[#allocation7 + $0x97c] ss:$28 sps:$4 sm:$0xff]  }
 0x530   :  { %10153 = vmatpush1.bf16.msra.mxu0 %v26144_v63  ;;  %v26204_v63 = vld [vmem:[#allocation7 + $0x978] ss:$28 sps:$4 sm:$0xff]  }
 0x531   :  { %23901 = vmatpush3.bf16.msra.mxu1 %v26148_v11  ;;  %10163 = vmatprep.subr.bf16.mxu0 %v26151_v0  ;;  %v26207_v11 = vld [vmem:[#allocation7 + $0x1400] ss:$28 sps:$4 sm:$0xff]  }
 0x532   :  { %23908 = vmatprep.subr.bf16.mxu1 %v26152_v44  ;;  %v26208_v0 = vld [vmem:[#allocation7 + $0x1240] ss:$28 sps:$4 sm:$0xff]   ;;  %v26209_v44 = vld [vmem:[#allocation7 + $0x9b0] ss:$28 sps:$4 sm:$0xff]  }
 0x533   :  { %10155 = vmatmul.mubr.bf16.vlgmr.msra.gmra.mrb[16].mxu0 %v29036_v21  ;;  %v26163_v21 = vld [vmem:[#allocation7 + $0xe88] ss:$28 sps:$4 sm:$0xff]  }
 0x534   :  { %10480 = vmatmul.mubr.bf16.vlgmr.msra.gmra.mrb[28].mxu1 %v29082_v48  ;;  %10164 = vmatpush1.bf16.msra.mxu0 %v26149_v57  ;;  %v26211_v57 = vld [vmem:[#allocation7 + $0x9b4] ss:$28 sps:$4 sm:$0xff]  }
 0x535   :  { %10195 = vmatprep.mubr.bf16.mxu0 %v29039_v22  ;;  %23909 = vmatpush3.bf16.msra.mxu1 %v26153_v2  ;;  %v26171_v22 = vld [vmem:[#allocation7 + $0x7f4] ss:$28 sps:$4 sm:$0xff]  }
 0x536   :  { %10519 = vmatprep.mubr.bf16.mxu1 %v29085_v59  ;;  %10165 = vmatprep.subr.bf16.mxu0 %v26156_v3  ;;  %v26212_v2 = vld [vmem:[#allocation7 + $0x1438] ss:$28 sps:$4 sm:$0xff]  }
 0x537   :  { %23910 = vmatprep.subr.bf16.mxu1 %v26157_v61  ;;  %v26213_v3 = vld [vmem:[#allocation7 + $0x1278] ss:$28 sps:$4 sm:$0xff]   ;;  %v26214_v61 = vld [vmem:[#allocation7 + $0x9e8] ss:$28 sps:$4 sm:$0xff]  }
 0x538   :  { %10166 = vmatpush1.bf16.msra.mxu0 %v26154_v56  ;;  %v26216_v56 = vld [vmem:[#allocation7 + $0x9ec] ss:$28 sps:$4 sm:$0xff]  }
 0x539   :  { %23911 = vmatpush3.bf16.msra.mxu1 %v26158_v4  ;;  %10167 = vmatprep.subr.bf16.mxu0 %v26161_v6  ;;  %v26217_v4 = vld [vmem:[#allocation7 + $0x1470] ss:$28 sps:$4 sm:$0xff]  }
 0x53a   :  { %23912 = vmatprep.subr.bf16.mxu1 %v26162_v12  ;;  %v26218_v6 = vld [vmem:[#allocation7 + $0x12b0] ss:$28 sps:$4 sm:$0xff]   ;;  %v26221_v12 = vld [vmem:[#allocation7 + $0xa24] ss:$28 sps:$4 sm:$0xff]  }
 0x53c   :  { %10168 = vmatpush1.bf16.msra.mxu0 %v26159_v17  ;;  %v26222_v17 = vld [vmem:[#allocation7 + $0x14a8] ss:$28 sps:$4 sm:$0xff]  }
 0x53d   :  { %23913 = vmatpush3.bf16.msra.mxu1 %v26163_v21  ;;  %10169 = vmatprep.subr.bf16.mxu0 %v26166_v18  ;;  %v26219_v21 = vld [vmem:[#allocation7 + $0xa20] ss:$28 sps:$4 sm:$0xff]   ;;  %v26223_v18 = vld [vmem:[#allocation7 + $0x12e8] ss:$28 sps:$4 sm:$0xff]  }
 0x53e   :  { %23914 = vmatprep.subr.bf16.mxu1 %v26167_v24  ;;  %v26227_v24 = vld [vmem:[#allocation7 + $0x14e0] ss:$28 sps:$4 sm:$0xff]  }
 0x540   :  { %10170 = vmatpush1.bf16.msra.mxu0 %v26164_v23  ;;  %v26226_v23 = vld [vmem:[#allocation7 + $0xa5c] ss:$28 sps:$4 sm:$0xff]  }
 0x541   :  { %23915 = vmatpush3.bf16.msra.mxu1 %v26168_v30  ;;  %10171 = vmatprep.subr.bf16.mxu0 %v26171_v22  ;;  %v26224_v30 = vld [vmem:[#allocation7 + $0xa58] ss:$28 sps:$4 sm:$0xff]   ;;  %v26228_v22 = vld [vmem:[#allocation7 + $0x1320] ss:$28 sps:$4 sm:$0xff]  }
 0x542   :  { %23916 = vmatprep.subr.bf16.mxu1 %v26172_v13  ;;  %v26229_v13 = vld [vmem:[#allocation7 + $0xa90] ss:$28 sps:$4 sm:$0xff]  }
 0x544   :  { %10172 = vmatpush1.bf16.msra.mxu0 %v26169_v25  ;;  %v26231_v25 = vld [vmem:[#allocation7 + $0xa94] ss:$28 sps:$4 sm:$0xff]  }
 0x545   :  { %23917 = vmatpush3.bf16.msra.mxu1 %v26173_v10  ;;  %10173 = vmatprep.subr.bf16.mxu0 %v26176_v28  ;;  %v26234_v10 = vld [vmem:[#allocation10 + $0x4] ss:$48 sps:$4 sm:$0xff]   ;;  %v26232_v28 = vld [vmem:[#allocation10] ss:$48 sps:$4 sm:$0xff]  }
 0x546   :  { %23918 = vmatprep.subr.bf16.mxu1 %v26177_v31  ;;  %v26240_v31 = vld [vmem:[#allocation10 + $0x64] ss:$48 sps:$4 sm:$0xff]  }
 0x548   :  { %10174 = vmatpush1.bf16.msra.mxu0 %v26174_v29  ;;  %v26237_v29 = vld [vmem:[#allocation7 + $0xacc] ss:$28 sps:$4 sm:$0xff]  }
 0x549   :  { %23919 = vmatpush3.bf16.msra.mxu1 %v26178_v42  ;;  %10175 = vmatprep.subr.bf16.mxu0 %v26181_v43  ;;  %v26235_v42 = vld [vmem:[#allocation7 + $0xac8] ss:$28 sps:$4 sm:$0xff]  }
 0x54a   :  { %23920 = vmatprep.subr.bf16.mxu1 %v26182_v5  ;;  %v26238_v43 = vld [vmem:[#allocation10 + $0x60] ss:$48 sps:$4 sm:$0xff]   ;;  %v26243_v5 = vld [vmem:[#allocation7 + $0xb04] ss:$28 sps:$4 sm:$0xff]  }
 0x54c   :  { %10176 = vmatpush1.bf16.msra.mxu0 %v26179_v32  ;;  %v26246_v32 = vld [vmem:[#allocation10 + $0xc4] ss:$48 sps:$4 sm:$0xff]  }
 0x54d   :  { %23921 = vmatpush3.bf16.msra.mxu1 %v26183_v34  ;;  %10177 = vmatprep.subr.bf16.mxu0 %v26186_v60  ;;  %v26241_v34 = vld [vmem:[#allocation7 + $0xb00] ss:$28 sps:$4 sm:$0xff]   ;;  %v26244_v60 = vld [vmem:[#allocation10 + $0xc0] ss:$48 sps:$4 sm:$0xff]  }
 0x54e   :  { %23922 = vmatprep.subr.bf16.mxu1 %v26187_v35  ;;  %v26249_v35 = vld [vmem:[#allocation7 + $0xb3c] ss:$28 sps:$4 sm:$0xff]  }
 0x550   :  { %10178 = vmatpush1.bf16.msra.mxu0 %v26184_v9  ;;  %v26252_v9 = vld [vmem:[#allocation10 + $0x124] ss:$48 sps:$4 sm:$0xff]  }
 0x551   :  { %23923 = vmatpush3.bf16.msra.mxu1 %v26188_v40  ;;  %10179 = vmatprep.subr.bf16.mxu0 %v26191_v47  ;;  %v26250_v40 = vld [vmem:[#allocation10 + $0x120] ss:$48 sps:$4 sm:$0xff]   ;;  %v26255_v47 = vld [vmem:[#allocation7 + $0xb74] ss:$28 sps:$4 sm:$0xff]  }
 0x552   :  { %23930 = vmatprep.subr.bf16.mxu1 %v26192_v50  ;;  %v26256_v50 = vld [vmem:[#allocation10 + $0x180] ss:$48 sps:$4 sm:$0xff]  }
 0x554   :  { %10520 = vmatmul.mubr.bf16.vlgmr.msra.gmra.mrb[32].mxu1 %v29094_v36  ;;  %10180 = vmatpush1.bf16.msra.mxu0 %v26189_v49  ;;  %v26258_v49 = vld [vmem:[#allocation10 + $0x184] ss:$48 sps:$4 sm:$0xff]  }
 0x555   :  { %23931 = vmatpush3.bf16.msra.mxu1 %v26193_v27  ;;  %10559 = vmatprep.mubr.bf16.mxu1 %v29097_v39  ;;  %v29126_v27 = vld [vmem:[#allocation8] sm:$0xff] }
 0x556   :  { %10181 = vmatprep.subr.bf16.mxu0 %v26196_v51  ;;  %23932 = vmatprep.subr.bf16.mxu1 %v26197_v53  ;;  %v26261_v51 = vld [vmem:[#allocation7 + $0xbac] ss:$28 sps:$4 sm:$0xff]  }
 0x557   :  { %v26259_v53 = vld [vmem:[#allocation7 + $0xba8] ss:$28 sps:$4 sm:$0xff]  }
 0x558   :  { %10182 = vmatpush1.bf16.msra.mxu0 %v26194_v52  ;;  %v26264_v52 = vld [vmem:[#allocation10 + $0x1e4] ss:$48 sps:$4 sm:$0xff]  }
 0x559   :  { %23933 = vmatpush3.bf16.msra.mxu1 %v26198_v45  ;;  %10183 = vmatprep.subr.bf16.mxu0 %v26201_v54  ;;  %v26262_v45 = vld [vmem:[#allocation10 + $0x1e0] ss:$48 sps:$4 sm:$0xff]   ;;  %v26267_v54 = vld [vmem:[#allocation7 + $0xbe4] ss:$28 sps:$4 sm:$0xff]  }
 0x55a   :  { %23934 = vmatprep.subr.bf16.mxu1 %v26202_v33  ;;  %v26270_v33 = vld [vmem:[#allocation10 + $0x244] ss:$48 sps:$4 sm:$0xff]  }
 0x55c   :  { %10184 = vmatpush1.bf16.msra.mxu0 %v26199_v58  ;;  %v6105_v58 = vrot.slane %v29126_v27, %v28976_v14 }
 0x55d   :  { %23935 = vmatpush3.bf16.msra.mxu1 %v26203_v46  ;;  %10185 = vmatprep.subr.bf16.mxu0 %v26206_v62 }
 0x55e   :  { %23936 = vmatprep.subr.bf16.mxu1 %v26207_v11  ;;  %v26265_v11 = vld [vmem:[#allocation7 + $0xbe0] ss:$28 sps:$4 sm:$0xff]  }
 0x560   :  { %10186 = vmatpush1.bf16.msra.mxu0 %v26204_v63 }
 0x561   :  { %23937 = vmatpush3.bf16.msra.mxu1 %v26208_v0  ;;  %10187 = vmatprep.subr.bf16.mxu0 %v26211_v57  ;;  %v26268_v0 = vld [vmem:[#allocation10 + $0x240] ss:$48 sps:$4 sm:$0xff]   ;;  %v6101_v57 = vrot.slane %v29126_v27, %v29003_v15 }
 0x562   :  { %23938 = vmatprep.subr.bf16.mxu1 %v26212_v2 }
 0x564   :  { %10188 = vmatpush1.bf16.msra.mxu0 %v26209_v44 }
 0x565   :  { %23939 = vmatpush3.bf16.msra.mxu1 %v26213_v3  ;;  %10189 = vmatprep.subr.bf16.mxu0 %v26216_v56 }
 0x566   :  { %23940 = vmatprep.subr.bf16.mxu1 %v26217_v4  ;;  %v26273_v4 = vld [vmem:[#allocation7 + $0xc1c] ss:$28 sps:$4 sm:$0xff]  }
 0x568   :  { %10190 = vmatpush1.bf16.msra.mxu0 %v26214_v61 }
 0x569   :  { %23941 = vmatpush3.bf16.msra.mxu1 %v26218_v6  ;;  %10191 = vmatprep.subr.bf16.mxu0 %v26221_v12  ;;  %v6113_v12 = vrot.slane %v29126_v27, %v29008_v37 }
 0x56a   :  { %23942 = vmatprep.subr.bf16.mxu1 %v26222_v17 }
 0x56c   :  { %10192 = vmatpush1.bf16.msra.mxu0 %v26219_v21  ;;  %v26276_v21 = vld [vmem:[#allocation10 + $0x2a4] ss:$48 sps:$4 sm:$0xff]  }
 0x56d   :  { %23943 = vmatpush3.bf16.msra.mxu1 %v26223_v18  ;;  %10193 = vmatprep.subr.bf16.mxu0 %v26226_v23  ;;  %v26271_v18 = vld [vmem:[#allocation7 + $0xc18] ss:$28 sps:$4 sm:$0xff]  }
 0x56e   :  { %23944 = vmatprep.subr.bf16.mxu1 %v26227_v24  ;;  %v26274_v23 = vld [vmem:[#allocation10 + $0x2a0] ss:$48 sps:$4 sm:$0xff]  }
 0x570   :  { %10194 = vmatpush1.bf16.msra.mxu0 %v26224_v30  ;;  %v26279_v30 = vld [vmem:[#allocation7 + $0xc54] ss:$28 sps:$4 sm:$0xff]  }
 0x571   :  { %23945 = vmatpush3.bf16.msra.mxu1 %v26228_v22  ;;  %10204 = vmatprep.subr.bf16.mxu0 %v26231_v25  ;;  %v26282_v22 = vld [vmem:[#allocation10 + $0x304] ss:$48 sps:$4 sm:$0xff]  }
 0x572   :  { %14712 = vmatprep.subr.bf16.mxu1 %v26234_v10  ;;  %v26280_v10 = vld [vmem:[#allocation10 + $0x300] ss:$48 sps:$4 sm:$0xff]  }
 0x573   :  { %10196 = vmatmul.mubr.bf16.vlgmr.msra.gmra.mrb[16].mxu0 %v29055_v55  ;;  %v26247_v55 = vld [vmem:[#allocation7 + $0xb38] ss:$28 sps:$4 sm:$0xff]  }
 0x574   :  { %10560 = vmatmul.mubr.bf16.vlgmr.msra.gmra.mrb[36].mxu1 %v29103_v16  ;;  %10205 = vmatpush1.bf16.msra.mxu0 %v26229_v13  ;;  %v26277_v13 = vld [vmem:[#allocation7 + $0xc50] ss:$28 sps:$4 sm:$0xff]  }
 0x575   :  { %10236 = vmatprep.mubr.bf16.mxu0 %v29058_v41  ;;  %14713 = vmatpush1.bf16.msra.mxu1 %v26232_v28  ;;  %v26253_v41 = vld [vmem:[#allocation7 + $0xb70] ss:$28 sps:$4 sm:$0xff]  }
 0x576   :  { %10206 = vmatprep.subr.bf16.mxu0 %v26237_v29  ;;  %14714 = vmatprep.subr.bf16.mxu1 %v26240_v31  ;;  %v26285_v28 = vld [vmem:[#allocation7 + $0xc8c] ss:$28 sps:$4 sm:$0xff]  }
 0x577   :  { %v26288_v31 = vld [vmem:[#allocation10 + $0x364] ss:$48 sps:$4 sm:$0xff]  }
 0x578   :  { %10207 = vmatpush1.bf16.msra.mxu0 %v26235_v42 }
 0x579   :  { %14715 = vmatpush1.bf16.msra.mxu1 %v26238_v43  ;;  %10208 = vmatprep.subr.bf16.mxu0 %v26243_v5  ;;  %v26283_v43 = vld [vmem:[#allocation7 + $0xc88] ss:$28 sps:$4 sm:$0xff]  }
 0x57a   :  { %14716 = vmatprep.subr.bf16.mxu1 %v26246_v32  ;;  %v26286_v5 = vld [vmem:[#allocation10 + $0x360] ss:$48 sps:$4 sm:$0xff]   ;;  %v26291_v32 = vld [vmem:[#allocation7 + $0xcc4] ss:$28 sps:$4 sm:$0xff]  }
 0x57c   :  { %10209 = vmatpush1.bf16.msra.mxu0 %v26241_v34  ;;  %v26294_v34 = vld [vmem:[#allocation10 + $0x3c4] ss:$48 sps:$4 sm:$0xff]  }
 0x57d   :  { %14717 = vmatpush1.bf16.msra.mxu1 %v26244_v60  ;;  %10210 = vmatprep.subr.bf16.mxu0 %v26249_v35  ;;  %v26289_v60 = vld [vmem:[#allocation7 + $0xcc0] ss:$28 sps:$4 sm:$0xff]  }
 0x57e   :  { %14718 = vmatprep.subr.bf16.mxu1 %v26252_v9  ;;  %v26292_v9 = vld [vmem:[#allocation10 + $0x3c0] ss:$48 sps:$4 sm:$0xff]  }
 0x580   :  { %10211 = vmatpush1.bf16.msra.mxu0 %v26247_v55 }
 0x581   :  { %14719 = vmatpush1.bf16.msra.mxu1 %v26250_v40  ;;  %10212 = vmatprep.subr.bf16.mxu0 %v26255_v47  ;;  %v26297_v40 = vld [vmem:[#allocation7 + $0xcfc] ss:$28 sps:$4 sm:$0xff]  }
 0x582   :  { %14720 = vmatprep.subr.bf16.mxu1 %v26258_v49  ;;  %v26300_v47 = vld [vmem:[#allocation10 + $0x424] ss:$48 sps:$4 sm:$0xff]   ;;  %v26295_v49 = vld [vmem:[#allocation7 + $0xcf8] ss:$28 sps:$4 sm:$0xff]  }
 0x584   :  { %10213 = vmatpush1.bf16.msra.mxu0 %v26253_v41  ;;  %v26298_v41 = vld [vmem:[#allocation10 + $0x420] ss:$48 sps:$4 sm:$0xff]  }
 0x585   :  { %14721 = vmatpush1.bf16.msra.mxu1 %v26256_v50  ;;  %10214 = vmatprep.subr.bf16.mxu0 %v26261_v51  ;;  %v26303_v50 = vld [vmem:[#allocation7 + $0xd34] ss:$28 sps:$4 sm:$0xff]   ;;  %v26306_v51 = vld [vmem:[#allocation10 + $0x484] ss:$48 sps:$4 sm:$0xff]  }
 0x586   :  { %v9828_v46 = vpop.f32.mrb[12].mxu0  ;;  %14722 = vmatprep.subr.bf16.mxu1 %v26264_v52 }
 0x587   :  { %v29130_v62 = vpop.f32.mrb[12].mxu1  ;;  %v9830_v63 = vpop.f32.mrb[13].mxu0  ;;  %v24096_v24 = vadd.f32 %v9828_v46, %v6101_v57  ;;  %v26315_v57 = vld [vmem:[#allocation7 + $0xda4] ss:$28 sps:$4 sm:$0xff]  }
 0x588   :  { %v24097_v44 = vadd.f32 %v9830_v63, %v6105_v58  ;;  %v10076_v2 = vpop.f32.mrb[13].mxu1  ;;  %v9832_v3 = vpop.f32.mrb[14].mxu0  ;;  %10215 = vmatpush1.bf16.msra.mxu0 %v26259_v53  ;;  %v26301_v53 = vld [vmem:[#allocation7 + $0xd30] ss:$28 sps:$4 sm:$0xff]   ;;  %v26307_v63 = vld [vmem:[#allocation7 + $0xd68] ss:$28 sps:$4 sm:$0xff]  }
 0x589   :  { %v10078_v56 = vpop.f32.mrb[14].mxu1  ;;  %14723 = vmatpush1.bf16.msra.mxu1 %v26262_v45  ;;  %v9833_v61 = vpop.f32.mrb[15].mxu0  ;;  %10216 = vmatprep.subr.bf16.mxu0 %v26267_v54  ;;  %v24099_v25 = vadd.f32 %v10076_v2, %v6113_v12  ;;  %v22450_v29 = vmul.f32 -1.442695, %v24096_v24  ;;  %v26304_v45 = vld [vmem:[#allocation10 + $0x480] ss:$48 sps:$4 sm:$0xff]  }
 0x58a   :  { %v22451_v6 = vmul.f32 -1.442695, %v24097_v44  ;;  %v10079_v17 = vpop.f32.mrb[15].mxu1  ;;  %14724 = vmatprep.subr.bf16.mxu1 %v26270_v33  ;;  %v26309_v58 = vld [vmem:[#allocation7 + $0xd6c] ss:$28 sps:$4 sm:$0xff]  }
 0x58b   :  { %v22453_v42 = vmul.f32 -1.442695, %v24099_v25  ;;  %v26312_v33 = vld [vmem:[#allocation10 + $0x4e4] ss:$48 sps:$4 sm:$0xff]   ;;  %v26319_v24 = vld [vmem:[#allocation7 + $0xdd8] ss:$28 sps:$4 sm:$0xff]  }
 0x58c   :  { %10217 = vmatpush1.bf16.msra.mxu0 %v26265_v11  ;;  %28389 = vpow2.f32 %v22451_v6  ;;  %v26318_v2 = vld [vmem:[#allocation10 + $0x544] ss:$48 sps:$4 sm:$0xff]  }
 0x58d   :  { %14725 = vmatpush1.bf16.msra.mxu1 %v26268_v0  ;;  %10218 = vmatprep.subr.bf16.mxu0 %v26273_v4  ;;  %28391 = vpow2.f32 %v22450_v29  ;;  %v26310_v0 = vld [vmem:[#allocation10 + $0x4e0] ss:$48 sps:$4 sm:$0xff]   ;;  %v26313_v56 = vld [vmem:[#allocation7 + $0xda0] ss:$28 sps:$4 sm:$0xff]  }
 0x58e   :  { %14726 = vmatprep.subr.bf16.mxu1 %v26276_v21  ;;  %28393 = vpow2.f32 %v22453_v42  ;;  %v26316_v4 = vld [vmem:[#allocation10 + $0x540] ss:$48 sps:$4 sm:$0xff]   ;;  %v26324_v17 = vld [vmem:[#allocation10 + $0x5a4] ss:$48 sps:$4 sm:$0xff]  }
 0x58f   :  { %v26321_v6 = vld [vmem:[#allocation7 + $0xddc] ss:$28 sps:$4 sm:$0xff]   ;;  %v26333_v29 = vld [vmem:[#allocation7 + $0xe4c] ss:$28 sps:$4 sm:$0xff]  }
 0x590   :  { %10219 = vmatpush1.bf16.msra.mxu0 %v26271_v18  ;;  %v26330_v25 = vld [vmem:[#allocation10 + $0x604] ss:$48 sps:$4 sm:$0xff]  }
 0x591   :  { %14727 = vmatpush1.bf16.msra.mxu1 %v26274_v23  ;;  %10220 = vmatprep.subr.bf16.mxu0 %v26279_v30  ;;  %v26322_v30 = vld [vmem:[#allocation10 + $0x5a0] ss:$48 sps:$4 sm:$0xff]  }
 0x592   :  { %14728 = vmatprep.subr.bf16.mxu1 %v26282_v22  ;;  %v26327_v22 = vld [vmem:[#allocation7 + $0xe14] ss:$28 sps:$4 sm:$0xff]  }
 0x594   :  { %10221 = vmatpush1.bf16.msra.mxu0 %v26277_v13  ;;  %v26325_v13 = vld [vmem:[#allocation7 + $0xe10] ss:$28 sps:$4 sm:$0xff]  }
 0x595   :  { %14729 = vmatpush1.bf16.msra.mxu1 %v26280_v10  ;;  %10222 = vmatprep.subr.bf16.mxu0 %v26285_v28  ;;  %v26328_v28 = vld [vmem:[#allocation10 + $0x600] ss:$48 sps:$4 sm:$0xff]  }
 0x596   :  { %14730 = vmatprep.subr.bf16.mxu1 %v26288_v31  ;;  %v28390_v35 = vpop.eup %28389 }
 0x597   :  { %v10589_v55 = vadd.f32 1.0, %v28390_v35  ;;  %v28392_v52 = vpop.eup %28391  ;;  %v26342_v35 = vld [vmem:[#allocation10 + $0x6c4] ss:$48 sps:$4 sm:$0xff]  }
 0x598   :  { %10223 = vmatpush1.bf16.msra.mxu0 %v26283_v43  ;;  %v28394_v54 = vpop.eup %28393  ;;  %v10588_v46 = vadd.f32 1.0, %v28392_v52  ;;  %v26331_v43 = vld [vmem:[#allocation7 + $0xe48] ss:$28 sps:$4 sm:$0xff]  }
 0x599   :  { %14731 = vmatpush1.bf16.msra.mxu1 %v26286_v5  ;;  %10224 = vmatprep.subr.bf16.mxu0 %v26291_v32  ;;  %28395 = vrcp.f32 %v10589_v55  ;;  %v10591_v11 = vadd.f32 1.0, %v28394_v54  ;;  %v26334_v5 = vld [vmem:[#allocation10 + $0x660] ss:$48 sps:$4 sm:$0xff]   ;;  %v26336_v32 = vld [vmem:[#allocation10 + $0x664] ss:$48 sps:$4 sm:$0xff]  }
 0x59a   :  { %14732 = vmatprep.subr.bf16.mxu1 %v26294_v34  ;;  %28397 = vrcp.f32 %v10588_v46  ;;  %v26340_v55 = vld [vmem:[#allocation10 + $0x6c0] ss:$48 sps:$4 sm:$0xff]   ;;  %v6125_v46 = vrot.slane %v29126_v27, %v29066_v20 }
 0x59b   :  { %28399 = vrcp.f32 %v10591_v11  ;;  %v26357_v52 = vld [vmem:[#allocation7 + $0xf2c] ss:$28 sps:$4 sm:$0xff]  }
 0x59c   :  { %10225 = vmatpush1.bf16.msra.mxu0 %v26289_v60  ;;  %v26339_v60 = vld [vmem:[#allocation7 + $0xe84] ss:$28 sps:$4 sm:$0xff]   ;;  %v26358_v54 = vld [vmem:[#allocation10 + $0x7e0] ss:$48 sps:$4 sm:$0xff]  }
 0x59d   :  { %14733 = vmatpush1.bf16.msra.mxu1 %v26292_v9  ;;  %10226 = vmatprep.subr.bf16.mxu0 %v26297_v40  ;;  %v26337_v9 = vld [vmem:[#allocation7 + $0xe80] ss:$28 sps:$4 sm:$0xff]  }
 0x59e   :  { %14734 = vmatprep.subr.bf16.mxu1 %v26300_v47  ;;  %v26348_v40 = vld [vmem:[#allocation10 + $0x724] ss:$48 sps:$4 sm:$0xff]   ;;  %v26343_v47 = vld [vmem:[#allocation7 + $0xeb8] ss:$28 sps:$4 sm:$0xff]  }
 0x5a0   :  { %10227 = vmatpush1.bf16.msra.mxu0 %v26295_v49  ;;  %v26346_v49 = vld [vmem:[#allocation10 + $0x720] ss:$48 sps:$4 sm:$0xff]  }
 0x5a1   :  { %14735 = vmatpush1.bf16.msra.mxu1 %v26298_v41  ;;  %10228 = vmatprep.subr.bf16.mxu0 %v26303_v50  ;;  %v26351_v41 = vld [vmem:[#allocation7 + $0xef4] ss:$28 sps:$4 sm:$0xff]   ;;  %v26354_v50 = vld [vmem:[#allocation10 + $0x784] ss:$48 sps:$4 sm:$0xff]  }
 0x5a2   :  { %14736 = vmatprep.subr.bf16.mxu1 %v26306_v51  ;;  %v26352_v51 = vld [vmem:[#allocation10 + $0x780] ss:$48 sps:$4 sm:$0xff]  }
 0x5a3   :  { %v28396_v44 = vpop.eup %28395 }
 0x5a4   :  { %10229 = vmatpush1.bf16.msra.mxu0 %v26301_v53  ;;  %v29136_v3 = vpack.c.bf16 %v28396_v44, %v28396_v44  ;;  %v28398_v10 = vpop.eup %28397  ;;  %v26360_v53 = vld [vmem:[#allocation10 + $0x7e4] ss:$48 sps:$4 sm:$0xff]   ;;  %v6109_v44 = vrot.slane %v29126_v27, %v29023_v1 }
 0x5a5   :  { %14737 = vmatpush1.bf16.msra.mxu1 %v26304_v45  ;;  %10230 = vmatprep.subr.bf16.mxu0 %v26309_v58  ;;  %v28400_v31 = vpop.eup %28399  ;;  %v29141_v42 = vpack.c.bf16 %v28398_v10, %v28398_v10  ;;  %v26355_v45 = vld [vmem:[#allocation7 + $0xf28] ss:$28 sps:$4 sm:$0xff]   ;;  %v26378_v27 = vld [vmem:[#allocation10 + $0x904] ss:$48 sps:$4 sm:$0xff]  }
 0x5a6   :  { %14738 = vmatprep.subr.bf16.mxu1 %v26312_v33  ;;  %14744 = vmatprep.mubr.bf16.mxu1 %v29136_v3  ;;  %v29144_v34 = vpack.c.bf16 %v28400_v31, %v28400_v31  ;;  %v26363_v58 = vld [vmem:[#allocation7 + $0xf64] ss:$28 sps:$4 sm:$0xff]   ;;  %v26366_v33 = vld [vmem:[#allocation10 + $0x844] ss:$48 sps:$4 sm:$0xff]  }
 0x5a7   :  { %v23836_v61 = vpop.f32.mrb[16].mxu1  ;;  %v26384_v10 = vld [vmem:[#allocation10 + $0x964] ss:$48 sps:$4 sm:$0xff]   ;;  %v26387_v31 = vld [vmem:[#allocation7 + $0x1044] ss:$28 sps:$4 sm:$0xff]  }
 0x5a8   :  { %v23837_v12 = vpop.f32.mrb[17].mxu1  ;;  %10231 = vmatpush1.bf16.msra.mxu0 %v26307_v63  ;;  %v26361_v63 = vld [vmem:[#allocation7 + $0xf60] ss:$28 sps:$4 sm:$0xff]  }
 0x5a9   :  { %v29139_v21 = vadd.f32 %v23837_v12, %v23836_v61  ;;  %v23839_v18 = vpop.f32.mrb[18].mxu1  ;;  %14739 = vmatpush1.bf16.msra.mxu1 %v26310_v0  ;;  %10232 = vmatprep.subr.bf16.mxu0 %v26315_v57  ;;  %v26364_v0 = vld [vmem:[#allocation10 + $0x840] ss:$48 sps:$4 sm:$0xff]  }
 0x5aa   :  { %v23840_v23 = vpop.f32.mrb[19].mxu1  ;;  %14740 = vmatprep.subr.bf16.mxu1 %v26318_v2  ;;  %v26369_v57 = vld [vmem:[#allocation7 + $0xf9c] ss:$28 sps:$4 sm:$0xff]  }
 0x5ab   :  { %v10362_v61 = vadd.f32 %v29139_v21, %v6125_v46  ;;  %v26370_v23 = vld [vmem:[#allocation10 + $0x8a0] ss:$48 sps:$4 sm:$0xff]  }
 0x5ac   :  { %10233 = vmatpush1.bf16.msra.mxu0 %v26313_v56  ;;  %v26372_v56 = vld [vmem:[#allocation10 + $0x8a4] ss:$48 sps:$4 sm:$0xff]   ;;  %v26376_v21 = vld [vmem:[#allocation10 + $0x900] ss:$48 sps:$4 sm:$0xff]  }
 0x5ad   :  { %14741 = vmatpush1.bf16.msra.mxu1 %v26316_v4  ;;  %10234 = vmatprep.subr.bf16.mxu0 %v26321_v6 }
 0x5ae   :  { %14742 = vmatprep.subr.bf16.mxu1 %v26324_v17  ;;  %v26367_v17 = vld [vmem:[#allocation7 + $0xf98] ss:$28 sps:$4 sm:$0xff]  }
 0x5b0   :  { %10235 = vmatpush1.bf16.msra.mxu0 %v26319_v24  ;;  %v26375_v24 = vld [vmem:[#allocation7 + $0xfd4] ss:$28 sps:$4 sm:$0xff]  }
 0x5b1   :  { %14743 = vmatpush1.bf16.msra.mxu1 %v26322_v30  ;;  %10245 = vmatprep.subr.bf16.mxu0 %v26327_v22  ;;  %v24098_v30 = vadd.f32 %v29130_v62, %v6109_v44  ;;  %v26373_v22 = vld [vmem:[#allocation7 + $0xfd0] ss:$28 sps:$4 sm:$0xff]  }
 0x5b2   :  { %14753 = vmatprep.subr.bf16.mxu1 %v26330_v25  ;;  %v26381_v25 = vld [vmem:[#allocation7 + $0x100c] ss:$28 sps:$4 sm:$0xff]  }
 0x5b3   :  { %10237 = vmatmul.mubr.bf16.vlgmr.msra.gmra.mrb[16].mxu0 %v29082_v48  ;;  %v26345_v48 = vld [vmem:[#allocation7 + $0xebc] ss:$28 sps:$4 sm:$0xff]  }
 0x5b4   :  { %14745 = vmatmul.mubr.bf16.vlgmr.msra.gmra.mrb[40].mxu1 %v29141_v42  ;;  %10246 = vmatpush1.bf16.msra.mxu0 %v26325_v13  ;;  %v22452_v13 = vmul.f32 -1.442695, %v24098_v30  ;;  %v26390_v62 = vld [vmem:[#allocation10 + $0x9c4] ss:$48 sps:$4 sm:$0xff]  }
 0x5b5   :  { %10277 = vmatprep.mubr.bf16.mxu0 %v29085_v59  ;;  %14754 = vmatpush1.bf16.msra.mxu1 %v26328_v28  ;;  %v26349_v59 = vld [vmem:[#allocation7 + $0xef0] ss:$28 sps:$4 sm:$0xff]   ;;  %v26379_v28 = vld [vmem:[#allocation7 + $0x1008] ss:$28 sps:$4 sm:$0xff]   ;;  %v26427_v30 = vld [vmem:[#allocation7 + $0x1200] ss:$28 sps:$4 sm:$0xff]  }
 0x5b6   :  { %14785 = vmatprep.mubr.bf16.mxu1 %v29144_v34  ;;  %10247 = vmatprep.subr.bf16.mxu0 %v26333_v29  ;;  %v26382_v29 = vld [vmem:[#allocation10 + $0x960] ss:$48 sps:$4 sm:$0xff]   ;;  %28401 = vpow2.f32 %v22452_v13 }
 0x5b7   :  { %14755 = vmatprep.subr.bf16.mxu1 %v26336_v32  ;;  %v26393_v32 = vld [vmem:[#allocation7 + $0x107c] ss:$28 sps:$4 sm:$0xff]   ;;  %v26438_v13 = vld [vmem:[#allocation7 + $0x12ac] ss:$28 sps:$4 sm:$0xff]  }
 0x5b8   :  { %10248 = vmatpush1.bf16.msra.mxu0 %v26331_v43  ;;  %v26385_v43 = vld [vmem:[#allocation7 + $0x1040] ss:$28 sps:$4 sm:$0xff]  }
 0x5b9   :  { %14756 = vmatpush1.bf16.msra.mxu1 %v26334_v5  ;;  %10249 = vmatprep.subr.bf16.mxu0 %v26339_v60  ;;  %v26388_v5 = vld [vmem:[#allocation10 + $0x9c0] ss:$48 sps:$4 sm:$0xff]   ;;  %v26396_v60 = vld [vmem:[#allocation10 + $0xa24] ss:$48 sps:$4 sm:$0xff]  }
 0x5ba   :  { %14757 = vmatprep.subr.bf16.mxu1 %v26342_v35  ;;  %v26391_v35 = vld [vmem:[#allocation7 + $0x1078] ss:$28 sps:$4 sm:$0xff]  }
 0x5bc   :  { %10250 = vmatpush1.bf16.msra.mxu0 %v26337_v9  ;;  %v26394_v9 = vld [vmem:[#allocation10 + $0xa20] ss:$48 sps:$4 sm:$0xff]  }
 0x5bd   :  { %14758 = vmatpush1.bf16.msra.mxu1 %v26340_v55  ;;  %10251 = vmatprep.subr.bf16.mxu0 %v26345_v48  ;;  %v26399_v55 = vld [vmem:[#allocation7 + $0x10b4] ss:$28 sps:$4 sm:$0xff]   ;;  %v26402_v48 = vld [vmem:[#allocation10 + $0xa84] ss:$48 sps:$4 sm:$0xff]  }
 0x5be   :  { %14759 = vmatprep.subr.bf16.mxu1 %v26348_v40 }
 0x5c0   :  { %10252 = vmatpush1.bf16.msra.mxu0 %v26343_v47  ;;  %v28402_v40 = vpop.eup %28401  ;;  %v26397_v47 = vld [vmem:[#allocation7 + $0x10b0] ss:$28 sps:$4 sm:$0xff]  }
 0x5c1   :  { %14760 = vmatpush1.bf16.msra.mxu1 %v26346_v49  ;;  %10253 = vmatprep.subr.bf16.mxu0 %v26351_v41  ;;  %v26400_v49 = vld [vmem:[#allocation10 + $0xa80] ss:$48 sps:$4 sm:$0xff]  }
 0x5c2   :  { %14761 = vmatprep.subr.bf16.mxu1 %v26354_v50  ;;  %v26405_v41 = vld [vmem:[#allocation7 + $0x10ec] ss:$28 sps:$4 sm:$0xff]  }
 0x5c3   :  { %v26408_v50 = vld [vmem:[#allocation10 + $0xae4] ss:$48 sps:$4 sm:$0xff]  }
 0x5c4   :  { %10254 = vmatpush1.bf16.msra.mxu0 %v26349_v59  ;;  %v10590_v59 = vadd.f32 1.0, %v28402_v40  ;;  %v26453_v40 = vld [vmem:[#allocation7 + $0x13c4] ss:$28 sps:$4 sm:$0xff]  }
 0x5c5   :  { %14762 = vmatpush1.bf16.msra.mxu1 %v26352_v51  ;;  %10255 = vmatprep.subr.bf16.mxu0 %v26357_v52  ;;  %v26403_v51 = vld [vmem:[#allocation7 + $0x10e8] ss:$28 sps:$4 sm:$0xff]  }
 0x5c6   :  { %14763 = vmatprep.subr.bf16.mxu1 %v26360_v53  ;;  %v26406_v52 = vld [vmem:[#allocation10 + $0xae0] ss:$48 sps:$4 sm:$0xff]   ;;  %v26411_v53 = vld [vmem:[#allocation7 + $0x1124] ss:$28 sps:$4 sm:$0xff]   ;;  %28403 = vrcp.f32 %v10590_v59  ;;  %v26457_v59 = vld [vmem:[#allocation7 + $0x1430] ss:$28 sps:$4 sm:$0xff]  }
 0x5c7   :  { %v23858_v11 = vpop.f32.mrb[20].mxu1 }
 0x5c8   :  { %v23859_v2 = vpop.f32.mrb[21].mxu1  ;;  %10256 = vmatpush1.bf16.msra.mxu0 %v26355_v45  ;;  %v26414_v45 = vld [vmem:[#allocation10 + $0xb44] ss:$48 sps:$4 sm:$0xff]  }
 0x5c9   :  { %v23860_v4 = vadd.f32 %v23859_v2, %v23858_v11  ;;  %v23861_v6 = vpop.f32.mrb[22].mxu1  ;;  %14764 = vmatpush1.bf16.msra.mxu1 %v26358_v54  ;;  %10257 = vmatprep.subr.bf16.mxu0 %v26363_v58  ;;  %v26409_v58 = vld [vmem:[#allocation7 + $0x1120] ss:$28 sps:$4 sm:$0xff]   ;;  %v26415_v2 = vld [vmem:[#allocation7 + $0x1158] ss:$28 sps:$4 sm:$0xff]  }
 0x5ca   :  { %v23862_v12 = vpop.f32.mrb[23].mxu1  ;;  %14765 = vmatprep.subr.bf16.mxu1 %v26366_v33  ;;  %v26412_v33 = vld [vmem:[#allocation10 + $0xb40] ss:$48 sps:$4 sm:$0xff]   ;;  %v26420_v11 = vld [vmem:[#allocation10 + $0xba4] ss:$48 sps:$4 sm:$0xff]  }
 0x5cb   :  { %v29154_v18 = vadd.f32 %v23860_v4, %v10362_v61  ;;  %v26418_v61 = vld [vmem:[#allocation10 + $0xba0] ss:$48 sps:$4 sm:$0xff]   ;;  %v26423_v4 = vld [vmem:[#allocation7 + $0x1194] ss:$28 sps:$4 sm:$0xff]  }
 0x5cc   :  { %10258 = vmatpush1.bf16.msra.mxu0 %v26361_v63  ;;  %v26417_v63 = vld [vmem:[#allocation7 + $0x115c] ss:$28 sps:$4 sm:$0xff]   ;;  %v26421_v6 = vld [vmem:[#allocation7 + $0x1190] ss:$28 sps:$4 sm:$0xff]  }
 0x5cd   :  { %14766 = vmatpush1.bf16.msra.mxu1 %v26364_v0  ;;  %10259 = vmatprep.subr.bf16.mxu0 %v26369_v57 }
 0x5ce   :  { %14767 = vmatprep.subr.bf16.mxu1 %v26372_v56 }
 0x5d0   :  { %10260 = vmatpush1.bf16.msra.mxu0 %v26367_v17  ;;  %v28404_v12 = vpop.eup %28403  ;;  %v26426_v17 = vld [vmem:[#allocation7 + $0x11cc] ss:$28 sps:$4 sm:$0xff]  }
 0x5d1   :  { %14768 = vmatpush1.bf16.msra.mxu1 %v26370_v23  ;;  %10261 = vmatprep.subr.bf16.mxu0 %v26375_v24  ;;  %v29158_v23 = vpack.c.bf16 %v28404_v12, %v28404_v12  ;;  %v26429_v24 = vld [vmem:[#allocation7 + $0x1204] ss:$28 sps:$4 sm:$0xff]   ;;  %v26573_v12 = vld [vmem:[#allocation10 + $0xc64] ss:$48 sps:$4 sm:$0xff]  }
 0x5d2   :  { %14769 = vmatprep.subr.bf16.mxu1 %v26378_v27  ;;  %v26432_v27 = vld [vmem:[#allocation7 + $0x123c] ss:$28 sps:$4 sm:$0xff]  }
 0x5d4   :  { %10262 = vmatpush1.bf16.msra.mxu0 %v26373_v22  ;;  %v26430_v22 = vld [vmem:[#allocation7 + $0x1238] ss:$28 sps:$4 sm:$0xff]  }
 0x5d5   :  { %14770 = vmatpush1.bf16.msra.mxu1 %v26376_v21  ;;  %10263 = vmatprep.subr.bf16.mxu0 %v26381_v25  ;;  %v26435_v21 = vld [vmem:[#allocation7 + $0x1274] ss:$28 sps:$4 sm:$0xff]  }
 0x5d6   :  { %14771 = vmatprep.subr.bf16.mxu1 %v26384_v10  ;;  %v26433_v25 = vld [vmem:[#allocation7 + $0x1270] ss:$28 sps:$4 sm:$0xff]   ;;  %v26441_v10 = vld [vmem:[#allocation7 + $0x12e4] ss:$28 sps:$4 sm:$0xff]  }
 0x5d8   :  { %10264 = vmatpush1.bf16.msra.mxu0 %v26379_v28 }
 0x5d9   :  { %14772 = vmatpush1.bf16.msra.mxu1 %v26382_v29  ;;  %10265 = vmatprep.subr.bf16.mxu0 %v26387_v31  ;;  %v26444_v31 = vld [vmem:[#allocation7 + $0x131c] ss:$28 sps:$4 sm:$0xff]  }
 0x5da   :  { %14773 = vmatprep.subr.bf16.mxu1 %v26390_v62 }
 0x5dc   :  { %10266 = vmatpush1.bf16.msra.mxu0 %v26385_v43 }
 0x5dd   :  { %14774 = vmatpush1.bf16.msra.mxu1 %v26388_v5  ;;  %10267 = vmatprep.subr.bf16.mxu0 %v26393_v32 }
 0x5de   :  { %14775 = vmatprep.subr.bf16.mxu1 %v26396_v60  ;;  %v26442_v60 = vld [vmem:[#allocation7 + $0x1318] ss:$28 sps:$4 sm:$0xff]  }
 0x5e0   :  { %10268 = vmatpush1.bf16.msra.mxu0 %v26391_v35  ;;  %v26447_v35 = vld [vmem:[#allocation7 + $0x1354] ss:$28 sps:$4 sm:$0xff]  }
 0x5e1   :  { %14776 = vmatpush1.bf16.msra.mxu1 %v26394_v9  ;;  %10269 = vmatprep.subr.bf16.mxu0 %v26399_v55  ;;  %v26445_v9 = vld [vmem:[#allocation7 + $0x1350] ss:$28 sps:$4 sm:$0xff]  }
 0x5e2   :  { %14777 = vmatprep.subr.bf16.mxu1 %v26402_v48  ;;  %v26450_v55 = vld [vmem:[#allocation7 + $0x138c] ss:$28 sps:$4 sm:$0xff]  }
 0x5e3   :  { %v26448_v48 = vld [vmem:[#allocation7 + $0x1388] ss:$28 sps:$4 sm:$0xff]  }
 0x5e4   :  { %10270 = vmatpush1.bf16.msra.mxu0 %v26397_v47  ;;  %v26451_v47 = vld [vmem:[#allocation7 + $0x13c0] ss:$28 sps:$4 sm:$0xff]  }
 0x5e5   :  { %14778 = vmatpush1.bf16.msra.mxu1 %v26400_v49  ;;  %10271 = vmatprep.subr.bf16.mxu0 %v26405_v41  ;;  %v26456_v49 = vld [vmem:[#allocation7 + $0x13fc] ss:$28 sps:$4 sm:$0xff]  }
 0x5e6   :  { %14779 = vmatprep.subr.bf16.mxu1 %v26408_v50  ;;  %v26454_v41 = vld [vmem:[#allocation7 + $0x13f8] ss:$28 sps:$4 sm:$0xff]  }
 0x5e7   :  { %v23880_v54 = vpop.f32.mrb[24].mxu1  ;;  %v26459_v50 = vld [vmem:[#allocation7 + $0x1434] ss:$28 sps:$4 sm:$0xff]  }
 0x5e8   :  { %v23881_v46 = vpop.f32.mrb[25].mxu1  ;;  %10272 = vmatpush1.bf16.msra.mxu0 %v26403_v51  ;;  %v26462_v51 = vld [vmem:[#allocation7 + $0x146c] ss:$28 sps:$4 sm:$0xff]  }
 0x5e9   :  { %v23882_v0 = vadd.f32 %v23881_v46, %v23880_v54  ;;  %v23883_v57 = vpop.f32.mrb[26].mxu1  ;;  %14780 = vmatpush1.bf16.msra.mxu1 %v26406_v52  ;;  %10273 = vmatprep.subr.bf16.mxu0 %v26411_v53  ;;  %v26460_v52 = vld [vmem:[#allocation7 + $0x1468] ss:$28 sps:$4 sm:$0xff]  }
 0x5ea   :  { %v23884_v44 = vpop.f32.mrb[27].mxu1  ;;  %14781 = vmatprep.subr.bf16.mxu1 %v26414_v45  ;;  %v26465_v53 = vld [vmem:[#allocation7 + $0x14a4] ss:$28 sps:$4 sm:$0xff]   ;;  %v26466_v57 = vld [vmem:[#allocation7 + $0x14d8] ss:$28 sps:$4 sm:$0xff]  }
 0x5eb   :  { %v10442_v56 = vadd.f32 %v23882_v0, %v29154_v18  ;;  %v26424_v18 = vld [vmem:[#allocation7 + $0x11c8] ss:$28 sps:$4 sm:$0xff]  }
 0x5ec   :  { %10274 = vmatpush1.bf16.msra.mxu0 %v26409_v58  ;;  %v26463_v58 = vld [vmem:[#allocation7 + $0x14a0] ss:$28 sps:$4 sm:$0xff]   ;;  %v26471_v44 = vld [vmem:[#allocation10 + $0xc] ss:$48 sps:$4 sm:$0xff]  }
 0x5ed   :  { %14782 = vmatpush1.bf16.msra.mxu1 %v26412_v33  ;;  %10275 = vmatprep.subr.bf16.mxu0 %v26417_v63  ;;  %v26468_v33 = vld [vmem:[#allocation7 + $0x14dc] ss:$28 sps:$4 sm:$0xff]  }
 0x5ee   :  { %14783 = vmatprep.subr.bf16.mxu1 %v26420_v11 }
 0x5f0   :  { %10276 = vmatpush1.bf16.msra.mxu0 %v26415_v2  ;;  %v26469_v2 = vld [vmem:[#allocation10 + $0x8] ss:$48 sps:$4 sm:$0xff]  }
 0x5f1   :  { %14784 = vmatpush1.bf16.msra.mxu1 %v26418_v61  ;;  %10286 = vmatprep.subr.bf16.mxu0 %v26423_v4  ;;  %v26565_v61 = vld [vmem:[#allocation10 + $0xc00] ss:$48 sps:$4 sm:$0xff]   ;;  %v26567_v4 = vld [vmem:[#allocation10 + $0xc04] ss:$48 sps:$4 sm:$0xff]  }
 0x5f2   :  { %14794 = vmatprep.subr.bf16.mxu1 %v26567_v4  ;;  %v26519_v4 = vld [vmem:[#allocation10 + $0x60c] ss:$48 sps:$4 sm:$0xff]  }
 0x5f3   :  { %10278 = vmatmul.mubr.bf16.vlgmr.msra.gmra.mrb[16].mxu0 %v29094_v36  ;;  %v26436_v36 = vld [vmem:[#allocation7 + $0x12a8] ss:$28 sps:$4 sm:$0xff]  }
 0x5f4   :  { %14786 = vmatmul.mubr.bf16.vlgmr.msra.gmra.mrb[40].mxu1 %v29158_v23  ;;  %10287 = vmatpush1.bf16.msra.mxu0 %v26421_v6  ;;  %v26472_v6 = vld [vmem:[#allocation10 + $0x68] ss:$48 sps:$4 sm:$0xff]  }
 0x5f5   :  { %10318 = vmatprep.mubr.bf16.mxu0 %v29097_v39  ;;  %10288 = vmatprep.subr.bf16.mxu0 %v26426_v17  ;;  %v26439_v39 = vld [vmem:[#allocation7 + $0x12e0] ss:$28 sps:$4 sm:$0xff]   ;;  %v26477_v17 = vld [vmem:[#allocation10 + $0xcc] ss:$48 sps:$4 sm:$0xff]  }
 0x5f6   :  { %14795 = vmatpush1.bf16.msra.mxu1 %v26565_v61  ;;  %v26514_v61 = vld [vmem:[#allocation10 + $0x5a8] ss:$48 sps:$4 sm:$0xff]  }
 0x5f7   :  { %14796 = vmatprep.subr.bf16.mxu1 %v26573_v12  ;;  %v26522_v12 = vld [vmem:[#allocation10 + $0x66c] ss:$48 sps:$4 sm:$0xff]  }
 0x5f8   :  { %10289 = vmatpush1.bf16.msra.mxu0 %v26424_v18  ;;  %v26571_v18 = vld [vmem:[#allocation10 + $0xc60] ss:$48 sps:$4 sm:$0xff]  }
 0x5f9   :  { %10290 = vmatprep.subr.bf16.mxu0 %v26429_v24  ;;  %v26475_v24 = vld [vmem:[#allocation10 + $0xc8] ss:$48 sps:$4 sm:$0xff]  }
 0x5fa   :  { %14797 = vmatpush1.bf16.msra.mxu1 %v26571_v18  ;;  %v26525_v18 = vld [vmem:[#allocation10 + $0x6cc] ss:$48 sps:$4 sm:$0xff]  }
 0x5fc   :  { %10291 = vmatpush1.bf16.msra.mxu0 %v26427_v30  ;;  %v26480_v30 = vld [vmem:[#allocation10 + $0x12c] ss:$48 sps:$4 sm:$0xff]  }
 0x5fd   :  { %10292 = vmatprep.subr.bf16.mxu0 %v26432_v27  ;;  %v26579_v27 = vld [vmem:[#allocation10 + $0xcc4] ss:$48 sps:$4 sm:$0xff]  }
 0x5fe   :  { %14798 = vmatprep.subr.bf16.mxu1 %v26579_v27  ;;  %v26526_v27 = vld [vmem:[#allocation10 + $0x728] ss:$48 sps:$4 sm:$0xff]  }
 0x600   :  { %10293 = vmatpush1.bf16.msra.mxu0 %v26430_v22  ;;  %v26577_v22 = vld [vmem:[#allocation10 + $0xcc0] ss:$48 sps:$4 sm:$0xff]  }
 0x601   :  { %10294 = vmatprep.subr.bf16.mxu0 %v26435_v21  ;;  %v26483_v21 = vld [vmem:[#allocation10 + $0x18c] ss:$48 sps:$4 sm:$0xff]   ;;  %14799 = vmatpush1.bf16.msra.mxu1 %v26577_v22 }
 0x602   :  { %v26531_v22 = vld [vmem:[#allocation10 + $0x78c] ss:$48 sps:$4 sm:$0xff]  }
 0x604   :  { %10295 = vmatpush1.bf16.msra.mxu0 %v26433_v25  ;;  %v26585_v25 = vld [vmem:[#allocation10 + $0xd24] ss:$48 sps:$4 sm:$0xff]  }
 0x605   :  { %10296 = vmatprep.subr.bf16.mxu0 %v26438_v13  ;;  %v26583_v13 = vld [vmem:[#allocation10 + $0xd20] ss:$48 sps:$4 sm:$0xff]   ;;  %14800 = vmatprep.subr.bf16.mxu1 %v26585_v25  ;;  %v26532_v25 = vld [vmem:[#allocation10 + $0x7e8] ss:$48 sps:$4 sm:$0xff]  }
 0x606   :  { %14801 = vmatpush1.bf16.msra.mxu1 %v26583_v13  ;;  %v26537_v13 = vld [vmem:[#allocation10 + $0x84c] ss:$48 sps:$4 sm:$0xff]  }
 0x607   :  { %v23902_v28 = vpop.f32.mrb[28].mxu1 }
 0x608   :  { %v23903_v29 = vpop.f32.mrb[29].mxu1  ;;  %10297 = vmatpush1.bf16.msra.mxu0 %v26436_v36  ;;  %v26481_v36 = vld [vmem:[#allocation10 + $0x188] ss:$48 sps:$4 sm:$0xff]  }
 0x609   :  { %v23904_v62 = vadd.f32 %v23903_v29, %v23902_v28  ;;  %v23905_v43 = vpop.f32.mrb[30].mxu1  ;;  %10298 = vmatprep.subr.bf16.mxu0 %v26441_v10  ;;  %v26486_v10 = vld [vmem:[#allocation10 + $0x1ec] ss:$48 sps:$4 sm:$0xff]   ;;  %v26591_v28 = vld [vmem:[#allocation10 + $0xd84] ss:$48 sps:$4 sm:$0xff]  }
 0x60a   :  { %v23906_v5 = vpop.f32.mrb[31].mxu1  ;;  %v26589_v29 = vld [vmem:[#allocation10 + $0xd80] ss:$48 sps:$4 sm:$0xff]   ;;  %14802 = vmatprep.subr.bf16.mxu1 %v26591_v28  ;;  %v26535_v28 = vld [vmem:[#allocation10 + $0x848] ss:$48 sps:$4 sm:$0xff]  }
 0x60b   :  { %v10482_v32 = vadd.f32 %v23904_v62, %v10442_v56  ;;  %v26474_v56 = vld [vmem:[#allocation10 + $0x6c] ss:$48 sps:$4 sm:$0xff]   ;;  %v26597_v62 = vld [vmem:[#allocation10 + $0xde4] ss:$48 sps:$4 sm:$0xff]   ;;  %v26595_v43 = vld [vmem:[#allocation10 + $0xde0] ss:$48 sps:$4 sm:$0xff]   ;;  %14803 = vmatpush1.bf16.msra.mxu1 %v26589_v29 }
 0x60c   :  { %10299 = vmatpush1.bf16.msra.mxu0 %v26439_v39  ;;  %v26484_v39 = vld [vmem:[#allocation10 + $0x1e8] ss:$48 sps:$4 sm:$0xff]   ;;  %14804 = vmatprep.subr.bf16.mxu1 %v26597_v62  ;;  %v26540_v29 = vld [vmem:[#allocation10 + $0x8ac] ss:$48 sps:$4 sm:$0xff]  }
 0x60d   :  { %10300 = vmatprep.subr.bf16.mxu0 %v26444_v31  ;;  %v26489_v31 = vld [vmem:[#allocation10 + $0x24c] ss:$48 sps:$4 sm:$0xff]   ;;  %v26538_v62 = vld [vmem:[#allocation10 + $0x8a8] ss:$48 sps:$4 sm:$0xff]  }
 0x60f   :  { %14805 = vmatpush1.bf16.msra.mxu1 %v26595_v43  ;;  %v26543_v43 = vld [vmem:[#allocation10 + $0x90c] ss:$48 sps:$4 sm:$0xff]  }
 0x610   :  { %10301 = vmatpush1.bf16.msra.mxu0 %v26442_v60  ;;  %v26487_v60 = vld [vmem:[#allocation10 + $0x248] ss:$48 sps:$4 sm:$0xff]  }
 0x611   :  { %10302 = vmatprep.subr.bf16.mxu0 %v26447_v35  ;;  %v26603_v35 = vld [vmem:[#allocation10 + $0xe44] ss:$48 sps:$4 sm:$0xff]  }
 0x612   :  { %14806 = vmatprep.subr.bf16.mxu1 %v26603_v35  ;;  %v26546_v35 = vld [vmem:[#allocation10 + $0x96c] ss:$48 sps:$4 sm:$0xff]  }
 0x614   :  { %10303 = vmatpush1.bf16.msra.mxu0 %v26445_v9 }
 0x615   :  { %10304 = vmatprep.subr.bf16.mxu0 %v26450_v55 }
 0x618   :  { %10305 = vmatpush1.bf16.msra.mxu0 %v26448_v48  ;;  %v26492_v48 = vld [vmem:[#allocation10 + $0x2ac] ss:$48 sps:$4 sm:$0xff]  }
 0x619   :  { %10306 = vmatprep.subr.bf16.mxu0 %v26453_v40  ;;  %v26601_v40 = vld [vmem:[#allocation10 + $0xe40] ss:$48 sps:$4 sm:$0xff]  }
 0x61a   :  { %14807 = vmatpush1.bf16.msra.mxu1 %v26601_v40  ;;  %v26549_v40 = vld [vmem:[#allocation10 + $0x9cc] ss:$48 sps:$4 sm:$0xff]  }
 0x61c   :  { %10307 = vmatpush1.bf16.msra.mxu0 %v26451_v47 }
 0x61d   :  { %10308 = vmatprep.subr.bf16.mxu0 %v26456_v49 }
 0x620   :  { %10309 = vmatpush1.bf16.msra.mxu0 %v26454_v41  ;;  %v26490_v41 = vld [vmem:[#allocation10 + $0x2a8] ss:$48 sps:$4 sm:$0xff]  }
 0x621   :  { %10310 = vmatprep.subr.bf16.mxu0 %v26459_v50  ;;  %v26495_v50 = vld [vmem:[#allocation10 + $0x30c] ss:$48 sps:$4 sm:$0xff]  }
 0x624   :  { %10311 = vmatpush1.bf16.msra.mxu0 %v26457_v59  ;;  %v26609_v59 = vld [vmem:[#allocation10 + $0xea4] ss:$48 sps:$4 sm:$0xff]  }
 0x625   :  { %10312 = vmatprep.subr.bf16.mxu0 %v26462_v51  ;;  %v26607_v51 = vld [vmem:[#allocation10 + $0xea0] ss:$48 sps:$4 sm:$0xff]   ;;  %14808 = vmatprep.subr.bf16.mxu1 %v26609_v59  ;;  %v26552_v59 = vld [vmem:[#allocation10 + $0xa2c] ss:$48 sps:$4 sm:$0xff]  }
 0x626   :  { %14809 = vmatpush1.bf16.msra.mxu1 %v26607_v51  ;;  %v26645_v51 = vld [vmem:[#allocation10 + $0x10e4] ss:$48 sps:$4 sm:$0xff]  }
 0x627   :  { %v23924_v45 = vpop.f32.mrb[32].mxu1 }
 0x628   :  { %v23925_v54 = vpop.f32.mrb[33].mxu1  ;;  %10313 = vmatpush1.bf16.msra.mxu0 %v26460_v52  ;;  %v26493_v52 = vld [vmem:[#allocation10 + $0x308] ss:$48 sps:$4 sm:$0xff]  }
 0x629   :  { %v23926_v46 = vadd.f32 %v23925_v54, %v23924_v45  ;;  %v23927_v63 = vpop.f32.mrb[34].mxu1  ;;  %10314 = vmatprep.subr.bf16.mxu0 %v26465_v53  ;;  %v26498_v53 = vld [vmem:[#allocation10 + $0x36c] ss:$48 sps:$4 sm:$0xff]   ;;  %v26496_v45 = vld [vmem:[#allocation10 + $0x368] ss:$48 sps:$4 sm:$0xff]  }
 0x62a   :  { %v23928_v11 = vpop.f32.mrb[35].mxu1  ;;  %v26501_v54 = vld [vmem:[#allocation10 + $0x3cc] ss:$48 sps:$4 sm:$0xff]  }
 0x62b   :  { %v29163_v0 = vadd.f32 %v23926_v46, %v10482_v32  ;;  %v26502_v46 = vld [vmem:[#allocation10 + $0x428] ss:$48 sps:$4 sm:$0xff]   ;;  %v26507_v63 = vld [vmem:[#allocation10 + $0x48c] ss:$48 sps:$4 sm:$0xff]  }
 0x62c   :  { %10315 = vmatpush1.bf16.msra.mxu0 %v26463_v58  ;;  %v26499_v58 = vld [vmem:[#allocation10 + $0x3c8] ss:$48 sps:$4 sm:$0xff]  }
 0x62d   :  { %10316 = vmatprep.subr.bf16.mxu0 %v26468_v33  ;;  %v26504_v33 = vld [vmem:[#allocation10 + $0x42c] ss:$48 sps:$4 sm:$0xff]   ;;  %v26505_v11 = vld [vmem:[#allocation10 + $0x488] ss:$48 sps:$4 sm:$0xff]  }
 0x630   :  { %10317 = vmatpush1.bf16.msra.mxu0 %v26466_v57  ;;  %v26508_v57 = vld [vmem:[#allocation10 + $0x4e8] ss:$48 sps:$4 sm:$0xff]  }
 0x631   :  { %14876 = vmatprep.subr.bf16.mxu0 %v26471_v44  ;;  %v26513_v44 = vld [vmem:[#allocation10 + $0x54c] ss:$48 sps:$4 sm:$0xff]  }
 0x633   :  { %10319 = vmatmul.mubr.bf16.vlgmr.msra.gmra.mrb[16].mxu0 %v29103_v16  ;;  %v26478_v16 = vld [vmem:[#allocation10 + $0x128] ss:$48 sps:$4 sm:$0xff]  }
 0x634   :  { %14877 = vmatpush1.bf16.msra.mxu0 %v26469_v2  ;;  %14908 = vmatprep.mubr.bf16.mxu0 %v29136_v3  ;;  %v26511_v2 = vld [vmem:[#allocation10 + $0x548] ss:$48 sps:$4 sm:$0xff]  }
 0x635   :  { %14878 = vmatprep.subr.bf16.mxu0 %v26474_v56  ;;  %v26516_v56 = vld [vmem:[#allocation10 + $0x5ac] ss:$48 sps:$4 sm:$0xff]  }
 0x638   :  { %14879 = vmatpush1.bf16.msra.mxu0 %v26472_v6  ;;  %v26517_v6 = vld [vmem:[#allocation10 + $0x608] ss:$48 sps:$4 sm:$0xff]  }
 0x639   :  { %14880 = vmatprep.subr.bf16.mxu0 %v26477_v17  ;;  %v26520_v17 = vld [vmem:[#allocation10 + $0x668] ss:$48 sps:$4 sm:$0xff]  }
 0x63c   :  { %14881 = vmatpush1.bf16.msra.mxu0 %v26475_v24  ;;  %v26523_v24 = vld [vmem:[#allocation10 + $0x6c8] ss:$48 sps:$4 sm:$0xff]  }
 0x63d   :  { %14882 = vmatprep.subr.bf16.mxu0 %v26480_v30  ;;  %v26528_v30 = vld [vmem:[#allocation10 + $0x72c] ss:$48 sps:$4 sm:$0xff]  }
 0x640   :  { %14883 = vmatpush1.bf16.msra.mxu0 %v26478_v16  ;;  %v26529_v16 = vld [vmem:[#allocation10 + $0x788] ss:$48 sps:$4 sm:$0xff]  }
 0x641   :  { %14884 = vmatprep.subr.bf16.mxu0 %v26483_v21  ;;  %v26534_v21 = vld [vmem:[#allocation10 + $0x7ec] ss:$48 sps:$4 sm:$0xff]  }
 0x644   :  { %14885 = vmatpush1.bf16.msra.mxu0 %v26481_v36  ;;  %v26615_v36 = vld [vmem:[#allocation10 + $0xf04] ss:$48 sps:$4 sm:$0xff]  }
 0x645   :  { %14886 = vmatprep.subr.bf16.mxu0 %v26486_v10  ;;  %v26613_v10 = vld [vmem:[#allocation10 + $0xf00] ss:$48 sps:$4 sm:$0xff]   ;;  %14810 = vmatprep.subr.bf16.mxu1 %v26615_v36  ;;  %v26604_v36 = vld [vmem:[#allocation10 + $0xe48] ss:$48 sps:$4 sm:$0xff]  }
 0x646   :  { %14811 = vmatpush1.bf16.msra.mxu1 %v26613_v10  ;;  %v26612_v10 = vld [vmem:[#allocation10 + $0xeac] ss:$48 sps:$4 sm:$0xff]  }
 0x647   :  { %v23946_v5 = vpop.f32.mrb[36].mxu1 }
 0x648   :  { %v23947_v32 = vpop.f32.mrb[37].mxu1  ;;  %14887 = vmatpush1.bf16.msra.mxu0 %v26484_v39  ;;  %v26621_v39 = vld [vmem:[#allocation10 + $0xf64] ss:$48 sps:$4 sm:$0xff]  }
 0x649   :  { %v23948_v9 = vadd.f32 %v23947_v32, %v23946_v5  ;;  %v23949_v55 = vpop.f32.mrb[38].mxu1  ;;  %14888 = vmatprep.subr.bf16.mxu0 %v26489_v31  ;;  %v26619_v31 = vld [vmem:[#allocation10 + $0xf60] ss:$48 sps:$4 sm:$0xff]   ;;  %14812 = vmatprep.subr.bf16.mxu1 %v26621_v39  ;;  %v26627_v5 = vld [vmem:[#allocation10 + $0xfc4] ss:$48 sps:$4 sm:$0xff]  }
 0x64a   :  { %v23950_v47 = vpop.f32.mrb[39].mxu1  ;;  %14813 = vmatpush1.bf16.msra.mxu1 %v26619_v31  ;;  %v26625_v32 = vld [vmem:[#allocation10 + $0xfc0] ss:$48 sps:$4 sm:$0xff]   ;;  %v26616_v39 = vld [vmem:[#allocation10 + $0xf08] ss:$48 sps:$4 sm:$0xff]  }
 0x64b   :  { %v29168_v49 = vadd.f32 %v23948_v9, %v29163_v0  ;;  %v26510_v0 = vld [vmem:[#allocation10 + $0x4ec] ss:$48 sps:$4 sm:$0xff]   ;;  %14814 = vmatprep.subr.bf16.mxu1 %v26627_v5  ;;  %v26633_v9 = vld [vmem:[#allocation10 + $0x1024] ss:$48 sps:$4 sm:$0xff]   ;;  %v26631_v55 = vld [vmem:[#allocation10 + $0x1020] ss:$48 sps:$4 sm:$0xff]  }
 0x64c   :  { %14889 = vmatpush1.bf16.msra.mxu0 %v26487_v60  ;;  %v26541_v60 = vld [vmem:[#allocation10 + $0x908] ss:$48 sps:$4 sm:$0xff]   ;;  %v26639_v47 = vld [vmem:[#allocation10 + $0x1084] ss:$48 sps:$4 sm:$0xff]   ;;  %v26624_v31 = vld [vmem:[#allocation10 + $0xf6c] ss:$48 sps:$4 sm:$0xff]  }
 0x64d   :  { %14890 = vmatprep.subr.bf16.mxu0 %v26492_v48  ;;  %v26544_v48 = vld [vmem:[#allocation10 + $0x968] ss:$48 sps:$4 sm:$0xff]  }
 0x64e   :  { %14815 = vmatpush1.bf16.msra.mxu1 %v26625_v32  ;;  %v26628_v5 = vld [vmem:[#allocation10 + $0xfc8] ss:$48 sps:$4 sm:$0xff]   ;;  %v26636_v32 = vld [vmem:[#allocation10 + $0x102c] ss:$48 sps:$4 sm:$0xff]  }
 0x64f   :  { %14816 = vmatprep.subr.bf16.mxu1 %v26633_v9  ;;  %v26640_v9 = vld [vmem:[#allocation10 + $0x1088] ss:$48 sps:$4 sm:$0xff]  }
 0x650   :  { %14891 = vmatpush1.bf16.msra.mxu0 %v26490_v41  ;;  %v26637_v41 = vld [vmem:[#allocation10 + $0x1080] ss:$48 sps:$4 sm:$0xff]  }
 0x651   :  { %14892 = vmatprep.subr.bf16.mxu0 %v26495_v50  ;;  %v26547_v50 = vld [vmem:[#allocation10 + $0x9c8] ss:$48 sps:$4 sm:$0xff]  }
 0x652   :  { %14817 = vmatpush1.bf16.msra.mxu1 %v26631_v55  ;;  %v26648_v55 = vld [vmem:[#allocation10 + $0x10ec] ss:$48 sps:$4 sm:$0xff]  }
 0x653   :  { %14818 = vmatprep.subr.bf16.mxu1 %v26639_v47  ;;  %v26652_v47 = vld [vmem:[#allocation10 + $0x1148] ss:$48 sps:$4 sm:$0xff]  }
 0x654   :  { %14893 = vmatpush1.bf16.msra.mxu0 %v26493_v52  ;;  %v26643_v52 = vld [vmem:[#allocation10 + $0x10e0] ss:$48 sps:$4 sm:$0xff]  }
 0x655   :  { %14894 = vmatprep.subr.bf16.mxu0 %v26498_v53  ;;  %v26550_v53 = vld [vmem:[#allocation10 + $0xa28] ss:$48 sps:$4 sm:$0xff]  }
 0x656   :  { %14819 = vmatpush1.bf16.msra.mxu1 %v26637_v41  ;;  %v26660_v41 = vld [vmem:[#allocation10 + $0x11ac] ss:$48 sps:$4 sm:$0xff]  }
 0x657   :  { %14820 = vmatprep.subr.bf16.mxu1 %v26645_v51  ;;  %v28497_v51 = vld [vmem:[#allocation8] sm:$0xff] }
 0x658   :  { %14895 = vmatpush1.bf16.msra.mxu0 %v26496_v45  ;;  %v26555_v45 = vld [vmem:[#allocation10 + $0xa8c] ss:$48 sps:$4 sm:$0xff]  }
 0x659   :  { %14896 = vmatprep.subr.bf16.mxu0 %v26501_v54  ;;  %v26651_v54 = vld [vmem:[#allocation10 + $0x1144] ss:$48 sps:$4 sm:$0xff]  }
 0x65a   :  { %14821 = vmatpush1.bf16.msra.mxu1 %v26643_v52  ;;  %v6117_v52 = vrot.slane %v28497_v51, %v29045_v19 }
 0x65b   :  { %14822 = vmatprep.subr.bf16.mxu1 %v26651_v54 }
 0x65c   :  { %14897 = vmatpush1.bf16.msra.mxu0 %v26499_v58  ;;  %v26649_v58 = vld [vmem:[#allocation10 + $0x1140] ss:$48 sps:$4 sm:$0xff]  }
 0x65d   :  { %14898 = vmatprep.subr.bf16.mxu0 %v26504_v33  ;;  %v26553_v33 = vld [vmem:[#allocation10 + $0xa88] ss:$48 sps:$4 sm:$0xff]  }
 0x65e   :  { %14823 = vmatpush1.bf16.msra.mxu1 %v26649_v58 }
 0x660   :  { %14899 = vmatpush1.bf16.msra.mxu0 %v26502_v46  ;;  %v26558_v46 = vld [vmem:[#allocation10 + $0xaec] ss:$48 sps:$4 sm:$0xff]  }
 0x661   :  { %14900 = vmatprep.subr.bf16.mxu0 %v26507_v63  ;;  %v26657_v63 = vld [vmem:[#allocation10 + $0x11a4] ss:$48 sps:$4 sm:$0xff]  }
 0x662   :  { %14824 = vmatprep.subr.bf16.mxu1 %v26657_v63 }
 0x664   :  { %14901 = vmatpush1.bf16.msra.mxu0 %v26505_v11  ;;  %v26655_v11 = vld [vmem:[#allocation10 + $0x11a0] ss:$48 sps:$4 sm:$0xff]  }
 0x665   :  { %14902 = vmatprep.subr.bf16.mxu0 %v26510_v0  ;;  %v26556_v0 = vld [vmem:[#allocation10 + $0xae8] ss:$48 sps:$4 sm:$0xff]   ;;  %14825 = vmatpush1.bf16.msra.mxu1 %v26655_v11 }
 0x668   :  { %14903 = vmatpush1.bf16.msra.mxu0 %v26508_v57  ;;  %v26561_v57 = vld [vmem:[#allocation10 + $0xb4c] ss:$48 sps:$4 sm:$0xff]  }
 0x669   :  { %14904 = vmatprep.subr.bf16.mxu0 %v26513_v44  ;;  %v26663_v44 = vld [vmem:[#allocation10 + $0x1204] ss:$48 sps:$4 sm:$0xff]  }
 0x66a   :  { %14835 = vmatprep.subr.bf16.mxu1 %v26663_v44 }
 0x66c   :  { %14905 = vmatpush1.bf16.msra.mxu0 %v26511_v2  ;;  %v26559_v2 = vld [vmem:[#allocation10 + $0xb48] ss:$48 sps:$4 sm:$0xff]  }
 0x66d   :  { %14906 = vmatprep.subr.bf16.mxu0 %v26516_v56  ;;  %v26564_v56 = vld [vmem:[#allocation10 + $0xbac] ss:$48 sps:$4 sm:$0xff]  }
 0x670   :  { %14907 = vmatpush1.bf16.msra.mxu0 %v26514_v61  ;;  %v26562_v61 = vld [vmem:[#allocation10 + $0xba8] ss:$48 sps:$4 sm:$0xff]  }
 0x671   :  { %14917 = vmatprep.subr.bf16.mxu0 %v26519_v4  ;;  %v26570_v4 = vld [vmem:[#allocation10 + $0xc0c] ss:$48 sps:$4 sm:$0xff]  }
 0x673   :  { %14909 = vmatmul.mubr.bf16.vlgmr.msra.gmra.mrb[20].mxu0 %v29141_v42 }
 0x674   :  { %14918 = vmatpush1.bf16.msra.mxu0 %v26517_v6  ;;  %14949 = vmatprep.mubr.bf16.mxu0 %v29144_v34  ;;  %v26568_v6 = vld [vmem:[#allocation10 + $0xc08] ss:$48 sps:$4 sm:$0xff]  }
 0x675   :  { %14919 = vmatprep.subr.bf16.mxu0 %v26522_v12  ;;  %v26576_v12 = vld [vmem:[#allocation10 + $0xc6c] ss:$48 sps:$4 sm:$0xff]  }
 0x678   :  { %14920 = vmatpush1.bf16.msra.mxu0 %v26520_v17  ;;  %v26574_v17 = vld [vmem:[#allocation10 + $0xc68] ss:$48 sps:$4 sm:$0xff]  }
 0x679   :  { %14921 = vmatprep.subr.bf16.mxu0 %v26525_v18  ;;  %v26582_v18 = vld [vmem:[#allocation10 + $0xccc] ss:$48 sps:$4 sm:$0xff]  }
 0x67c   :  { %14922 = vmatpush1.bf16.msra.mxu0 %v26523_v24  ;;  %v26580_v24 = vld [vmem:[#allocation10 + $0xcc8] ss:$48 sps:$4 sm:$0xff]  }
 0x67d   :  { %14923 = vmatprep.subr.bf16.mxu0 %v26528_v30  ;;  %v26588_v30 = vld [vmem:[#allocation10 + $0xd2c] ss:$48 sps:$4 sm:$0xff]  }
 0x680   :  { %14924 = vmatpush1.bf16.msra.mxu0 %v26526_v27  ;;  %v26586_v27 = vld [vmem:[#allocation10 + $0xd28] ss:$48 sps:$4 sm:$0xff]  }
 0x681   :  { %14925 = vmatprep.subr.bf16.mxu0 %v26531_v22  ;;  %v26594_v22 = vld [vmem:[#allocation10 + $0xd8c] ss:$48 sps:$4 sm:$0xff]  }
 0x684   :  { %14926 = vmatpush1.bf16.msra.mxu0 %v26529_v16  ;;  %v26592_v16 = vld [vmem:[#allocation10 + $0xd88] ss:$48 sps:$4 sm:$0xff]  }
 0x685   :  { %14927 = vmatprep.subr.bf16.mxu0 %v26534_v21  ;;  %v26600_v21 = vld [vmem:[#allocation10 + $0xdec] ss:$48 sps:$4 sm:$0xff]  }
 0x688   :  { %14928 = vmatpush1.bf16.msra.mxu0 %v26532_v25  ;;  %v26598_v25 = vld [vmem:[#allocation10 + $0xde8] ss:$48 sps:$4 sm:$0xff]  }
 0x689   :  { %14929 = vmatprep.subr.bf16.mxu0 %v26537_v13  ;;  %v26606_v13 = vld [vmem:[#allocation10 + $0xe4c] ss:$48 sps:$4 sm:$0xff]  }
 0x68c   :  { %14930 = vmatpush1.bf16.msra.mxu0 %v26535_v28  ;;  %v26610_v28 = vld [vmem:[#allocation10 + $0xea8] ss:$48 sps:$4 sm:$0xff]  }
 0x68d   :  { %14931 = vmatprep.subr.bf16.mxu0 %v26540_v29  ;;  %v26618_v29 = vld [vmem:[#allocation10 + $0xf0c] ss:$48 sps:$4 sm:$0xff]  }
 0x690   :  { %14932 = vmatpush1.bf16.msra.mxu0 %v26538_v62  ;;  %v26622_v62 = vld [vmem:[#allocation10 + $0xf68] ss:$48 sps:$4 sm:$0xff]  }
 0x691   :  { %14933 = vmatprep.subr.bf16.mxu0 %v26543_v43  ;;  %v26630_v43 = vld [vmem:[#allocation10 + $0xfcc] ss:$48 sps:$4 sm:$0xff]  }
 0x694   :  { %14934 = vmatpush1.bf16.msra.mxu0 %v26541_v60  ;;  %v26634_v60 = vld [vmem:[#allocation10 + $0x1028] ss:$48 sps:$4 sm:$0xff]  }
 0x695   :  { %14935 = vmatprep.subr.bf16.mxu0 %v26546_v35  ;;  %v26642_v35 = vld [vmem:[#allocation10 + $0x108c] ss:$48 sps:$4 sm:$0xff]  }
 0x698   :  { %14936 = vmatpush1.bf16.msra.mxu0 %v26544_v48  ;;  %v26646_v48 = vld [vmem:[#allocation10 + $0x10e8] ss:$48 sps:$4 sm:$0xff]  }
 0x699   :  { %14937 = vmatprep.subr.bf16.mxu0 %v26549_v40  ;;  %v26654_v40 = vld [vmem:[#allocation10 + $0x114c] ss:$48 sps:$4 sm:$0xff]  }
 0x69c   :  { %14938 = vmatpush1.bf16.msra.mxu0 %v26547_v50  ;;  %v26658_v50 = vld [vmem:[#allocation10 + $0x11a8] ss:$48 sps:$4 sm:$0xff]  }
 0x69d   :  { %14939 = vmatprep.subr.bf16.mxu0 %v26552_v59  ;;  %v26666_v59 = vld [vmem:[#allocation10 + $0x120c] ss:$48 sps:$4 sm:$0xff]  }
 0x6a0   :  { %14940 = vmatpush1.bf16.msra.mxu0 %v26550_v53  ;;  %v6121_v53 = vrot.slane %v28497_v51, %v29026_v8  ;;  %v26703_v51 = vld [vmem:[#allocation10 + $0x14a0] ss:$48 sps:$4 sm:$0xff]  }
 0x6a1   :  { %14941 = vmatprep.subr.bf16.mxu0 %v26555_v45 }
 0x6a4   :  { %14942 = vmatpush1.bf16.msra.mxu0 %v26553_v33 }
 0x6a5   :  { %14943 = vmatprep.subr.bf16.mxu0 %v26558_v46 }
 0x6a8   :  { %14944 = vmatpush1.bf16.msra.mxu0 %v26556_v0 }
 0x6a9   :  { %14945 = vmatprep.subr.bf16.mxu0 %v26561_v57 }
 0x6ac   :  { %14946 = vmatpush1.bf16.msra.mxu0 %v26559_v2 }
 0x6ad   :  { %14947 = vmatprep.subr.bf16.mxu0 %v26564_v56 }
 0x6b0   :  { %14948 = vmatpush1.bf16.msra.mxu0 %v26562_v61 }
 0x6b1   :  { %14958 = vmatprep.subr.bf16.mxu0 %v26570_v4 }
 0x6b3   :  { %14950 = vmatmul.mubr.bf16.vlgmr.msra.gmra.mrb[20].mxu0 %v29158_v23 }
 0x6b4   :  { %14959 = vmatpush1.bf16.msra.mxu0 %v26568_v6  ;;  %v22456_v6 = vmul.f32 -1.442695, %v29168_v49  ;;  %v26667_v49 = vld [vmem:[#allocation10 + $0x1260] ss:$48 sps:$4 sm:$0xff]  }
 0x6b5   :  { %14960 = vmatprep.subr.bf16.mxu0 %v26576_v12 }
 0x6b8   :  { %14961 = vmatpush1.bf16.msra.mxu0 %v26574_v17  ;;  %v26661_v17 = vld [vmem:[#allocation10 + $0x1200] ss:$48 sps:$4 sm:$0xff]  }
 0x6b9   :  { %14962 = vmatprep.subr.bf16.mxu0 %v26582_v18  ;;  %v26664_v18 = vld [vmem:[#allocation10 + $0x1208] ss:$48 sps:$4 sm:$0xff]  }
 0x6bc   :  { %14963 = vmatpush1.bf16.msra.mxu0 %v26580_v24 }
 0x6bd   :  { %14964 = vmatprep.subr.bf16.mxu0 %v26588_v30  ;;  %v26669_v30 = vld [vmem:[#allocation10 + $0x1264] ss:$48 sps:$4 sm:$0xff]  }
 0x6c0   :  { %14965 = vmatpush1.bf16.msra.mxu0 %v26586_v27  ;;  %v26672_v27 = vld [vmem:[#allocation10 + $0x126c] ss:$48 sps:$4 sm:$0xff]  }
 0x6c1   :  { %14966 = vmatprep.subr.bf16.mxu0 %v26594_v22  ;;  %v26670_v22 = vld [vmem:[#allocation10 + $0x1268] ss:$48 sps:$4 sm:$0xff]  }
 0x6c4   :  { %14967 = vmatpush1.bf16.msra.mxu0 %v26592_v16  ;;  %v26675_v16 = vld [vmem:[#allocation10 + $0x12c4] ss:$48 sps:$4 sm:$0xff]  }
 0x6c5   :  { %14968 = vmatprep.subr.bf16.mxu0 %v26600_v21  ;;  %v26678_v21 = vld [vmem:[#allocation10 + $0x12cc] ss:$48 sps:$4 sm:$0xff]  }
 0x6c8   :  { %14969 = vmatpush1.bf16.msra.mxu0 %v26598_v25  ;;  %v26673_v25 = vld [vmem:[#allocation10 + $0x12c0] ss:$48 sps:$4 sm:$0xff]  }
 0x6c9   :  { %14970 = vmatprep.subr.bf16.mxu0 %v26606_v13  ;;  %v26676_v13 = vld [vmem:[#allocation10 + $0x12c8] ss:$48 sps:$4 sm:$0xff]  }
 0x6cc   :  { %14971 = vmatpush1.bf16.msra.mxu0 %v26604_v36  ;;  %v26681_v36 = vld [vmem:[#allocation10 + $0x1324] ss:$48 sps:$4 sm:$0xff]  }
 0x6cd   :  { %14972 = vmatprep.subr.bf16.mxu0 %v26612_v10  ;;  %v26684_v10 = vld [vmem:[#allocation10 + $0x132c] ss:$48 sps:$4 sm:$0xff]  }
 0x6d0   :  { %14973 = vmatpush1.bf16.msra.mxu0 %v26610_v28  ;;  %v26679_v28 = vld [vmem:[#allocation10 + $0x1320] ss:$48 sps:$4 sm:$0xff]  }
 0x6d1   :  { %14974 = vmatprep.subr.bf16.mxu0 %v26618_v29  ;;  %v26682_v29 = vld [vmem:[#allocation10 + $0x1328] ss:$48 sps:$4 sm:$0xff]  }
 0x6d4   :  { %14975 = vmatpush1.bf16.msra.mxu0 %v26616_v39 }
 0x6d5   :  { %14976 = vmatprep.subr.bf16.mxu0 %v26624_v31  ;;  %v26687_v31 = vld [vmem:[#allocation10 + $0x1384] ss:$48 sps:$4 sm:$0xff]  }
 0x6d8   :  { %14977 = vmatpush1.bf16.msra.mxu0 %v26622_v62  ;;  %v26690_v62 = vld [vmem:[#allocation10 + $0x138c] ss:$48 sps:$4 sm:$0xff]  }
 0x6d9   :  { %14978 = vmatprep.subr.bf16.mxu0 %v26630_v43 }
 0x6dc   :  { %14979 = vmatpush1.bf16.msra.mxu0 %v26628_v5  ;;  %v26685_v5 = vld [vmem:[#allocation10 + $0x1380] ss:$48 sps:$4 sm:$0xff]  }
 0x6dd   :  { %14980 = vmatprep.subr.bf16.mxu0 %v26636_v32  ;;  %v26688_v32 = vld [vmem:[#allocation10 + $0x1388] ss:$48 sps:$4 sm:$0xff]  }
 0x6e0   :  { %14981 = vmatpush1.bf16.msra.mxu0 %v26634_v60  ;;  %v26693_v60 = vld [vmem:[#allocation10 + $0x13e4] ss:$48 sps:$4 sm:$0xff]  }
 0x6e1   :  { %14982 = vmatprep.subr.bf16.mxu0 %v26642_v35  ;;  %v26696_v35 = vld [vmem:[#allocation10 + $0x13ec] ss:$48 sps:$4 sm:$0xff]  }
 0x6e4   :  { %14983 = vmatpush1.bf16.msra.mxu0 %v26640_v9  ;;  %v26691_v9 = vld [vmem:[#allocation10 + $0x13e0] ss:$48 sps:$4 sm:$0xff]  }
 0x6e5   :  { %14984 = vmatprep.subr.bf16.mxu0 %v26648_v55  ;;  %v26694_v55 = vld [vmem:[#allocation10 + $0x13e8] ss:$48 sps:$4 sm:$0xff]  }
 0x6e8   :  { %14985 = vmatpush1.bf16.msra.mxu0 %v26646_v48  ;;  %v26699_v48 = vld [vmem:[#allocation10 + $0x1444] ss:$48 sps:$4 sm:$0xff]  }
 0x6e9   :  { %14986 = vmatprep.subr.bf16.mxu0 %v26654_v40  ;;  %v26702_v40 = vld [vmem:[#allocation10 + $0x144c] ss:$48 sps:$4 sm:$0xff]  }
 0x6ec   :  { %14987 = vmatpush1.bf16.msra.mxu0 %v26652_v47  ;;  %v26697_v47 = vld [vmem:[#allocation10 + $0x1440] ss:$48 sps:$4 sm:$0xff]  }
 0x6ed   :  { %14988 = vmatprep.subr.bf16.mxu0 %v26660_v41  ;;  %v26700_v41 = vld [vmem:[#allocation10 + $0x1448] ss:$48 sps:$4 sm:$0xff]  }
 0x6f0   :  { %14989 = vmatpush1.bf16.msra.mxu0 %v26658_v50  ;;  %v26705_v50 = vld [vmem:[#allocation10 + $0x14a4] ss:$48 sps:$4 sm:$0xff]  }
 0x6f1   :  { %14999 = vmatprep.subr.bf16.mxu0 %v26666_v59  ;;  %v26708_v59 = vld [vmem:[#allocation10 + $0x14ac] ss:$48 sps:$4 sm:$0xff]  }
 0x706   :  { %v10320_v45 = vpop.f32.mrb[16].mxu0 }
 0x707   :  { %v24100_v54 = vadd.f32 %v10320_v45, %v6117_v52  ;;  %v10322_v58 = vpop.f32.mrb[17].mxu0  ;;  %v26706_v52 = vld [vmem:[#allocation10 + $0x14a8] ss:$48 sps:$4 sm:$0xff]   ;;  %v26714_v45 = vld [vmem:[#allocation10 + $0x1c] ss:$48 sps:$4 sm:$0xff]  }
 0x708   :  { %v24101_v33 = vadd.f32 %v10322_v58, %v6121_v53  ;;  %v10324_v46 = vpop.f32.mrb[18].mxu0  ;;  %v26711_v53 = vld [vmem:[#allocation10 + $0x14] ss:$48 sps:$4 sm:$0xff]   ;;  %v26709_v58 = vld [vmem:[#allocation10 + $0x10] ss:$48 sps:$4 sm:$0xff]  }
 0x709   :  { %v22454_v63 = vmul.f32 -1.442695, %v24100_v54  ;;  %v10325_v11 = vpop.f32.mrb[19].mxu0  ;;  %v26712_v46 = vld [vmem:[#allocation10 + $0x18] ss:$48 sps:$4 sm:$0xff]  }
 0x70a   :  { %v22455_v0 = vmul.f32 -1.442695, %v24101_v33  ;;  %v26720_v11 = vld [vmem:[#allocation10 + $0x7c] ss:$48 sps:$4 sm:$0xff]  }
 0x70b   :  { %28405 = vpow2.f32 %v22454_v63  ;;  %v26717_v63 = vld [vmem:[#allocation10 + $0x74] ss:$48 sps:$4 sm:$0xff]  }
 0x70c   :  { %28407 = vpow2.f32 %v22455_v0  ;;  %v26715_v0 = vld [vmem:[#allocation10 + $0x70] ss:$48 sps:$4 sm:$0xff]  }
 0x715   :  { %v28406_v57 = vpop.eup %28405 }
 0x716   :  { %v28408_v44 = vpop.eup %28407  ;;  %v10592_v2 = vadd.f32 1.0, %v28406_v57  ;;  %v26718_v57 = vld [vmem:[#allocation10 + $0x78] ss:$48 sps:$4 sm:$0xff]  }
 0x717   :  { %v10593_v56 = vadd.f32 1.0, %v28408_v44  ;;  %v26723_v44 = vld [vmem:[#allocation10 + $0xd4] ss:$48 sps:$4 sm:$0xff]  }
 0x718   :  { %28409 = vrcp.f32 %v10592_v2  ;;  %v26726_v2 = vld [vmem:[#allocation10 + $0xdc] ss:$48 sps:$4 sm:$0xff]  }
 0x719   :  { %28411 = vrcp.f32 %v10593_v56  ;;  %v26721_v56 = vld [vmem:[#allocation10 + $0xd0] ss:$48 sps:$4 sm:$0xff]  }
 0x71a   :  { %28413 = vpow2.f32 %v22456_v6  ;;  %v26732_v6 = vld [vmem:[#allocation10 + $0x13c] ss:$48 sps:$4 sm:$0xff]  }
 0x722   :  { %v28410_v61 = vpop.eup %28409 }
 0x723   :  { %v28412_v4 = vpop.eup %28411  ;;  %v29178_v24 = vpack.c.bf16 %v28410_v61, %v28410_v61  ;;  %v26724_v61 = vld [vmem:[#allocation10 + $0xd8] ss:$48 sps:$4 sm:$0xff]  }
 0x724   :  { %v29176_v12 = vpack.c.bf16 %v28412_v4, %v28412_v4  ;;  %v28414_v39 = vpop.eup %28413  ;;  %v26729_v4 = vld [vmem:[#allocation10 + $0x134] ss:$48 sps:$4 sm:$0xff]  }
 0x725   :  { %v10594_v43 = vadd.f32 1.0, %v28414_v39  ;;  %v26753_v39 = vld [vmem:[#allocation10 + $0x2b4] ss:$48 sps:$4 sm:$0xff]  }
 0x726   :  { %14826 = vmatprep.mubr.bf16.mxu1 %v29176_v12  ;;  %14990 = vmatprep.mubr.bf16.mxu0 %v29176_v12 }
 0x727   :  { %14827 = vmatmul.mubr.bf16.vlgmr.msra.gmra.mrb[40].mxu1 %v29178_v24  ;;  %14991 = vmatmul.mubr.bf16.vlgmr.msra.gmra.mrb[20].mxu0 %v29178_v24  ;;  %28415 = vrcp.f32 %v10594_v43  ;;  %v26754_v43 = vld [vmem:[#allocation10 + $0x2b8] ss:$48 sps:$4 sm:$0xff]  }
 0x728   :  { %14836 = vmatpush1.bf16.msra.mxu1 %v26661_v17  ;;  %15000 = vmatpush1.bf16.msra.mxu0 %v26664_v18  ;;  %v26727_v17 = vld [vmem:[#allocation10 + $0x130] ss:$48 sps:$4 sm:$0xff]   ;;  %v26730_v18 = vld [vmem:[#allocation10 + $0x138] ss:$48 sps:$4 sm:$0xff]  }
 0x729   :  { %14837 = vmatprep.subr.bf16.mxu1 %v26669_v30  ;;  %15001 = vmatprep.subr.bf16.mxu0 %v26672_v27  ;;  %v26735_v30 = vld [vmem:[#allocation10 + $0x194] ss:$48 sps:$4 sm:$0xff]   ;;  %v26738_v27 = vld [vmem:[#allocation10 + $0x19c] ss:$48 sps:$4 sm:$0xff]  }
 0x72a   :  { %14867 = vmatprep.mubr.bf16.mxu1 %v28721_v26  ;;  %15031 = vmatprep.mubr.bf16.mxu0 %v28721_v26 }
 0x72c   :  { %14838 = vmatpush1.bf16.msra.mxu1 %v26667_v49  ;;  %15002 = vmatpush1.bf16.msra.mxu0 %v26670_v22  ;;  %v26733_v49 = vld [vmem:[#allocation10 + $0x190] ss:$48 sps:$4 sm:$0xff]   ;;  %v26736_v22 = vld [vmem:[#allocation10 + $0x198] ss:$48 sps:$4 sm:$0xff]  }
 0x72d   :  { %14839 = vmatprep.subr.bf16.mxu1 %v26675_v16  ;;  %15003 = vmatprep.subr.bf16.mxu0 %v26678_v21  ;;  %v26741_v16 = vld [vmem:[#allocation10 + $0x1f4] ss:$48 sps:$4 sm:$0xff]   ;;  %v26744_v21 = vld [vmem:[#allocation10 + $0x1fc] ss:$48 sps:$4 sm:$0xff]  }
 0x730   :  { %14840 = vmatpush1.bf16.msra.mxu1 %v26673_v25  ;;  %15004 = vmatpush1.bf16.msra.mxu0 %v26676_v13  ;;  %v26739_v25 = vld [vmem:[#allocation10 + $0x1f0] ss:$48 sps:$4 sm:$0xff]   ;;  %v26742_v13 = vld [vmem:[#allocation10 + $0x1f8] ss:$48 sps:$4 sm:$0xff]  }
 0x731   :  { %14841 = vmatprep.subr.bf16.mxu1 %v26681_v36  ;;  %15005 = vmatprep.subr.bf16.mxu0 %v26684_v10  ;;  %v28416_v54 = vpop.eup %28415  ;;  %v26747_v36 = vld [vmem:[#allocation10 + $0x254] ss:$48 sps:$4 sm:$0xff]   ;;  %v26750_v10 = vld [vmem:[#allocation10 + $0x25c] ss:$48 sps:$4 sm:$0xff]  }
 0x732   :  { %v29186_v33 = vpack.c.bf16 %v28416_v54, %v28416_v54  ;;  %v26783_v54 = vld [vmem:[#allocation10 + $0x494] ss:$48 sps:$4 sm:$0xff]  }
 0x734   :  { %14842 = vmatpush1.bf16.msra.mxu1 %v26679_v28  ;;  %15006 = vmatpush1.bf16.msra.mxu0 %v26682_v29  ;;  %v26745_v28 = vld [vmem:[#allocation10 + $0x250] ss:$48 sps:$4 sm:$0xff]   ;;  %v26748_v29 = vld [vmem:[#allocation10 + $0x258] ss:$48 sps:$4 sm:$0xff]  }
 0x735   :  { %14843 = vmatprep.subr.bf16.mxu1 %v26687_v31  ;;  %15007 = vmatprep.subr.bf16.mxu0 %v26690_v62  ;;  %v26756_v31 = vld [vmem:[#allocation10 + $0x2bc] ss:$48 sps:$4 sm:$0xff]   ;;  %v26751_v62 = vld [vmem:[#allocation10 + $0x2b0] ss:$48 sps:$4 sm:$0xff]  }
 0x738   :  { %14844 = vmatpush1.bf16.msra.mxu1 %v26685_v5  ;;  %15008 = vmatpush1.bf16.msra.mxu0 %v26688_v32  ;;  %v26759_v5 = vld [vmem:[#allocation10 + $0x314] ss:$48 sps:$4 sm:$0xff]   ;;  %v26762_v32 = vld [vmem:[#allocation10 + $0x31c] ss:$48 sps:$4 sm:$0xff]  }
 0x739   :  { %14845 = vmatprep.subr.bf16.mxu1 %v26693_v60  ;;  %15009 = vmatprep.subr.bf16.mxu0 %v26696_v35  ;;  %v26757_v60 = vld [vmem:[#allocation10 + $0x310] ss:$48 sps:$4 sm:$0xff]   ;;  %v26760_v35 = vld [vmem:[#allocation10 + $0x318] ss:$48 sps:$4 sm:$0xff]  }
 0x73c   :  { %14846 = vmatpush1.bf16.msra.mxu1 %v26691_v9  ;;  %15010 = vmatpush1.bf16.msra.mxu0 %v26694_v55  ;;  %v26765_v9 = vld [vmem:[#allocation10 + $0x374] ss:$48 sps:$4 sm:$0xff]   ;;  %v26768_v55 = vld [vmem:[#allocation10 + $0x37c] ss:$48 sps:$4 sm:$0xff]  }
 0x73d   :  { %14847 = vmatprep.subr.bf16.mxu1 %v26699_v48  ;;  %15011 = vmatprep.subr.bf16.mxu0 %v26702_v40  ;;  %v26763_v48 = vld [vmem:[#allocation10 + $0x370] ss:$48 sps:$4 sm:$0xff]   ;;  %v26766_v40 = vld [vmem:[#allocation10 + $0x378] ss:$48 sps:$4 sm:$0xff]  }
 0x740   :  { %14848 = vmatpush1.bf16.msra.mxu1 %v26697_v47  ;;  %15012 = vmatpush1.bf16.msra.mxu0 %v26700_v41  ;;  %v26771_v47 = vld [vmem:[#allocation10 + $0x3d4] ss:$48 sps:$4 sm:$0xff]   ;;  %v26774_v41 = vld [vmem:[#allocation10 + $0x3dc] ss:$48 sps:$4 sm:$0xff]  }
 0x741   :  { %14849 = vmatprep.subr.bf16.mxu1 %v26705_v50  ;;  %15013 = vmatprep.subr.bf16.mxu0 %v26708_v59  ;;  %v26769_v50 = vld [vmem:[#allocation10 + $0x3d0] ss:$48 sps:$4 sm:$0xff]   ;;  %v26772_v59 = vld [vmem:[#allocation10 + $0x3d8] ss:$48 sps:$4 sm:$0xff]  }
 0x744   :  { %14850 = vmatpush1.bf16.msra.mxu1 %v26703_v51  ;;  %15014 = vmatpush1.bf16.msra.mxu0 %v26706_v52  ;;  %v26777_v51 = vld [vmem:[#allocation10 + $0x434] ss:$48 sps:$4 sm:$0xff]   ;;  %v26780_v52 = vld [vmem:[#allocation10 + $0x43c] ss:$48 sps:$4 sm:$0xff]  }
 0x745   :  { %15040 = vmatprep.subr.bf16.mxu1 %v26711_v53  ;;  %15204 = vmatprep.subr.bf16.mxu0 %v26714_v45  ;;  %v26775_v53 = vld [vmem:[#allocation10 + $0x430] ss:$48 sps:$4 sm:$0xff]   ;;  %v26778_v45 = vld [vmem:[#allocation10 + $0x438] ss:$48 sps:$4 sm:$0xff]  }
 0x747   :  { %14868 = vmatmul.mubr.bf16.vlgmr.msra.gmra.mrb[40].mxu1 %v29186_v33  ;;  %15032 = vmatmul.mubr.bf16.vlgmr.msra.gmra.mrb[20].mxu0 %v29186_v33 }
 0x748   :  { %15041 = vmatpush1.bf16.msra.mxu1 %v26709_v58  ;;  %15072 = vmatprep.mubr.bf16.mxu1 %v29136_v3  ;;  %v26786_v58 = vld [vmem:[#allocation10 + $0x49c] ss:$48 sps:$4 sm:$0xff]  }
 0x749   :  { %15205 = vmatpush1.bf16.msra.mxu0 %v26712_v46  ;;  %15236 = vmatprep.mubr.bf16.mxu0 %v29136_v3  ;;  %v26781_v46 = vld [vmem:[#allocation10 + $0x490] ss:$48 sps:$4 sm:$0xff]  }
 0x74a   :  { %15042 = vmatprep.subr.bf16.mxu1 %v26717_v63  ;;  %15206 = vmatprep.subr.bf16.mxu0 %v26720_v11  ;;  %v26784_v63 = vld [vmem:[#allocation10 + $0x498] ss:$48 sps:$4 sm:$0xff]   ;;  %v26789_v11 = vld [vmem:[#allocation10 + $0x4f4] ss:$48 sps:$4 sm:$0xff]  }
 0x74c   :  { %15043 = vmatpush1.bf16.msra.mxu1 %v26715_v0  ;;  %v26792_v0 = vld [vmem:[#allocation10 + $0x4fc] ss:$48 sps:$4 sm:$0xff]  }
 0x74d   :  { %15207 = vmatpush1.bf16.msra.mxu0 %v26718_v57  ;;  %15044 = vmatprep.subr.bf16.mxu1 %v26723_v44  ;;  %v26787_v57 = vld [vmem:[#allocation10 + $0x4f0] ss:$48 sps:$4 sm:$0xff]   ;;  %v26790_v44 = vld [vmem:[#allocation10 + $0x4f8] ss:$48 sps:$4 sm:$0xff]  }
 0x74e   :  { %15208 = vmatprep.subr.bf16.mxu0 %v26726_v2  ;;  %v26795_v2 = vld [vmem:[#allocation10 + $0x554] ss:$48 sps:$4 sm:$0xff]  }
 0x750   :  { %15045 = vmatpush1.bf16.msra.mxu1 %v26721_v56  ;;  %v26798_v56 = vld [vmem:[#allocation10 + $0x55c] ss:$48 sps:$4 sm:$0xff]  }
 0x751   :  { %15209 = vmatpush1.bf16.msra.mxu0 %v26724_v61  ;;  %15046 = vmatprep.subr.bf16.mxu1 %v26729_v4  ;;  %v26793_v61 = vld [vmem:[#allocation10 + $0x550] ss:$48 sps:$4 sm:$0xff]   ;;  %v26796_v4 = vld [vmem:[#allocation10 + $0x558] ss:$48 sps:$4 sm:$0xff]  }
 0x752   :  { %15210 = vmatprep.subr.bf16.mxu0 %v26732_v6  ;;  %v26801_v6 = vld [vmem:[#allocation10 + $0x5b4] ss:$48 sps:$4 sm:$0xff]  }
 0x754   :  { %15047 = vmatpush1.bf16.msra.mxu1 %v26727_v17  ;;  %v26804_v17 = vld [vmem:[#allocation10 + $0x5bc] ss:$48 sps:$4 sm:$0xff]  }
 0x755   :  { %15211 = vmatpush1.bf16.msra.mxu0 %v26730_v18  ;;  %15048 = vmatprep.subr.bf16.mxu1 %v26735_v30  ;;  %v26799_v18 = vld [vmem:[#allocation10 + $0x5b0] ss:$48 sps:$4 sm:$0xff]   ;;  %v26802_v30 = vld [vmem:[#allocation10 + $0x5b8] ss:$48 sps:$4 sm:$0xff]  }
 0x756   :  { %15212 = vmatprep.subr.bf16.mxu0 %v26738_v27  ;;  %v26807_v27 = vld [vmem:[#allocation10 + $0x614] ss:$48 sps:$4 sm:$0xff]  }
 0x758   :  { %15049 = vmatpush1.bf16.msra.mxu1 %v26733_v49  ;;  %v26810_v49 = vld [vmem:[#allocation10 + $0x61c] ss:$48 sps:$4 sm:$0xff]  }
 0x759   :  { %15213 = vmatpush1.bf16.msra.mxu0 %v26736_v22  ;;  %15050 = vmatprep.subr.bf16.mxu1 %v26741_v16  ;;  %v26805_v22 = vld [vmem:[#allocation10 + $0x610] ss:$48 sps:$4 sm:$0xff]   ;;  %v26808_v16 = vld [vmem:[#allocation10 + $0x618] ss:$48 sps:$4 sm:$0xff]  }
 0x75a   :  { %15214 = vmatprep.subr.bf16.mxu0 %v26744_v21  ;;  %v26813_v21 = vld [vmem:[#allocation10 + $0x674] ss:$48 sps:$4 sm:$0xff]  }
 0x75c   :  { %15051 = vmatpush1.bf16.msra.mxu1 %v26739_v25  ;;  %v26816_v25 = vld [vmem:[#allocation10 + $0x67c] ss:$48 sps:$4 sm:$0xff]  }
 0x75d   :  { %15215 = vmatpush1.bf16.msra.mxu0 %v26742_v13  ;;  %15052 = vmatprep.subr.bf16.mxu1 %v26747_v36  ;;  %v26811_v13 = vld [vmem:[#allocation10 + $0x670] ss:$48 sps:$4 sm:$0xff]   ;;  %v26814_v36 = vld [vmem:[#allocation10 + $0x678] ss:$48 sps:$4 sm:$0xff]  }
 0x75e   :  { %15216 = vmatprep.subr.bf16.mxu0 %v26750_v10  ;;  %v26819_v10 = vld [vmem:[#allocation10 + $0x6d4] ss:$48 sps:$4 sm:$0xff]  }
 0x760   :  { %15053 = vmatpush1.bf16.msra.mxu1 %v26745_v28  ;;  %v26822_v28 = vld [vmem:[#allocation10 + $0x6dc] ss:$48 sps:$4 sm:$0xff]  }
 0x761   :  { %15217 = vmatpush1.bf16.msra.mxu0 %v26748_v29  ;;  %15054 = vmatprep.subr.bf16.mxu1 %v26753_v39  ;;  %v26817_v29 = vld [vmem:[#allocation10 + $0x6d0] ss:$48 sps:$4 sm:$0xff]   ;;  %v26820_v39 = vld [vmem:[#allocation10 + $0x6d8] ss:$48 sps:$4 sm:$0xff]  }
 0x762   :  { %15218 = vmatprep.subr.bf16.mxu0 %v26756_v31  ;;  %v26825_v31 = vld [vmem:[#allocation10 + $0x734] ss:$48 sps:$4 sm:$0xff]  }
 0x764   :  { %15055 = vmatpush1.bf16.msra.mxu1 %v26751_v62  ;;  %v26828_v62 = vld [vmem:[#allocation10 + $0x73c] ss:$48 sps:$4 sm:$0xff]  }
 0x765   :  { %15219 = vmatpush1.bf16.msra.mxu0 %v26754_v43  ;;  %15056 = vmatprep.subr.bf16.mxu1 %v26759_v5  ;;  %v26823_v43 = vld [vmem:[#allocation10 + $0x730] ss:$48 sps:$4 sm:$0xff]   ;;  %v26826_v5 = vld [vmem:[#allocation10 + $0x738] ss:$48 sps:$4 sm:$0xff]  }
 0x766   :  { %15220 = vmatprep.subr.bf16.mxu0 %v26762_v32  ;;  %v26831_v32 = vld [vmem:[#allocation10 + $0x794] ss:$48 sps:$4 sm:$0xff]  }
 0x768   :  { %15057 = vmatpush1.bf16.msra.mxu1 %v26757_v60  ;;  %v26834_v60 = vld [vmem:[#allocation10 + $0x79c] ss:$48 sps:$4 sm:$0xff]  }
 0x769   :  { %15221 = vmatpush1.bf16.msra.mxu0 %v26760_v35  ;;  %15058 = vmatprep.subr.bf16.mxu1 %v26765_v9  ;;  %v26829_v35 = vld [vmem:[#allocation10 + $0x790] ss:$48 sps:$4 sm:$0xff]   ;;  %v26832_v9 = vld [vmem:[#allocation10 + $0x798] ss:$48 sps:$4 sm:$0xff]  }
 0x76a   :  { %15222 = vmatprep.subr.bf16.mxu0 %v26768_v55  ;;  %v26837_v55 = vld [vmem:[#allocation10 + $0x7f4] ss:$48 sps:$4 sm:$0xff]  }
 0x76c   :  { %15059 = vmatpush1.bf16.msra.mxu1 %v26763_v48  ;;  %v26840_v48 = vld [vmem:[#allocation10 + $0x7fc] ss:$48 sps:$4 sm:$0xff]  }
 0x76d   :  { %15223 = vmatpush1.bf16.msra.mxu0 %v26766_v40  ;;  %15060 = vmatprep.subr.bf16.mxu1 %v26771_v47  ;;  %v26835_v40 = vld [vmem:[#allocation10 + $0x7f0] ss:$48 sps:$4 sm:$0xff]   ;;  %v26838_v47 = vld [vmem:[#allocation10 + $0x7f8] ss:$48 sps:$4 sm:$0xff]  }
 0x76e   :  { %15224 = vmatprep.subr.bf16.mxu0 %v26774_v41  ;;  %v26843_v41 = vld [vmem:[#allocation10 + $0x854] ss:$48 sps:$4 sm:$0xff]  }
 0x770   :  { %15061 = vmatpush1.bf16.msra.mxu1 %v26769_v50  ;;  %v26846_v50 = vld [vmem:[#allocation10 + $0x85c] ss:$48 sps:$4 sm:$0xff]  }
 0x771   :  { %15225 = vmatpush1.bf16.msra.mxu0 %v26772_v59  ;;  %15062 = vmatprep.subr.bf16.mxu1 %v26777_v51  ;;  %v26841_v59 = vld [vmem:[#allocation10 + $0x850] ss:$48 sps:$4 sm:$0xff]   ;;  %v26844_v51 = vld [vmem:[#allocation10 + $0x858] ss:$48 sps:$4 sm:$0xff]  }
 0x772   :  { %15226 = vmatprep.subr.bf16.mxu0 %v26780_v52  ;;  %v26849_v52 = vld [vmem:[#allocation10 + $0x8b4] ss:$48 sps:$4 sm:$0xff]  }
 0x774   :  { %15063 = vmatpush1.bf16.msra.mxu1 %v26775_v53  ;;  %v26852_v53 = vld [vmem:[#allocation10 + $0x8bc] ss:$48 sps:$4 sm:$0xff]  }
 0x775   :  { %15227 = vmatpush1.bf16.msra.mxu0 %v26778_v45  ;;  %15064 = vmatprep.subr.bf16.mxu1 %v26783_v54  ;;  %v26847_v45 = vld [vmem:[#allocation10 + $0x8b0] ss:$48 sps:$4 sm:$0xff]   ;;  %v26850_v54 = vld [vmem:[#allocation10 + $0x8b8] ss:$48 sps:$4 sm:$0xff]  }
 0x776   :  { %15228 = vmatprep.subr.bf16.mxu0 %v26786_v58  ;;  %v26855_v58 = vld [vmem:[#allocation10 + $0x914] ss:$48 sps:$4 sm:$0xff]  }
 0x778   :  { %15065 = vmatpush1.bf16.msra.mxu1 %v26781_v46  ;;  %v26858_v46 = vld [vmem:[#allocation10 + $0x91c] ss:$48 sps:$4 sm:$0xff]  }
 0x779   :  { %15229 = vmatpush1.bf16.msra.mxu0 %v26784_v63  ;;  %15066 = vmatprep.subr.bf16.mxu1 %v26789_v11  ;;  %v26853_v63 = vld [vmem:[#allocation10 + $0x910] ss:$48 sps:$4 sm:$0xff]   ;;  %v26856_v11 = vld [vmem:[#allocation10 + $0x918] ss:$48 sps:$4 sm:$0xff]  }
 0x77a   :  { %15230 = vmatprep.subr.bf16.mxu0 %v26792_v0  ;;  %v26861_v0 = vld [vmem:[#allocation10 + $0x974] ss:$48 sps:$4 sm:$0xff]  }
 0x77c   :  { %15067 = vmatpush1.bf16.msra.mxu1 %v26787_v57  ;;  %v26864_v57 = vld [vmem:[#allocation10 + $0x97c] ss:$48 sps:$4 sm:$0xff]  }
 0x77d   :  { %15231 = vmatpush1.bf16.msra.mxu0 %v26790_v44  ;;  %15068 = vmatprep.subr.bf16.mxu1 %v26795_v2  ;;  %v26859_v44 = vld [vmem:[#allocation10 + $0x970] ss:$48 sps:$4 sm:$0xff]   ;;  %v26862_v2 = vld [vmem:[#allocation10 + $0x978] ss:$48 sps:$4 sm:$0xff]  }
 0x77e   :  { %15232 = vmatprep.subr.bf16.mxu0 %v26798_v56  ;;  %v26867_v56 = vld [vmem:[#allocation10 + $0x9d4] ss:$48 sps:$4 sm:$0xff]  }
 0x780   :  { %15069 = vmatpush1.bf16.msra.mxu1 %v26793_v61  ;;  %v26870_v61 = vld [vmem:[#allocation10 + $0x9dc] ss:$48 sps:$4 sm:$0xff]  }
 0x781   :  { %15233 = vmatpush1.bf16.msra.mxu0 %v26796_v4  ;;  %15070 = vmatprep.subr.bf16.mxu1 %v26801_v6  ;;  %v26865_v4 = vld [vmem:[#allocation10 + $0x9d0] ss:$48 sps:$4 sm:$0xff]   ;;  %v26868_v6 = vld [vmem:[#allocation10 + $0x9d8] ss:$48 sps:$4 sm:$0xff]  }
 0x782   :  { %15234 = vmatprep.subr.bf16.mxu0 %v26804_v17  ;;  %v26873_v17 = vld [vmem:[#allocation10 + $0xa34] ss:$48 sps:$4 sm:$0xff]  }
 0x784   :  { %15071 = vmatpush1.bf16.msra.mxu1 %v26799_v18  ;;  %v26876_v18 = vld [vmem:[#allocation10 + $0xa3c] ss:$48 sps:$4 sm:$0xff]  }
 0x785   :  { %15235 = vmatpush1.bf16.msra.mxu0 %v26802_v30  ;;  %15081 = vmatprep.subr.bf16.mxu1 %v26807_v27  ;;  %v26871_v30 = vld [vmem:[#allocation10 + $0xa30] ss:$48 sps:$4 sm:$0xff]   ;;  %v26874_v27 = vld [vmem:[#allocation10 + $0xa38] ss:$48 sps:$4 sm:$0xff]  }
 0x786   :  { %15245 = vmatprep.subr.bf16.mxu0 %v26810_v49  ;;  %v26879_v49 = vld [vmem:[#allocation10 + $0xa94] ss:$48 sps:$4 sm:$0xff]  }
 0x787   :  { %15073 = vmatmul.mubr.bf16.vlgmr.msra.gmra.mrb[44].mxu1 %v29141_v42 }
 0x788   :  { %15237 = vmatmul.mubr.bf16.vlgmr.msra.gmra.mrb[24].mxu0 %v29141_v42  ;;  %15082 = vmatpush1.bf16.msra.mxu1 %v26805_v22  ;;  %v26882_v22 = vld [vmem:[#allocation10 + $0xa9c] ss:$48 sps:$4 sm:$0xff]  }
 0x789   :  { %15113 = vmatprep.mubr.bf16.mxu1 %v29144_v34  ;;  %15246 = vmatpush1.bf16.msra.mxu0 %v26808_v16  ;;  %v26877_v16 = vld [vmem:[#allocation10 + $0xa90] ss:$48 sps:$4 sm:$0xff]  }
 0x78a   :  { %15277 = vmatprep.mubr.bf16.mxu0 %v29144_v34  ;;  %15083 = vmatprep.subr.bf16.mxu1 %v26813_v21  ;;  %v26880_v21 = vld [vmem:[#allocation10 + $0xa98] ss:$48 sps:$4 sm:$0xff]  }
 0x78b   :  { %15247 = vmatprep.subr.bf16.mxu0 %v26816_v25  ;;  %v26885_v25 = vld [vmem:[#allocation10 + $0xaf4] ss:$48 sps:$4 sm:$0xff]  }
 0x78c   :  { %15084 = vmatpush1.bf16.msra.mxu1 %v26811_v13  ;;  %v26888_v13 = vld [vmem:[#allocation10 + $0xafc] ss:$48 sps:$4 sm:$0xff]  }
 0x78d   :  { %15248 = vmatpush1.bf16.msra.mxu0 %v26814_v36  ;;  %15085 = vmatprep.subr.bf16.mxu1 %v26819_v10  ;;  %v26883_v36 = vld [vmem:[#allocation10 + $0xaf0] ss:$48 sps:$4 sm:$0xff]   ;;  %v26886_v10 = vld [vmem:[#allocation10 + $0xaf8] ss:$48 sps:$4 sm:$0xff]  }
 0x78e   :  { %15249 = vmatprep.subr.bf16.mxu0 %v26822_v28  ;;  %v26891_v28 = vld [vmem:[#allocation10 + $0xb54] ss:$48 sps:$4 sm:$0xff]  }
 0x790   :  { %15086 = vmatpush1.bf16.msra.mxu1 %v26817_v29  ;;  %v26894_v29 = vld [vmem:[#allocation10 + $0xb5c] ss:$48 sps:$4 sm:$0xff]  }
 0x791   :  { %15250 = vmatpush1.bf16.msra.mxu0 %v26820_v39  ;;  %15087 = vmatprep.subr.bf16.mxu1 %v26825_v31  ;;  %v26889_v39 = vld [vmem:[#allocation10 + $0xb50] ss:$48 sps:$4 sm:$0xff]   ;;  %v26892_v31 = vld [vmem:[#allocation10 + $0xb58] ss:$48 sps:$4 sm:$0xff]  }
 0x792   :  { %15251 = vmatprep.subr.bf16.mxu0 %v26828_v62  ;;  %v26897_v62 = vld [vmem:[#allocation10 + $0xbb4] ss:$48 sps:$4 sm:$0xff]  }
 0x794   :  { %15088 = vmatpush1.bf16.msra.mxu1 %v26823_v43  ;;  %v26900_v43 = vld [vmem:[#allocation10 + $0xbbc] ss:$48 sps:$4 sm:$0xff]  }
 0x795   :  { %15252 = vmatpush1.bf16.msra.mxu0 %v26826_v5  ;;  %15089 = vmatprep.subr.bf16.mxu1 %v26831_v32  ;;  %v26895_v5 = vld [vmem:[#allocation10 + $0xbb0] ss:$48 sps:$4 sm:$0xff]   ;;  %v26898_v32 = vld [vmem:[#allocation10 + $0xbb8] ss:$48 sps:$4 sm:$0xff]  }
 0x796   :  { %15253 = vmatprep.subr.bf16.mxu0 %v26834_v60  ;;  %v26903_v60 = vld [vmem:[#allocation10 + $0xc14] ss:$48 sps:$4 sm:$0xff]  }
 0x798   :  { %15090 = vmatpush1.bf16.msra.mxu1 %v26829_v35  ;;  %v26906_v35 = vld [vmem:[#allocation10 + $0xc1c] ss:$48 sps:$4 sm:$0xff]  }
 0x799   :  { %15254 = vmatpush1.bf16.msra.mxu0 %v26832_v9  ;;  %15091 = vmatprep.subr.bf16.mxu1 %v26837_v55  ;;  %v26901_v9 = vld [vmem:[#allocation10 + $0xc10] ss:$48 sps:$4 sm:$0xff]   ;;  %v26904_v55 = vld [vmem:[#allocation10 + $0xc18] ss:$48 sps:$4 sm:$0xff]  }
 0x79a   :  { %15255 = vmatprep.subr.bf16.mxu0 %v26840_v48  ;;  %v26909_v48 = vld [vmem:[#allocation10 + $0xc74] ss:$48 sps:$4 sm:$0xff]  }
 0x79c   :  { %15092 = vmatpush1.bf16.msra.mxu1 %v26835_v40  ;;  %v26912_v40 = vld [vmem:[#allocation10 + $0xc7c] ss:$48 sps:$4 sm:$0xff]  }
 0x79d   :  { %15256 = vmatpush1.bf16.msra.mxu0 %v26838_v47  ;;  %15093 = vmatprep.subr.bf16.mxu1 %v26843_v41  ;;  %v26907_v47 = vld [vmem:[#allocation10 + $0xc70] ss:$48 sps:$4 sm:$0xff]   ;;  %v26910_v41 = vld [vmem:[#allocation10 + $0xc78] ss:$48 sps:$4 sm:$0xff]  }
 0x79e   :  { %15257 = vmatprep.subr.bf16.mxu0 %v26846_v50  ;;  %v26915_v50 = vld [vmem:[#allocation10 + $0xcd4] ss:$48 sps:$4 sm:$0xff]  }
 0x7a0   :  { %15094 = vmatpush1.bf16.msra.mxu1 %v26841_v59  ;;  %v26918_v59 = vld [vmem:[#allocation10 + $0xcdc] ss:$48 sps:$4 sm:$0xff]  }
 0x7a1   :  { %15258 = vmatpush1.bf16.msra.mxu0 %v26844_v51  ;;  %15095 = vmatprep.subr.bf16.mxu1 %v26849_v52  ;;  %v26913_v51 = vld [vmem:[#allocation10 + $0xcd0] ss:$48 sps:$4 sm:$0xff]   ;;  %v26916_v52 = vld [vmem:[#allocation10 + $0xcd8] ss:$48 sps:$4 sm:$0xff]  }
 0x7a2   :  { %15259 = vmatprep.subr.bf16.mxu0 %v26852_v53  ;;  %v26921_v53 = vld [vmem:[#allocation10 + $0xd34] ss:$48 sps:$4 sm:$0xff]  }
 0x7a4   :  { %15096 = vmatpush1.bf16.msra.mxu1 %v26847_v45  ;;  %v26924_v45 = vld [vmem:[#allocation10 + $0xd3c] ss:$48 sps:$4 sm:$0xff]  }
 0x7a5   :  { %15260 = vmatpush1.bf16.msra.mxu0 %v26850_v54  ;;  %15097 = vmatprep.subr.bf16.mxu1 %v26855_v58  ;;  %v26919_v54 = vld [vmem:[#allocation10 + $0xd30] ss:$48 sps:$4 sm:$0xff]   ;;  %v26922_v58 = vld [vmem:[#allocation10 + $0xd38] ss:$48 sps:$4 sm:$0xff]  }
 0x7a6   :  { %15261 = vmatprep.subr.bf16.mxu0 %v26858_v46  ;;  %v26927_v46 = vld [vmem:[#allocation10 + $0xd94] ss:$48 sps:$4 sm:$0xff]  }
 0x7a8   :  { %15098 = vmatpush1.bf16.msra.mxu1 %v26853_v63  ;;  %v26930_v63 = vld [vmem:[#allocation10 + $0xd9c] ss:$48 sps:$4 sm:$0xff]  }
 0x7a9   :  { %15262 = vmatpush1.bf16.msra.mxu0 %v26856_v11  ;;  %15099 = vmatprep.subr.bf16.mxu1 %v26861_v0  ;;  %v26925_v11 = vld [vmem:[#allocation10 + $0xd90] ss:$48 sps:$4 sm:$0xff]   ;;  %v26928_v0 = vld [vmem:[#allocation10 + $0xd98] ss:$48 sps:$4 sm:$0xff]  }
 0x7aa   :  { %15263 = vmatprep.subr.bf16.mxu0 %v26864_v57  ;;  %v26933_v57 = vld [vmem:[#allocation10 + $0xdf4] ss:$48 sps:$4 sm:$0xff]  }
 0x7ac   :  { %15100 = vmatpush1.bf16.msra.mxu1 %v26859_v44  ;;  %v26936_v44 = vld [vmem:[#allocation10 + $0xdfc] ss:$48 sps:$4 sm:$0xff]  }
 0x7ad   :  { %15264 = vmatpush1.bf16.msra.mxu0 %v26862_v2  ;;  %15101 = vmatprep.subr.bf16.mxu1 %v26867_v56  ;;  %v26931_v2 = vld [vmem:[#allocation10 + $0xdf0] ss:$48 sps:$4 sm:$0xff]   ;;  %v26934_v56 = vld [vmem:[#allocation10 + $0xdf8] ss:$48 sps:$4 sm:$0xff]  }
 0x7ae   :  { %15265 = vmatprep.subr.bf16.mxu0 %v26870_v61  ;;  %v26939_v61 = vld [vmem:[#allocation10 + $0xe54] ss:$48 sps:$4 sm:$0xff]  }
 0x7b0   :  { %15102 = vmatpush1.bf16.msra.mxu1 %v26865_v4  ;;  %v26942_v4 = vld [vmem:[#allocation10 + $0xe5c] ss:$48 sps:$4 sm:$0xff]  }
 0x7b1   :  { %15266 = vmatpush1.bf16.msra.mxu0 %v26868_v6  ;;  %15103 = vmatprep.subr.bf16.mxu1 %v26873_v17  ;;  %v26937_v6 = vld [vmem:[#allocation10 + $0xe50] ss:$48 sps:$4 sm:$0xff]   ;;  %v26940_v17 = vld [vmem:[#allocation10 + $0xe58] ss:$48 sps:$4 sm:$0xff]  }
 0x7b2   :  { %15267 = vmatprep.subr.bf16.mxu0 %v26876_v18  ;;  %v26945_v18 = vld [vmem:[#allocation10 + $0xeb4] ss:$48 sps:$4 sm:$0xff]  }
 0x7b4   :  { %15104 = vmatpush1.bf16.msra.mxu1 %v26871_v30  ;;  %v26948_v30 = vld [vmem:[#allocation10 + $0xebc] ss:$48 sps:$4 sm:$0xff]  }
 0x7b5   :  { %15268 = vmatpush1.bf16.msra.mxu0 %v26874_v27  ;;  %15105 = vmatprep.subr.bf16.mxu1 %v26879_v49  ;;  %v26943_v27 = vld [vmem:[#allocation10 + $0xeb0] ss:$48 sps:$4 sm:$0xff]   ;;  %v26946_v49 = vld [vmem:[#allocation10 + $0xeb8] ss:$48 sps:$4 sm:$0xff]  }
 0x7b6   :  { %15269 = vmatprep.subr.bf16.mxu0 %v26882_v22  ;;  %v26951_v22 = vld [vmem:[#allocation10 + $0xf14] ss:$48 sps:$4 sm:$0xff]  }
 0x7b8   :  { %15106 = vmatpush1.bf16.msra.mxu1 %v26877_v16  ;;  %v26954_v16 = vld [vmem:[#allocation10 + $0xf1c] ss:$48 sps:$4 sm:$0xff]  }
 0x7b9   :  { %15270 = vmatpush1.bf16.msra.mxu0 %v26880_v21  ;;  %15107 = vmatprep.subr.bf16.mxu1 %v26885_v25  ;;  %v26949_v21 = vld [vmem:[#allocation10 + $0xf10] ss:$48 sps:$4 sm:$0xff]   ;;  %v26952_v25 = vld [vmem:[#allocation10 + $0xf18] ss:$48 sps:$4 sm:$0xff]  }
 0x7ba   :  { %15271 = vmatprep.subr.bf16.mxu0 %v26888_v13  ;;  %v26957_v13 = vld [vmem:[#allocation10 + $0xf74] ss:$48 sps:$4 sm:$0xff]  }
 0x7bc   :  { %15108 = vmatpush1.bf16.msra.mxu1 %v26883_v36  ;;  %v26960_v36 = vld [vmem:[#allocation10 + $0xf7c] ss:$48 sps:$4 sm:$0xff]  }
 0x7bd   :  { %15272 = vmatpush1.bf16.msra.mxu0 %v26886_v10  ;;  %15109 = vmatprep.subr.bf16.mxu1 %v26891_v28  ;;  %v26955_v10 = vld [vmem:[#allocation10 + $0xf70] ss:$48 sps:$4 sm:$0xff]   ;;  %v26958_v28 = vld [vmem:[#allocation10 + $0xf78] ss:$48 sps:$4 sm:$0xff]  }
 0x7be   :  { %15273 = vmatprep.subr.bf16.mxu0 %v26894_v29  ;;  %v26963_v29 = vld [vmem:[#allocation10 + $0xfd4] ss:$48 sps:$4 sm:$0xff]  }
 0x7c0   :  { %15110 = vmatpush1.bf16.msra.mxu1 %v26889_v39  ;;  %v26966_v39 = vld [vmem:[#allocation10 + $0xfdc] ss:$48 sps:$4 sm:$0xff]  }
 0x7c1   :  { %15274 = vmatpush1.bf16.msra.mxu0 %v26892_v31  ;;  %15111 = vmatprep.subr.bf16.mxu1 %v26897_v62  ;;  %v26961_v31 = vld [vmem:[#allocation10 + $0xfd0] ss:$48 sps:$4 sm:$0xff]   ;;  %v26964_v62 = vld [vmem:[#allocation10 + $0xfd8] ss:$48 sps:$4 sm:$0xff]  }
 0x7c2   :  { %15275 = vmatprep.subr.bf16.mxu0 %v26900_v43  ;;  %v26969_v43 = vld [vmem:[#allocation10 + $0x1034] ss:$48 sps:$4 sm:$0xff]  }
 0x7c4   :  { %15112 = vmatpush1.bf16.msra.mxu1 %v26895_v5  ;;  %v26972_v5 = vld [vmem:[#allocation10 + $0x103c] ss:$48 sps:$4 sm:$0xff]  }
 0x7c5   :  { %15276 = vmatpush1.bf16.msra.mxu0 %v26898_v32  ;;  %15122 = vmatprep.subr.bf16.mxu1 %v26903_v60  ;;  %v26967_v32 = vld [vmem:[#allocation10 + $0x1030] ss:$48 sps:$4 sm:$0xff]   ;;  %v26970_v60 = vld [vmem:[#allocation10 + $0x1038] ss:$48 sps:$4 sm:$0xff]  }
 0x7c6   :  { %15286 = vmatprep.subr.bf16.mxu0 %v26906_v35  ;;  %v26975_v35 = vld [vmem:[#allocation10 + $0x1094] ss:$48 sps:$4 sm:$0xff]  }
 0x7c7   :  { %15114 = vmatmul.mubr.bf16.vlgmr.msra.gmra.mrb[44].mxu1 %v29158_v23 }
 0x7c8   :  { %15278 = vmatmul.mubr.bf16.vlgmr.msra.gmra.mrb[24].mxu0 %v29158_v23  ;;  %15123 = vmatpush1.bf16.msra.mxu1 %v26901_v9  ;;  %v26978_v9 = vld [vmem:[#allocation10 + $0x109c] ss:$48 sps:$4 sm:$0xff]  }
 0x7c9   :  { %15154 = vmatprep.mubr.bf16.mxu1 %v29176_v12  ;;  %15287 = vmatpush1.bf16.msra.mxu0 %v26904_v55  ;;  %v26973_v55 = vld [vmem:[#allocation10 + $0x1090] ss:$48 sps:$4 sm:$0xff]  }
 0x7ca   :  { %15318 = vmatprep.mubr.bf16.mxu0 %v29176_v12  ;;  %15124 = vmatprep.subr.bf16.mxu1 %v26909_v48  ;;  %v26976_v48 = vld [vmem:[#allocation10 + $0x1098] ss:$48 sps:$4 sm:$0xff]  }
 0x7cb   :  { %15288 = vmatprep.subr.bf16.mxu0 %v26912_v40  ;;  %v26981_v40 = vld [vmem:[#allocation10 + $0x10f4] ss:$48 sps:$4 sm:$0xff]  }
 0x7cc   :  { %15125 = vmatpush1.bf16.msra.mxu1 %v26907_v47  ;;  %v26984_v47 = vld [vmem:[#allocation10 + $0x10fc] ss:$48 sps:$4 sm:$0xff]  }
 0x7cd   :  { %15289 = vmatpush1.bf16.msra.mxu0 %v26910_v41  ;;  %15126 = vmatprep.subr.bf16.mxu1 %v26915_v50  ;;  %v26979_v41 = vld [vmem:[#allocation10 + $0x10f0] ss:$48 sps:$4 sm:$0xff]   ;;  %v26982_v50 = vld [vmem:[#allocation10 + $0x10f8] ss:$48 sps:$4 sm:$0xff]  }
 0x7ce   :  { %15290 = vmatprep.subr.bf16.mxu0 %v26918_v59  ;;  %v26987_v59 = vld [vmem:[#allocation10 + $0x1154] ss:$48 sps:$4 sm:$0xff]  }
 0x7d0   :  { %15127 = vmatpush1.bf16.msra.mxu1 %v26913_v51  ;;  %v26990_v51 = vld [vmem:[#allocation10 + $0x115c] ss:$48 sps:$4 sm:$0xff]  }
 0x7d1   :  { %15291 = vmatpush1.bf16.msra.mxu0 %v26916_v52  ;;  %15128 = vmatprep.subr.bf16.mxu1 %v26921_v53  ;;  %v26985_v52 = vld [vmem:[#allocation10 + $0x1150] ss:$48 sps:$4 sm:$0xff]   ;;  %v26988_v53 = vld [vmem:[#allocation10 + $0x1158] ss:$48 sps:$4 sm:$0xff]  }
 0x7d2   :  { %15292 = vmatprep.subr.bf16.mxu0 %v26924_v45  ;;  %v26993_v45 = vld [vmem:[#allocation10 + $0x11b4] ss:$48 sps:$4 sm:$0xff]  }
 0x7d4   :  { %15129 = vmatpush1.bf16.msra.mxu1 %v26919_v54  ;;  %v26996_v54 = vld [vmem:[#allocation10 + $0x11bc] ss:$48 sps:$4 sm:$0xff]  }
 0x7d5   :  { %15293 = vmatpush1.bf16.msra.mxu0 %v26922_v58  ;;  %15130 = vmatprep.subr.bf16.mxu1 %v26927_v46  ;;  %v26991_v58 = vld [vmem:[#allocation10 + $0x11b0] ss:$48 sps:$4 sm:$0xff]   ;;  %v26994_v46 = vld [vmem:[#allocation10 + $0x11b8] ss:$48 sps:$4 sm:$0xff]  }
 0x7d6   :  { %15294 = vmatprep.subr.bf16.mxu0 %v26930_v63  ;;  %v26999_v63 = vld [vmem:[#allocation10 + $0x1214] ss:$48 sps:$4 sm:$0xff]  }
 0x7d8   :  { %15131 = vmatpush1.bf16.msra.mxu1 %v26925_v11  ;;  %v27002_v11 = vld [vmem:[#allocation10 + $0x121c] ss:$48 sps:$4 sm:$0xff]  }
 0x7d9   :  { %15295 = vmatpush1.bf16.msra.mxu0 %v26928_v0  ;;  %15132 = vmatprep.subr.bf16.mxu1 %v26933_v57  ;;  %v26997_v0 = vld [vmem:[#allocation10 + $0x1210] ss:$48 sps:$4 sm:$0xff]   ;;  %v27000_v57 = vld [vmem:[#allocation10 + $0x1218] ss:$48 sps:$4 sm:$0xff]  }
 0x7da   :  { %15296 = vmatprep.subr.bf16.mxu0 %v26936_v44  ;;  %v27005_v44 = vld [vmem:[#allocation10 + $0x1274] ss:$48 sps:$4 sm:$0xff]  }
 0x7dc   :  { %15133 = vmatpush1.bf16.msra.mxu1 %v26931_v2  ;;  %v27008_v2 = vld [vmem:[#allocation10 + $0x127c] ss:$48 sps:$4 sm:$0xff]  }
 0x7dd   :  { %15297 = vmatpush1.bf16.msra.mxu0 %v26934_v56  ;;  %15134 = vmatprep.subr.bf16.mxu1 %v26939_v61  ;;  %v27003_v56 = vld [vmem:[#allocation10 + $0x1270] ss:$48 sps:$4 sm:$0xff]   ;;  %v27006_v61 = vld [vmem:[#allocation10 + $0x1278] ss:$48 sps:$4 sm:$0xff]  }
 0x7de   :  { %15298 = vmatprep.subr.bf16.mxu0 %v26942_v4  ;;  %v27011_v4 = vld [vmem:[#allocation10 + $0x12d4] ss:$48 sps:$4 sm:$0xff]  }
 0x7e0   :  { %15135 = vmatpush1.bf16.msra.mxu1 %v26937_v6  ;;  %v27014_v6 = vld [vmem:[#allocation10 + $0x12dc] ss:$48 sps:$4 sm:$0xff]  }
 0x7e1   :  { %15299 = vmatpush1.bf16.msra.mxu0 %v26940_v17  ;;  %15136 = vmatprep.subr.bf16.mxu1 %v26945_v18  ;;  %v27009_v17 = vld [vmem:[#allocation10 + $0x12d0] ss:$48 sps:$4 sm:$0xff]   ;;  %v27012_v18 = vld [vmem:[#allocation10 + $0x12d8] ss:$48 sps:$4 sm:$0xff]  }
 0x7e2   :  { %15300 = vmatprep.subr.bf16.mxu0 %v26948_v30  ;;  %v27017_v30 = vld [vmem:[#allocation10 + $0x1334] ss:$48 sps:$4 sm:$0xff]  }
 0x7e4   :  { %15137 = vmatpush1.bf16.msra.mxu1 %v26943_v27  ;;  %v27020_v27 = vld [vmem:[#allocation10 + $0x133c] ss:$48 sps:$4 sm:$0xff]  }
 0x7e5   :  { %15301 = vmatpush1.bf16.msra.mxu0 %v26946_v49  ;;  %15138 = vmatprep.subr.bf16.mxu1 %v26951_v22  ;;  %v27015_v49 = vld [vmem:[#allocation10 + $0x1330] ss:$48 sps:$4 sm:$0xff]   ;;  %v27018_v22 = vld [vmem:[#allocation10 + $0x1338] ss:$48 sps:$4 sm:$0xff]  }
 0x7e6   :  { %15302 = vmatprep.subr.bf16.mxu0 %v26954_v16  ;;  %v27023_v16 = vld [vmem:[#allocation10 + $0x1394] ss:$48 sps:$4 sm:$0xff]  }
 0x7e8   :  { %15139 = vmatpush1.bf16.msra.mxu1 %v26949_v21  ;;  %v27026_v21 = vld [vmem:[#allocation10 + $0x139c] ss:$48 sps:$4 sm:$0xff]  }
 0x7e9   :  { %15303 = vmatpush1.bf16.msra.mxu0 %v26952_v25  ;;  %15140 = vmatprep.subr.bf16.mxu1 %v26957_v13  ;;  %v27021_v25 = vld [vmem:[#allocation10 + $0x1390] ss:$48 sps:$4 sm:$0xff]   ;;  %v27024_v13 = vld [vmem:[#allocation10 + $0x1398] ss:$48 sps:$4 sm:$0xff]  }
 0x7ea   :  { %15304 = vmatprep.subr.bf16.mxu0 %v26960_v36  ;;  %v27029_v36 = vld [vmem:[#allocation10 + $0x13f4] ss:$48 sps:$4 sm:$0xff]  }
 0x7ec   :  { %15141 = vmatpush1.bf16.msra.mxu1 %v26955_v10  ;;  %v27032_v10 = vld [vmem:[#allocation10 + $0x13fc] ss:$48 sps:$4 sm:$0xff]  }
 0x7ed   :  { %15305 = vmatpush1.bf16.msra.mxu0 %v26958_v28  ;;  %15142 = vmatprep.subr.bf16.mxu1 %v26963_v29  ;;  %v27027_v28 = vld [vmem:[#allocation10 + $0x13f0] ss:$48 sps:$4 sm:$0xff]   ;;  %v27030_v29 = vld [vmem:[#allocation10 + $0x13f8] ss:$48 sps:$4 sm:$0xff]  }
 0x7ee   :  { %15306 = vmatprep.subr.bf16.mxu0 %v26966_v39  ;;  %v27035_v39 = vld [vmem:[#allocation10 + $0x1454] ss:$48 sps:$4 sm:$0xff]  }
 0x7f0   :  { %15143 = vmatpush1.bf16.msra.mxu1 %v26961_v31 }
 0x7f1   :  { %15307 = vmatpush1.bf16.msra.mxu0 %v26964_v62  ;;  %15144 = vmatprep.subr.bf16.mxu1 %v26969_v43  ;;  %v27038_v43 = vld [vmem:[#allocation10 + $0x145c] ss:$48 sps:$4 sm:$0xff]  }
 0x7f2   :  { %15308 = vmatprep.subr.bf16.mxu0 %v26972_v5 }
 0x7f4   :  { %15145 = vmatpush1.bf16.msra.mxu1 %v26967_v32 }
 0x7f5   :  { %15309 = vmatpush1.bf16.msra.mxu0 %v26970_v60  ;;  %15146 = vmatprep.subr.bf16.mxu1 %v26975_v35 }
 0x7f6   :  { %15310 = vmatprep.subr.bf16.mxu0 %v26978_v9  ;;  %v27033_v9 = vld [vmem:[#allocation10 + $0x1450] ss:$48 sps:$4 sm:$0xff]  }
 0x7f8   :  { %15147 = vmatpush1.bf16.msra.mxu1 %v26973_v55 }
 0x7f9   :  { %15311 = vmatpush1.bf16.msra.mxu0 %v26976_v48  ;;  %15148 = vmatprep.subr.bf16.mxu1 %v26981_v40  ;;  %v27036_v40 = vld [vmem:[#allocation10 + $0x1458] ss:$48 sps:$4 sm:$0xff]  }
 0x7fa   :  { %15312 = vmatprep.subr.bf16.mxu0 %v26984_v47  ;;  %v27041_v47 = vld [vmem:[#allocation10 + $0x14b4] ss:$48 sps:$4 sm:$0xff]  }
 0x7fc   :  { %15149 = vmatpush1.bf16.msra.mxu1 %v26979_v41  ;;  %v27044_v41 = vld [vmem:[#allocation10 + $0x14bc] ss:$48 sps:$4 sm:$0xff]  }
 0x7fd   :  { %15313 = vmatpush1.bf16.msra.mxu0 %v26982_v50  ;;  %15150 = vmatprep.subr.bf16.mxu1 %v26987_v59  ;;  %v27039_v50 = vld [vmem:[#allocation10 + $0x14b0] ss:$48 sps:$4 sm:$0xff]   ;;  %v27042_v59 = vld [vmem:[#allocation10 + $0x14b8] ss:$48 sps:$4 sm:$0xff]  }
 0x7fe   :  { %15314 = vmatprep.subr.bf16.mxu0 %v26990_v51  ;;  %v27047_v51 = vld [vmem:[#allocation10 + $0x24] ss:$48 sps:$4 sm:$0xff]  }
 0x800   :  { %15151 = vmatpush1.bf16.msra.mxu1 %v26985_v52  ;;  %v27050_v52 = vld [vmem:[#allocation10 + $0x2c] ss:$48 sps:$4 sm:$0xff]  }
 0x801   :  { %15315 = vmatpush1.bf16.msra.mxu0 %v26988_v53  ;;  %15152 = vmatprep.subr.bf16.mxu1 %v26993_v45  ;;  %v27045_v53 = vld [vmem:[#allocation10 + $0x20] ss:$48 sps:$4 sm:$0xff]   ;;  %v27048_v45 = vld [vmem:[#allocation10 + $0x28] ss:$48 sps:$4 sm:$0xff]  }
 0x802   :  { %15316 = vmatprep.subr.bf16.mxu0 %v26996_v54  ;;  %v27053_v54 = vld [vmem:[#allocation10 + $0x84] ss:$48 sps:$4 sm:$0xff]  }
 0x804   :  { %15153 = vmatpush1.bf16.msra.mxu1 %v26991_v58  ;;  %v27056_v58 = vld [vmem:[#allocation10 + $0x8c] ss:$48 sps:$4 sm:$0xff]  }
 0x805   :  { %15317 = vmatpush1.bf16.msra.mxu0 %v26994_v46  ;;  %15163 = vmatprep.subr.bf16.mxu1 %v26999_v63  ;;  %v27051_v46 = vld [vmem:[#allocation10 + $0x80] ss:$48 sps:$4 sm:$0xff]   ;;  %v27054_v63 = vld [vmem:[#allocation10 + $0x88] ss:$48 sps:$4 sm:$0xff]  }
 0x806   :  { %15327 = vmatprep.subr.bf16.mxu0 %v27002_v11  ;;  %v27059_v11 = vld [vmem:[#allocation10 + $0xe4] ss:$48 sps:$4 sm:$0xff]  }
 0x807   :  { %15155 = vmatmul.mubr.bf16.vlgmr.msra.gmra.mrb[44].mxu1 %v29178_v24 }
 0x808   :  { %15319 = vmatmul.mubr.bf16.vlgmr.msra.gmra.mrb[24].mxu0 %v29178_v24  ;;  %15164 = vmatpush1.bf16.msra.mxu1 %v26997_v0  ;;  %v27062_v0 = vld [vmem:[#allocation10 + $0xec] ss:$48 sps:$4 sm:$0xff]  }
 0x809   :  { %15328 = vmatpush1.bf16.msra.mxu0 %v27000_v57  ;;  %15165 = vmatprep.subr.bf16.mxu1 %v27005_v44  ;;  %v27057_v57 = vld [vmem:[#allocation10 + $0xe0] ss:$48 sps:$4 sm:$0xff]   ;;  %v27060_v44 = vld [vmem:[#allocation10 + $0xe8] ss:$48 sps:$4 sm:$0xff]  }
 0x80a   :  { %15329 = vmatprep.subr.bf16.mxu0 %v27008_v2  ;;  %15195 = vmatprep.mubr.bf16.mxu1 %v28721_v26  ;;  %v27065_v2 = vld [vmem:[#allocation10 + $0x144] ss:$48 sps:$4 sm:$0xff]  }
 0x80b   :  { %15359 = vmatprep.mubr.bf16.mxu0 %v28721_v26 }
 0x80c   :  { %15166 = vmatpush1.bf16.msra.mxu1 %v27003_v56  ;;  %v27068_v56 = vld [vmem:[#allocation10 + $0x14c] ss:$48 sps:$4 sm:$0xff]  }
 0x80d   :  { %15330 = vmatpush1.bf16.msra.mxu0 %v27006_v61  ;;  %15167 = vmatprep.subr.bf16.mxu1 %v27011_v4  ;;  %v27063_v61 = vld [vmem:[#allocation10 + $0x140] ss:$48 sps:$4 sm:$0xff]   ;;  %v27066_v4 = vld [vmem:[#allocation10 + $0x148] ss:$48 sps:$4 sm:$0xff]  }
 0x80e   :  { %15331 = vmatprep.subr.bf16.mxu0 %v27014_v6  ;;  %v27071_v6 = vld [vmem:[#allocation10 + $0x1a4] ss:$48 sps:$4 sm:$0xff]  }
 0x810   :  { %15168 = vmatpush1.bf16.msra.mxu1 %v27009_v17  ;;  %v27074_v17 = vld [vmem:[#allocation10 + $0x1ac] ss:$48 sps:$4 sm:$0xff]  }
 0x811   :  { %15332 = vmatpush1.bf16.msra.mxu0 %v27012_v18  ;;  %15169 = vmatprep.subr.bf16.mxu1 %v27017_v30  ;;  %v27072_v18 = vld [vmem:[#allocation10 + $0x1a8] ss:$48 sps:$4 sm:$0xff]   ;;  %v27077_v30 = vld [vmem:[#allocation10 + $0x204] ss:$48 sps:$4 sm:$0xff]  }
 0x812   :  { %15333 = vmatprep.subr.bf16.mxu0 %v27020_v27  ;;  %v27080_v27 = vld [vmem:[#allocation10 + $0x20c] ss:$48 sps:$4 sm:$0xff]  }
 0x814   :  { %15170 = vmatpush1.bf16.msra.mxu1 %v27015_v49  ;;  %v27075_v49 = vld [vmem:[#allocation10 + $0x200] ss:$48 sps:$4 sm:$0xff]  }
 0x815   :  { %15334 = vmatpush1.bf16.msra.mxu0 %v27018_v22  ;;  %15171 = vmatprep.subr.bf16.mxu1 %v27023_v16  ;;  %v27078_v22 = vld [vmem:[#allocation10 + $0x208] ss:$48 sps:$4 sm:$0xff]   ;;  %v27083_v16 = vld [vmem:[#allocation10 + $0x264] ss:$48 sps:$4 sm:$0xff]  }
 0x816   :  { %15335 = vmatprep.subr.bf16.mxu0 %v27026_v21  ;;  %v27086_v21 = vld [vmem:[#allocation10 + $0x26c] ss:$48 sps:$4 sm:$0xff]  }
 0x818   :  { %15172 = vmatpush1.bf16.msra.mxu1 %v27021_v25  ;;  %v27081_v25 = vld [vmem:[#allocation10 + $0x260] ss:$48 sps:$4 sm:$0xff]  }
 0x819   :  { %15336 = vmatpush1.bf16.msra.mxu0 %v27024_v13  ;;  %15173 = vmatprep.subr.bf16.mxu1 %v27029_v36  ;;  %v27084_v13 = vld [vmem:[#allocation10 + $0x268] ss:$48 sps:$4 sm:$0xff]   ;;  %v27089_v36 = vld [vmem:[#allocation10 + $0x2c4] ss:$48 sps:$4 sm:$0xff]  }
 0x81a   :  { %v29204_v31 = vpop.f32.mrb[40].mxu1  ;;  %v29206_v62 = vpop.f32.mrb[20].mxu0  ;;  %15337 = vmatprep.subr.bf16.mxu0 %v27032_v10  ;;  %v27092_v10 = vld [vmem:[#allocation10 + $0x2cc] ss:$48 sps:$4 sm:$0xff]  }
 0x81b   :  { %v29208_v5 = vpop.f32.mrb[41].mxu1  ;;  %v29210_v32 = vpop.f32.mrb[21].mxu0 }
 0x81c   :  { %v14873_v60 = vpop.f32.mrb[42].mxu1  ;;  %v15037_v35 = vpop.f32.mrb[22].mxu0  ;;  %15174 = vmatpush1.bf16.msra.mxu1 %v27027_v28  ;;  %v27087_v28 = vld [vmem:[#allocation10 + $0x2c0] ss:$48 sps:$4 sm:$0xff]  }
 0x81d   :  { %15338 = vmatpush1.bf16.msra.mxu0 %v27030_v29  ;;  %v14874_v55 = vpop.f32.mrb[43].mxu1  ;;  %v15038_v48 = vpop.f32.mrb[23].mxu0  ;;  %15175 = vmatprep.subr.bf16.mxu1 %v27035_v39  ;;  %v27090_v29 = vld [vmem:[#allocation10 + $0x2c8] ss:$48 sps:$4 sm:$0xff]   ;;  %v27095_v39 = vld [vmem:[#allocation10 + $0x324] ss:$48 sps:$4 sm:$0xff]  }
 0x81e   :  { %15339 = vmatprep.subr.bf16.mxu0 %v27038_v43  ;;  %v27098_v43 = vld [vmem:[#allocation10 + $0x32c] ss:$48 sps:$4 sm:$0xff]   ;;  %v27093_v60 = vld [vmem:[#allocation10 + $0x320] ss:$48 sps:$4 sm:$0xff]   ;;  %v27096_v35 = vld [vmem:[#allocation10 + $0x328] ss:$48 sps:$4 sm:$0xff]  }
 0x81f   :  { %v27104_v55 = vld [vmem:[#allocation10 + $0x38c] ss:$48 sps:$4 sm:$0xff]   ;;  %v27099_v48 = vld [vmem:[#allocation10 + $0x380] ss:$48 sps:$4 sm:$0xff]  }
 0x820   :  { %15176 = vmatpush1.bf16.msra.mxu1 %v27033_v9  ;;  %v27101_v9 = vld [vmem:[#allocation10 + $0x384] ss:$48 sps:$4 sm:$0xff]  }
 0x821   :  { %15340 = vmatpush1.bf16.msra.mxu0 %v27036_v40  ;;  %15177 = vmatprep.subr.bf16.mxu1 %v27041_v47  ;;  %v27102_v40 = vld [vmem:[#allocation10 + $0x388] ss:$48 sps:$4 sm:$0xff]   ;;  %v27107_v47 = vld [vmem:[#allocation10 + $0x3e4] ss:$48 sps:$4 sm:$0xff]  }
 0x822   :  { %15341 = vmatprep.subr.bf16.mxu0 %v27044_v41  ;;  %v27110_v41 = vld [vmem:[#allocation10 + $0x3ec] ss:$48 sps:$4 sm:$0xff]  }
 0x824   :  { %15178 = vmatpush1.bf16.msra.mxu1 %v27039_v50  ;;  %v27105_v50 = vld [vmem:[#allocation10 + $0x3e0] ss:$48 sps:$4 sm:$0xff]  }
 0x825   :  { %15342 = vmatpush1.bf16.msra.mxu0 %v27042_v59  ;;  %15368 = vmatprep.subr.bf16.mxu1 %v27047_v51  ;;  %v27108_v59 = vld [vmem:[#allocation10 + $0x3e8] ss:$48 sps:$4 sm:$0xff]   ;;  %v27113_v51 = vld [vmem:[#allocation10 + $0x444] ss:$48 sps:$4 sm:$0xff]  }
 0x826   :  { %15532 = vmatprep.subr.bf16.mxu0 %v27050_v52  ;;  %v27116_v52 = vld [vmem:[#allocation10 + $0x44c] ss:$48 sps:$4 sm:$0xff]  }
 0x827   :  { %15196 = vmatmul.mubr.bf16.vlgmr.msra.gmra.mrb[44].mxu1 %v29186_v33 }
 0x828   :  { %15360 = vmatmul.mubr.bf16.vlgmr.msra.gmra.mrb[24].mxu0 %v29186_v33  ;;  %15369 = vmatpush1.bf16.msra.mxu1 %v27045_v53  ;;  %v27111_v53 = vld [vmem:[#allocation10 + $0x440] ss:$48 sps:$4 sm:$0xff]  }
 0x829   :  { %15400 = vmatprep.mubr.bf16.mxu1 %v29136_v3  ;;  %15533 = vmatpush1.bf16.msra.mxu0 %v27048_v45  ;;  %v27114_v45 = vld [vmem:[#allocation10 + $0x448] ss:$48 sps:$4 sm:$0xff]  }
 0x82a   :  { %15564 = vmatprep.mubr.bf16.mxu0 %v29136_v3  ;;  %15370 = vmatprep.subr.bf16.mxu1 %v27053_v54  ;;  %v27069_v3 = vld [vmem:[#allocation10 + $0x1a0] ss:$48 sps:$4 sm:$0xff]   ;;  %v27119_v54 = vld [vmem:[#allocation10 + $0x4a4] ss:$48 sps:$4 sm:$0xff]  }
 0x82b   :  { %15534 = vmatprep.subr.bf16.mxu0 %v27056_v58  ;;  %v27122_v58 = vld [vmem:[#allocation10 + $0x4ac] ss:$48 sps:$4 sm:$0xff]  }
 0x82c   :  { %15371 = vmatpush1.bf16.msra.mxu1 %v27051_v46  ;;  %v27117_v46 = vld [vmem:[#allocation10 + $0x4a0] ss:$48 sps:$4 sm:$0xff]  }
 0x82d   :  { %15535 = vmatpush1.bf16.msra.mxu0 %v27054_v63  ;;  %15372 = vmatprep.subr.bf16.mxu1 %v27059_v11  ;;  %v27120_v63 = vld [vmem:[#allocation10 + $0x4a8] ss:$48 sps:$4 sm:$0xff]   ;;  %v27125_v11 = vld [vmem:[#allocation10 + $0x504] ss:$48 sps:$4 sm:$0xff]  }
 0x82e   :  { %15536 = vmatprep.subr.bf16.mxu0 %v27062_v0  ;;  %v27128_v0 = vld [vmem:[#allocation10 + $0x50c] ss:$48 sps:$4 sm:$0xff]  }
 0x830   :  { %15373 = vmatpush1.bf16.msra.mxu1 %v27057_v57  ;;  %v27123_v57 = vld [vmem:[#allocation10 + $0x500] ss:$48 sps:$4 sm:$0xff]  }
 0x831   :  { %15537 = vmatpush1.bf16.msra.mxu0 %v27060_v44  ;;  %15374 = vmatprep.subr.bf16.mxu1 %v27065_v2  ;;  %v27126_v44 = vld [vmem:[#allocation10 + $0x508] ss:$48 sps:$4 sm:$0xff]   ;;  %v27131_v2 = vld [vmem:[#allocation10 + $0x564] ss:$48 sps:$4 sm:$0xff]  }
 0x832   :  { %15538 = vmatprep.subr.bf16.mxu0 %v27068_v56  ;;  %v27134_v56 = vld [vmem:[#allocation10 + $0x56c] ss:$48 sps:$4 sm:$0xff]  }
 0x834   :  { %15375 = vmatpush1.bf16.msra.mxu1 %v27063_v61  ;;  %v27129_v61 = vld [vmem:[#allocation10 + $0x560] ss:$48 sps:$4 sm:$0xff]  }
 0x835   :  { %15539 = vmatpush1.bf16.msra.mxu0 %v27066_v4  ;;  %15376 = vmatprep.subr.bf16.mxu1 %v27071_v6  ;;  %v27132_v4 = vld [vmem:[#allocation10 + $0x568] ss:$48 sps:$4 sm:$0xff]   ;;  %v27137_v6 = vld [vmem:[#allocation10 + $0x5c4] ss:$48 sps:$4 sm:$0xff]  }
 0x836   :  { %15540 = vmatprep.subr.bf16.mxu0 %v27074_v17  ;;  %v27140_v17 = vld [vmem:[#allocation10 + $0x5cc] ss:$48 sps:$4 sm:$0xff]  }
 0x838   :  { %15377 = vmatpush1.bf16.msra.mxu1 %v27069_v3  ;;  %v27135_v3 = vld [vmem:[#allocation10 + $0x5c0] ss:$48 sps:$4 sm:$0xff]  }
 0x839   :  { %15541 = vmatpush1.bf16.msra.mxu0 %v27072_v18  ;;  %15378 = vmatprep.subr.bf16.mxu1 %v27077_v30  ;;  %v27138_v18 = vld [vmem:[#allocation10 + $0x5c8] ss:$48 sps:$4 sm:$0xff]   ;;  %v27143_v30 = vld [vmem:[#allocation10 + $0x624] ss:$48 sps:$4 sm:$0xff]  }
 0x83a   :  { %15542 = vmatprep.subr.bf16.mxu0 %v27080_v27  ;;  %v27146_v27 = vld [vmem:[#allocation10 + $0x62c] ss:$48 sps:$4 sm:$0xff]  }
 0x83c   :  { %15379 = vmatpush1.bf16.msra.mxu1 %v27075_v49  ;;  %v27141_v49 = vld [vmem:[#allocation10 + $0x620] ss:$48 sps:$4 sm:$0xff]  }
 0x83d   :  { %15543 = vmatpush1.bf16.msra.mxu0 %v27078_v22  ;;  %15380 = vmatprep.subr.bf16.mxu1 %v27083_v16  ;;  %v27144_v22 = vld [vmem:[#allocation10 + $0x628] ss:$48 sps:$4 sm:$0xff]   ;;  %v27149_v16 = vld [vmem:[#allocation10 + $0x684] ss:$48 sps:$4 sm:$0xff]  }
 0x83e   :  { %15544 = vmatprep.subr.bf16.mxu0 %v27086_v21  ;;  %v27152_v21 = vld [vmem:[#allocation10 + $0x68c] ss:$48 sps:$4 sm:$0xff]  }
 0x840   :  { %15381 = vmatpush1.bf16.msra.mxu1 %v27081_v25  ;;  %v27147_v25 = vld [vmem:[#allocation10 + $0x680] ss:$48 sps:$4 sm:$0xff]  }
 0x841   :  { %15545 = vmatpush1.bf16.msra.mxu0 %v27084_v13  ;;  %15382 = vmatprep.subr.bf16.mxu1 %v27089_v36  ;;  %v27150_v13 = vld [vmem:[#allocation10 + $0x688] ss:$48 sps:$4 sm:$0xff]   ;;  %v27155_v36 = vld [vmem:[#allocation10 + $0x6e4] ss:$48 sps:$4 sm:$0xff]  }
 0x842   :  { %15546 = vmatprep.subr.bf16.mxu0 %v27092_v10  ;;  %v27158_v10 = vld [vmem:[#allocation10 + $0x6ec] ss:$48 sps:$4 sm:$0xff]  }
 0x844   :  { %15383 = vmatpush1.bf16.msra.mxu1 %v27087_v28  ;;  %v27153_v28 = vld [vmem:[#allocation10 + $0x6e0] ss:$48 sps:$4 sm:$0xff]  }
 0x845   :  { %15547 = vmatpush1.bf16.msra.mxu0 %v27090_v29  ;;  %15384 = vmatprep.subr.bf16.mxu1 %v27095_v39  ;;  %v27156_v29 = vld [vmem:[#allocation10 + $0x6e8] ss:$48 sps:$4 sm:$0xff]   ;;  %v27161_v39 = vld [vmem:[#allocation10 + $0x744] ss:$48 sps:$4 sm:$0xff]  }
 0x846   :  { %15548 = vmatprep.subr.bf16.mxu0 %v27098_v43  ;;  %v27159_v43 = vld [vmem:[#allocation10 + $0x740] ss:$48 sps:$4 sm:$0xff]  }
 0x848   :  { %15385 = vmatpush1.bf16.msra.mxu1 %v27093_v60  ;;  %v27162_v60 = vld [vmem:[#allocation10 + $0x748] ss:$48 sps:$4 sm:$0xff]  }
 0x849   :  { %15549 = vmatpush1.bf16.msra.mxu0 %v27096_v35  ;;  %15386 = vmatprep.subr.bf16.mxu1 %v27101_v9  ;;  %v27167_v35 = vld [vmem:[#allocation10 + $0x7a4] ss:$48 sps:$4 sm:$0xff]   ;;  %v27170_v9 = vld [vmem:[#allocation10 + $0x7ac] ss:$48 sps:$4 sm:$0xff]  }
 0x84a   :  { %15550 = vmatprep.subr.bf16.mxu0 %v27104_v55  ;;  %v27168_v55 = vld [vmem:[#allocation10 + $0x7a8] ss:$48 sps:$4 sm:$0xff]  }
 0x84c   :  { %15387 = vmatpush1.bf16.msra.mxu1 %v27099_v48  ;;  %v27173_v48 = vld [vmem:[#allocation10 + $0x804] ss:$48 sps:$4 sm:$0xff]  }
 0x84d   :  { %15551 = vmatpush1.bf16.msra.mxu0 %v27102_v40  ;;  %15388 = vmatprep.subr.bf16.mxu1 %v27107_v47  ;;  %v27176_v40 = vld [vmem:[#allocation10 + $0x80c] ss:$48 sps:$4 sm:$0xff]   ;;  %v27171_v47 = vld [vmem:[#allocation10 + $0x800] ss:$48 sps:$4 sm:$0xff]  }
 0x84e   :  { %15552 = vmatprep.subr.bf16.mxu0 %v27110_v41  ;;  %v27174_v41 = vld [vmem:[#allocation10 + $0x808] ss:$48 sps:$4 sm:$0xff]  }
 0x850   :  { %15389 = vmatpush1.bf16.msra.mxu1 %v27105_v50  ;;  %v27179_v50 = vld [vmem:[#allocation10 + $0x864] ss:$48 sps:$4 sm:$0xff]  }
 0x851   :  { %15553 = vmatpush1.bf16.msra.mxu0 %v27108_v59  ;;  %15390 = vmatprep.subr.bf16.mxu1 %v27113_v51  ;;  %v27182_v59 = vld [vmem:[#allocation10 + $0x86c] ss:$48 sps:$4 sm:$0xff]   ;;  %v27177_v51 = vld [vmem:[#allocation10 + $0x860] ss:$48 sps:$4 sm:$0xff]  }
 0x852   :  { %15554 = vmatprep.subr.bf16.mxu0 %v27116_v52  ;;  %v27180_v52 = vld [vmem:[#allocation10 + $0x868] ss:$48 sps:$4 sm:$0xff]  }
 0x854   :  { %15391 = vmatpush1.bf16.msra.mxu1 %v27111_v53  ;;  %v27185_v53 = vld [vmem:[#allocation10 + $0x8c4] ss:$48 sps:$4 sm:$0xff]  }
 0x855   :  { %15555 = vmatpush1.bf16.msra.mxu0 %v27114_v45  ;;  %15392 = vmatprep.subr.bf16.mxu1 %v27119_v54  ;;  %v27188_v45 = vld [vmem:[#allocation10 + $0x8cc] ss:$48 sps:$4 sm:$0xff]   ;;  %v27183_v54 = vld [vmem:[#allocation10 + $0x8c0] ss:$48 sps:$4 sm:$0xff]  }
 0x856   :  { %15556 = vmatprep.subr.bf16.mxu0 %v27122_v58  ;;  %v27186_v58 = vld [vmem:[#allocation10 + $0x8c8] ss:$48 sps:$4 sm:$0xff]  }
 0x858   :  { %15393 = vmatpush1.bf16.msra.mxu1 %v27117_v46  ;;  %v27191_v46 = vld [vmem:[#allocation10 + $0x924] ss:$48 sps:$4 sm:$0xff]  }
 0x859   :  { %15557 = vmatpush1.bf16.msra.mxu0 %v27120_v63  ;;  %15394 = vmatprep.subr.bf16.mxu1 %v27125_v11  ;;  %v27194_v63 = vld [vmem:[#allocation10 + $0x92c] ss:$48 sps:$4 sm:$0xff]   ;;  %v27189_v11 = vld [vmem:[#allocation10 + $0x920] ss:$48 sps:$4 sm:$0xff]  }
 0x85a   :  { %15558 = vmatprep.subr.bf16.mxu0 %v27128_v0  ;;  %v27192_v0 = vld [vmem:[#allocation10 + $0x928] ss:$48 sps:$4 sm:$0xff]  }
 0x85c   :  { %15395 = vmatpush1.bf16.msra.mxu1 %v27123_v57  ;;  %v27197_v57 = vld [vmem:[#allocation10 + $0x984] ss:$48 sps:$4 sm:$0xff]  }
 0x85d   :  { %15559 = vmatpush1.bf16.msra.mxu0 %v27126_v44  ;;  %15396 = vmatprep.subr.bf16.mxu1 %v27131_v2  ;;  %v27200_v44 = vld [vmem:[#allocation10 + $0x98c] ss:$48 sps:$4 sm:$0xff]   ;;  %v27195_v2 = vld [vmem:[#allocation10 + $0x980] ss:$48 sps:$4 sm:$0xff]  }
 0x85e   :  { %15560 = vmatprep.subr.bf16.mxu0 %v27134_v56  ;;  %v27198_v56 = vld [vmem:[#allocation10 + $0x988] ss:$48 sps:$4 sm:$0xff]  }
 0x860   :  { %15397 = vmatpush1.bf16.msra.mxu1 %v27129_v61  ;;  %v27203_v61 = vld [vmem:[#allocation10 + $0x9e4] ss:$48 sps:$4 sm:$0xff]  }
 0x861   :  { %15561 = vmatpush1.bf16.msra.mxu0 %v27132_v4  ;;  %15398 = vmatprep.subr.bf16.mxu1 %v27137_v6  ;;  %v27206_v4 = vld [vmem:[#allocation10 + $0x9ec] ss:$48 sps:$4 sm:$0xff]   ;;  %v27201_v6 = vld [vmem:[#allocation10 + $0x9e0] ss:$48 sps:$4 sm:$0xff]  }
 0x862   :  { %15562 = vmatprep.subr.bf16.mxu0 %v27140_v17  ;;  %v27204_v17 = vld [vmem:[#allocation10 + $0x9e8] ss:$48 sps:$4 sm:$0xff]  }
 0x864   :  { %15399 = vmatpush1.bf16.msra.mxu1 %v27135_v3  ;;  %v27209_v3 = vld [vmem:[#allocation10 + $0xa44] ss:$48 sps:$4 sm:$0xff]  }
 0x865   :  { %15563 = vmatpush1.bf16.msra.mxu0 %v27138_v18  ;;  %15409 = vmatprep.subr.bf16.mxu1 %v27143_v30  ;;  %v27212_v18 = vld [vmem:[#allocation10 + $0xa4c] ss:$48 sps:$4 sm:$0xff]   ;;  %v27207_v30 = vld [vmem:[#allocation10 + $0xa40] ss:$48 sps:$4 sm:$0xff]  }
 0x866   :  { %15573 = vmatprep.subr.bf16.mxu0 %v27146_v27  ;;  %v27210_v27 = vld [vmem:[#allocation10 + $0xa48] ss:$48 sps:$4 sm:$0xff]  }
 0x867   :  { %15401 = vmatmul.mubr.bf16.vlgmr.msra.gmra.mrb[48].mxu1 %v29141_v42 }
 0x868   :  { %15565 = vmatmul.mubr.bf16.vlgmr.msra.gmra.mrb[28].mxu0 %v29141_v42  ;;  %15410 = vmatpush1.bf16.msra.mxu1 %v27141_v49  ;;  %v27164_v42 = vld [vmem:[#allocation10 + $0x74c] ss:$48 sps:$4 sm:$0xff]   ;;  %v27215_v49 = vld [vmem:[#allocation10 + $0xaa4] ss:$48 sps:$4 sm:$0xff]  }
 0x869   :  { %15441 = vmatprep.mubr.bf16.mxu1 %v29144_v34  ;;  %15574 = vmatpush1.bf16.msra.mxu0 %v27144_v22  ;;  %v27218_v22 = vld [vmem:[#allocation10 + $0xaac] ss:$48 sps:$4 sm:$0xff]  }
 0x86a   :  { %15605 = vmatprep.mubr.bf16.mxu0 %v29144_v34  ;;  %15411 = vmatprep.subr.bf16.mxu1 %v27149_v16  ;;  %v27165_v34 = vld [vmem:[#allocation10 + $0x7a0] ss:$48 sps:$4 sm:$0xff]  }
 0x86b   :  { %15575 = vmatprep.subr.bf16.mxu0 %v27152_v21  ;;  %v27213_v16 = vld [vmem:[#allocation10 + $0xaa0] ss:$48 sps:$4 sm:$0xff]   ;;  %v27216_v21 = vld [vmem:[#allocation10 + $0xaa8] ss:$48 sps:$4 sm:$0xff]  }
 0x86c   :  { %15412 = vmatpush1.bf16.msra.mxu1 %v27147_v25  ;;  %v27221_v25 = vld [vmem:[#allocation10 + $0xb04] ss:$48 sps:$4 sm:$0xff]  }
 0x86d   :  { %15576 = vmatpush1.bf16.msra.mxu0 %v27150_v13  ;;  %15413 = vmatprep.subr.bf16.mxu1 %v27155_v36  ;;  %v27224_v13 = vld [vmem:[#allocation10 + $0xb0c] ss:$48 sps:$4 sm:$0xff]   ;;  %v27219_v36 = vld [vmem:[#allocation10 + $0xb00] ss:$48 sps:$4 sm:$0xff]  }
 0x86e   :  { %15577 = vmatprep.subr.bf16.mxu0 %v27158_v10  ;;  %v27222_v10 = vld [vmem:[#allocation10 + $0xb08] ss:$48 sps:$4 sm:$0xff]  }
 0x870   :  { %15414 = vmatpush1.bf16.msra.mxu1 %v27153_v28  ;;  %v27227_v28 = vld [vmem:[#allocation10 + $0xb64] ss:$48 sps:$4 sm:$0xff]  }
 0x871   :  { %15578 = vmatpush1.bf16.msra.mxu0 %v27156_v29  ;;  %15415 = vmatprep.subr.bf16.mxu1 %v27161_v39  ;;  %v27230_v29 = vld [vmem:[#allocation10 + $0xb6c] ss:$48 sps:$4 sm:$0xff]   ;;  %v27225_v39 = vld [vmem:[#allocation10 + $0xb60] ss:$48 sps:$4 sm:$0xff]  }
 0x872   :  { %15579 = vmatprep.subr.bf16.mxu0 %v27164_v42  ;;  %v27228_v42 = vld [vmem:[#allocation10 + $0xb68] ss:$48 sps:$4 sm:$0xff]  }
 0x874   :  { %15416 = vmatpush1.bf16.msra.mxu1 %v27159_v43  ;;  %v27233_v43 = vld [vmem:[#allocation10 + $0xbc4] ss:$48 sps:$4 sm:$0xff]  }
 0x875   :  { %15580 = vmatpush1.bf16.msra.mxu0 %v27162_v60  ;;  %15417 = vmatprep.subr.bf16.mxu1 %v27167_v35  ;;  %v27236_v60 = vld [vmem:[#allocation10 + $0xbcc] ss:$48 sps:$4 sm:$0xff]   ;;  %v27231_v35 = vld [vmem:[#allocation10 + $0xbc0] ss:$48 sps:$4 sm:$0xff]  }
 0x876   :  { %15581 = vmatprep.subr.bf16.mxu0 %v27170_v9  ;;  %v27234_v9 = vld [vmem:[#allocation10 + $0xbc8] ss:$48 sps:$4 sm:$0xff]  }
 0x878   :  { %15418 = vmatpush1.bf16.msra.mxu1 %v27165_v34  ;;  %v27239_v34 = vld [vmem:[#allocation10 + $0xc24] ss:$48 sps:$4 sm:$0xff]  }
 0x879   :  { %15582 = vmatpush1.bf16.msra.mxu0 %v27168_v55  ;;  %15419 = vmatprep.subr.bf16.mxu1 %v27173_v48  ;;  %v27242_v55 = vld [vmem:[#allocation10 + $0xc2c] ss:$48 sps:$4 sm:$0xff]   ;;  %v27237_v48 = vld [vmem:[#allocation10 + $0xc20] ss:$48 sps:$4 sm:$0xff]  }
 0x87a   :  { %15583 = vmatprep.subr.bf16.mxu0 %v27176_v40  ;;  %v27240_v40 = vld [vmem:[#allocation10 + $0xc28] ss:$48 sps:$4 sm:$0xff]  }
 0x87c   :  { %15420 = vmatpush1.bf16.msra.mxu1 %v27171_v47  ;;  %v27245_v47 = vld [vmem:[#allocation10 + $0xc84] ss:$48 sps:$4 sm:$0xff]  }
 0x87d   :  { %15584 = vmatpush1.bf16.msra.mxu0 %v27174_v41  ;;  %15421 = vmatprep.subr.bf16.mxu1 %v27179_v50  ;;  %v27248_v41 = vld [vmem:[#allocation10 + $0xc8c] ss:$48 sps:$4 sm:$0xff]   ;;  %v27243_v50 = vld [vmem:[#allocation10 + $0xc80] ss:$48 sps:$4 sm:$0xff]  }
 0x87e   :  { %15585 = vmatprep.subr.bf16.mxu0 %v27182_v59  ;;  %v27246_v59 = vld [vmem:[#allocation10 + $0xc88] ss:$48 sps:$4 sm:$0xff]  }
 0x880   :  { %15422 = vmatpush1.bf16.msra.mxu1 %v27177_v51  ;;  %v27251_v51 = vld [vmem:[#allocation10 + $0xce4] ss:$48 sps:$4 sm:$0xff]  }
 0x881   :  { %15586 = vmatpush1.bf16.msra.mxu0 %v27180_v52  ;;  %15423 = vmatprep.subr.bf16.mxu1 %v27185_v53  ;;  %v27254_v52 = vld [vmem:[#allocation10 + $0xcec] ss:$48 sps:$4 sm:$0xff]   ;;  %v27249_v53 = vld [vmem:[#allocation10 + $0xce0] ss:$48 sps:$4 sm:$0xff]  }
 0x882   :  { %15587 = vmatprep.subr.bf16.mxu0 %v27188_v45  ;;  %v27252_v45 = vld [vmem:[#allocation10 + $0xce8] ss:$48 sps:$4 sm:$0xff]  }
 0x884   :  { %15424 = vmatpush1.bf16.msra.mxu1 %v27183_v54  ;;  %v27257_v54 = vld [vmem:[#allocation10 + $0xd44] ss:$48 sps:$4 sm:$0xff]  }
 0x885   :  { %15588 = vmatpush1.bf16.msra.mxu0 %v27186_v58  ;;  %15425 = vmatprep.subr.bf16.mxu1 %v27191_v46  ;;  %v27255_v58 = vld [vmem:[#allocation10 + $0xd40] ss:$48 sps:$4 sm:$0xff]   ;;  %v27258_v46 = vld [vmem:[#allocation10 + $0xd48] ss:$48 sps:$4 sm:$0xff]  }
 0x886   :  { %15589 = vmatprep.subr.bf16.mxu0 %v27194_v63  ;;  %v27263_v63 = vld [vmem:[#allocation10 + $0xda4] ss:$48 sps:$4 sm:$0xff]  }
 0x888   :  { %15426 = vmatpush1.bf16.msra.mxu1 %v27189_v11  ;;  %v27266_v11 = vld [vmem:[#allocation10 + $0xdac] ss:$48 sps:$4 sm:$0xff]  }
 0x889   :  { %15590 = vmatpush1.bf16.msra.mxu0 %v27192_v0  ;;  %15427 = vmatprep.subr.bf16.mxu1 %v27197_v57  ;;  %v27264_v0 = vld [vmem:[#allocation10 + $0xda8] ss:$48 sps:$4 sm:$0xff]   ;;  %v27269_v57 = vld [vmem:[#allocation10 + $0xe04] ss:$48 sps:$4 sm:$0xff]  }
 0x88a   :  { %15591 = vmatprep.subr.bf16.mxu0 %v27200_v44  ;;  %v27272_v44 = vld [vmem:[#allocation10 + $0xe0c] ss:$48 sps:$4 sm:$0xff]  }
 0x88c   :  { %15428 = vmatpush1.bf16.msra.mxu1 %v27195_v2  ;;  %v27267_v2 = vld [vmem:[#allocation10 + $0xe00] ss:$48 sps:$4 sm:$0xff]  }
 0x88d   :  { %15592 = vmatpush1.bf16.msra.mxu0 %v27198_v56  ;;  %15429 = vmatprep.subr.bf16.mxu1 %v27203_v61  ;;  %v27270_v56 = vld [vmem:[#allocation10 + $0xe08] ss:$48 sps:$4 sm:$0xff]   ;;  %v27275_v61 = vld [vmem:[#allocation10 + $0xe64] ss:$48 sps:$4 sm:$0xff]  }
 0x88e   :  { %15593 = vmatprep.subr.bf16.mxu0 %v27206_v4  ;;  %v27278_v4 = vld [vmem:[#allocation10 + $0xe6c] ss:$48 sps:$4 sm:$0xff]  }
 0x890   :  { %15430 = vmatpush1.bf16.msra.mxu1 %v27201_v6  ;;  %v27273_v6 = vld [vmem:[#allocation10 + $0xe60] ss:$48 sps:$4 sm:$0xff]  }
 0x891   :  { %15594 = vmatpush1.bf16.msra.mxu0 %v27204_v17  ;;  %15431 = vmatprep.subr.bf16.mxu1 %v27209_v3  ;;  %v27276_v17 = vld [vmem:[#allocation10 + $0xe68] ss:$48 sps:$4 sm:$0xff]   ;;  %v27281_v3 = vld [vmem:[#allocation10 + $0xec4] ss:$48 sps:$4 sm:$0xff]  }
 0x892   :  { %15595 = vmatprep.subr.bf16.mxu0 %v27212_v18  ;;  %v27284_v18 = vld [vmem:[#allocation10 + $0xecc] ss:$48 sps:$4 sm:$0xff]  }
 0x894   :  { %15432 = vmatpush1.bf16.msra.mxu1 %v27207_v30  ;;  %v27279_v30 = vld [vmem:[#allocation10 + $0xec0] ss:$48 sps:$4 sm:$0xff]  }
 0x895   :  { %15596 = vmatpush1.bf16.msra.mxu0 %v27210_v27  ;;  %15433 = vmatprep.subr.bf16.mxu1 %v27215_v49  ;;  %v27282_v27 = vld [vmem:[#allocation10 + $0xec8] ss:$48 sps:$4 sm:$0xff]   ;;  %v27287_v49 = vld [vmem:[#allocation10 + $0xf24] ss:$48 sps:$4 sm:$0xff]  }
 0x896   :  { %15597 = vmatprep.subr.bf16.mxu0 %v27218_v22  ;;  %v27290_v22 = vld [vmem:[#allocation10 + $0xf2c] ss:$48 sps:$4 sm:$0xff]  }
 0x898   :  { %15434 = vmatpush1.bf16.msra.mxu1 %v27213_v16  ;;  %v27285_v16 = vld [vmem:[#allocation10 + $0xf20] ss:$48 sps:$4 sm:$0xff]  }
 0x899   :  { %15598 = vmatpush1.bf16.msra.mxu0 %v27216_v21  ;;  %15435 = vmatprep.subr.bf16.mxu1 %v27221_v25  ;;  %v27288_v21 = vld [vmem:[#allocation10 + $0xf28] ss:$48 sps:$4 sm:$0xff]   ;;  %v27293_v25 = vld [vmem:[#allocation10 + $0xf84] ss:$48 sps:$4 sm:$0xff]  }
 0x89a   :  { %15599 = vmatprep.subr.bf16.mxu0 %v27224_v13  ;;  %v27296_v13 = vld [vmem:[#allocation10 + $0xf8c] ss:$48 sps:$4 sm:$0xff]  }
 0x89c   :  { %15436 = vmatpush1.bf16.msra.mxu1 %v27219_v36  ;;  %v27291_v36 = vld [vmem:[#allocation10 + $0xf80] ss:$48 sps:$4 sm:$0xff]  }
 0x89d   :  { %15600 = vmatpush1.bf16.msra.mxu0 %v27222_v10  ;;  %15437 = vmatprep.subr.bf16.mxu1 %v27227_v28  ;;  %v27294_v10 = vld [vmem:[#allocation10 + $0xf88] ss:$48 sps:$4 sm:$0xff]   ;;  %v27299_v28 = vld [vmem:[#allocation10 + $0xfe4] ss:$48 sps:$4 sm:$0xff]  }
 0x89e   :  { %15601 = vmatprep.subr.bf16.mxu0 %v27230_v29  ;;  %v27302_v29 = vld [vmem:[#allocation10 + $0xfec] ss:$48 sps:$4 sm:$0xff]  }
 0x8a0   :  { %15438 = vmatpush1.bf16.msra.mxu1 %v27225_v39  ;;  %v27297_v39 = vld [vmem:[#allocation10 + $0xfe0] ss:$48 sps:$4 sm:$0xff]  }
 0x8a1   :  { %15602 = vmatpush1.bf16.msra.mxu0 %v27228_v42  ;;  %15439 = vmatprep.subr.bf16.mxu1 %v27233_v43  ;;  %v27300_v42 = vld [vmem:[#allocation10 + $0xfe8] ss:$48 sps:$4 sm:$0xff]   ;;  %v27305_v43 = vld [vmem:[#allocation10 + $0x1044] ss:$48 sps:$4 sm:$0xff]  }
 0x8a2   :  { %15603 = vmatprep.subr.bf16.mxu0 %v27236_v60  ;;  %v27308_v60 = vld [vmem:[#allocation10 + $0x104c] ss:$48 sps:$4 sm:$0xff]  }
 0x8a4   :  { %15440 = vmatpush1.bf16.msra.mxu1 %v27231_v35  ;;  %v27303_v35 = vld [vmem:[#allocation10 + $0x1040] ss:$48 sps:$4 sm:$0xff]  }
 0x8a5   :  { %15604 = vmatpush1.bf16.msra.mxu0 %v27234_v9  ;;  %15450 = vmatprep.subr.bf16.mxu1 %v27239_v34  ;;  %v27306_v9 = vld [vmem:[#allocation10 + $0x1048] ss:$48 sps:$4 sm:$0xff]   ;;  %v27311_v34 = vld [vmem:[#allocation10 + $0x10a4] ss:$48 sps:$4 sm:$0xff]  }
 0x8a6   :  { %15614 = vmatprep.subr.bf16.mxu0 %v27242_v55  ;;  %v27314_v55 = vld [vmem:[#allocation10 + $0x10ac] ss:$48 sps:$4 sm:$0xff]  }
 0x8a7   :  { %15442 = vmatmul.mubr.bf16.vlgmr.msra.gmra.mrb[48].mxu1 %v29158_v23 }
 0x8a8   :  { %15606 = vmatmul.mubr.bf16.vlgmr.msra.gmra.mrb[28].mxu0 %v29158_v23  ;;  %15451 = vmatpush1.bf16.msra.mxu1 %v27237_v48  ;;  %v27260_v23 = vld [vmem:[#allocation10 + $0xd4c] ss:$48 sps:$4 sm:$0xff]   ;;  %v27309_v48 = vld [vmem:[#allocation10 + $0x10a0] ss:$48 sps:$4 sm:$0xff]  }
 0x8a9   :  { %15482 = vmatprep.mubr.bf16.mxu1 %v29176_v12  ;;  %15615 = vmatpush1.bf16.msra.mxu0 %v27240_v40  ;;  %v27312_v40 = vld [vmem:[#allocation10 + $0x10a8] ss:$48 sps:$4 sm:$0xff]  }
 0x8aa   :  { %15646 = vmatprep.mubr.bf16.mxu0 %v29176_v12  ;;  %15452 = vmatprep.subr.bf16.mxu1 %v27245_v47  ;;  %v27261_v12 = vld [vmem:[#allocation10 + $0xda0] ss:$48 sps:$4 sm:$0xff]   ;;  %v27317_v47 = vld [vmem:[#allocation10 + $0x1104] ss:$48 sps:$4 sm:$0xff]  }
 0x8ab   :  { %15616 = vmatprep.subr.bf16.mxu0 %v27248_v41  ;;  %v27320_v41 = vld [vmem:[#allocation10 + $0x110c] ss:$48 sps:$4 sm:$0xff]  }
 0x8ac   :  { %15453 = vmatpush1.bf16.msra.mxu1 %v27243_v50  ;;  %v27315_v50 = vld [vmem:[#allocation10 + $0x1100] ss:$48 sps:$4 sm:$0xff]  }
 0x8ad   :  { %15617 = vmatpush1.bf16.msra.mxu0 %v27246_v59  ;;  %15454 = vmatprep.subr.bf16.mxu1 %v27251_v51  ;;  %v27318_v59 = vld [vmem:[#allocation10 + $0x1108] ss:$48 sps:$4 sm:$0xff]   ;;  %v27323_v51 = vld [vmem:[#allocation10 + $0x1164] ss:$48 sps:$4 sm:$0xff]  }
 0x8ae   :  { %15618 = vmatprep.subr.bf16.mxu0 %v27254_v52  ;;  %v29224_v52 = vld [vmem:[#allocation11] sm:$0xff] }
 0x8b0   :  { %15455 = vmatpush1.bf16.msra.mxu1 %v27249_v53  ;;  %v27326_v53 = vld [vmem:[#allocation10 + $0x116c] ss:$48 sps:$4 sm:$0xff]  }
 0x8b1   :  { %15619 = vmatpush1.bf16.msra.mxu0 %v27252_v45  ;;  %15456 = vmatprep.subr.bf16.mxu1 %v27257_v54  ;;  %v27321_v45 = vld [vmem:[#allocation10 + $0x1160] ss:$48 sps:$4 sm:$0xff]   ;;  %v11299_v54 = vrot.slane %v29224_v52, %v28976_v14 }
 0x8b2   :  { %15620 = vmatprep.subr.bf16.mxu0 %v27260_v23  ;;  %v27324_v23 = vld [vmem:[#allocation10 + $0x1168] ss:$48 sps:$4 sm:$0xff]  }
 0x8b4   :  { %15457 = vmatpush1.bf16.msra.mxu1 %v27255_v58  ;;  %v27329_v58 = vld [vmem:[#allocation10 + $0x11c4] ss:$48 sps:$4 sm:$0xff]  }
 0x8b5   :  { %15621 = vmatpush1.bf16.msra.mxu0 %v27258_v46  ;;  %15458 = vmatprep.subr.bf16.mxu1 %v27263_v63  ;;  %v27332_v46 = vld [vmem:[#allocation10 + $0x11cc] ss:$48 sps:$4 sm:$0xff]   ;;  %v27327_v63 = vld [vmem:[#allocation10 + $0x11c0] ss:$48 sps:$4 sm:$0xff]  }
 0x8b6   :  { %15622 = vmatprep.subr.bf16.mxu0 %v27266_v11  ;;  %v24103_v11 = vadd.f32 %v29208_v5, %v11299_v54  ;;  %v27339_v5 = vld [vmem:[#allocation10 + $0x1280] ss:$48 sps:$4 sm:$0xff]  }
 0x8b7   :  { %v27383_v54 = vld [vmem:[#allocation13 + $0x4] ss:$28 sps:$4 sm:$0xff]  }
 0x8b8   :  { %15459 = vmatpush1.bf16.msra.mxu1 %v27261_v12  ;;  %v27330_v12 = vld [vmem:[#allocation10 + $0x11c8] ss:$48 sps:$4 sm:$0xff]  }
 0x8b9   :  { %15623 = vmatpush1.bf16.msra.mxu0 %v27264_v0  ;;  %15460 = vmatprep.subr.bf16.mxu1 %v27269_v57  ;;  %v27335_v0 = vld [vmem:[#allocation10 + $0x1224] ss:$48 sps:$4 sm:$0xff]   ;;  %v27338_v57 = vld [vmem:[#allocation10 + $0x122c] ss:$48 sps:$4 sm:$0xff]  }
 0x8ba   :  { %15624 = vmatprep.subr.bf16.mxu0 %v27272_v44  ;;  %v27333_v44 = vld [vmem:[#allocation10 + $0x1220] ss:$48 sps:$4 sm:$0xff]  }
 0x8bc   :  { %15461 = vmatpush1.bf16.msra.mxu1 %v27267_v2  ;;  %v23130_v2 = vmul.f32 -1.442695, %v24103_v11  ;;  %v27389_v11 = vld [vmem:[#allocation13 + $0x3c] ss:$28 sps:$4 sm:$0xff]  }
 0x8bd   :  { %15625 = vmatpush1.bf16.msra.mxu0 %v27270_v56  ;;  %15462 = vmatprep.subr.bf16.mxu1 %v27275_v61  ;;  %v27336_v56 = vld [vmem:[#allocation10 + $0x1228] ss:$48 sps:$4 sm:$0xff]   ;;  %v27341_v61 = vld [vmem:[#allocation10 + $0x1284] ss:$48 sps:$4 sm:$0xff]  }
 0x8be   :  { %15626 = vmatprep.subr.bf16.mxu0 %v27278_v4  ;;  %v27344_v4 = vld [vmem:[#allocation10 + $0x128c] ss:$48 sps:$4 sm:$0xff]   ;;  %28417 = vpow2.f32 %v23130_v2 }
 0x8bf   :  { %v27395_v2 = vld [vmem:[#allocation13 + $0x74] ss:$28 sps:$4 sm:$0xff]  }
 0x8c0   :  { %15463 = vmatpush1.bf16.msra.mxu1 %v27273_v6  ;;  %v27342_v6 = vld [vmem:[#allocation10 + $0x1288] ss:$48 sps:$4 sm:$0xff]  }
 0x8c1   :  { %15627 = vmatpush1.bf16.msra.mxu0 %v27276_v17  ;;  %15464 = vmatprep.subr.bf16.mxu1 %v27281_v3  ;;  %v27347_v17 = vld [vmem:[#allocation10 + $0x12e4] ss:$48 sps:$4 sm:$0xff]   ;;  %v27350_v3 = vld [vmem:[#allocation10 + $0x12ec] ss:$48 sps:$4 sm:$0xff]  }
 0x8c2   :  { %15628 = vmatprep.subr.bf16.mxu0 %v27284_v18  ;;  %v27345_v18 = vld [vmem:[#allocation10 + $0x12e0] ss:$48 sps:$4 sm:$0xff]  }
 0x8c4   :  { %15465 = vmatpush1.bf16.msra.mxu1 %v27279_v30  ;;  %v27348_v30 = vld [vmem:[#allocation10 + $0x12e8] ss:$48 sps:$4 sm:$0xff]  }
 0x8c5   :  { %15629 = vmatpush1.bf16.msra.mxu0 %v27282_v27  ;;  %15466 = vmatprep.subr.bf16.mxu1 %v27287_v49  ;;  %v27353_v27 = vld [vmem:[#allocation10 + $0x1344] ss:$48 sps:$4 sm:$0xff]   ;;  %v27351_v49 = vld [vmem:[#allocation10 + $0x1340] ss:$48 sps:$4 sm:$0xff]  }
 0x8c6   :  { %15630 = vmatprep.subr.bf16.mxu0 %v27290_v22  ;;  %v27354_v22 = vld [vmem:[#allocation10 + $0x1348] ss:$48 sps:$4 sm:$0xff]  }
 0x8c8   :  { %15467 = vmatpush1.bf16.msra.mxu1 %v27285_v16  ;;  %v27359_v16 = vld [vmem:[#allocation10 + $0x13a4] ss:$48 sps:$4 sm:$0xff]  }
 0x8c9   :  { %15631 = vmatpush1.bf16.msra.mxu0 %v27288_v21  ;;  %15468 = vmatprep.subr.bf16.mxu1 %v27293_v25  ;;  %v27362_v21 = vld [vmem:[#allocation10 + $0x13ac] ss:$48 sps:$4 sm:$0xff]   ;;  %v28418_v25 = vpop.eup %28417 }
 0x8ca   :  { %15632 = vmatprep.subr.bf16.mxu0 %v27296_v13  ;;  %v27357_v13 = vld [vmem:[#allocation10 + $0x13a0] ss:$48 sps:$4 sm:$0xff]  }
 0x8cc   :  { %15469 = vmatpush1.bf16.msra.mxu1 %v27291_v36  ;;  %v27365_v36 = vld [vmem:[#allocation10 + $0x1404] ss:$48 sps:$4 sm:$0xff]  }
 0x8cd   :  { %15633 = vmatpush1.bf16.msra.mxu0 %v27294_v10  ;;  %15470 = vmatprep.subr.bf16.mxu1 %v27299_v28  ;;  %v15733_v10 = vadd.f32 1.0, %v28418_v25  ;;  %v27368_v28 = vld [vmem:[#allocation10 + $0x140c] ss:$48 sps:$4 sm:$0xff]   ;;  %v27422_v25 = vld [vmem:[#allocation13 + $0x15c] ss:$28 sps:$4 sm:$0xff]  }
 0x8ce   :  { %15634 = vmatprep.subr.bf16.mxu0 %v27302_v29  ;;  %v27363_v29 = vld [vmem:[#allocation10 + $0x1400] ss:$48 sps:$4 sm:$0xff]  }
 0x8cf   :  { %28419 = vrcp.f32 %v15733_v10  ;;  %v27420_v10 = vld [vmem:[#allocation13 + $0x158] ss:$28 sps:$4 sm:$0xff]  }
 0x8d0   :  { %15471 = vmatpush1.bf16.msra.mxu1 %v27297_v39  ;;  %v27366_v39 = vld [vmem:[#allocation10 + $0x1408] ss:$48 sps:$4 sm:$0xff]  }
 0x8d1   :  { %15635 = vmatpush1.bf16.msra.mxu0 %v27300_v42  ;;  %15472 = vmatprep.subr.bf16.mxu1 %v27305_v43  ;;  %v27371_v42 = vld [vmem:[#allocation10 + $0x1464] ss:$48 sps:$4 sm:$0xff]  }
 0x8d2   :  { %15636 = vmatprep.subr.bf16.mxu0 %v27308_v60  ;;  %v27374_v60 = vld [vmem:[#allocation10 + $0x146c] ss:$48 sps:$4 sm:$0xff]  }
 0x8d4   :  { %15473 = vmatpush1.bf16.msra.mxu1 %v27303_v35 }
 0x8d5   :  { %15637 = vmatpush1.bf16.msra.mxu0 %v27306_v9  ;;  %15474 = vmatprep.subr.bf16.mxu1 %v27311_v34 }
 0x8d6   :  { %15638 = vmatprep.subr.bf16.mxu0 %v27314_v55 }
 0x8d8   :  { %15475 = vmatpush1.bf16.msra.mxu1 %v27309_v48  ;;  %v27369_v48 = vld [vmem:[#allocation10 + $0x1460] ss:$48 sps:$4 sm:$0xff]  }
 0x8d9   :  { %15639 = vmatpush1.bf16.msra.mxu0 %v27312_v40  ;;  %15476 = vmatprep.subr.bf16.mxu1 %v27317_v47 }
 0x8da   :  { %15640 = vmatprep.subr.bf16.mxu0 %v27320_v41  ;;  %v27372_v41 = vld [vmem:[#allocation10 + $0x1468] ss:$48 sps:$4 sm:$0xff]  }
 0x8dc   :  { %15477 = vmatpush1.bf16.msra.mxu1 %v27315_v50  ;;  %v27377_v50 = vld [vmem:[#allocation10 + $0x14c4] ss:$48 sps:$4 sm:$0xff]  }
 0x8dd   :  { %15641 = vmatpush1.bf16.msra.mxu0 %v27318_v59  ;;  %15478 = vmatprep.subr.bf16.mxu1 %v27323_v51  ;;  %v27380_v51 = vld [vmem:[#allocation10 + $0x14cc] ss:$48 sps:$4 sm:$0xff]  }
 0x8de   :  { %15642 = vmatprep.subr.bf16.mxu0 %v27326_v53  ;;  %v27375_v53 = vld [vmem:[#allocation10 + $0x14c0] ss:$48 sps:$4 sm:$0xff]  }
 0x8e0   :  { %15479 = vmatpush1.bf16.msra.mxu1 %v27321_v45  ;;  %v27378_v45 = vld [vmem:[#allocation10 + $0x14c8] ss:$48 sps:$4 sm:$0xff]  }
 0x8e1   :  { %15643 = vmatpush1.bf16.msra.mxu0 %v27324_v23  ;;  %15480 = vmatprep.subr.bf16.mxu1 %v27329_v58  ;;  %v27386_v23 = vld [vmem:[#allocation13 + $0xc] ss:$28 sps:$4 sm:$0xff]   ;;  %v28420_v58 = vpop.eup %28419 }
 0x8e2   :  { %15644 = vmatprep.subr.bf16.mxu0 %v27332_v46  ;;  %v27381_v46 = vld [vmem:[#allocation13] ss:$28 sps:$4 sm:$0xff]  }
 0x8e4   :  { %15481 = vmatpush1.bf16.msra.mxu1 %v27327_v63  ;;  %v27384_v63 = vld [vmem:[#allocation13 + $0x8] ss:$28 sps:$4 sm:$0xff]  }
 0x8e5   :  { %15645 = vmatpush1.bf16.msra.mxu0 %v27330_v12  ;;  %15491 = vmatprep.subr.bf16.mxu1 %v27335_v0  ;;  %v29242_v12 = vpack.c.bf16 %v28420_v58, %v28420_v58  ;;  %v27392_v0 = vld [vmem:[#allocation13 + $0x44] ss:$28 sps:$4 sm:$0xff]   ;;  %v27444_v58 = vld [vmem:[#allocation13 + $0x238] ss:$28 sps:$4 sm:$0xff]  }
 0x8e6   :  { %15655 = vmatprep.subr.bf16.mxu0 %v27338_v57  ;;  %v27387_v57 = vld [vmem:[#allocation13 + $0x38] ss:$28 sps:$4 sm:$0xff]  }
 0x8e7   :  { %15483 = vmatmul.mubr.bf16.vlgmr.msra.gmra.mrb[48].mxu1 %v29178_v24 }
 0x8e8   :  { %15647 = vmatmul.mubr.bf16.vlgmr.msra.gmra.mrb[28].mxu0 %v29178_v24  ;;  %15492 = vmatpush1.bf16.msra.mxu1 %v27333_v44  ;;  %v27356_v24 = vld [vmem:[#allocation10 + $0x134c] ss:$48 sps:$4 sm:$0xff]  }
 0x8e9   :  { %15656 = vmatpush1.bf16.msra.mxu0 %v27336_v56  ;;  %15493 = vmatprep.subr.bf16.mxu1 %v27341_v61  ;;  %v27390_v44 = vld [vmem:[#allocation13 + $0x40] ss:$28 sps:$4 sm:$0xff]   ;;  %v27393_v61 = vld [vmem:[#allocation13 + $0x70] ss:$28 sps:$4 sm:$0xff]  }
 0x8ea   :  { %15657 = vmatprep.subr.bf16.mxu0 %v27344_v4  ;;  %15523 = vmatprep.mubr.bf16.mxu1 %v28721_v26  ;;  %v27398_v56 = vld [vmem:[#allocation13 + $0x7c] ss:$28 sps:$4 sm:$0xff]  }
 0x8eb   :  { %15687 = vmatprep.mubr.bf16.mxu0 %v28721_v26  ;;  %v27360_v26 = vld [vmem:[#allocation10 + $0x13a8] ss:$48 sps:$4 sm:$0xff]   ;;  %v27396_v4 = vld [vmem:[#allocation13 + $0x78] ss:$28 sps:$4 sm:$0xff]  }
 0x8ec   :  { %15494 = vmatpush1.bf16.msra.mxu1 %v27339_v5  ;;  %v27401_v5 = vld [vmem:[#allocation13 + $0xac] ss:$28 sps:$4 sm:$0xff]  }
 0x8ed   :  { %15658 = vmatpush1.bf16.msra.mxu0 %v27342_v6  ;;  %15495 = vmatprep.subr.bf16.mxu1 %v27347_v17  ;;  %v27399_v6 = vld [vmem:[#allocation13 + $0xa8] ss:$28 sps:$4 sm:$0xff]   ;;  %v27402_v17 = vld [vmem:[#allocation13 + $0xb0] ss:$28 sps:$4 sm:$0xff]  }
 0x8ee   :  { %15659 = vmatprep.subr.bf16.mxu0 %v27350_v3  ;;  %v27407_v3 = vld [vmem:[#allocation13 + $0xe4] ss:$28 sps:$4 sm:$0xff]  }
 0x8f0   :  { %15496 = vmatpush1.bf16.msra.mxu1 %v27345_v18  ;;  %v27410_v18 = vld [vmem:[#allocation13 + $0xec] ss:$28 sps:$4 sm:$0xff]  }
 0x8f1   :  { %15660 = vmatpush1.bf16.msra.mxu0 %v27348_v30  ;;  %15497 = vmatprep.subr.bf16.mxu1 %v27353_v27  ;;  %v27405_v30 = vld [vmem:[#allocation13 + $0xe0] ss:$28 sps:$4 sm:$0xff]   ;;  %v27408_v27 = vld [vmem:[#allocation13 + $0xe8] ss:$28 sps:$4 sm:$0xff]  }
 0x8f2   :  { %15661 = vmatprep.subr.bf16.mxu0 %v27356_v24  ;;  %v27413_v24 = vld [vmem:[#allocation13 + $0x11c] ss:$28 sps:$4 sm:$0xff]  }
 0x8f4   :  { %15498 = vmatpush1.bf16.msra.mxu1 %v27351_v49  ;;  %v27416_v49 = vld [vmem:[#allocation13 + $0x124] ss:$28 sps:$4 sm:$0xff]  }
 0x8f5   :  { %15662 = vmatpush1.bf16.msra.mxu0 %v27354_v22  ;;  %15499 = vmatprep.subr.bf16.mxu1 %v27359_v16  ;;  %v27411_v22 = vld [vmem:[#allocation13 + $0x118] ss:$28 sps:$4 sm:$0xff]   ;;  %v27414_v16 = vld [vmem:[#allocation13 + $0x120] ss:$28 sps:$4 sm:$0xff]  }
 0x8f6   :  { %15663 = vmatprep.subr.bf16.mxu0 %v27362_v21  ;;  %v27419_v21 = vld [vmem:[#allocation13 + $0x154] ss:$28 sps:$4 sm:$0xff]  }
 0x8f8   :  { %15500 = vmatpush1.bf16.msra.mxu1 %v27357_v13  ;;  %v11295_v13 = vrot.slane %v29224_v52, %v29003_v15 }
 0x8f9   :  { %15664 = vmatpush1.bf16.msra.mxu0 %v27360_v26  ;;  %15501 = vmatprep.subr.bf16.mxu1 %v27365_v36  ;;  %v27417_v26 = vld [vmem:[#allocation13 + $0x150] ss:$28 sps:$4 sm:$0xff]   ;;  %v11307_v36 = vrot.slane %v29224_v52, %v29008_v37 }
 0x8fa   :  { %v29233_v43 = vpop.f32.mrb[44].mxu1  ;;  %15665 = vmatprep.subr.bf16.mxu0 %v27368_v28  ;;  %v27425_v28 = vld [vmem:[#allocation13 + $0x18c] ss:$28 sps:$4 sm:$0xff]  }
 0x8fb   :  { %v29235_v35 = vpop.f32.mrb[24].mxu0  ;;  %v29237_v9 = vpop.f32.mrb[45].mxu1 }
 0x8fc   :  { %v29239_v34 = vpop.f32.mrb[25].mxu0  ;;  %v15201_v55 = vpop.f32.mrb[46].mxu1  ;;  %15502 = vmatpush1.bf16.msra.mxu1 %v27363_v29  ;;  %v27428_v29 = vld [vmem:[#allocation13 + $0x194] ss:$28 sps:$4 sm:$0xff]  }
 0x8fd   :  { %v15365_v40 = vpop.f32.mrb[26].mxu0  ;;  %15666 = vmatpush1.bf16.msra.mxu0 %v27366_v39  ;;  %v15202_v47 = vpop.f32.mrb[47].mxu1  ;;  %15503 = vmatprep.subr.bf16.mxu1 %v27371_v42  ;;  %v24102_v39 = vadd.f32 %v29204_v31, %v11295_v13  ;;  %v27423_v42 = vld [vmem:[#allocation13 + $0x188] ss:$28 sps:$4 sm:$0xff]   ;;  %v27426_v55 = vld [vmem:[#allocation13 + $0x190] ss:$28 sps:$4 sm:$0xff]  }
 0x8fe   :  { %v15366_v59 = vpop.f32.mrb[27].mxu0  ;;  %15667 = vmatprep.subr.bf16.mxu0 %v27374_v60  ;;  %v24105_v60 = vadd.f32 %v29210_v32, %v11307_v36  ;;  %v27434_v40 = vld [vmem:[#allocation13 + $0x1cc] ss:$28 sps:$4 sm:$0xff]   ;;  %v27440_v31 = vld [vmem:[#allocation13 + $0x204] ss:$28 sps:$4 sm:$0xff]  }
 0x8ff   :  { %v23129_v47 = vmul.f32 -1.442695, %v24102_v39  ;;  %v27432_v59 = vld [vmem:[#allocation13 + $0x1c8] ss:$28 sps:$4 sm:$0xff]   ;;  %v27438_v32 = vld [vmem:[#allocation13 + $0x200] ss:$28 sps:$4 sm:$0xff]  }
 0x900   :  { %15504 = vmatpush1.bf16.msra.mxu1 %v27369_v48  ;;  %v27431_v48 = vld [vmem:[#allocation13 + $0x1c4] ss:$28 sps:$4 sm:$0xff]   ;;  %v27482_v36 = vld [vmem:[#allocation13 + $0x38c] ss:$28 sps:$4 sm:$0xff]  }
 0x901   :  { %15668 = vmatpush1.bf16.msra.mxu0 %v27372_v41  ;;  %15505 = vmatprep.subr.bf16.mxu1 %v27377_v50  ;;  %v27429_v41 = vld [vmem:[#allocation13 + $0x1c0] ss:$28 sps:$4 sm:$0xff]   ;;  %v23132_v50 = vmul.f32 -1.442695, %v24105_v60  ;;  %28421 = vpow2.f32 %v23129_v47  ;;  %v27480_v39 = vld [vmem:[#allocation13 + $0x388] ss:$28 sps:$4 sm:$0xff]  }
 0x902   :  { %15669 = vmatprep.subr.bf16.mxu0 %v27380_v51  ;;  %v27437_v51 = vld [vmem:[#allocation13 + $0x1fc] ss:$28 sps:$4 sm:$0xff]   ;;  %v27479_v13 = vld [vmem:[#allocation13 + $0x384] ss:$28 sps:$4 sm:$0xff]   ;;  %v27491_v47 = vld [vmem:[#allocation13 + $0x3f4] ss:$28 sps:$4 sm:$0xff]  }
 0x903   :  { %28423 = vpow2.f32 %v23132_v50  ;;  %v27489_v50 = vld [vmem:[#allocation13 + $0x3f0] ss:$28 sps:$4 sm:$0xff]  }
 0x904   :  { %15506 = vmatpush1.bf16.msra.mxu1 %v27375_v53  ;;  %v27435_v53 = vld [vmem:[#allocation13 + $0x1f8] ss:$28 sps:$4 sm:$0xff]  }
 0x905   :  { %15670 = vmatpush1.bf16.msra.mxu0 %v27378_v45  ;;  %20041 = vmatprep.subr.bf16.mxu1 %v27383_v54  ;;  %v27443_v45 = vld [vmem:[#allocation13 + $0x234] ss:$28 sps:$4 sm:$0xff]   ;;  %v27446_v54 = vld [vmem:[#allocation13 + $0x23c] ss:$28 sps:$4 sm:$0xff]  }
 0x906   :  { %20287 = vmatprep.subr.bf16.mxu0 %v27386_v23  ;;  %v27441_v23 = vld [vmem:[#allocation13 + $0x230] ss:$28 sps:$4 sm:$0xff]  }
 0x907   :  { %15524 = vmatmul.mubr.bf16.vlgmr.msra.gmra.mrb[48].mxu1 %v29186_v33 }
 0x908   :  { %15688 = vmatmul.mubr.bf16.vlgmr.msra.gmra.mrb[28].mxu0 %v29186_v33  ;;  %20042 = vmatpush1.bf16.msra.mxu1 %v27381_v46  ;;  %v27404_v33 = vld [vmem:[#allocation13 + $0xb4] ss:$28 sps:$4 sm:$0xff]   ;;  %v27449_v46 = vld [vmem:[#allocation13 + $0x26c] ss:$28 sps:$4 sm:$0xff]  }
 0x909   :  { %20073 = vmatprep.mubr.bf16.mxu1 %v29242_v12  ;;  %20288 = vmatpush1.bf16.msra.mxu0 %v27384_v63  ;;  %v27452_v63 = vld [vmem:[#allocation13 + $0x274] ss:$28 sps:$4 sm:$0xff]  }
 0x90a   :  { %20319 = vmatprep.mubr.bf16.mxu0 %v29242_v12  ;;  %20043 = vmatprep.subr.bf16.mxu1 %v27389_v11  ;;  %v27447_v11 = vld [vmem:[#allocation13 + $0x268] ss:$28 sps:$4 sm:$0xff]  }
 0x90b   :  { %20289 = vmatprep.subr.bf16.mxu0 %v27392_v0  ;;  %v28422_v0 = vpop.eup %28421 }
 0x90c   :  { %20044 = vmatpush1.bf16.msra.mxu1 %v27387_v57  ;;  %v27450_v57 = vld [vmem:[#allocation13 + $0x270] ss:$28 sps:$4 sm:$0xff]  }
 0x90d   :  { %20290 = vmatpush1.bf16.msra.mxu0 %v27390_v44  ;;  %20045 = vmatprep.subr.bf16.mxu1 %v27395_v2  ;;  %v27455_v44 = vld [vmem:[#allocation13 + $0x2a4] ss:$28 sps:$4 sm:$0xff]   ;;  %v27458_v2 = vld [vmem:[#allocation13 + $0x2ac] ss:$28 sps:$4 sm:$0xff]  }
 0x90e   :  { %20291 = vmatprep.subr.bf16.mxu0 %v27398_v56  ;;  %v28424_v56 = vpop.eup %28423 }
 0x910   :  { %20046 = vmatpush1.bf16.msra.mxu1 %v27393_v61  ;;  %v15732_v61 = vadd.f32 1.0, %v28422_v0  ;;  %v27510_v0 = vld [vmem:[#allocation13 + $0x4a0] ss:$28 sps:$4 sm:$0xff]  }
 0x911   :  { %20292 = vmatpush1.bf16.msra.mxu0 %v27396_v4  ;;  %20047 = vmatprep.subr.bf16.mxu1 %v27401_v5  ;;  %v27453_v4 = vld [vmem:[#allocation13 + $0x2a0] ss:$28 sps:$4 sm:$0xff]   ;;  %v27456_v5 = vld [vmem:[#allocation13 + $0x2a8] ss:$28 sps:$4 sm:$0xff]  }
 0x912   :  { %20293 = vmatprep.subr.bf16.mxu0 %v27404_v33  ;;  %v27461_v33 = vld [vmem:[#allocation13 + $0x2dc] ss:$28 sps:$4 sm:$0xff]   ;;  %28425 = vrcp.f32 %v15732_v61  ;;  %v11315_v61 = vrot.slane %v29224_v52, %v29026_v8 }
 0x914   :  { %20048 = vmatpush1.bf16.msra.mxu1 %v27399_v6  ;;  %v15735_v6 = vadd.f32 1.0, %v28424_v56  ;;  %v27513_v56 = vld [vmem:[#allocation13 + $0x4d0] ss:$28 sps:$4 sm:$0xff]  }
 0x915   :  { %20294 = vmatpush1.bf16.msra.mxu0 %v27402_v17  ;;  %20049 = vmatprep.subr.bf16.mxu1 %v27407_v3  ;;  %v27464_v17 = vld [vmem:[#allocation13 + $0x2e4] ss:$28 sps:$4 sm:$0xff]   ;;  %v27459_v3 = vld [vmem:[#allocation13 + $0x2d8] ss:$28 sps:$4 sm:$0xff]  }
 0x916   :  { %20295 = vmatprep.subr.bf16.mxu0 %v27410_v18  ;;  %v27462_v18 = vld [vmem:[#allocation13 + $0x2e0] ss:$28 sps:$4 sm:$0xff]   ;;  %28427 = vrcp.f32 %v15735_v6 }
 0x918   :  { %20050 = vmatpush1.bf16.msra.mxu1 %v27405_v30  ;;  %v27467_v30 = vld [vmem:[#allocation13 + $0x314] ss:$28 sps:$4 sm:$0xff]  }
 0x919   :  { %20296 = vmatpush1.bf16.msra.mxu0 %v27408_v27  ;;  %20051 = vmatprep.subr.bf16.mxu1 %v27413_v24  ;;  %v27470_v27 = vld [vmem:[#allocation13 + $0x31c] ss:$28 sps:$4 sm:$0xff]   ;;  %v27465_v24 = vld [vmem:[#allocation13 + $0x310] ss:$28 sps:$4 sm:$0xff]  }
 0x91a   :  { %20297 = vmatprep.subr.bf16.mxu0 %v27416_v49  ;;  %v27468_v49 = vld [vmem:[#allocation13 + $0x318] ss:$28 sps:$4 sm:$0xff]  }
 0x91c   :  { %20052 = vmatpush1.bf16.msra.mxu1 %v27411_v22  ;;  %v27473_v22 = vld [vmem:[#allocation13 + $0x34c] ss:$28 sps:$4 sm:$0xff]  }
 0x91d   :  { %20298 = vmatpush1.bf16.msra.mxu0 %v27414_v16  ;;  %20053 = vmatprep.subr.bf16.mxu1 %v27419_v21  ;;  %v27476_v16 = vld [vmem:[#allocation13 + $0x354] ss:$28 sps:$4 sm:$0xff]   ;;  %v27471_v21 = vld [vmem:[#allocation13 + $0x348] ss:$28 sps:$4 sm:$0xff]  }
 0x91e   :  { %20299 = vmatprep.subr.bf16.mxu0 %v27422_v25  ;;  %v27474_v25 = vld [vmem:[#allocation13 + $0x350] ss:$28 sps:$4 sm:$0xff]  }
 0x920   :  { %20054 = vmatpush1.bf16.msra.mxu1 %v27417_v26  ;;  %v28426_v26 = vpop.eup %28425 }
 0x921   :  { %20300 = vmatpush1.bf16.msra.mxu0 %v27420_v10  ;;  %20055 = vmatprep.subr.bf16.mxu1 %v27425_v28  ;;  %v28428_v10 = vpop.eup %28427  ;;  %v27477_v28 = vld [vmem:[#allocation13 + $0x380] ss:$28 sps:$4 sm:$0xff]  }
 0x922   :  { %20301 = vmatprep.subr.bf16.mxu0 %v27428_v29  ;;  %v29253_v29 = vpack.c.bf16 %v28426_v26, %v28426_v26  ;;  %v29256_v60 = vpack.c.bf16 %v28428_v10, %v28428_v10  ;;  %v27542_v26 = vld [vmem:[#allocation13 + $0x5bc] ss:$28 sps:$4 sm:$0xff]  }
 0x923   :  { %v27540_v10 = vld [vmem:[#allocation13 + $0x5b8] ss:$28 sps:$4 sm:$0xff]  }
 0x924   :  { %20056 = vmatpush1.bf16.msra.mxu1 %v27423_v42  ;;  %v27485_v42 = vld [vmem:[#allocation13 + $0x3bc] ss:$28 sps:$4 sm:$0xff]  }
 0x925   :  { %20302 = vmatpush1.bf16.msra.mxu0 %v27426_v55  ;;  %20057 = vmatprep.subr.bf16.mxu1 %v27431_v48  ;;  %v27488_v55 = vld [vmem:[#allocation13 + $0x3c4] ss:$28 sps:$4 sm:$0xff]   ;;  %v27483_v48 = vld [vmem:[#allocation13 + $0x3b8] ss:$28 sps:$4 sm:$0xff]  }
 0x926   :  { %20303 = vmatprep.subr.bf16.mxu0 %v27434_v40  ;;  %v27486_v40 = vld [vmem:[#allocation13 + $0x3c0] ss:$28 sps:$4 sm:$0xff]  }
 0x928   :  { %20058 = vmatpush1.bf16.msra.mxu1 %v27429_v41  ;;  %v27494_v41 = vld [vmem:[#allocation13 + $0x3fc] ss:$28 sps:$4 sm:$0xff]  }
 0x929   :  { %20304 = vmatpush1.bf16.msra.mxu0 %v27432_v59  ;;  %20059 = vmatprep.subr.bf16.mxu1 %v27437_v51  ;;  %v27492_v59 = vld [vmem:[#allocation13 + $0x3f8] ss:$28 sps:$4 sm:$0xff]   ;;  %v27497_v51 = vld [vmem:[#allocation13 + $0x42c] ss:$28 sps:$4 sm:$0xff]  }
 0x92a   :  { %20305 = vmatprep.subr.bf16.mxu0 %v27440_v31  ;;  %v27500_v31 = vld [vmem:[#allocation13 + $0x434] ss:$28 sps:$4 sm:$0xff]  }
 0x92c   :  { %20060 = vmatpush1.bf16.msra.mxu1 %v27435_v53  ;;  %v27495_v53 = vld [vmem:[#allocation13 + $0x428] ss:$28 sps:$4 sm:$0xff]  }
 0x92d   :  { %20306 = vmatpush1.bf16.msra.mxu0 %v27438_v32  ;;  %20061 = vmatprep.subr.bf16.mxu1 %v27443_v45  ;;  %v27498_v32 = vld [vmem:[#allocation13 + $0x430] ss:$28 sps:$4 sm:$0xff]   ;;  %v27503_v45 = vld [vmem:[#allocation13 + $0x464] ss:$28 sps:$4 sm:$0xff]  }
 0x92e   :  { %20307 = vmatprep.subr.bf16.mxu0 %v27446_v54  ;;  %v27506_v54 = vld [vmem:[#allocation13 + $0x46c] ss:$28 sps:$4 sm:$0xff]  }
 0x930   :  { %20062 = vmatpush1.bf16.msra.mxu1 %v27441_v23  ;;  %v27501_v23 = vld [vmem:[#allocation13 + $0x460] ss:$28 sps:$4 sm:$0xff]  }
 0x931   :  { %20308 = vmatpush1.bf16.msra.mxu0 %v27444_v58  ;;  %20063 = vmatprep.subr.bf16.mxu1 %v27449_v46  ;;  %v27504_v58 = vld [vmem:[#allocation13 + $0x468] ss:$28 sps:$4 sm:$0xff]   ;;  %v27509_v46 = vld [vmem:[#allocation13 + $0x49c] ss:$28 sps:$4 sm:$0xff]  }
 0x932   :  { %20309 = vmatprep.subr.bf16.mxu0 %v27452_v63  ;;  %v27512_v63 = vld [vmem:[#allocation13 + $0x4a4] ss:$28 sps:$4 sm:$0xff]  }
 0x934   :  { %20064 = vmatpush1.bf16.msra.mxu1 %v27447_v11  ;;  %v27507_v11 = vld [vmem:[#allocation13 + $0x498] ss:$28 sps:$4 sm:$0xff]  }
 0x935   :  { %20310 = vmatpush1.bf16.msra.mxu0 %v27450_v57  ;;  %20065 = vmatprep.subr.bf16.mxu1 %v27455_v44  ;;  %v27515_v57 = vld [vmem:[#allocation13 + $0x4d4] ss:$28 sps:$4 sm:$0xff]   ;;  %v27518_v44 = vld [vmem:[#allocation13 + $0x4dc] ss:$28 sps:$4 sm:$0xff]  }
 0x936   :  { %20311 = vmatprep.subr.bf16.mxu0 %v27458_v2  ;;  %v11303_v2 = vrot.slane %v29224_v52, %v29023_v1 }
 0x938   :  { %20066 = vmatpush1.bf16.msra.mxu1 %v27453_v4  ;;  %v27516_v4 = vld [vmem:[#allocation13 + $0x4d8] ss:$28 sps:$4 sm:$0xff]   ;;  %v24104_v6 = vadd.f32 %v29206_v62, %v11303_v2  ;;  %v27536_v62 = vld [vmem:[#allocation13 + $0x584] ss:$28 sps:$4 sm:$0xff]  }
 0x939   :  { %20312 = vmatpush1.bf16.msra.mxu0 %v27456_v5  ;;  %20067 = vmatprep.subr.bf16.mxu1 %v27461_v33  ;;  %v27521_v5 = vld [vmem:[#allocation13 + $0x50c] ss:$28 sps:$4 sm:$0xff]   ;;  %v27524_v33 = vld [vmem:[#allocation13 + $0x514] ss:$28 sps:$4 sm:$0xff]   ;;  %v27575_v2 = vld [vmem:[#allocation13 + $0x704] ss:$28 sps:$4 sm:$0xff]  }
 0x93a   :  { %20313 = vmatprep.subr.bf16.mxu0 %v27464_v17  ;;  %v27519_v17 = vld [vmem:[#allocation13 + $0x508] ss:$28 sps:$4 sm:$0xff]  }
 0x93c   :  { %20068 = vmatpush1.bf16.msra.mxu1 %v27459_v3  ;;  %v24107_v3 = vadd.f32 %v29237_v9, %v11315_v61  ;;  %v27534_v9 = vld [vmem:[#allocation13 + $0x580] ss:$28 sps:$4 sm:$0xff]   ;;  %v27578_v61 = vld [vmem:[#allocation13 + $0x70c] ss:$28 sps:$4 sm:$0xff]  }
 0x93d   :  { %20314 = vmatpush1.bf16.msra.mxu0 %v27462_v18  ;;  %20069 = vmatprep.subr.bf16.mxu1 %v27467_v30  ;;  %v27522_v18 = vld [vmem:[#allocation13 + $0x510] ss:$28 sps:$4 sm:$0xff]   ;;  %v27527_v30 = vld [vmem:[#allocation13 + $0x544] ss:$28 sps:$4 sm:$0xff]  }
 0x93e   :  { %20315 = vmatprep.subr.bf16.mxu0 %v27470_v27  ;;  %v27530_v27 = vld [vmem:[#allocation13 + $0x54c] ss:$28 sps:$4 sm:$0xff]  }
 0x940   :  { %20070 = vmatpush1.bf16.msra.mxu1 %v27465_v24  ;;  %v23131_v24 = vmul.f32 -1.442695, %v24104_v6  ;;  %v27576_v6 = vld [vmem:[#allocation13 + $0x708] ss:$28 sps:$4 sm:$0xff]  }
 0x941   :  { %20316 = vmatpush1.bf16.msra.mxu0 %v27468_v49  ;;  %20071 = vmatprep.subr.bf16.mxu1 %v27473_v22  ;;  %v27525_v49 = vld [vmem:[#allocation13 + $0x540] ss:$28 sps:$4 sm:$0xff]   ;;  %v23134_v22 = vmul.f32 -1.442695, %v24107_v3 }
 0x942   :  { %20317 = vmatprep.subr.bf16.mxu0 %v27476_v16  ;;  %v27528_v16 = vld [vmem:[#allocation13 + $0x548] ss:$28 sps:$4 sm:$0xff]   ;;  %28429 = vpow2.f32 %v23131_v24  ;;  %v27587_v24 = vld [vmem:[#allocation13 + $0x774] ss:$28 sps:$4 sm:$0xff]  }
 0x943   :  { %28431 = vpow2.f32 %v23134_v22  ;;  %v27585_v22 = vld [vmem:[#allocation13 + $0x770] ss:$28 sps:$4 sm:$0xff]  }
 0x944   :  { %20072 = vmatpush1.bf16.msra.mxu1 %v27471_v21  ;;  %v27533_v21 = vld [vmem:[#allocation13 + $0x57c] ss:$28 sps:$4 sm:$0xff]  }
 0x945   :  { %20318 = vmatpush1.bf16.msra.mxu0 %v27474_v25  ;;  %20082 = vmatprep.subr.bf16.mxu1 %v27479_v13  ;;  %v27531_v25 = vld [vmem:[#allocation13 + $0x578] ss:$28 sps:$4 sm:$0xff]  }
 0x946   :  { %20328 = vmatprep.subr.bf16.mxu0 %v27482_v36  ;;  %v27539_v13 = vld [vmem:[#allocation13 + $0x5b4] ss:$28 sps:$4 sm:$0xff]  }
 0x947   :  { %20074 = vmatmul.mubr.bf16.vlgmr.msra.gmra.mrb[52].mxu1 %v29253_v29  ;;  %v27537_v36 = vld [vmem:[#allocation13 + $0x5b0] ss:$28 sps:$4 sm:$0xff]  }
 0x948   :  { %20320 = vmatmul.mubr.bf16.vlgmr.msra.gmra.mrb[32].mxu0 %v29253_v29  ;;  %20083 = vmatpush1.bf16.msra.mxu1 %v27477_v28  ;;  %v27545_v28 = vld [vmem:[#allocation13 + $0x5ec] ss:$28 sps:$4 sm:$0xff]  }
 0x949   :  { %20114 = vmatprep.mubr.bf16.mxu1 %v29256_v60  ;;  %20329 = vmatpush1.bf16.msra.mxu0 %v27480_v39  ;;  %v27548_v39 = vld [vmem:[#allocation13 + $0x5f4] ss:$28 sps:$4 sm:$0xff]  }
 0x94a   :  { %20360 = vmatprep.mubr.bf16.mxu0 %v29256_v60  ;;  %20084 = vmatprep.subr.bf16.mxu1 %v27485_v42  ;;  %v27543_v42 = vld [vmem:[#allocation13 + $0x5e8] ss:$28 sps:$4 sm:$0xff]  }
 0x94b   :  { %20330 = vmatprep.subr.bf16.mxu0 %v27488_v55 }
 0x94c   :  { %20085 = vmatpush1.bf16.msra.mxu1 %v27483_v48  ;;  %v28430_v55 = vpop.eup %28429  ;;  %v27546_v48 = vld [vmem:[#allocation13 + $0x5f0] ss:$28 sps:$4 sm:$0xff]  }
 0x94d   :  { %20331 = vmatpush1.bf16.msra.mxu0 %v27486_v40  ;;  %20086 = vmatprep.subr.bf16.mxu1 %v27491_v47  ;;  %v27551_v40 = vld [vmem:[#allocation13 + $0x624] ss:$28 sps:$4 sm:$0xff]   ;;  %v27554_v47 = vld [vmem:[#allocation13 + $0x62c] ss:$28 sps:$4 sm:$0xff]  }
 0x94e   :  { %20332 = vmatprep.subr.bf16.mxu0 %v27494_v41  ;;  %v28432_v41 = vpop.eup %28431 }
 0x950   :  { %20087 = vmatpush1.bf16.msra.mxu1 %v27489_v50  ;;  %v15734_v50 = vadd.f32 1.0, %v28430_v55  ;;  %v27606_v55 = vld [vmem:[#allocation13 + $0x820] ss:$28 sps:$4 sm:$0xff]  }
 0x951   :  { %20333 = vmatpush1.bf16.msra.mxu0 %v27492_v59  ;;  %20088 = vmatprep.subr.bf16.mxu1 %v27497_v51  ;;  %v27549_v59 = vld [vmem:[#allocation13 + $0x620] ss:$28 sps:$4 sm:$0xff]   ;;  %v27552_v51 = vld [vmem:[#allocation13 + $0x628] ss:$28 sps:$4 sm:$0xff]  }
 0x952   :  { %20334 = vmatprep.subr.bf16.mxu0 %v27500_v31  ;;  %v27557_v31 = vld [vmem:[#allocation13 + $0x65c] ss:$28 sps:$4 sm:$0xff]   ;;  %28433 = vrcp.f32 %v15734_v50  ;;  %v11323_v50 = vrot.slane %v29224_v52, %v845_v38 }
 0x953   :  { %v27621_v38 = vld [vmem:[#allocation13 + $0x8c0] ss:$28 sps:$4 sm:$0xff]  }
 0x954   :  { %20089 = vmatpush1.bf16.msra.mxu1 %v27495_v53  ;;  %v15737_v53 = vadd.f32 1.0, %v28432_v41  ;;  %v27609_v41 = vld [vmem:[#allocation13 + $0x850] ss:$28 sps:$4 sm:$0xff]  }
 0x955   :  { %20335 = vmatpush1.bf16.msra.mxu0 %v27498_v32  ;;  %20090 = vmatprep.subr.bf16.mxu1 %v27503_v45  ;;  %v27560_v32 = vld [vmem:[#allocation13 + $0x664] ss:$28 sps:$4 sm:$0xff]   ;;  %v27555_v45 = vld [vmem:[#allocation13 + $0x658] ss:$28 sps:$4 sm:$0xff]  }
 0x956   :  { %20336 = vmatprep.subr.bf16.mxu0 %v27506_v54  ;;  %v27558_v54 = vld [vmem:[#allocation13 + $0x660] ss:$28 sps:$4 sm:$0xff]   ;;  %28435 = vrcp.f32 %v15737_v53 }
 0x958   :  { %20091 = vmatpush1.bf16.msra.mxu1 %v27501_v23  ;;  %v27563_v23 = vld [vmem:[#allocation13 + $0x694] ss:$28 sps:$4 sm:$0xff]  }
 0x959   :  { %20337 = vmatpush1.bf16.msra.mxu0 %v27504_v58  ;;  %20092 = vmatprep.subr.bf16.mxu1 %v27509_v46  ;;  %v27566_v58 = vld [vmem:[#allocation13 + $0x69c] ss:$28 sps:$4 sm:$0xff]   ;;  %v27561_v46 = vld [vmem:[#allocation13 + $0x690] ss:$28 sps:$4 sm:$0xff]  }
 0x95a   :  { %20338 = vmatprep.subr.bf16.mxu0 %v27512_v63  ;;  %v27564_v63 = vld [vmem:[#allocation13 + $0x698] ss:$28 sps:$4 sm:$0xff]  }
 0x95c   :  { %20093 = vmatpush1.bf16.msra.mxu1 %v27507_v11  ;;  %v27569_v11 = vld [vmem:[#allocation13 + $0x6cc] ss:$28 sps:$4 sm:$0xff]  }
 0x95d   :  { %20339 = vmatpush1.bf16.msra.mxu0 %v27510_v0  ;;  %20094 = vmatprep.subr.bf16.mxu1 %v27515_v57  ;;  %v27572_v0 = vld [vmem:[#allocation13 + $0x6d4] ss:$28 sps:$4 sm:$0xff]   ;;  %v27567_v57 = vld [vmem:[#allocation13 + $0x6c8] ss:$28 sps:$4 sm:$0xff]  }
 0x95e   :  { %20340 = vmatprep.subr.bf16.mxu0 %v27518_v44  ;;  %v27570_v44 = vld [vmem:[#allocation13 + $0x6d0] ss:$28 sps:$4 sm:$0xff]  }
 0x960   :  { %20095 = vmatpush1.bf16.msra.mxu1 %v27513_v56  ;;  %v28434_v56 = vpop.eup %28433 }
 0x961   :  { %20341 = vmatpush1.bf16.msra.mxu0 %v27516_v4  ;;  %20096 = vmatprep.subr.bf16.mxu1 %v27521_v5  ;;  %v28436_v4 = vpop.eup %28435  ;;  %v27573_v5 = vld [vmem:[#allocation13 + $0x700] ss:$28 sps:$4 sm:$0xff]  }
 0x962   :  { %20342 = vmatprep.subr.bf16.mxu0 %v27524_v33  ;;  %v29267_v33 = vpack.c.bf16 %v28434_v56, %v28434_v56  ;;  %v29270_v3 = vpack.c.bf16 %v28436_v4, %v28436_v4  ;;  %v27641_v56 = vld [vmem:[#allocation13 + $0x96c] ss:$28 sps:$4 sm:$0xff]  }
 0x963   :  { %v27639_v4 = vld [vmem:[#allocation13 + $0x968] ss:$28 sps:$4 sm:$0xff]  }
 0x964   :  { %20097 = vmatpush1.bf16.msra.mxu1 %v27519_v17  ;;  %v27581_v17 = vld [vmem:[#allocation13 + $0x73c] ss:$28 sps:$4 sm:$0xff]  }
 0x965   :  { %20343 = vmatpush1.bf16.msra.mxu0 %v27522_v18  ;;  %20098 = vmatprep.subr.bf16.mxu1 %v27527_v30  ;;  %v27584_v18 = vld [vmem:[#allocation13 + $0x744] ss:$28 sps:$4 sm:$0xff]   ;;  %v27579_v30 = vld [vmem:[#allocation13 + $0x738] ss:$28 sps:$4 sm:$0xff]  }
 0x966   :  { %20344 = vmatprep.subr.bf16.mxu0 %v27530_v27  ;;  %v27582_v27 = vld [vmem:[#allocation13 + $0x740] ss:$28 sps:$4 sm:$0xff]  }
 0x968   :  { %20099 = vmatpush1.bf16.msra.mxu1 %v27525_v49  ;;  %v27590_v49 = vld [vmem:[#allocation13 + $0x77c] ss:$28 sps:$4 sm:$0xff]  }
 0x969   :  { %20345 = vmatpush1.bf16.msra.mxu0 %v27528_v16  ;;  %20100 = vmatprep.subr.bf16.mxu1 %v27533_v21  ;;  %v27588_v16 = vld [vmem:[#allocation13 + $0x778] ss:$28 sps:$4 sm:$0xff]   ;;  %v27593_v21 = vld [vmem:[#allocation13 + $0x7ac] ss:$28 sps:$4 sm:$0xff]  }
 0x96a   :  { %20346 = vmatprep.subr.bf16.mxu0 %v27536_v62  ;;  %v27596_v62 = vld [vmem:[#allocation13 + $0x7b4] ss:$28 sps:$4 sm:$0xff]  }
 0x96c   :  { %20101 = vmatpush1.bf16.msra.mxu1 %v27531_v25  ;;  %v27591_v25 = vld [vmem:[#allocation13 + $0x7a8] ss:$28 sps:$4 sm:$0xff]  }
 0x96d   :  { %20347 = vmatpush1.bf16.msra.mxu0 %v27534_v9  ;;  %20102 = vmatprep.subr.bf16.mxu1 %v27539_v13  ;;  %v27594_v9 = vld [vmem:[#allocation13 + $0x7b0] ss:$28 sps:$4 sm:$0xff]   ;;  %v27599_v13 = vld [vmem:[#allocation13 + $0x7e4] ss:$28 sps:$4 sm:$0xff]  }
 0x96e   :  { %20348 = vmatprep.subr.bf16.mxu0 %v27542_v26  ;;  %v27602_v26 = vld [vmem:[#allocation13 + $0x7ec] ss:$28 sps:$4 sm:$0xff]  }
 0x970   :  { %20103 = vmatpush1.bf16.msra.mxu1 %v27537_v36  ;;  %v27597_v36 = vld [vmem:[#allocation13 + $0x7e0] ss:$28 sps:$4 sm:$0xff]  }
 0x971   :  { %20349 = vmatpush1.bf16.msra.mxu0 %v27540_v10  ;;  %20104 = vmatprep.subr.bf16.mxu1 %v27545_v28  ;;  %v27600_v10 = vld [vmem:[#allocation13 + $0x7e8] ss:$28 sps:$4 sm:$0xff]   ;;  %v27605_v28 = vld [vmem:[#allocation13 + $0x81c] ss:$28 sps:$4 sm:$0xff]  }
 0x972   :  { %20350 = vmatprep.subr.bf16.mxu0 %v27548_v39  ;;  %v27608_v39 = vld [vmem:[#allocation13 + $0x824] ss:$28 sps:$4 sm:$0xff]  }
 0x974   :  { %20105 = vmatpush1.bf16.msra.mxu1 %v27543_v42  ;;  %v27603_v42 = vld [vmem:[#allocation13 + $0x818] ss:$28 sps:$4 sm:$0xff]  }
 0x975   :  { %20351 = vmatpush1.bf16.msra.mxu0 %v27546_v48  ;;  %20106 = vmatprep.subr.bf16.mxu1 %v27551_v40  ;;  %v27611_v48 = vld [vmem:[#allocation13 + $0x854] ss:$28 sps:$4 sm:$0xff]   ;;  %v27614_v40 = vld [vmem:[#allocation13 + $0x85c] ss:$28 sps:$4 sm:$0xff]  }
 0x976   :  { %20352 = vmatprep.subr.bf16.mxu0 %v27554_v47  ;;  %v11311_v47 = vrot.slane %v29224_v52, %v29045_v19 }
 0x978   :  { %20107 = vmatpush1.bf16.msra.mxu1 %v27549_v59  ;;  %v27612_v59 = vld [vmem:[#allocation13 + $0x858] ss:$28 sps:$4 sm:$0xff]   ;;  %v24106_v53 = vadd.f32 %v29233_v43, %v11311_v47  ;;  %v27632_v43 = vld [vmem:[#allocation13 + $0x904] ss:$28 sps:$4 sm:$0xff]  }
 0x979   :  { %20353 = vmatpush1.bf16.msra.mxu0 %v27552_v51  ;;  %20108 = vmatprep.subr.bf16.mxu1 %v27557_v31  ;;  %v27617_v51 = vld [vmem:[#allocation13 + $0x88c] ss:$28 sps:$4 sm:$0xff]   ;;  %v27620_v31 = vld [vmem:[#allocation13 + $0x894] ss:$28 sps:$4 sm:$0xff]  }
 0x97a   :  { %20354 = vmatprep.subr.bf16.mxu0 %v27560_v32  ;;  %v27615_v32 = vld [vmem:[#allocation13 + $0x888] ss:$28 sps:$4 sm:$0xff]  }
 0x97c   :  { %20109 = vmatpush1.bf16.msra.mxu1 %v27555_v45  ;;  %v24109_v45 = vadd.f32 %v29239_v34, %v11323_v50  ;;  %v27630_v34 = vld [vmem:[#allocation13 + $0x900] ss:$28 sps:$4 sm:$0xff]  }
 0x97d   :  { %20355 = vmatpush1.bf16.msra.mxu0 %v27558_v54  ;;  %20110 = vmatprep.subr.bf16.mxu1 %v27563_v23  ;;  %v27618_v54 = vld [vmem:[#allocation13 + $0x890] ss:$28 sps:$4 sm:$0xff]   ;;  %v27623_v23 = vld [vmem:[#allocation13 + $0x8c4] ss:$28 sps:$4 sm:$0xff]  }
 0x97e   :  { %20356 = vmatprep.subr.bf16.mxu0 %v27566_v58  ;;  %v23133_v58 = vmul.f32 -1.442695, %v24106_v53  ;;  %v23136_v52 = vmul.f32 -1.442695, %v24109_v45  ;;  %v27680_v53 = vld [vmem:[#allocation13 + $0xac4] ss:$28 sps:$4 sm:$0xff]  }
 0x97f   :  { %v27678_v45 = vld [vmem:[#allocation13 + $0xac0] ss:$28 sps:$4 sm:$0xff]  }
 0x980   :  { %20111 = vmatpush1.bf16.msra.mxu1 %v27561_v46  ;;  %v27624_v46 = vld [vmem:[#allocation13 + $0x8c8] ss:$28 sps:$4 sm:$0xff]   ;;  %28437 = vpow2.f32 %v23133_v58  ;;  %v27684_v58 = vld [vmem:[#allocation13 + $0xaf8] ss:$28 sps:$4 sm:$0xff]  }
 0x981   :  { %20357 = vmatpush1.bf16.msra.mxu0 %v27564_v63  ;;  %20112 = vmatprep.subr.bf16.mxu1 %v27569_v11  ;;  %v27629_v63 = vld [vmem:[#allocation13 + $0x8fc] ss:$28 sps:$4 sm:$0xff]   ;;  %28439 = vpow2.f32 %v23136_v52  ;;  %v27692_v52 = vld [vmem:[#allocation13 + $0xb34] ss:$28 sps:$4 sm:$0xff]  }
 0x982   :  { %20358 = vmatprep.subr.bf16.mxu0 %v27572_v0  ;;  %v27627_v11 = vld [vmem:[#allocation13 + $0x8f8] ss:$28 sps:$4 sm:$0xff]  }
 0x983   :  { %v27635_v0 = vld [vmem:[#allocation13 + $0x934] ss:$28 sps:$4 sm:$0xff]  }
 0x984   :  { %20113 = vmatpush1.bf16.msra.mxu1 %v27567_v57  ;;  %v27638_v57 = vld [vmem:[#allocation13 + $0x93c] ss:$28 sps:$4 sm:$0xff]  }
 0x985   :  { %20359 = vmatpush1.bf16.msra.mxu0 %v27570_v44  ;;  %20123 = vmatprep.subr.bf16.mxu1 %v27575_v2  ;;  %v27633_v44 = vld [vmem:[#allocation13 + $0x930] ss:$28 sps:$4 sm:$0xff]   ;;  %v27636_v2 = vld [vmem:[#allocation13 + $0x938] ss:$28 sps:$4 sm:$0xff]  }
 0x986   :  { %20369 = vmatprep.subr.bf16.mxu0 %v27578_v61  ;;  %v27644_v61 = vld [vmem:[#allocation13 + $0x974] ss:$28 sps:$4 sm:$0xff]  }
 0x987   :  { %20115 = vmatmul.mubr.bf16.vlgmr.msra.gmra.mrb[52].mxu1 %v29267_v33 }
 0x988   :  { %20361 = vmatmul.mubr.bf16.vlgmr.msra.gmra.mrb[32].mxu0 %v29267_v33  ;;  %20124 = vmatpush1.bf16.msra.mxu1 %v27573_v5 }
 0x989   :  { %20155 = vmatprep.mubr.bf16.mxu1 %v29270_v3  ;;  %20370 = vmatpush1.bf16.msra.mxu0 %v27576_v6  ;;  %v27642_v6 = vld [vmem:[#allocation13 + $0x970] ss:$28 sps:$4 sm:$0xff]  }
 0x98a   :  { %20401 = vmatprep.mubr.bf16.mxu0 %v29270_v3  ;;  %20125 = vmatprep.subr.bf16.mxu1 %v27581_v17  ;;  %v28438_v5 = vpop.eup %28437  ;;  %v27647_v17 = vld [vmem:[#allocation13 + $0x9a4] ss:$28 sps:$4 sm:$0xff]  }
 0x98b   :  { %20371 = vmatprep.subr.bf16.mxu0 %v27584_v18  ;;  %v27650_v18 = vld [vmem:[#allocation13 + $0x9ac] ss:$28 sps:$4 sm:$0xff]  }
 0x98c   :  { %20126 = vmatpush1.bf16.msra.mxu1 %v27579_v30  ;;  %v28440_v30 = vpop.eup %28439 }
 0x98d   :  { %20372 = vmatpush1.bf16.msra.mxu0 %v27582_v27  ;;  %20127 = vmatprep.subr.bf16.mxu1 %v27587_v24  ;;  %v15736_v27 = vadd.f32 1.0, %v28438_v5  ;;  %v27645_v24 = vld [vmem:[#allocation13 + $0x9a0] ss:$28 sps:$4 sm:$0xff]  }
 0x98e   :  { %20373 = vmatprep.subr.bf16.mxu0 %v27590_v49  ;;  %v27648_v49 = vld [vmem:[#allocation13 + $0x9a8] ss:$28 sps:$4 sm:$0xff]   ;;  %v27702_v5 = vld [vmem:[#allocation13 + $0xba0] ss:$28 sps:$4 sm:$0xff]  }
 0x98f   :  { %28441 = vrcp.f32 %v15736_v27 }
 0x990   :  { %20128 = vmatpush1.bf16.msra.mxu1 %v27585_v22  ;;  %v27653_v22 = vld [vmem:[#allocation13 + $0x9dc] ss:$28 sps:$4 sm:$0xff]  }
 0x991   :  { %20374 = vmatpush1.bf16.msra.mxu0 %v27588_v16  ;;  %20129 = vmatprep.subr.bf16.mxu1 %v27593_v21  ;;  %v15739_v16 = vadd.f32 1.0, %v28440_v30  ;;  %v27656_v21 = vld [vmem:[#allocation13 + $0x9e4] ss:$28 sps:$4 sm:$0xff]   ;;  %v28498_v30 = vld [vmem:[#allocation11] sm:$0xff] }
 0x992   :  { %20375 = vmatprep.subr.bf16.mxu0 %v27596_v62  ;;  %v27651_v62 = vld [vmem:[#allocation13 + $0x9d8] ss:$28 sps:$4 sm:$0xff]   ;;  %v11319_v27 = vrot.slane %v28498_v30, %v29066_v20 }
 0x993   :  { %28443 = vrcp.f32 %v15739_v16  ;;  %v27747_v30 = vld [vmem:[#allocation13 + $0xd58] ss:$28 sps:$4 sm:$0xff]  }
 0x994   :  { %20130 = vmatpush1.bf16.msra.mxu1 %v27591_v25  ;;  %v27654_v25 = vld [vmem:[#allocation13 + $0x9e0] ss:$28 sps:$4 sm:$0xff]  }
 0x995   :  { %20376 = vmatpush1.bf16.msra.mxu0 %v27594_v9  ;;  %20131 = vmatprep.subr.bf16.mxu1 %v27599_v13  ;;  %v27659_v9 = vld [vmem:[#allocation13 + $0xa14] ss:$28 sps:$4 sm:$0xff]   ;;  %v27662_v13 = vld [vmem:[#allocation13 + $0xa1c] ss:$28 sps:$4 sm:$0xff]  }
 0x996   :  { %20377 = vmatprep.subr.bf16.mxu0 %v27602_v26  ;;  %v27657_v26 = vld [vmem:[#allocation13 + $0xa10] ss:$28 sps:$4 sm:$0xff]  }
 0x998   :  { %20132 = vmatpush1.bf16.msra.mxu1 %v27597_v36  ;;  %v27660_v36 = vld [vmem:[#allocation13 + $0xa18] ss:$28 sps:$4 sm:$0xff]  }
 0x999   :  { %20378 = vmatpush1.bf16.msra.mxu0 %v27600_v10  ;;  %20133 = vmatprep.subr.bf16.mxu1 %v27605_v28  ;;  %v27665_v10 = vld [vmem:[#allocation13 + $0xa4c] ss:$28 sps:$4 sm:$0xff]   ;;  %v27668_v28 = vld [vmem:[#allocation13 + $0xa54] ss:$28 sps:$4 sm:$0xff]  }
 0x99a   :  { %20379 = vmatprep.subr.bf16.mxu0 %v27608_v39  ;;  %v27663_v39 = vld [vmem:[#allocation13 + $0xa48] ss:$28 sps:$4 sm:$0xff]  }
 0x99c   :  { %20134 = vmatpush1.bf16.msra.mxu1 %v27603_v42  ;;  %v27666_v42 = vld [vmem:[#allocation13 + $0xa50] ss:$28 sps:$4 sm:$0xff]  }
 0x99d   :  { %20380 = vmatpush1.bf16.msra.mxu0 %v27606_v55  ;;  %20135 = vmatprep.subr.bf16.mxu1 %v27611_v48  ;;  %v27671_v55 = vld [vmem:[#allocation13 + $0xa84] ss:$28 sps:$4 sm:$0xff]   ;;  %v28442_v48 = vpop.eup %28441 }
 0x99e   :  { %20381 = vmatprep.subr.bf16.mxu0 %v27614_v40  ;;  %v27674_v40 = vld [vmem:[#allocation13 + $0xa8c] ss:$28 sps:$4 sm:$0xff]   ;;  %v28444_v47 = vpop.eup %28443  ;;  %v29282_v50 = vpack.c.bf16 %v28442_v48, %v28442_v48 }
 0x9a0   :  { %20136 = vmatpush1.bf16.msra.mxu1 %v27609_v41  ;;  %v27669_v41 = vld [vmem:[#allocation13 + $0xa80] ss:$28 sps:$4 sm:$0xff]  }
 0x9a1   :  { %20382 = vmatpush1.bf16.msra.mxu0 %v27612_v59  ;;  %20137 = vmatprep.subr.bf16.mxu1 %v27617_v51  ;;  %v27672_v59 = vld [vmem:[#allocation13 + $0xa88] ss:$28 sps:$4 sm:$0xff]   ;;  %v27677_v51 = vld [vmem:[#allocation13 + $0xabc] ss:$28 sps:$4 sm:$0xff]  }
 0x9a2   :  { %20383 = vmatprep.subr.bf16.mxu0 %v27620_v31  ;;  %v29285_v31 = vpack.c.bf16 %v28444_v47, %v28444_v47  ;;  %v27719_v47 = vld [vmem:[#allocation13 + $0xc44] ss:$28 sps:$4 sm:$0xff]  }
 0x9a4   :  { %20138 = vmatpush1.bf16.msra.mxu1 %v27615_v32  ;;  %v27675_v32 = vld [vmem:[#allocation13 + $0xab8] ss:$28 sps:$4 sm:$0xff]  }
 0x9a5   :  { %20384 = vmatpush1.bf16.msra.mxu0 %v27618_v54  ;;  %20139 = vmatprep.subr.bf16.mxu1 %v27623_v23  ;;  %v27683_v54 = vld [vmem:[#allocation13 + $0xaf4] ss:$28 sps:$4 sm:$0xff]   ;;  %v27686_v23 = vld [vmem:[#allocation13 + $0xafc] ss:$28 sps:$4 sm:$0xff]  }
 0x9a6   :  { %20385 = vmatprep.subr.bf16.mxu0 %v27626_v7  ;;  %v27681_v7 = vld [vmem:[#allocation13 + $0xaf0] ss:$28 sps:$4 sm:$0xff]  }
 0x9a8   :  { %20140 = vmatpush1.bf16.msra.mxu1 %v27621_v38  ;;  %v27689_v38 = vld [vmem:[#allocation13 + $0xb2c] ss:$28 sps:$4 sm:$0xff]  }
 0x9a9   :  { %20386 = vmatpush1.bf16.msra.mxu0 %v27624_v46  ;;  %20141 = vmatprep.subr.bf16.mxu1 %v27629_v63  ;;  %v27687_v46 = vld [vmem:[#allocation13 + $0xb28] ss:$28 sps:$4 sm:$0xff]   ;;  %v27690_v63 = vld [vmem:[#allocation13 + $0xb30] ss:$28 sps:$4 sm:$0xff]  }
 0x9aa   :  { %20387 = vmatprep.subr.bf16.mxu0 %v27632_v43  ;;  %v27695_v43 = vld [vmem:[#allocation13 + $0xb64] ss:$28 sps:$4 sm:$0xff]  }
 0x9ac   :  { %20142 = vmatpush1.bf16.msra.mxu1 %v27627_v11  ;;  %v27698_v11 = vld [vmem:[#allocation13 + $0xb6c] ss:$28 sps:$4 sm:$0xff]  }
 0x9ad   :  { %20388 = vmatpush1.bf16.msra.mxu0 %v27630_v34  ;;  %20143 = vmatprep.subr.bf16.mxu1 %v27635_v0  ;;  %v27693_v34 = vld [vmem:[#allocation13 + $0xb60] ss:$28 sps:$4 sm:$0xff]   ;;  %v27696_v0 = vld [vmem:[#allocation13 + $0xb68] ss:$28 sps:$4 sm:$0xff]  }
 0x9ae   :  { %20389 = vmatprep.subr.bf16.mxu0 %v27638_v57  ;;  %v29290_v57 = vld [vmem:[#allocation11 + $0x8] sm:$0xf] }
 0x9b0   :  { %20144 = vmatpush1.bf16.msra.mxu1 %v27633_v44  ;;  %v27701_v44 = vld [vmem:[#allocation13 + $0xb9c] ss:$28 sps:$4 sm:$0xff]  }
 0x9b1   :  { %20390 = vmatpush1.bf16.msra.mxu0 %v27636_v2  ;;  %20145 = vmatprep.subr.bf16.mxu1 %v27641_v56  ;;  %v27704_v2 = vld [vmem:[#allocation13 + $0xba4] ss:$28 sps:$4 sm:$0xff]   ;;  %v11335_v56 = vrot.slane %v29290_v57, %v29023_v1 }
 0x9b2   :  { %20391 = vmatprep.subr.bf16.mxu0 %v27644_v61  ;;  %v27699_v61 = vld [vmem:[#allocation13 + $0xb98] ss:$28 sps:$4 sm:$0xff]  }
 0x9b4   :  { %20146 = vmatpush1.bf16.msra.mxu1 %v27639_v4  ;;  %v11339_v4 = vrot.slane %v29290_v57, %v29008_v37 }
 0x9b5   :  { %20392 = vmatpush1.bf16.msra.mxu0 %v27642_v6  ;;  %20147 = vmatprep.subr.bf16.mxu1 %v27647_v17  ;;  %v27707_v6 = vld [vmem:[#allocation13 + $0xbd4] ss:$28 sps:$4 sm:$0xff]  }
 0x9b6   :  { %20393 = vmatprep.subr.bf16.mxu0 %v27650_v18  ;;  %v27710_v18 = vld [vmem:[#allocation13 + $0xbdc] ss:$28 sps:$4 sm:$0xff]  }
 0x9b8   :  { %20148 = vmatpush1.bf16.msra.mxu1 %v27645_v24 }
 0x9b9   :  { %20394 = vmatpush1.bf16.msra.mxu0 %v27648_v49  ;;  %20149 = vmatprep.subr.bf16.mxu1 %v27653_v22 }
 0x9ba   :  { %20395 = vmatprep.subr.bf16.mxu0 %v27656_v21 }
 0x9bc   :  { %20150 = vmatpush1.bf16.msra.mxu1 %v27651_v62  ;;  %v27705_v62 = vld [vmem:[#allocation13 + $0xbd0] ss:$28 sps:$4 sm:$0xff]  }
 0x9bd   :  { %20396 = vmatpush1.bf16.msra.mxu0 %v27654_v25  ;;  %20151 = vmatprep.subr.bf16.mxu1 %v27659_v9  ;;  %v11331_v25 = vrot.slane %v29290_v57, %v28976_v14 }
 0x9be   :  { %20397 = vmatprep.subr.bf16.mxu0 %v27662_v13 }
 0x9c0   :  { %20152 = vmatpush1.bf16.msra.mxu1 %v27657_v26 }
 0x9c1   :  { %20398 = vmatpush1.bf16.msra.mxu0 %v27660_v36  ;;  %20153 = vmatprep.subr.bf16.mxu1 %v27665_v10  ;;  %v27708_v36 = vld [vmem:[#allocation13 + $0xbd8] ss:$28 sps:$4 sm:$0xff]   ;;  %v27713_v10 = vld [vmem:[#allocation13 + $0xc0c] ss:$28 sps:$4 sm:$0xff]  }
 0x9c2   :  { %20399 = vmatprep.subr.bf16.mxu0 %v27668_v28 }
 0x9c4   :  { %20154 = vmatpush1.bf16.msra.mxu1 %v27663_v39  ;;  %v27716_v39 = vld [vmem:[#allocation13 + $0xc14] ss:$28 sps:$4 sm:$0xff]  }
 0x9c5   :  { %20400 = vmatpush1.bf16.msra.mxu0 %v27666_v42  ;;  %20164 = vmatprep.subr.bf16.mxu1 %v27671_v55  ;;  %v24108_v42 = vadd.f32 %v29235_v35, %v11319_v27  ;;  %v27711_v55 = vld [vmem:[#allocation13 + $0xc08] ss:$28 sps:$4 sm:$0xff]   ;;  %v27723_v35 = vld [vmem:[#allocation13 + $0xc78] ss:$28 sps:$4 sm:$0xff]   ;;  %v27750_v27 = vld [vmem:[#allocation13 + $0xd60] ss:$28 sps:$4 sm:$0xff]  }
 0x9c6   :  { %20410 = vmatprep.subr.bf16.mxu0 %v27674_v40  ;;  %v27714_v40 = vld [vmem:[#allocation13 + $0xc10] ss:$28 sps:$4 sm:$0xff]  }
 0x9c7   :  { %20156 = vmatmul.mubr.bf16.vlgmr.msra.gmra.mrb[52].mxu1 %v29282_v50 }
 0x9c8   :  { %20402 = vmatmul.mubr.bf16.vlgmr.msra.gmra.mrb[32].mxu0 %v29282_v50  ;;  %20165 = vmatpush1.bf16.msra.mxu1 %v27669_v41  ;;  %v27722_v41 = vld [vmem:[#allocation13 + $0xc4c] ss:$28 sps:$4 sm:$0xff]  }
 0x9c9   :  { %20196 = vmatprep.mubr.bf16.mxu1 %v29285_v31  ;;  %20411 = vmatpush1.bf16.msra.mxu0 %v27672_v59  ;;  %v23135_v59 = vmul.f32 -1.442695, %v24108_v42  ;;  %v27765_v42 = vld [vmem:[#allocation13 + $0xe00] ss:$28 sps:$4 sm:$0xff]  }
 0x9ca   :  { %20442 = vmatprep.mubr.bf16.mxu0 %v29285_v31  ;;  %20166 = vmatprep.subr.bf16.mxu1 %v27677_v51  ;;  %v27717_v51 = vld [vmem:[#allocation13 + $0xc40] ss:$28 sps:$4 sm:$0xff]  }
 0x9cb   :  { %20412 = vmatprep.subr.bf16.mxu0 %v27680_v53  ;;  %28445 = vpow2.f32 %v23135_v59  ;;  %v27771_v59 = vld [vmem:[#allocation13 + $0xe38] ss:$28 sps:$4 sm:$0xff]  }
 0x9cc   :  { %20167 = vmatpush1.bf16.msra.mxu1 %v27675_v32  ;;  %v27720_v32 = vld [vmem:[#allocation13 + $0xc48] ss:$28 sps:$4 sm:$0xff]  }
 0x9cd   :  { %20413 = vmatpush1.bf16.msra.mxu0 %v27678_v45  ;;  %20168 = vmatprep.subr.bf16.mxu1 %v27683_v54  ;;  %v27725_v45 = vld [vmem:[#allocation13 + $0xc7c] ss:$28 sps:$4 sm:$0xff]   ;;  %v27728_v54 = vld [vmem:[#allocation13 + $0xc84] ss:$28 sps:$4 sm:$0xff]  }
 0x9ce   :  { %20414 = vmatprep.subr.bf16.mxu0 %v27686_v23  ;;  %v27726_v23 = vld [vmem:[#allocation13 + $0xc80] ss:$28 sps:$4 sm:$0xff]  }
 0x9d0   :  { %20169 = vmatpush1.bf16.msra.mxu1 %v27681_v7  ;;  %v27731_v7 = vld [vmem:[#allocation13 + $0xcb4] ss:$28 sps:$4 sm:$0xff]  }
 0x9d1   :  { %20415 = vmatpush1.bf16.msra.mxu0 %v27684_v58  ;;  %20170 = vmatprep.subr.bf16.mxu1 %v27689_v38  ;;  %v27734_v58 = vld [vmem:[#allocation13 + $0xcbc] ss:$28 sps:$4 sm:$0xff]   ;;  %v27729_v38 = vld [vmem:[#allocation13 + $0xcb0] ss:$28 sps:$4 sm:$0xff]  }
 0x9d2   :  { %20416 = vmatprep.subr.bf16.mxu0 %v27692_v52  ;;  %v27732_v52 = vld [vmem:[#allocation13 + $0xcb8] ss:$28 sps:$4 sm:$0xff]  }
 0x9d4   :  { %20171 = vmatpush1.bf16.msra.mxu1 %v27687_v46  ;;  %v27737_v46 = vld [vmem:[#allocation13 + $0xcec] ss:$28 sps:$4 sm:$0xff]  }
 0x9d5   :  { %20417 = vmatpush1.bf16.msra.mxu0 %v27690_v63  ;;  %20172 = vmatprep.subr.bf16.mxu1 %v27695_v43  ;;  %v27740_v63 = vld [vmem:[#allocation13 + $0xcf4] ss:$28 sps:$4 sm:$0xff]   ;;  %v27735_v43 = vld [vmem:[#allocation13 + $0xce8] ss:$28 sps:$4 sm:$0xff]  }
 0x9d6   :  { %20418 = vmatprep.subr.bf16.mxu0 %v27698_v11  ;;  %v28446_v11 = vpop.eup %28445 }
 0x9d8   :  { %20173 = vmatpush1.bf16.msra.mxu1 %v27693_v34  ;;  %v27738_v34 = vld [vmem:[#allocation13 + $0xcf0] ss:$28 sps:$4 sm:$0xff]  }
 0x9d9   :  { %20419 = vmatpush1.bf16.msra.mxu0 %v27696_v0  ;;  %20174 = vmatprep.subr.bf16.mxu1 %v27701_v44  ;;  %v27743_v0 = vld [vmem:[#allocation13 + $0xd24] ss:$28 sps:$4 sm:$0xff]   ;;  %v27746_v44 = vld [vmem:[#allocation13 + $0xd2c] ss:$28 sps:$4 sm:$0xff]  }
 0x9da   :  { %v29296_v17 = vpop.f32.mrb[48].mxu1  ;;  %20420 = vmatprep.subr.bf16.mxu0 %v27704_v2 }
 0x9db   :  { %v15689_v24 = vpop.f32.mrb[28].mxu0  ;;  %v15527_v49 = vpop.f32.mrb[49].mxu1 }
 0x9dc   :  { %v29299_v22 = vadd.f32 %v15689_v24, %v11335_v56  ;;  %v15691_v16 = vpop.f32.mrb[29].mxu0  ;;  %v15529_v21 = vpop.f32.mrb[50].mxu1  ;;  %20175 = vmatpush1.bf16.msra.mxu1 %v27699_v61  ;;  %v24111_v48 = vadd.f32 %v15527_v49, %v11331_v25  ;;  %v15738_v56 = vadd.f32 1.0, %v28446_v11  ;;  %v27741_v61 = vld [vmem:[#allocation13 + $0xd20] ss:$28 sps:$4 sm:$0xff]  }
 0x9dd   :  { %v29303_v9 = vadd.f32 %v15691_v16, %v11339_v4  ;;  %v15693_v13 = vpop.f32.mrb[30].mxu0  ;;  %20421 = vmatpush1.bf16.msra.mxu0 %v27702_v5  ;;  %v15530_v26 = vpop.f32.mrb[51].mxu1  ;;  %20176 = vmatprep.subr.bf16.mxu1 %v27707_v6  ;;  %v27744_v4 = vld [vmem:[#allocation13 + $0xd28] ss:$28 sps:$4 sm:$0xff]   ;;  %v27749_v5 = vld [vmem:[#allocation13 + $0xd5c] ss:$28 sps:$4 sm:$0xff]  }
 0x9de   :  { %v15694_v28 = vpop.f32.mrb[31].mxu0  ;;  %20422 = vmatprep.subr.bf16.mxu0 %v27710_v18  ;;  %v23138_v53 = vmul.f32 -1.442695, %v24111_v48  ;;  %v27752_v18 = vld [vmem:[#allocation13 + $0xd64] ss:$28 sps:$4 sm:$0xff]  }
 0x9df   :  { %v27755_v24 = vld [vmem:[#allocation13 + $0xd94] ss:$28 sps:$4 sm:$0xff]   ;;  %v27758_v49 = vld [vmem:[#allocation13 + $0xd9c] ss:$28 sps:$4 sm:$0xff]   ;;  %v27759_v13 = vld [vmem:[#allocation13 + $0xdc8] ss:$28 sps:$4 sm:$0xff]  }
 0x9e0   :  { %20177 = vmatpush1.bf16.msra.mxu1 %v27705_v62  ;;  %28447 = vpow2.f32 %v23138_v53  ;;  %v27753_v16 = vld [vmem:[#allocation13 + $0xd90] ss:$28 sps:$4 sm:$0xff]   ;;  %v27756_v21 = vld [vmem:[#allocation13 + $0xd98] ss:$28 sps:$4 sm:$0xff]   ;;  %v27768_v48 = vld [vmem:[#allocation13 + $0xe08] ss:$28 sps:$4 sm:$0xff]  }
 0x9e1   :  { %20423 = vmatpush1.bf16.msra.mxu0 %v27708_v36  ;;  %20178 = vmatprep.subr.bf16.mxu1 %v27713_v10  ;;  %28449 = vrcp.f32 %v15738_v56  ;;  %v27761_v62 = vld [vmem:[#allocation13 + $0xdcc] ss:$28 sps:$4 sm:$0xff]   ;;  %v27764_v25 = vld [vmem:[#allocation13 + $0xdd4] ss:$28 sps:$4 sm:$0xff]   ;;  %v27767_v36 = vld [vmem:[#allocation13 + $0xe04] ss:$28 sps:$4 sm:$0xff]   ;;  %v11327_v56 = vrot.slane %v29290_v57, %v29003_v15 }
 0x9e2   :  { %20424 = vmatprep.subr.bf16.mxu0 %v27716_v39  ;;  %v27762_v26 = vld [vmem:[#allocation13 + $0xdd0] ss:$28 sps:$4 sm:$0xff]   ;;  %v27800_v11 = vld [vmem:[#allocation13 + $0xf24] ss:$28 sps:$4 sm:$0xff]  }
 0x9e3   :  { %v27770_v28 = vld [vmem:[#allocation13 + $0xe0c] ss:$28 sps:$4 sm:$0xff]   ;;  %v27779_v53 = vld [vmem:[#allocation13 + $0xe74] ss:$28 sps:$4 sm:$0xff]   ;;  %v27813_v57 = vld [vmem:[#allocation13 + $0xfc0] ss:$28 sps:$4 sm:$0xff]  }
 0x9e4   :  { %20179 = vmatpush1.bf16.msra.mxu1 %v27711_v55 }
 0x9e5   :  { %20425 = vmatpush1.bf16.msra.mxu0 %v27714_v40  ;;  %20180 = vmatprep.subr.bf16.mxu1 %v27719_v47  ;;  %v27773_v40 = vld [vmem:[#allocation13 + $0xe3c] ss:$28 sps:$4 sm:$0xff]  }
 0x9e6   :  { %20426 = vmatprep.subr.bf16.mxu0 %v27722_v41  ;;  %v27776_v41 = vld [vmem:[#allocation13 + $0xe44] ss:$28 sps:$4 sm:$0xff]  }
 0x9e8   :  { %20181 = vmatpush1.bf16.msra.mxu1 %v27717_v51  ;;  %v27774_v51 = vld [vmem:[#allocation13 + $0xe40] ss:$28 sps:$4 sm:$0xff]  }
 0x9e9   :  { %20427 = vmatpush1.bf16.msra.mxu0 %v27720_v32  ;;  %20182 = vmatprep.subr.bf16.mxu1 %v27725_v45  ;;  %v27782_v32 = vld [vmem:[#allocation13 + $0xe7c] ss:$28 sps:$4 sm:$0xff]   ;;  %v27777_v45 = vld [vmem:[#allocation13 + $0xe70] ss:$28 sps:$4 sm:$0xff]  }
 0x9ea   :  { %20428 = vmatprep.subr.bf16.mxu0 %v27728_v54  ;;  %v28448_v2 = vpop.eup %28447  ;;  %v27780_v54 = vld [vmem:[#allocation13 + $0xe78] ss:$28 sps:$4 sm:$0xff]  }
 0x9eb   :  { %v15741_v6 = vadd.f32 1.0, %v28448_v2  ;;  %v28450_v10 = vpop.eup %28449  ;;  %v27806_v2 = vld [vmem:[#allocation13 + $0xf5c] ss:$28 sps:$4 sm:$0xff]  }
 0x9ec   :  { %20183 = vmatpush1.bf16.msra.mxu1 %v27723_v35  ;;  %v29306_v55 = vpack.c.bf16 %v28450_v10, %v28450_v10  ;;  %v27785_v35 = vld [vmem:[#allocation13 + $0xeac] ss:$28 sps:$4 sm:$0xff]   ;;  %v27830_v10 = vld [vmem:[#allocation13 + $0x103c] ss:$28 sps:$4 sm:$0xff]  }
 0x9ed   :  { %20429 = vmatpush1.bf16.msra.mxu0 %v27726_v23  ;;  %20184 = vmatprep.subr.bf16.mxu1 %v27731_v7  ;;  %28451 = vrcp.f32 %v15741_v6  ;;  %v27788_v23 = vld [vmem:[#allocation13 + $0xeb4] ss:$28 sps:$4 sm:$0xff]   ;;  %v27783_v7 = vld [vmem:[#allocation13 + $0xea8] ss:$28 sps:$4 sm:$0xff]  }
 0x9ee   :  { %20430 = vmatprep.subr.bf16.mxu0 %v27734_v58  ;;  %v27786_v58 = vld [vmem:[#allocation13 + $0xeb0] ss:$28 sps:$4 sm:$0xff]  }
 0x9ef   :  { %v27812_v6 = vld [vmem:[#allocation13 + $0xf94] ss:$28 sps:$4 sm:$0xff]  }
 0x9f0   :  { %20185 = vmatpush1.bf16.msra.mxu1 %v27729_v38  ;;  %v27791_v38 = vld [vmem:[#allocation13 + $0xee4] ss:$28 sps:$4 sm:$0xff]  }
 0x9f1   :  { %20431 = vmatpush1.bf16.msra.mxu0 %v27732_v52  ;;  %20186 = vmatprep.subr.bf16.mxu1 %v27737_v46  ;;  %v27794_v52 = vld [vmem:[#allocation13 + $0xeec] ss:$28 sps:$4 sm:$0xff]   ;;  %v27789_v46 = vld [vmem:[#allocation13 + $0xee0] ss:$28 sps:$4 sm:$0xff]  }
 0x9f2   :  { %20432 = vmatprep.subr.bf16.mxu0 %v27740_v63  ;;  %v27792_v63 = vld [vmem:[#allocation13 + $0xee8] ss:$28 sps:$4 sm:$0xff]  }
 0x9f4   :  { %20187 = vmatpush1.bf16.msra.mxu1 %v27735_v43  ;;  %v27797_v43 = vld [vmem:[#allocation13 + $0xf1c] ss:$28 sps:$4 sm:$0xff]  }
 0x9f5   :  { %20433 = vmatpush1.bf16.msra.mxu0 %v27738_v34  ;;  %20188 = vmatprep.subr.bf16.mxu1 %v27743_v0  ;;  %v27795_v34 = vld [vmem:[#allocation13 + $0xf18] ss:$28 sps:$4 sm:$0xff]   ;;  %v27798_v0 = vld [vmem:[#allocation13 + $0xf20] ss:$28 sps:$4 sm:$0xff]  }
 0x9f6   :  { %20434 = vmatprep.subr.bf16.mxu0 %v27746_v44  ;;  %v27803_v44 = vld [vmem:[#allocation13 + $0xf54] ss:$28 sps:$4 sm:$0xff]  }
 0x9f7   :  { %v28452_v39 = vpop.eup %28451 }
 0x9f8   :  { %20189 = vmatpush1.bf16.msra.mxu1 %v27741_v61  ;;  %v29309_v47 = vpack.c.bf16 %v28452_v39, %v28452_v39  ;;  %v27801_v61 = vld [vmem:[#allocation13 + $0xf50] ss:$28 sps:$4 sm:$0xff]  }
 0x9f9   :  { %20435 = vmatpush1.bf16.msra.mxu0 %v27744_v4  ;;  %20190 = vmatprep.subr.bf16.mxu1 %v27749_v5  ;;  %v27804_v4 = vld [vmem:[#allocation13 + $0xf58] ss:$28 sps:$4 sm:$0xff]   ;;  %v27809_v5 = vld [vmem:[#allocation13 + $0xf8c] ss:$28 sps:$4 sm:$0xff]  }
 0x9fa   :  { %20436 = vmatprep.subr.bf16.mxu0 %v27752_v18  ;;  %v24110_v18 = vadd.f32 %v29296_v17, %v11327_v56  ;;  %v27819_v17 = vld [vmem:[#allocation13 + $0xff8] ss:$28 sps:$4 sm:$0xff]   ;;  %v27833_v39 = vld [vmem:[#allocation13 + $0x106c] ss:$28 sps:$4 sm:$0xff]  }
 0x9fc   :  { %20191 = vmatpush1.bf16.msra.mxu1 %v27747_v30  ;;  %v27807_v30 = vld [vmem:[#allocation13 + $0xf88] ss:$28 sps:$4 sm:$0xff]  }
 0x9fd   :  { %20437 = vmatpush1.bf16.msra.mxu0 %v27750_v27  ;;  %20192 = vmatprep.subr.bf16.mxu1 %v27755_v24  ;;  %v27810_v27 = vld [vmem:[#allocation13 + $0xf90] ss:$28 sps:$4 sm:$0xff]   ;;  %v27815_v24 = vld [vmem:[#allocation13 + $0xfc4] ss:$28 sps:$4 sm:$0xff]  }
 0x9fe   :  { %20438 = vmatprep.subr.bf16.mxu0 %v27758_v49  ;;  %v27818_v49 = vld [vmem:[#allocation13 + $0xfcc] ss:$28 sps:$4 sm:$0xff]  }
 0xa00   :  { %20193 = vmatpush1.bf16.msra.mxu1 %v27753_v16  ;;  %v23137_v16 = vmul.f32 -1.442695, %v24110_v18  ;;  %v27864_v18 = vld [vmem:[#allocation13 + $0x1188] ss:$28 sps:$4 sm:$0xff]  }
 0xa01   :  { %20439 = vmatpush1.bf16.msra.mxu0 %v27756_v21  ;;  %20194 = vmatprep.subr.bf16.mxu1 %v27761_v62  ;;  %v23140_v21 = vmul.f32 -1.442695, %v29303_v9  ;;  %v27816_v62 = vld [vmem:[#allocation13 + $0xfc8] ss:$28 sps:$4 sm:$0xff]   ;;  %v27828_v9 = vld [vmem:[#allocation13 + $0x1038] ss:$28 sps:$4 sm:$0xff]  }
 0xa02   :  { %20440 = vmatprep.subr.bf16.mxu0 %v27764_v25  ;;  %v27821_v25 = vld [vmem:[#allocation13 + $0xffc] ss:$28 sps:$4 sm:$0xff]   ;;  %28453 = vpow2.f32 %v23137_v16 }
 0xa03   :  { %28455 = vpow2.f32 %v23140_v21  ;;  %v27870_v16 = vld [vmem:[#allocation13 + $0x11c0] ss:$28 sps:$4 sm:$0xff]  }
 0xa04   :  { %20195 = vmatpush1.bf16.msra.mxu1 %v27759_v13  ;;  %v27824_v13 = vld [vmem:[#allocation13 + $0x1004] ss:$28 sps:$4 sm:$0xff]   ;;  %v27878_v21 = vld [vmem:[#allocation13 + $0x11fc] ss:$28 sps:$4 sm:$0xff]  }
 0xa05   :  { %20441 = vmatpush1.bf16.msra.mxu0 %v27762_v26  ;;  %20205 = vmatprep.subr.bf16.mxu1 %v27767_v36  ;;  %v27822_v26 = vld [vmem:[#allocation13 + $0x1000] ss:$28 sps:$4 sm:$0xff]   ;;  %v27827_v36 = vld [vmem:[#allocation13 + $0x1034] ss:$28 sps:$4 sm:$0xff]  }
 0xa06   :  { %20451 = vmatprep.subr.bf16.mxu0 %v27770_v28  ;;  %v27825_v28 = vld [vmem:[#allocation13 + $0x1030] ss:$28 sps:$4 sm:$0xff]  }
 0xa07   :  { %20197 = vmatmul.mubr.bf16.vlgmr.msra.gmra.mrb[52].mxu1 %v29306_v55 }
 0xa08   :  { %20443 = vmatmul.mubr.bf16.vlgmr.msra.gmra.mrb[32].mxu0 %v29306_v55  ;;  %20206 = vmatpush1.bf16.msra.mxu1 %v27765_v42  ;;  %v27836_v42 = vld [vmem:[#allocation13 + $0x1074] ss:$28 sps:$4 sm:$0xff]  }
 0xa09   :  { %20237 = vmatprep.mubr.bf16.mxu1 %v29309_v47  ;;  %20452 = vmatpush1.bf16.msra.mxu0 %v27768_v48  ;;  %v27831_v48 = vld [vmem:[#allocation13 + $0x1068] ss:$28 sps:$4 sm:$0xff]  }
 0xa0a   :  { %20483 = vmatprep.mubr.bf16.mxu0 %v29309_v47  ;;  %20207 = vmatprep.subr.bf16.mxu1 %v27773_v40 }
 0xa0b   :  { %20453 = vmatprep.subr.bf16.mxu0 %v27776_v41  ;;  %v27834_v41 = vld [vmem:[#allocation13 + $0x1070] ss:$28 sps:$4 sm:$0xff]  }
 0xa0c   :  { %20208 = vmatpush1.bf16.msra.mxu1 %v27771_v59  ;;  %v28454_v40 = vpop.eup %28453  ;;  %v27839_v59 = vld [vmem:[#allocation13 + $0x10a4] ss:$28 sps:$4 sm:$0xff]  }
 0xa0d   :  { %20454 = vmatpush1.bf16.msra.mxu0 %v27774_v51  ;;  %20209 = vmatprep.subr.bf16.mxu1 %v27779_v53  ;;  %v27842_v51 = vld [vmem:[#allocation13 + $0x10ac] ss:$28 sps:$4 sm:$0xff]   ;;  %v28456_v53 = vpop.eup %28455 }
 0xa0e   :  { %20455 = vmatprep.subr.bf16.mxu0 %v27782_v32  ;;  %v15740_v32 = vadd.f32 1.0, %v28454_v40  ;;  %v27891_v40 = vld [vmem:[#allocation13 + $0x1298] ss:$28 sps:$4 sm:$0xff]  }
 0xa10   :  { %20210 = vmatpush1.bf16.msra.mxu1 %v27777_v45  ;;  %v27837_v45 = vld [vmem:[#allocation13 + $0x10a0] ss:$28 sps:$4 sm:$0xff]   ;;  %28457 = vrcp.f32 %v15740_v32  ;;  %v27900_v32 = vld [vmem:[#allocation13 + $0x12d8] ss:$28 sps:$4 sm:$0xff]  }
 0xa11   :  { %20456 = vmatpush1.bf16.msra.mxu0 %v27780_v54  ;;  %20211 = vmatprep.subr.bf16.mxu1 %v27785_v35  ;;  %v27840_v54 = vld [vmem:[#allocation13 + $0x10a8] ss:$28 sps:$4 sm:$0xff]   ;;  %v27845_v35 = vld [vmem:[#allocation13 + $0x10dc] ss:$28 sps:$4 sm:$0xff]  }
 0xa12   :  { %20457 = vmatprep.subr.bf16.mxu0 %v27788_v23  ;;  %v15743_v23 = vadd.f32 1.0, %v28456_v53  ;;  %v27897_v53 = vld [vmem:[#allocation13 + $0x12d0] ss:$28 sps:$4 sm:$0xff]  }
 0xa14   :  { %20212 = vmatpush1.bf16.msra.mxu1 %v27783_v7  ;;  %v27848_v7 = vld [vmem:[#allocation13 + $0x10e4] ss:$28 sps:$4 sm:$0xff]   ;;  %28459 = vrcp.f32 %v15743_v23  ;;  %v27906_v23 = vld [vmem:[#allocation13 + $0x1310] ss:$28 sps:$4 sm:$0xff]  }
 0xa15   :  { %20458 = vmatpush1.bf16.msra.mxu0 %v27786_v58  ;;  %20213 = vmatprep.subr.bf16.mxu1 %v27791_v38  ;;  %v27843_v58 = vld [vmem:[#allocation13 + $0x10d8] ss:$28 sps:$4 sm:$0xff]   ;;  %v27846_v38 = vld [vmem:[#allocation13 + $0x10e0] ss:$28 sps:$4 sm:$0xff]  }
 0xa16   :  { %20459 = vmatprep.subr.bf16.mxu0 %v27794_v52  ;;  %v27851_v52 = vld [vmem:[#allocation13 + $0x1114] ss:$28 sps:$4 sm:$0xff]  }
 0xa18   :  { %20214 = vmatpush1.bf16.msra.mxu1 %v27789_v46  ;;  %v27854_v46 = vld [vmem:[#allocation13 + $0x111c] ss:$28 sps:$4 sm:$0xff]  }
 0xa19   :  { %20460 = vmatpush1.bf16.msra.mxu0 %v27792_v63  ;;  %20215 = vmatprep.subr.bf16.mxu1 %v27797_v43  ;;  %v27849_v63 = vld [vmem:[#allocation13 + $0x1110] ss:$28 sps:$4 sm:$0xff]   ;;  %v27852_v43 = vld [vmem:[#allocation13 + $0x1118] ss:$28 sps:$4 sm:$0xff]  }
 0xa1a   :  { %20461 = vmatprep.subr.bf16.mxu0 %v27800_v11  ;;  %v27857_v11 = vld [vmem:[#allocation13 + $0x114c] ss:$28 sps:$4 sm:$0xff]   ;;  %v28458_v56 = vpop.eup %28457 }
 0xa1c   :  { %20216 = vmatpush1.bf16.msra.mxu1 %v27795_v34  ;;  %v27860_v34 = vld [vmem:[#allocation13 + $0x1154] ss:$28 sps:$4 sm:$0xff]  }
 0xa1d   :  { %20462 = vmatpush1.bf16.msra.mxu0 %v27798_v0  ;;  %20217 = vmatprep.subr.bf16.mxu1 %v27803_v44  ;;  %v27855_v0 = vld [vmem:[#allocation13 + $0x1148] ss:$28 sps:$4 sm:$0xff]   ;;  %v27858_v44 = vld [vmem:[#allocation13 + $0x1150] ss:$28 sps:$4 sm:$0xff]  }
 0xa1e   :  { %20463 = vmatprep.subr.bf16.mxu0 %v27806_v2  ;;  %v27863_v2 = vld [vmem:[#allocation13 + $0x1184] ss:$28 sps:$4 sm:$0xff]  }
 0xa20   :  { %20218 = vmatpush1.bf16.msra.mxu1 %v27801_v61  ;;  %v27866_v61 = vld [vmem:[#allocation13 + $0x118c] ss:$28 sps:$4 sm:$0xff]  }
 0xa21   :  { %20464 = vmatpush1.bf16.msra.mxu0 %v27804_v4  ;;  %20219 = vmatprep.subr.bf16.mxu1 %v27809_v5  ;;  %v28460_v4 = vpop.eup %28459  ;;  %v27861_v5 = vld [vmem:[#allocation13 + $0x1180] ss:$28 sps:$4 sm:$0xff]  }
 0xa22   :  { %20465 = vmatprep.subr.bf16.mxu0 %v27812_v6  ;;  %v29318_v6 = vpack.c.bf16 %v28458_v56, %v28458_v56  ;;  %v27929_v56 = vld [vmem:[#allocation13 + $0x13ec] ss:$28 sps:$4 sm:$0xff]  }
 0xa24   :  { %20220 = vmatpush1.bf16.msra.mxu1 %v27807_v30  ;;  %v27869_v30 = vld [vmem:[#allocation13 + $0x11bc] ss:$28 sps:$4 sm:$0xff]  }
 0xa25   :  { %20466 = vmatpush1.bf16.msra.mxu0 %v27810_v27  ;;  %20221 = vmatprep.subr.bf16.mxu1 %v27815_v24  ;;  %v29321_v27 = vpack.c.bf16 %v28460_v4, %v28460_v4  ;;  %v27872_v24 = vld [vmem:[#allocation13 + $0x11c4] ss:$28 sps:$4 sm:$0xff]  }
 0xa26   :  { %20467 = vmatprep.subr.bf16.mxu0 %v27818_v49  ;;  %v27867_v49 = vld [vmem:[#allocation13 + $0x11b8] ss:$28 sps:$4 sm:$0xff]   ;;  %v27927_v4 = vld [vmem:[#allocation13 + $0x13e8] ss:$28 sps:$4 sm:$0xff]  }
 0xa28   :  { %20222 = vmatpush1.bf16.msra.mxu1 %v27813_v57  ;;  %v27875_v57 = vld [vmem:[#allocation13 + $0x11f4] ss:$28 sps:$4 sm:$0xff]  }
 0xa29   :  { %20468 = vmatpush1.bf16.msra.mxu0 %v27816_v62  ;;  %20223 = vmatprep.subr.bf16.mxu1 %v27821_v25  ;;  %v27873_v62 = vld [vmem:[#allocation13 + $0x11f0] ss:$28 sps:$4 sm:$0xff]   ;;  %v27876_v25 = vld [vmem:[#allocation13 + $0x11f8] ss:$28 sps:$4 sm:$0xff]  }
 0xa2a   :  { %20469 = vmatprep.subr.bf16.mxu0 %v27824_v13  ;;  %v27881_v13 = vld [vmem:[#allocation13 + $0x122c] ss:$28 sps:$4 sm:$0xff]  }
 0xa2c   :  { %20224 = vmatpush1.bf16.msra.mxu1 %v27819_v17  ;;  %v27884_v17 = vld [vmem:[#allocation13 + $0x1234] ss:$28 sps:$4 sm:$0xff]  }
 0xa2d   :  { %20470 = vmatpush1.bf16.msra.mxu0 %v27822_v26  ;;  %20225 = vmatprep.subr.bf16.mxu1 %v27827_v36  ;;  %v27879_v26 = vld [vmem:[#allocation13 + $0x1228] ss:$28 sps:$4 sm:$0xff]   ;;  %v27882_v36 = vld [vmem:[#allocation13 + $0x1230] ss:$28 sps:$4 sm:$0xff]  }
 0xa2e   :  { %20471 = vmatprep.subr.bf16.mxu0 %v27830_v10  ;;  %v27887_v10 = vld [vmem:[#allocation13 + $0x1264] ss:$28 sps:$4 sm:$0xff]  }
 0xa30   :  { %20226 = vmatpush1.bf16.msra.mxu1 %v27825_v28  ;;  %v27890_v28 = vld [vmem:[#allocation13 + $0x126c] ss:$28 sps:$4 sm:$0xff]  }
 0xa31   :  { %20472 = vmatpush1.bf16.msra.mxu0 %v27828_v9  ;;  %20227 = vmatprep.subr.bf16.mxu1 %v27833_v39  ;;  %v27885_v9 = vld [vmem:[#allocation13 + $0x1260] ss:$28 sps:$4 sm:$0xff]   ;;  %v27888_v39 = vld [vmem:[#allocation13 + $0x1268] ss:$28 sps:$4 sm:$0xff]  }
 0xa32   :  { %20473 = vmatprep.subr.bf16.mxu0 %v27836_v42  ;;  %v27893_v42 = vld [vmem:[#allocation13 + $0x129c] ss:$28 sps:$4 sm:$0xff]  }
 0xa34   :  { %20228 = vmatpush1.bf16.msra.mxu1 %v27831_v48  ;;  %v27896_v48 = vld [vmem:[#allocation13 + $0x12a4] ss:$28 sps:$4 sm:$0xff]  }
 0xa35   :  { %20474 = vmatpush1.bf16.msra.mxu0 %v27834_v41  ;;  %20229 = vmatprep.subr.bf16.mxu1 %v27839_v59  ;;  %v27894_v41 = vld [vmem:[#allocation13 + $0x12a0] ss:$28 sps:$4 sm:$0xff]   ;;  %v27899_v59 = vld [vmem:[#allocation13 + $0x12d4] ss:$28 sps:$4 sm:$0xff]  }
 0xa36   :  { %20475 = vmatprep.subr.bf16.mxu0 %v27842_v51  ;;  %v27902_v51 = vld [vmem:[#allocation13 + $0x12dc] ss:$28 sps:$4 sm:$0xff]  }
 0xa38   :  { %20230 = vmatpush1.bf16.msra.mxu1 %v27837_v45  ;;  %v27905_v45 = vld [vmem:[#allocation13 + $0x130c] ss:$28 sps:$4 sm:$0xff]  }
 0xa39   :  { %20476 = vmatpush1.bf16.msra.mxu0 %v27840_v54  ;;  %20231 = vmatprep.subr.bf16.mxu1 %v27845_v35  ;;  %v27908_v54 = vld [vmem:[#allocation13 + $0x1314] ss:$28 sps:$4 sm:$0xff]   ;;  %v27903_v35 = vld [vmem:[#allocation13 + $0x1308] ss:$28 sps:$4 sm:$0xff]  }
 0xa3a   :  { %20477 = vmatprep.subr.bf16.mxu0 %v27848_v7  ;;  %v27911_v7 = vld [vmem:[#allocation13 + $0x1344] ss:$28 sps:$4 sm:$0xff]  }
 0xa3c   :  { %20232 = vmatpush1.bf16.msra.mxu1 %v27843_v58  ;;  %v27914_v58 = vld [vmem:[#allocation13 + $0x134c] ss:$28 sps:$4 sm:$0xff]  }
 0xa3d   :  { %20478 = vmatpush1.bf16.msra.mxu0 %v27846_v38  ;;  %20233 = vmatprep.subr.bf16.mxu1 %v27851_v52  ;;  %v23139_v38 = vmul.f32 -1.442695, %v29299_v22  ;;  %v27909_v52 = vld [vmem:[#allocation13 + $0x1340] ss:$28 sps:$4 sm:$0xff]   ;;  %v27924_v22 = vld [vmem:[#allocation13 + $0x13b8] ss:$28 sps:$4 sm:$0xff]  }
 0xa3e   :  { %20479 = vmatprep.subr.bf16.mxu0 %v27854_v46  ;;  %v27912_v46 = vld [vmem:[#allocation13 + $0x1348] ss:$28 sps:$4 sm:$0xff]  }
 0xa3f   :  { %28461 = vpow2.f32 %v23139_v38  ;;  %v27971_v38 = vld [vmem:[#allocation13 + $0x88] ss:$28 sps:$4 sm:$0xff]  }
 0xa40   :  { %20234 = vmatpush1.bf16.msra.mxu1 %v27849_v63  ;;  %v27917_v63 = vld [vmem:[#allocation13 + $0x137c] ss:$28 sps:$4 sm:$0xff]  }
 0xa41   :  { %20480 = vmatpush1.bf16.msra.mxu0 %v27852_v43  ;;  %20235 = vmatprep.subr.bf16.mxu1 %v27857_v11  ;;  %v27920_v43 = vld [vmem:[#allocation13 + $0x1384] ss:$28 sps:$4 sm:$0xff]   ;;  %v27915_v11 = vld [vmem:[#allocation13 + $0x1378] ss:$28 sps:$4 sm:$0xff]  }
 0xa42   :  { %20481 = vmatprep.subr.bf16.mxu0 %v27860_v34  ;;  %v27918_v34 = vld [vmem:[#allocation13 + $0x1380] ss:$28 sps:$4 sm:$0xff]  }
 0xa44   :  { %20236 = vmatpush1.bf16.msra.mxu1 %v27855_v0  ;;  %v27923_v0 = vld [vmem:[#allocation13 + $0x13b4] ss:$28 sps:$4 sm:$0xff]  }
 0xa45   :  { %20482 = vmatpush1.bf16.msra.mxu0 %v27858_v44  ;;  %20246 = vmatprep.subr.bf16.mxu1 %v27863_v2  ;;  %v27926_v44 = vld [vmem:[#allocation13 + $0x13bc] ss:$28 sps:$4 sm:$0xff]   ;;  %v27921_v2 = vld [vmem:[#allocation13 + $0x13b0] ss:$28 sps:$4 sm:$0xff]  }
 0xa46   :  { %20492 = vmatprep.subr.bf16.mxu0 %v27866_v61  ;;  %v27932_v61 = vld [vmem:[#allocation13 + $0x13f4] ss:$28 sps:$4 sm:$0xff]  }
 0xa47   :  { %20238 = vmatmul.mubr.bf16.vlgmr.msra.gmra.mrb[52].mxu1 %v29318_v6 }
 0xa48   :  { %20484 = vmatmul.mubr.bf16.vlgmr.msra.gmra.mrb[32].mxu0 %v29318_v6  ;;  %20247 = vmatpush1.bf16.msra.mxu1 %v27861_v5 }
 0xa49   :  { %20278 = vmatprep.mubr.bf16.mxu1 %v29321_v27  ;;  %20493 = vmatpush1.bf16.msra.mxu0 %v27864_v18  ;;  %v28462_v5 = vpop.eup %28461  ;;  %v27930_v18 = vld [vmem:[#allocation13 + $0x13f0] ss:$28 sps:$4 sm:$0xff]  }
 0xa4a   :  { %20524 = vmatprep.mubr.bf16.mxu0 %v29321_v27  ;;  %20248 = vmatprep.subr.bf16.mxu1 %v27869_v30  ;;  %v27935_v30 = vld [vmem:[#allocation13 + $0x1424] ss:$28 sps:$4 sm:$0xff]  }
 0xa4b   :  { %20494 = vmatprep.subr.bf16.mxu0 %v27872_v24  ;;  %v27938_v24 = vld [vmem:[#allocation13 + $0x142c] ss:$28 sps:$4 sm:$0xff]  }
 0xa4c   :  { %20249 = vmatpush1.bf16.msra.mxu1 %v27867_v49  ;;  %v15742_v49 = vadd.f32 1.0, %v28462_v5  ;;  %v27987_v5 = vld [vmem:[#allocation13 + $0x160] ss:$28 sps:$4 sm:$0xff]  }
 0xa4d   :  { %20495 = vmatpush1.bf16.msra.mxu0 %v27870_v16  ;;  %20250 = vmatprep.subr.bf16.mxu1 %v27875_v57  ;;  %v27933_v16 = vld [vmem:[#allocation13 + $0x1420] ss:$28 sps:$4 sm:$0xff]   ;;  %v27936_v57 = vld [vmem:[#allocation13 + $0x1428] ss:$28 sps:$4 sm:$0xff]  }
 0xa4e   :  { %20496 = vmatprep.subr.bf16.mxu0 %v27878_v21  ;;  %v27941_v21 = vld [vmem:[#allocation13 + $0x145c] ss:$28 sps:$4 sm:$0xff]   ;;  %28463 = vrcp.f32 %v15742_v49 }
 0xa4f   :  { %v27992_v49 = vld [vmem:[#allocation13 + $0x198] ss:$28 sps:$4 sm:$0xff]  }
 0xa50   :  { %20251 = vmatpush1.bf16.msra.mxu1 %v27873_v62  ;;  %v27944_v62 = vld [vmem:[#allocation13 + $0x1464] ss:$28 sps:$4 sm:$0xff]  }
 0xa51   :  { %20497 = vmatpush1.bf16.msra.mxu0 %v27876_v25  ;;  %20252 = vmatprep.subr.bf16.mxu1 %v27881_v13  ;;  %v27939_v25 = vld [vmem:[#allocation13 + $0x1458] ss:$28 sps:$4 sm:$0xff]   ;;  %v27942_v13 = vld [vmem:[#allocation13 + $0x1460] ss:$28 sps:$4 sm:$0xff]  }
 0xa52   :  { %20498 = vmatprep.subr.bf16.mxu0 %v27884_v17  ;;  %v27947_v17 = vld [vmem:[#allocation13 + $0x1494] ss:$28 sps:$4 sm:$0xff]  }
 0xa54   :  { %20253 = vmatpush1.bf16.msra.mxu1 %v27879_v26  ;;  %v27950_v26 = vld [vmem:[#allocation13 + $0x149c] ss:$28 sps:$4 sm:$0xff]  }
 0xa55   :  { %20499 = vmatpush1.bf16.msra.mxu0 %v27882_v36  ;;  %20254 = vmatprep.subr.bf16.mxu1 %v27887_v10  ;;  %v27945_v36 = vld [vmem:[#allocation13 + $0x1490] ss:$28 sps:$4 sm:$0xff]   ;;  %v27948_v10 = vld [vmem:[#allocation13 + $0x1498] ss:$28 sps:$4 sm:$0xff]  }
 0xa56   :  { %20500 = vmatprep.subr.bf16.mxu0 %v27890_v28  ;;  %v27953_v28 = vld [vmem:[#allocation13 + $0x14cc] ss:$28 sps:$4 sm:$0xff]  }
 0xa58   :  { %20255 = vmatpush1.bf16.msra.mxu1 %v27885_v9  ;;  %v27956_v9 = vld [vmem:[#allocation13 + $0x14d4] ss:$28 sps:$4 sm:$0xff]  }
 0xa59   :  { %20501 = vmatpush1.bf16.msra.mxu0 %v27888_v39  ;;  %20256 = vmatprep.subr.bf16.mxu1 %v27893_v42  ;;  %v27951_v39 = vld [vmem:[#allocation13 + $0x14c8] ss:$28 sps:$4 sm:$0xff]   ;;  %v27954_v42 = vld [vmem:[#allocation13 + $0x14d0] ss:$28 sps:$4 sm:$0xff]  }
 0xa5a   :  { %20502 = vmatprep.subr.bf16.mxu0 %v27896_v48  ;;  %v27959_v48 = vld [vmem:[#allocation13 + $0x14] ss:$28 sps:$4 sm:$0xff]  }
 0xa5c   :  { %20257 = vmatpush1.bf16.msra.mxu1 %v27891_v40  ;;  %v28464_v40 = vpop.eup %28463 }
 0xa5d   :  { %20503 = vmatpush1.bf16.msra.mxu0 %v27894_v41  ;;  %20258 = vmatprep.subr.bf16.mxu1 %v27899_v59  ;;  %v27960_v41 = vld [vmem:[#allocation13 + $0x1d8] ss:$28 sps:$4 sm:$0xff]   ;;  %v27957_v59 = vld [vmem:[#allocation13 + $0x10] ss:$28 sps:$4 sm:$0xff]  }
 0xa5e   :  { %20504 = vmatprep.subr.bf16.mxu0 %v27902_v51  ;;  %v29327_v51 = vpack.c.bf16 %v28464_v40, %v28464_v40  ;;  %v28012_v40 = vld [vmem:[#allocation13 + $0x278] ss:$28 sps:$4 sm:$0xff]  }
 0xa60   :  { %20259 = vmatpush1.bf16.msra.mxu1 %v27897_v53  ;;  %v27961_v53 = vld [vmem:[#allocation13 + $0x18] ss:$28 sps:$4 sm:$0xff]  }
 0xa61   :  { %20505 = vmatpush1.bf16.msra.mxu0 %v27900_v32  ;;  %20260 = vmatprep.subr.bf16.mxu1 %v27905_v45  ;;  %v27964_v32 = vld [vmem:[#allocation13 + $0x4c] ss:$28 sps:$4 sm:$0xff]  }
 0xa62   :  { %20506 = vmatprep.subr.bf16.mxu0 %v27908_v54  ;;  %v27965_v45 = vld [vmem:[#allocation13 + $0x210] ss:$28 sps:$4 sm:$0xff]   ;;  %v27962_v54 = vld [vmem:[#allocation13 + $0x48] ss:$28 sps:$4 sm:$0xff]  }
 0xa64   :  { %20261 = vmatpush1.bf16.msra.mxu1 %v27903_v35  ;;  %v27966_v35 = vld [vmem:[#allocation13 + $0x50] ss:$28 sps:$4 sm:$0xff]  }
 0xa65   :  { %20507 = vmatpush1.bf16.msra.mxu0 %v27906_v23  ;;  %20262 = vmatprep.subr.bf16.mxu1 %v27911_v7  ;;  %v27969_v23 = vld [vmem:[#allocation13 + $0x84] ss:$28 sps:$4 sm:$0xff]  }
 0xa66   :  { %20508 = vmatprep.subr.bf16.mxu0 %v27914_v58  ;;  %v27970_v7 = vld [vmem:[#allocation13 + $0x248] ss:$28 sps:$4 sm:$0xff]   ;;  %v27967_v58 = vld [vmem:[#allocation13 + $0x80] ss:$28 sps:$4 sm:$0xff]  }
 0xa68   :  { %20263 = vmatpush1.bf16.msra.mxu1 %v27909_v52  ;;  %v27974_v52 = vld [vmem:[#allocation13 + $0xbc] ss:$28 sps:$4 sm:$0xff]  }
 0xa69   :  { %20509 = vmatpush1.bf16.msra.mxu0 %v27912_v46  ;;  %20264 = vmatprep.subr.bf16.mxu1 %v27917_v63  ;;  %v27975_v46 = vld [vmem:[#allocation13 + $0x280] ss:$28 sps:$4 sm:$0xff]   ;;  %v27972_v63 = vld [vmem:[#allocation13 + $0xb8] ss:$28 sps:$4 sm:$0xff]  }
 0xa6a   :  { %20510 = vmatprep.subr.bf16.mxu0 %v27920_v43  ;;  %v27976_v43 = vld [vmem:[#allocation13 + $0xc0] ss:$28 sps:$4 sm:$0xff]  }
 0xa6c   :  { %20265 = vmatpush1.bf16.msra.mxu1 %v27915_v11  ;;  %v27979_v11 = vld [vmem:[#allocation13 + $0xf4] ss:$28 sps:$4 sm:$0xff]  }
 0xa6d   :  { %20511 = vmatpush1.bf16.msra.mxu0 %v27918_v34  ;;  %20266 = vmatprep.subr.bf16.mxu1 %v27923_v0  ;;  %v27980_v34 = vld [vmem:[#allocation13 + $0x2b8] ss:$28 sps:$4 sm:$0xff]  }
 0xa6e   :  { %20512 = vmatprep.subr.bf16.mxu0 %v27926_v44  ;;  %v27981_v0 = vld [vmem:[#allocation13 + $0xf8] ss:$28 sps:$4 sm:$0xff]   ;;  %v27984_v44 = vld [vmem:[#allocation13 + $0x12c] ss:$28 sps:$4 sm:$0xff]  }
 0xa70   :  { %20267 = vmatpush1.bf16.msra.mxu1 %v27921_v2  ;;  %v27985_v2 = vld [vmem:[#allocation13 + $0x2f0] ss:$28 sps:$4 sm:$0xff]  }
 0xa71   :  { %20513 = vmatpush1.bf16.msra.mxu0 %v27924_v22  ;;  %20268 = vmatprep.subr.bf16.mxu1 %v27929_v56  ;;  %v27982_v22 = vld [vmem:[#allocation13 + $0x128] ss:$28 sps:$4 sm:$0xff]   ;;  %v27986_v56 = vld [vmem:[#allocation13 + $0x130] ss:$28 sps:$4 sm:$0xff]  }
 0xa72   :  { %20514 = vmatprep.subr.bf16.mxu0 %v27932_v61  ;;  %v27989_v61 = vld [vmem:[#allocation13 + $0x164] ss:$28 sps:$4 sm:$0xff]  }
 0xa74   :  { %20269 = vmatpush1.bf16.msra.mxu1 %v27927_v4  ;;  %v27990_v4 = vld [vmem:[#allocation13 + $0x328] ss:$28 sps:$4 sm:$0xff]  }
 0xa75   :  { %20515 = vmatpush1.bf16.msra.mxu0 %v27930_v18  ;;  %20270 = vmatprep.subr.bf16.mxu1 %v27935_v30  ;;  %v27991_v18 = vld [vmem:[#allocation13 + $0x168] ss:$28 sps:$4 sm:$0xff]   ;;  %v27994_v30 = vld [vmem:[#allocation13 + $0x19c] ss:$28 sps:$4 sm:$0xff]  }
 0xa76   :  { %20516 = vmatprep.subr.bf16.mxu0 %v27938_v24  ;;  %v27995_v24 = vld [vmem:[#allocation13 + $0x360] ss:$28 sps:$4 sm:$0xff]  }
 0xa78   :  { %20271 = vmatpush1.bf16.msra.mxu1 %v27933_v16  ;;  %v27996_v16 = vld [vmem:[#allocation13 + $0x1a0] ss:$28 sps:$4 sm:$0xff]  }
 0xa79   :  { %20517 = vmatpush1.bf16.msra.mxu0 %v27936_v57  ;;  %20272 = vmatprep.subr.bf16.mxu1 %v27941_v21  ;;  %v27999_v57 = vld [vmem:[#allocation13 + $0x1d4] ss:$28 sps:$4 sm:$0xff]  }
 0xa7a   :  { %20518 = vmatprep.subr.bf16.mxu0 %v27944_v62  ;;  %v28000_v21 = vld [vmem:[#allocation13 + $0x558] ss:$28 sps:$4 sm:$0xff]   ;;  %v27997_v62 = vld [vmem:[#allocation13 + $0x1d0] ss:$28 sps:$4 sm:$0xff]  }
 0xa7c   :  { %20273 = vmatpush1.bf16.msra.mxu1 %v27939_v25  ;;  %v28001_v25 = vld [vmem:[#allocation13 + $0x398] ss:$28 sps:$4 sm:$0xff]  }
 0xa7d   :  { %20519 = vmatpush1.bf16.msra.mxu0 %v27942_v13  ;;  %20274 = vmatprep.subr.bf16.mxu1 %v27947_v17  ;;  %v28004_v13 = vld [vmem:[#allocation13 + $0x20c] ss:$28 sps:$4 sm:$0xff]  }
 0xa7e   :  { %20520 = vmatprep.subr.bf16.mxu0 %v27950_v26  ;;  %v28005_v17 = vld [vmem:[#allocation13 + $0x590] ss:$28 sps:$4 sm:$0xff]   ;;  %v28002_v26 = vld [vmem:[#allocation13 + $0x208] ss:$28 sps:$4 sm:$0xff]  }
 0xa80   :  { %20275 = vmatpush1.bf16.msra.mxu1 %v27945_v36  ;;  %v28006_v36 = vld [vmem:[#allocation13 + $0x3d0] ss:$28 sps:$4 sm:$0xff]  }
 0xa81   :  { %20521 = vmatpush1.bf16.msra.mxu0 %v27948_v10  ;;  %20276 = vmatprep.subr.bf16.mxu1 %v27953_v28  ;;  %v28009_v10 = vld [vmem:[#allocation13 + $0x244] ss:$28 sps:$4 sm:$0xff]  }
 0xa82   :  { %20522 = vmatprep.subr.bf16.mxu0 %v27956_v9  ;;  %v28010_v28 = vld [vmem:[#allocation13 + $0x5c8] ss:$28 sps:$4 sm:$0xff]   ;;  %v28007_v9 = vld [vmem:[#allocation13 + $0x240] ss:$28 sps:$4 sm:$0xff]  }
 0xa84   :  { %20277 = vmatpush1.bf16.msra.mxu1 %v27951_v39  ;;  %v28011_v39 = vld [vmem:[#allocation13 + $0x408] ss:$28 sps:$4 sm:$0xff]  }
 0xa85   :  { %20523 = vmatpush1.bf16.msra.mxu0 %v27954_v42  ;;  %20533 = vmatprep.subr.bf16.mxu1 %v27959_v48  ;;  %v28014_v42 = vld [vmem:[#allocation13 + $0x27c] ss:$28 sps:$4 sm:$0xff]  }
 0xa86   :  { %23952 = vmatprep.subr.bf16.mxu0 %v27960_v41  ;;  %v28015_v48 = vld [vmem:[#allocation13 + $0x600] ss:$28 sps:$4 sm:$0xff]  }
 0xa87   :  { %20279 = vmatmul.mubr.bf16.vlgmr.msra.gmra.mrb[52].mxu1 %v29327_v51  ;;  %v28016_v41 = vld [vmem:[#allocation13 + $0x440] ss:$28 sps:$4 sm:$0xff]  }
 0xa88   :  { %20525 = vmatmul.mubr.bf16.vlgmr.msra.gmra.mrb[32].mxu0 %v29327_v51  ;;  %20534 = vmatpush1.bf16.msra.mxu1 %v27957_v59  ;;  %v28019_v59 = vld [vmem:[#allocation13 + $0x2b4] ss:$28 sps:$4 sm:$0xff]  }
 0xa89   :  { %20565 = vmatprep.mubr.bf16.mxu1 %v29242_v12  ;;  %23953 = vmatpush3.bf16.msra.mxu0 %v27961_v53  ;;  %v28020_v53 = vld [vmem:[#allocation13 + $0x638] ss:$28 sps:$4 sm:$0xff]  }
 0xa8a   :  { %20811 = vmatprep.mubr.bf16.mxu0 %v29242_v12  ;;  %20535 = vmatprep.subr.bf16.mxu1 %v27964_v32  ;;  %v27977_v12 = vld [vmem:[#allocation13 + $0xf0] ss:$28 sps:$4 sm:$0xff]  }
 0xa8b   :  { %23954 = vmatprep.subr.bf16.mxu0 %v27965_v45  ;;  %v28017_v32 = vld [vmem:[#allocation13 + $0x2b0] ss:$28 sps:$4 sm:$0xff]   ;;  %v28021_v45 = vld [vmem:[#allocation13 + $0x478] ss:$28 sps:$4 sm:$0xff]  }
 0xa8c   :  { %20536 = vmatpush1.bf16.msra.mxu1 %v27962_v54  ;;  %v28024_v54 = vld [vmem:[#allocation13 + $0x2ec] ss:$28 sps:$4 sm:$0xff]  }
 0xa8d   :  { %23955 = vmatpush3.bf16.msra.mxu0 %v27966_v35  ;;  %20537 = vmatprep.subr.bf16.mxu1 %v27969_v23  ;;  %v28025_v35 = vld [vmem:[#allocation13 + $0x670] ss:$28 sps:$4 sm:$0xff]   ;;  %v28022_v23 = vld [vmem:[#allocation13 + $0x2e8] ss:$28 sps:$4 sm:$0xff]  }
 0xa8e   :  { %23956 = vmatprep.subr.bf16.mxu0 %v27970_v7  ;;  %v28026_v7 = vld [vmem:[#allocation13 + $0x4b0] ss:$28 sps:$4 sm:$0xff]  }
 0xa90   :  { %20538 = vmatpush1.bf16.msra.mxu1 %v27967_v58  ;;  %v28029_v58 = vld [vmem:[#allocation13 + $0x324] ss:$28 sps:$4 sm:$0xff]  }
 0xa91   :  { %23957 = vmatpush3.bf16.msra.mxu0 %v27971_v38  ;;  %20539 = vmatprep.subr.bf16.mxu1 %v27974_v52  ;;  %v28030_v38 = vld [vmem:[#allocation13 + $0x6a8] ss:$28 sps:$4 sm:$0xff]   ;;  %v28027_v52 = vld [vmem:[#allocation13 + $0x320] ss:$28 sps:$4 sm:$0xff]  }
 0xa92   :  { %23958 = vmatprep.subr.bf16.mxu0 %v27975_v46  ;;  %v28031_v46 = vld [vmem:[#allocation13 + $0x4e8] ss:$28 sps:$4 sm:$0xff]  }
 0xa94   :  { %20540 = vmatpush1.bf16.msra.mxu1 %v27972_v63  ;;  %v28034_v63 = vld [vmem:[#allocation13 + $0x35c] ss:$28 sps:$4 sm:$0xff]  }
 0xa95   :  { %23959 = vmatpush3.bf16.msra.mxu0 %v27976_v43  ;;  %20541 = vmatprep.subr.bf16.mxu1 %v27979_v11  ;;  %v28035_v43 = vld [vmem:[#allocation13 + $0x6e0] ss:$28 sps:$4 sm:$0xff]   ;;  %v28032_v11 = vld [vmem:[#allocation13 + $0x358] ss:$28 sps:$4 sm:$0xff]  }
 0xa96   :  { %23960 = vmatprep.subr.bf16.mxu0 %v27980_v34  ;;  %v28036_v34 = vld [vmem:[#allocation13 + $0x520] ss:$28 sps:$4 sm:$0xff]  }
 0xa98   :  { %20542 = vmatpush1.bf16.msra.mxu1 %v27977_v12  ;;  %v28039_v12 = vld [vmem:[#allocation13 + $0x394] ss:$28 sps:$4 sm:$0xff]  }
 0xa99   :  { %23961 = vmatpush3.bf16.msra.mxu0 %v27981_v0  ;;  %20543 = vmatprep.subr.bf16.mxu1 %v27984_v44  ;;  %v28040_v0 = vld [vmem:[#allocation13 + $0x8d8] ss:$28 sps:$4 sm:$0xff]   ;;  %v28037_v44 = vld [vmem:[#allocation13 + $0x390] ss:$28 sps:$4 sm:$0xff]  }
 0xa9a   :  { %23962 = vmatprep.subr.bf16.mxu0 %v27985_v2  ;;  %v28041_v2 = vld [vmem:[#allocation13 + $0x718] ss:$28 sps:$4 sm:$0xff]  }
 0xa9c   :  { %20544 = vmatpush1.bf16.msra.mxu1 %v27982_v22  ;;  %v28044_v22 = vld [vmem:[#allocation13 + $0x3cc] ss:$28 sps:$4 sm:$0xff]  }
 0xa9d   :  { %23963 = vmatpush3.bf16.msra.mxu0 %v27986_v56  ;;  %20545 = vmatprep.subr.bf16.mxu1 %v27989_v61  ;;  %v28045_v56 = vld [vmem:[#allocation13 + $0x910] ss:$28 sps:$4 sm:$0xff]   ;;  %v28042_v61 = vld [vmem:[#allocation13 + $0x3c8] ss:$28 sps:$4 sm:$0xff]  }
 0xa9e   :  { %23964 = vmatprep.subr.bf16.mxu0 %v27990_v4  ;;  %v28046_v4 = vld [vmem:[#allocation13 + $0x750] ss:$28 sps:$4 sm:$0xff]  }
 0xaa0   :  { %20546 = vmatpush1.bf16.msra.mxu1 %v27987_v5  ;;  %v28049_v5 = vld [vmem:[#allocation13 + $0x404] ss:$28 sps:$4 sm:$0xff]  }
 0xaa1   :  { %23965 = vmatpush3.bf16.msra.mxu0 %v27991_v18  ;;  %20547 = vmatprep.subr.bf16.mxu1 %v27994_v30  ;;  %v28050_v18 = vld [vmem:[#allocation13 + $0x948] ss:$28 sps:$4 sm:$0xff]   ;;  %v28047_v30 = vld [vmem:[#allocation13 + $0x400] ss:$28 sps:$4 sm:$0xff]  }
 0xaa2   :  { %23966 = vmatprep.subr.bf16.mxu0 %v27995_v24  ;;  %v28054_v24 = vld [vmem:[#allocation13 + $0x43c] ss:$28 sps:$4 sm:$0xff]  }
 0xaa4   :  { %20548 = vmatpush1.bf16.msra.mxu1 %v27992_v49  ;;  %v28055_v49 = vld [vmem:[#allocation13 + $0x980] ss:$28 sps:$4 sm:$0xff]  }
 0xaa5   :  { %23967 = vmatpush3.bf16.msra.mxu0 %v27996_v16  ;;  %20549 = vmatprep.subr.bf16.mxu1 %v27999_v57  ;;  %v28052_v16 = vld [vmem:[#allocation13 + $0x438] ss:$28 sps:$4 sm:$0xff]  }
 0xaa6   :  { %23974 = vmatprep.subr.bf16.mxu0 %v28000_v21  ;;  %v28059_v57 = vld [vmem:[#allocation13 + $0x474] ss:$28 sps:$4 sm:$0xff]  }
 0xaa7   :  { %v28060_v21 = vld [vmem:[#allocation13 + $0x9b8] ss:$28 sps:$4 sm:$0xff]  }
 0xaa8   :  { %20812 = vmatmul.mubr.bf16.vlgmr.msra.gmra.mrb[36].mxu0 %v29253_v29  ;;  %20550 = vmatpush1.bf16.msra.mxu1 %v27997_v62  ;;  %v28057_v62 = vld [vmem:[#allocation13 + $0x470] ss:$28 sps:$4 sm:$0xff]  }
 0xaa9   :  { %23975 = vmatpush3.bf16.msra.mxu0 %v28001_v25  ;;  %20851 = vmatprep.mubr.bf16.mxu0 %v29256_v60  ;;  %v28061_v25 = vld [vmem:[#allocation13 + $0x7f8] ss:$28 sps:$4 sm:$0xff]  }
 0xaaa   :  { %20551 = vmatprep.subr.bf16.mxu1 %v28004_v13  ;;  %23976 = vmatprep.subr.bf16.mxu0 %v28005_v17  ;;  %v28064_v13 = vld [vmem:[#allocation13 + $0x4ac] ss:$28 sps:$4 sm:$0xff]  }
 0xaab   :  { %v28065_v17 = vld [vmem:[#allocation13 + $0x9f0] ss:$28 sps:$4 sm:$0xff]  }
 0xaac   :  { %20552 = vmatpush1.bf16.msra.mxu1 %v28002_v26  ;;  %v28062_v26 = vld [vmem:[#allocation13 + $0x4a8] ss:$28 sps:$4 sm:$0xff]  }
 0xaad   :  { %23977 = vmatpush3.bf16.msra.mxu0 %v28006_v36  ;;  %20553 = vmatprep.subr.bf16.mxu1 %v28009_v10  ;;  %v28066_v36 = vld [vmem:[#allocation13 + $0x830] ss:$28 sps:$4 sm:$0xff]   ;;  %v28069_v10 = vld [vmem:[#allocation13 + $0x4e4] ss:$28 sps:$4 sm:$0xff]  }
 0xaae   :  { %23978 = vmatprep.subr.bf16.mxu0 %v28010_v28  ;;  %v28070_v28 = vld [vmem:[#allocation13 + $0xa28] ss:$28 sps:$4 sm:$0xff]  }
 0xab0   :  { %20554 = vmatpush1.bf16.msra.mxu1 %v28007_v9  ;;  %v28067_v9 = vld [vmem:[#allocation13 + $0x4e0] ss:$28 sps:$4 sm:$0xff]  }
 0xab1   :  { %23979 = vmatpush3.bf16.msra.mxu0 %v28011_v39  ;;  %20555 = vmatprep.subr.bf16.mxu1 %v28014_v42  ;;  %v28071_v39 = vld [vmem:[#allocation13 + $0x868] ss:$28 sps:$4 sm:$0xff]   ;;  %v28074_v42 = vld [vmem:[#allocation13 + $0x51c] ss:$28 sps:$4 sm:$0xff]  }
 0xab2   :  { %23980 = vmatprep.subr.bf16.mxu0 %v28015_v48  ;;  %v28075_v48 = vld [vmem:[#allocation13 + $0xa60] ss:$28 sps:$4 sm:$0xff]  }
 0xab4   :  { %20556 = vmatpush1.bf16.msra.mxu1 %v28012_v40  ;;  %v28072_v40 = vld [vmem:[#allocation13 + $0x518] ss:$28 sps:$4 sm:$0xff]  }
 0xab5   :  { %23981 = vmatpush3.bf16.msra.mxu0 %v28016_v41  ;;  %20557 = vmatprep.subr.bf16.mxu1 %v28019_v59  ;;  %v28076_v41 = vld [vmem:[#allocation13 + $0x8a0] ss:$28 sps:$4 sm:$0xff]   ;;  %v28079_v59 = vld [vmem:[#allocation13 + $0x554] ss:$28 sps:$4 sm:$0xff]  }
 0xab6   :  { %23982 = vmatprep.subr.bf16.mxu0 %v28020_v53  ;;  %v28080_v53 = vld [vmem:[#allocation13 + $0xc58] ss:$28 sps:$4 sm:$0xff]  }
 0xab8   :  { %20558 = vmatpush1.bf16.msra.mxu1 %v28017_v32  ;;  %v28077_v32 = vld [vmem:[#allocation13 + $0x550] ss:$28 sps:$4 sm:$0xff]  }
 0xab9   :  { %23983 = vmatpush3.bf16.msra.mxu0 %v28021_v45  ;;  %20559 = vmatprep.subr.bf16.mxu1 %v28024_v54  ;;  %v28081_v45 = vld [vmem:[#allocation13 + $0xa98] ss:$28 sps:$4 sm:$0xff]   ;;  %v28084_v54 = vld [vmem:[#allocation13 + $0x58c] ss:$28 sps:$4 sm:$0xff]  }
 0xaba   :  { %23984 = vmatprep.subr.bf16.mxu0 %v28025_v35  ;;  %v28085_v35 = vld [vmem:[#allocation13 + $0xc90] ss:$28 sps:$4 sm:$0xff]  }
 0xabc   :  { %20560 = vmatpush1.bf16.msra.mxu1 %v28022_v23  ;;  %v28082_v23 = vld [vmem:[#allocation13 + $0x588] ss:$28 sps:$4 sm:$0xff]  }
 0xabd   :  { %23985 = vmatpush3.bf16.msra.mxu0 %v28026_v7  ;;  %20561 = vmatprep.subr.bf16.mxu1 %v28029_v58  ;;  %v28086_v7 = vld [vmem:[#allocation13 + $0xad0] ss:$28 sps:$4 sm:$0xff]   ;;  %v28089_v58 = vld [vmem:[#allocation13 + $0x5c4] ss:$28 sps:$4 sm:$0xff]  }
 0xabe   :  { %23986 = vmatprep.subr.bf16.mxu0 %v28030_v38  ;;  %v28090_v38 = vld [vmem:[#allocation13 + $0xcc8] ss:$28 sps:$4 sm:$0xff]  }
 0xac0   :  { %20562 = vmatpush1.bf16.msra.mxu1 %v28027_v52  ;;  %v28087_v52 = vld [vmem:[#allocation13 + $0x5c0] ss:$28 sps:$4 sm:$0xff]  }
 0xac1   :  { %23987 = vmatpush3.bf16.msra.mxu0 %v28031_v46  ;;  %20563 = vmatprep.subr.bf16.mxu1 %v28034_v63  ;;  %v28091_v46 = vld [vmem:[#allocation13 + $0xb08] ss:$28 sps:$4 sm:$0xff]   ;;  %v28094_v63 = vld [vmem:[#allocation13 + $0x5fc] ss:$28 sps:$4 sm:$0xff]  }
 0xac2   :  { %23988 = vmatprep.subr.bf16.mxu0 %v28035_v43  ;;  %v28095_v43 = vld [vmem:[#allocation13 + $0xd00] ss:$28 sps:$4 sm:$0xff]  }
 0xac4   :  { %20564 = vmatpush1.bf16.msra.mxu1 %v28032_v11  ;;  %v28092_v11 = vld [vmem:[#allocation13 + $0x5f8] ss:$28 sps:$4 sm:$0xff]  }
 0xac5   :  { %23989 = vmatpush3.bf16.msra.mxu0 %v28036_v34  ;;  %20574 = vmatprep.subr.bf16.mxu1 %v28039_v12  ;;  %v28096_v34 = vld [vmem:[#allocation13 + $0xb40] ss:$28 sps:$4 sm:$0xff]   ;;  %v28099_v12 = vld [vmem:[#allocation13 + $0x634] ss:$28 sps:$4 sm:$0xff]  }
 0xac6   :  { %23996 = vmatprep.subr.bf16.mxu0 %v28040_v0  ;;  %v28100_v0 = vld [vmem:[#allocation13 + $0xd38] ss:$28 sps:$4 sm:$0xff]  }
 0xac7   :  { %20566 = vmatmul.mubr.bf16.vlgmr.msra.gmra.mrb[56].mxu1 %v29253_v29  ;;  %v28051_v29 = vld [vmem:[#allocation13 + $0x788] ss:$28 sps:$4 sm:$0xff]  }
 0xac8   :  { %20852 = vmatmul.mubr.bf16.vlgmr.msra.gmra.mrb[40].mxu0 %v29267_v33  ;;  %20575 = vmatpush1.bf16.msra.mxu1 %v28037_v44  ;;  %v28097_v44 = vld [vmem:[#allocation13 + $0x630] ss:$28 sps:$4 sm:$0xff]  }
 0xac9   :  { %20606 = vmatprep.mubr.bf16.mxu1 %v29256_v60  ;;  %23997 = vmatpush3.bf16.msra.mxu0 %v28041_v2  ;;  %v28056_v60 = vld [vmem:[#allocation13 + $0x7c0] ss:$28 sps:$4 sm:$0xff]   ;;  %v28101_v2 = vld [vmem:[#allocation13 + $0xb78] ss:$28 sps:$4 sm:$0xff]  }
 0xaca   :  { %20891 = vmatprep.mubr.bf16.mxu0 %v29270_v3  ;;  %20576 = vmatprep.subr.bf16.mxu1 %v28044_v22  ;;  %v28104_v22 = vld [vmem:[#allocation13 + $0x66c] ss:$28 sps:$4 sm:$0xff]  }
 0xacb   :  { %23998 = vmatprep.subr.bf16.mxu0 %v28045_v56  ;;  %v28105_v56 = vld [vmem:[#allocation13 + $0xd70] ss:$28 sps:$4 sm:$0xff]  }
 0xacc   :  { %20577 = vmatpush1.bf16.msra.mxu1 %v28042_v61  ;;  %v28102_v61 = vld [vmem:[#allocation13 + $0x668] ss:$28 sps:$4 sm:$0xff]  }
 0xacd   :  { %23999 = vmatpush3.bf16.msra.mxu0 %v28046_v4  ;;  %20578 = vmatprep.subr.bf16.mxu1 %v28049_v5  ;;  %v28106_v4 = vld [vmem:[#allocation13 + $0xbb0] ss:$28 sps:$4 sm:$0xff]   ;;  %v28109_v5 = vld [vmem:[#allocation13 + $0x6a4] ss:$28 sps:$4 sm:$0xff]  }
 0xace   :  { %24000 = vmatprep.subr.bf16.mxu0 %v28050_v18  ;;  %v28110_v18 = vld [vmem:[#allocation13 + $0xda8] ss:$28 sps:$4 sm:$0xff]  }
 0xad0   :  { %20579 = vmatpush1.bf16.msra.mxu1 %v28047_v30  ;;  %v28107_v30 = vld [vmem:[#allocation13 + $0x6a0] ss:$28 sps:$4 sm:$0xff]  }
 0xad1   :  { %24001 = vmatpush3.bf16.msra.mxu0 %v28051_v29  ;;  %20580 = vmatprep.subr.bf16.mxu1 %v28054_v24  ;;  %v28111_v29 = vld [vmem:[#allocation13 + $0xbe8] ss:$28 sps:$4 sm:$0xff]   ;;  %v28114_v24 = vld [vmem:[#allocation13 + $0x6dc] ss:$28 sps:$4 sm:$0xff]  }
 0xad2   :  { %24002 = vmatprep.subr.bf16.mxu0 %v28055_v49  ;;  %v28115_v49 = vld [vmem:[#allocation13 + $0xde0] ss:$28 sps:$4 sm:$0xff]  }
 0xad4   :  { %20581 = vmatpush1.bf16.msra.mxu1 %v28052_v16  ;;  %v28112_v16 = vld [vmem:[#allocation13 + $0x6d8] ss:$28 sps:$4 sm:$0xff]  }
 0xad5   :  { %24003 = vmatpush3.bf16.msra.mxu0 %v28056_v60  ;;  %20582 = vmatprep.subr.bf16.mxu1 %v28059_v57  ;;  %v28116_v60 = vld [vmem:[#allocation13 + $0xc20] ss:$28 sps:$4 sm:$0xff]   ;;  %v28119_v57 = vld [vmem:[#allocation13 + $0x714] ss:$28 sps:$4 sm:$0xff]  }
 0xad6   :  { %24004 = vmatprep.subr.bf16.mxu0 %v28060_v21  ;;  %v28120_v21 = vld [vmem:[#allocation13 + $0xfd8] ss:$28 sps:$4 sm:$0xff]  }
 0xad8   :  { %20583 = vmatpush1.bf16.msra.mxu1 %v28057_v62  ;;  %v28117_v62 = vld [vmem:[#allocation13 + $0x710] ss:$28 sps:$4 sm:$0xff]  }
 0xad9   :  { %24005 = vmatpush3.bf16.msra.mxu0 %v28061_v25  ;;  %20584 = vmatprep.subr.bf16.mxu1 %v28064_v13  ;;  %v28121_v25 = vld [vmem:[#allocation13 + $0xe18] ss:$28 sps:$4 sm:$0xff]   ;;  %v28124_v13 = vld [vmem:[#allocation13 + $0x74c] ss:$28 sps:$4 sm:$0xff]  }
 0xada   :  { %24006 = vmatprep.subr.bf16.mxu0 %v28065_v17  ;;  %v28125_v17 = vld [vmem:[#allocation13 + $0x1010] ss:$28 sps:$4 sm:$0xff]  }
 0xadc   :  { %20585 = vmatpush1.bf16.msra.mxu1 %v28062_v26  ;;  %v28122_v26 = vld [vmem:[#allocation13 + $0x748] ss:$28 sps:$4 sm:$0xff]  }
 0xadd   :  { %24007 = vmatpush3.bf16.msra.mxu0 %v28066_v36  ;;  %20586 = vmatprep.subr.bf16.mxu1 %v28069_v10  ;;  %v28126_v36 = vld [vmem:[#allocation13 + $0xe50] ss:$28 sps:$4 sm:$0xff]   ;;  %v28129_v10 = vld [vmem:[#allocation13 + $0x784] ss:$28 sps:$4 sm:$0xff]  }
 0xade   :  { %24008 = vmatprep.subr.bf16.mxu0 %v28070_v28  ;;  %v28130_v28 = vld [vmem:[#allocation13 + $0x1048] ss:$28 sps:$4 sm:$0xff]  }
 0xae0   :  { %20587 = vmatpush1.bf16.msra.mxu1 %v28067_v9  ;;  %v28127_v9 = vld [vmem:[#allocation13 + $0x780] ss:$28 sps:$4 sm:$0xff]  }
 0xae1   :  { %24009 = vmatpush3.bf16.msra.mxu0 %v28071_v39  ;;  %20588 = vmatprep.subr.bf16.mxu1 %v28074_v42  ;;  %v28134_v39 = vld [vmem:[#allocation13 + $0x7bc] ss:$28 sps:$4 sm:$0xff]  }
 0xae2   :  { %24010 = vmatprep.subr.bf16.mxu0 %v28075_v48  ;;  %v28135_v42 = vld [vmem:[#allocation13 + $0x1080] ss:$28 sps:$4 sm:$0xff]   ;;  %v28132_v48 = vld [vmem:[#allocation13 + $0x7b8] ss:$28 sps:$4 sm:$0xff]  }
 0xae4   :  { %20589 = vmatpush1.bf16.msra.mxu1 %v28072_v40  ;;  %v28139_v40 = vld [vmem:[#allocation13 + $0x7f4] ss:$28 sps:$4 sm:$0xff]  }
 0xae5   :  { %24011 = vmatpush3.bf16.msra.mxu0 %v28076_v41  ;;  %20590 = vmatprep.subr.bf16.mxu1 %v28079_v59  ;;  %v28140_v41 = vld [vmem:[#allocation13 + $0x10b8] ss:$28 sps:$4 sm:$0xff]   ;;  %v28137_v59 = vld [vmem:[#allocation13 + $0x7f0] ss:$28 sps:$4 sm:$0xff]  }
 0xae6   :  { %24018 = vmatprep.subr.bf16.mxu0 %v28080_v53  ;;  %v28141_v53 = vld [vmem:[#allocation13 + $0xef8] ss:$28 sps:$4 sm:$0xff]  }
 0xae8   :  { %20892 = vmatmul.mubr.bf16.vlgmr.msra.gmra.mrb[44].mxu0 %v29282_v50  ;;  %20591 = vmatpush1.bf16.msra.mxu1 %v28077_v32  ;;  %v28144_v32 = vld [vmem:[#allocation13 + $0x82c] ss:$28 sps:$4 sm:$0xff]  }
 0xae9   :  { %24019 = vmatpush3.bf16.msra.mxu0 %v28081_v45  ;;  %20931 = vmatprep.mubr.bf16.mxu0 %v29285_v31  ;;  %v28145_v45 = vld [vmem:[#allocation13 + $0x10f0] ss:$28 sps:$4 sm:$0xff]  }
 0xaea   :  { %20592 = vmatprep.subr.bf16.mxu1 %v28084_v54  ;;  %24020 = vmatprep.subr.bf16.mxu0 %v28085_v35  ;;  %v28142_v54 = vld [vmem:[#allocation13 + $0x828] ss:$28 sps:$4 sm:$0xff]   ;;  %v28146_v35 = vld [vmem:[#allocation13 + $0xf30] ss:$28 sps:$4 sm:$0xff]  }
 0xaec   :  { %20593 = vmatpush1.bf16.msra.mxu1 %v28082_v23  ;;  %v28149_v23 = vld [vmem:[#allocation13 + $0x864] ss:$28 sps:$4 sm:$0xff]  }
 0xaed   :  { %24021 = vmatpush3.bf16.msra.mxu0 %v28086_v7  ;;  %20594 = vmatprep.subr.bf16.mxu1 %v28089_v58  ;;  %v28150_v7 = vld [vmem:[#allocation13 + $0x1128] ss:$28 sps:$4 sm:$0xff]   ;;  %v28147_v58 = vld [vmem:[#allocation13 + $0x860] ss:$28 sps:$4 sm:$0xff]  }
 0xaee   :  { %24022 = vmatprep.subr.bf16.mxu0 %v28090_v38  ;;  %v28151_v38 = vld [vmem:[#allocation13 + $0xf68] ss:$28 sps:$4 sm:$0xff]  }
 0xaf0   :  { %20595 = vmatpush1.bf16.msra.mxu1 %v28087_v52  ;;  %v28154_v52 = vld [vmem:[#allocation13 + $0x89c] ss:$28 sps:$4 sm:$0xff]  }
 0xaf1   :  { %24023 = vmatpush3.bf16.msra.mxu0 %v28091_v46  ;;  %20596 = vmatprep.subr.bf16.mxu1 %v28094_v63  ;;  %v28155_v46 = vld [vmem:[#allocation13 + $0x1160] ss:$28 sps:$4 sm:$0xff]   ;;  %v28152_v63 = vld [vmem:[#allocation13 + $0x898] ss:$28 sps:$4 sm:$0xff]  }
 0xaf2   :  { %24024 = vmatprep.subr.bf16.mxu0 %v28095_v43  ;;  %v28156_v43 = vld [vmem:[#allocation13 + $0xfa0] ss:$28 sps:$4 sm:$0xff]  }
 0xaf4   :  { %20597 = vmatpush1.bf16.msra.mxu1 %v28092_v11  ;;  %v28159_v11 = vld [vmem:[#allocation13 + $0x8d4] ss:$28 sps:$4 sm:$0xff]  }
 0xaf5   :  { %24025 = vmatpush3.bf16.msra.mxu0 %v28096_v34  ;;  %20598 = vmatprep.subr.bf16.mxu1 %v28099_v12  ;;  %v28160_v34 = vld [vmem:[#allocation13 + $0x1358] ss:$28 sps:$4 sm:$0xff]   ;;  %v28157_v12 = vld [vmem:[#allocation13 + $0x8d0] ss:$28 sps:$4 sm:$0xff]  }
 0xaf6   :  { %24026 = vmatprep.subr.bf16.mxu0 %v28100_v0  ;;  %v28161_v0 = vld [vmem:[#allocation13 + $0x1198] ss:$28 sps:$4 sm:$0xff]  }
 0xaf8   :  { %20599 = vmatpush1.bf16.msra.mxu1 %v28097_v44  ;;  %v28164_v44 = vld [vmem:[#allocation13 + $0x90c] ss:$28 sps:$4 sm:$0xff]  }
 0xaf9   :  { %24027 = vmatpush3.bf16.msra.mxu0 %v28101_v2  ;;  %20600 = vmatprep.subr.bf16.mxu1 %v28104_v22  ;;  %v28165_v2 = vld [vmem:[#allocation13 + $0x1390] ss:$28 sps:$4 sm:$0xff]   ;;  %v28162_v22 = vld [vmem:[#allocation13 + $0x908] ss:$28 sps:$4 sm:$0xff]  }
 0xafa   :  { %24028 = vmatprep.subr.bf16.mxu0 %v28105_v56  ;;  %v28166_v56 = vld [vmem:[#allocation13 + $0x11d0] ss:$28 sps:$4 sm:$0xff]  }
 0xafc   :  { %20601 = vmatpush1.bf16.msra.mxu1 %v28102_v61  ;;  %v28169_v61 = vld [vmem:[#allocation13 + $0x944] ss:$28 sps:$4 sm:$0xff]  }
 0xafd   :  { %24029 = vmatpush3.bf16.msra.mxu0 %v28106_v4  ;;  %20602 = vmatprep.subr.bf16.mxu1 %v28109_v5  ;;  %v28170_v4 = vld [vmem:[#allocation13 + $0x13c8] ss:$28 sps:$4 sm:$0xff]   ;;  %v28167_v5 = vld [vmem:[#allocation13 + $0x940] ss:$28 sps:$4 sm:$0xff]  }
 0xafe   :  { %24030 = vmatprep.subr.bf16.mxu0 %v28110_v18  ;;  %v28171_v18 = vld [vmem:[#allocation13 + $0x1208] ss:$28 sps:$4 sm:$0xff]  }
 0xb00   :  { %20603 = vmatpush1.bf16.msra.mxu1 %v28107_v30  ;;  %v28174_v30 = vld [vmem:[#allocation13 + $0x97c] ss:$28 sps:$4 sm:$0xff]  }
 0xb01   :  { %24031 = vmatpush3.bf16.msra.mxu0 %v28111_v29  ;;  %20604 = vmatprep.subr.bf16.mxu1 %v28114_v24  ;;  %v28175_v29 = vld [vmem:[#allocation13 + $0x1400] ss:$28 sps:$4 sm:$0xff]   ;;  %v28172_v24 = vld [vmem:[#allocation13 + $0x978] ss:$28 sps:$4 sm:$0xff]  }
 0xb02   :  { %24032 = vmatprep.subr.bf16.mxu0 %v28115_v49  ;;  %v28176_v49 = vld [vmem:[#allocation13 + $0x1240] ss:$28 sps:$4 sm:$0xff]  }
 0xb04   :  { %20605 = vmatpush1.bf16.msra.mxu1 %v28112_v16  ;;  %v28179_v16 = vld [vmem:[#allocation13 + $0x9b4] ss:$28 sps:$4 sm:$0xff]  }
 0xb05   :  { %24033 = vmatpush3.bf16.msra.mxu0 %v28116_v60  ;;  %20615 = vmatprep.subr.bf16.mxu1 %v28119_v57  ;;  %v28180_v60 = vld [vmem:[#allocation13 + $0x1438] ss:$28 sps:$4 sm:$0xff]   ;;  %v28177_v57 = vld [vmem:[#allocation13 + $0x9b0] ss:$28 sps:$4 sm:$0xff]  }
 0xb06   :  { %24040 = vmatprep.subr.bf16.mxu0 %v28120_v21  ;;  %v28181_v21 = vld [vmem:[#allocation13 + $0x1278] ss:$28 sps:$4 sm:$0xff]  }
 0xb07   :  { %20607 = vmatmul.mubr.bf16.vlgmr.msra.gmra.mrb[56].mxu1 %v29267_v33  ;;  %v28131_v33 = vld [vmem:[#allocation13 + $0xe88] ss:$28 sps:$4 sm:$0xff]  }
 0xb08   :  { %20932 = vmatmul.mubr.bf16.vlgmr.msra.gmra.mrb[48].mxu0 %v29306_v55  ;;  %20616 = vmatpush1.bf16.msra.mxu1 %v28117_v62  ;;  %v28184_v62 = vld [vmem:[#allocation13 + $0x9ec] ss:$28 sps:$4 sm:$0xff]  }
 0xb09   :  { %20647 = vmatprep.mubr.bf16.mxu1 %v29270_v3  ;;  %24041 = vmatpush3.bf16.msra.mxu0 %v28121_v25  ;;  %v28136_v3 = vld [vmem:[#allocation13 + $0xec0] ss:$28 sps:$4 sm:$0xff]   ;;  %v28185_v25 = vld [vmem:[#allocation13 + $0x1470] ss:$28 sps:$4 sm:$0xff]  }
 0xb0a   :  { %20971 = vmatprep.mubr.bf16.mxu0 %v29309_v47  ;;  %20617 = vmatprep.subr.bf16.mxu1 %v28124_v13  ;;  %v28182_v13 = vld [vmem:[#allocation13 + $0x9e8] ss:$28 sps:$4 sm:$0xff]  }
 0xb0b   :  { %24042 = vmatprep.subr.bf16.mxu0 %v28125_v17  ;;  %v28186_v17 = vld [vmem:[#allocation13 + $0x12b0] ss:$28 sps:$4 sm:$0xff]  }
 0xb0c   :  { %20618 = vmatpush1.bf16.msra.mxu1 %v28122_v26  ;;  %v28189_v26 = vld [vmem:[#allocation13 + $0xa24] ss:$28 sps:$4 sm:$0xff]  }
 0xb0d   :  { %24043 = vmatpush3.bf16.msra.mxu0 %v28126_v36  ;;  %20619 = vmatprep.subr.bf16.mxu1 %v28129_v10  ;;  %v28190_v36 = vld [vmem:[#allocation13 + $0x14a8] ss:$28 sps:$4 sm:$0xff]   ;;  %v28187_v10 = vld [vmem:[#allocation13 + $0xa20] ss:$28 sps:$4 sm:$0xff]  }
 0xb0e   :  { %24044 = vmatprep.subr.bf16.mxu0 %v28130_v28  ;;  %v28191_v28 = vld [vmem:[#allocation13 + $0x12e8] ss:$28 sps:$4 sm:$0xff]  }
 0xb10   :  { %20620 = vmatpush1.bf16.msra.mxu1 %v28127_v9  ;;  %v28194_v9 = vld [vmem:[#allocation13 + $0xa5c] ss:$28 sps:$4 sm:$0xff]  }
 0xb11   :  { %24045 = vmatpush3.bf16.msra.mxu0 %v28131_v33  ;;  %20621 = vmatprep.subr.bf16.mxu1 %v28134_v39  ;;  %v28195_v33 = vld [vmem:[#allocation13 + $0x14e0] ss:$28 sps:$4 sm:$0xff]   ;;  %v28192_v39 = vld [vmem:[#allocation13 + $0xa58] ss:$28 sps:$4 sm:$0xff]  }
 0xb12   :  { %24046 = vmatprep.subr.bf16.mxu0 %v28135_v42  ;;  %v28196_v42 = vld [vmem:[#allocation13 + $0x1320] ss:$28 sps:$4 sm:$0xff]  }
 0xb14   :  { %20622 = vmatpush1.bf16.msra.mxu1 %v28132_v48  ;;  %v28199_v48 = vld [vmem:[#allocation13 + $0xa94] ss:$28 sps:$4 sm:$0xff]  }
 0xb15   :  { %24047 = vmatpush3.bf16.msra.mxu0 %v28136_v3  ;;  %20623 = vmatprep.subr.bf16.mxu1 %v28139_v40  ;;  %v28197_v3 = vld [vmem:[#allocation13 + $0xa90] ss:$28 sps:$4 sm:$0xff]  }
 0xb16   :  { %24048 = vmatprep.subr.bf16.mxu0 %v28140_v41  ;;  %v28202_v40 = vld [vmem:[#allocation13 + $0xacc] ss:$28 sps:$4 sm:$0xff]  }
 0xb17   :  { %v28200_v41 = vld [vmem:[#allocation13 + $0xac8] ss:$28 sps:$4 sm:$0xff]  }
 0xb18   :  { %20624 = vmatpush1.bf16.msra.mxu1 %v28137_v59  ;;  %v28205_v59 = vld [vmem:[#allocation13 + $0xb04] ss:$28 sps:$4 sm:$0xff]  }
 0xb19   :  { %24049 = vmatpush3.bf16.msra.mxu0 %v28141_v53  ;;  %20625 = vmatprep.subr.bf16.mxu1 %v28144_v32  ;;  %v28203_v53 = vld [vmem:[#allocation13 + $0xb00] ss:$28 sps:$4 sm:$0xff]  }
 0xb1a   :  { %24050 = vmatprep.subr.bf16.mxu0 %v28145_v45  ;;  %v28208_v32 = vld [vmem:[#allocation13 + $0xb3c] ss:$28 sps:$4 sm:$0xff]  }
 0xb1b   :  { %v28206_v45 = vld [vmem:[#allocation13 + $0xb38] ss:$28 sps:$4 sm:$0xff]  }
 0xb1c   :  { %20626 = vmatpush1.bf16.msra.mxu1 %v28142_v54  ;;  %v28211_v54 = vld [vmem:[#allocation13 + $0xb74] ss:$28 sps:$4 sm:$0xff]  }
 0xb1d   :  { %24051 = vmatpush3.bf16.msra.mxu0 %v28146_v35  ;;  %20627 = vmatprep.subr.bf16.mxu1 %v28149_v23  ;;  %v28209_v35 = vld [vmem:[#allocation13 + $0xb70] ss:$28 sps:$4 sm:$0xff]   ;;  %v29350_v23 = vld [vmem:[#allocation14] sm:$0xff] }
 0xb1e   :  { %24052 = vmatprep.subr.bf16.mxu0 %v28150_v7  ;;  %v16553_v7 = vrot.slane %v29350_v23, %v29003_v15 }
 0xb20   :  { %20628 = vmatpush1.bf16.msra.mxu1 %v28147_v58  ;;  %v16557_v58 = vrot.slane %v29350_v23, %v28976_v14 }
 0xb21   :  { %24053 = vmatpush3.bf16.msra.mxu0 %v28151_v38  ;;  %20629 = vmatprep.subr.bf16.mxu1 %v28154_v52  ;;  %v28212_v38 = vld [vmem:[#allocation13 + $0xba8] ss:$28 sps:$4 sm:$0xff]   ;;  %v16565_v52 = vrot.slane %v29350_v23, %v29008_v37 }
 0xb22   :  { %24054 = vmatprep.subr.bf16.mxu0 %v28155_v46  ;;  %v28217_v46 = vld [vmem:[#allocation13 + $0xbe4] ss:$28 sps:$4 sm:$0xff]  }
 0xb24   :  { %20630 = vmatpush1.bf16.msra.mxu1 %v28152_v63 }
 0xb25   :  { %24055 = vmatpush3.bf16.msra.mxu0 %v28156_v43  ;;  %20631 = vmatprep.subr.bf16.mxu1 %v28159_v11 }
 0xb26   :  { %24062 = vmatprep.subr.bf16.mxu0 %v28160_v34 }
 0xb28   :  { %20972 = vmatmul.mubr.bf16.vlgmr.msra.gmra.mrb[52].mxu0 %v29318_v6  ;;  %20632 = vmatpush1.bf16.msra.mxu1 %v28157_v12 }
 0xb29   :  { %24063 = vmatpush3.bf16.msra.mxu0 %v28161_v0  ;;  %21011 = vmatprep.mubr.bf16.mxu0 %v29321_v27 }
 0xb2a   :  { %20633 = vmatprep.subr.bf16.mxu1 %v28164_v44  ;;  %24064 = vmatprep.subr.bf16.mxu0 %v28165_v2  ;;  %v28215_v2 = vld [vmem:[#allocation13 + $0xbe0] ss:$28 sps:$4 sm:$0xff]  }
 0xb2c   :  { %20634 = vmatpush1.bf16.msra.mxu1 %v28162_v22 }
 0xb2d   :  { %24065 = vmatpush3.bf16.msra.mxu0 %v28166_v56  ;;  %20635 = vmatprep.subr.bf16.mxu1 %v28169_v61  ;;  %v28220_v61 = vld [vmem:[#allocation13 + $0xc1c] ss:$28 sps:$4 sm:$0xff]  }
 0xb2e   :  { %24066 = vmatprep.subr.bf16.mxu0 %v28170_v4 }
 0xb30   :  { %20636 = vmatpush1.bf16.msra.mxu1 %v28167_v5 }
 0xb31   :  { %24067 = vmatpush3.bf16.msra.mxu0 %v28171_v18  ;;  %20637 = vmatprep.subr.bf16.mxu1 %v28174_v30  ;;  %v28218_v30 = vld [vmem:[#allocation13 + $0xc18] ss:$28 sps:$4 sm:$0xff]  }
 0xb32   :  { %24068 = vmatprep.subr.bf16.mxu0 %v28175_v29  ;;  %v28223_v29 = vld [vmem:[#allocation13 + $0xc54] ss:$28 sps:$4 sm:$0xff]  }
 0xb34   :  { %20638 = vmatpush1.bf16.msra.mxu1 %v28172_v24  ;;  %v28221_v24 = vld [vmem:[#allocation13 + $0xc50] ss:$28 sps:$4 sm:$0xff]  }
 0xb35   :  { %24069 = vmatpush3.bf16.msra.mxu0 %v28176_v49  ;;  %20639 = vmatprep.subr.bf16.mxu1 %v28179_v16  ;;  %v28226_v49 = vld [vmem:[#allocation13 + $0xc8c] ss:$28 sps:$4 sm:$0xff]  }
 0xb36   :  { %24070 = vmatprep.subr.bf16.mxu0 %v28180_v60  ;;  %v28224_v16 = vld [vmem:[#allocation13 + $0xc88] ss:$28 sps:$4 sm:$0xff]  }
 0xb38   :  { %20640 = vmatpush1.bf16.msra.mxu1 %v28177_v57  ;;  %v28229_v57 = vld [vmem:[#allocation13 + $0xcc4] ss:$28 sps:$4 sm:$0xff]  }
 0xb39   :  { %24071 = vmatpush3.bf16.msra.mxu0 %v28181_v21  ;;  %20641 = vmatprep.subr.bf16.mxu1 %v28184_v62 }
 0xb3a   :  { %24072 = vmatprep.subr.bf16.mxu0 %v28185_v25 }
 0xb3c   :  { %20642 = vmatpush1.bf16.msra.mxu1 %v28182_v13 }
 0xb3d   :  { %24073 = vmatpush3.bf16.msra.mxu0 %v28186_v17  ;;  %20643 = vmatprep.subr.bf16.mxu1 %v28189_v26 }
 0xb3e   :  { %24074 = vmatprep.subr.bf16.mxu0 %v28190_v36  ;;  %v28227_v36 = vld [vmem:[#allocation13 + $0xcc0] ss:$28 sps:$4 sm:$0xff]  }
 0xb40   :  { %20644 = vmatpush1.bf16.msra.mxu1 %v28187_v10 }
 0xb41   :  { %24075 = vmatpush3.bf16.msra.mxu0 %v28191_v28  ;;  %20645 = vmatprep.subr.bf16.mxu1 %v28194_v9  ;;  %v28232_v28 = vld [vmem:[#allocation13 + $0xcfc] ss:$28 sps:$4 sm:$0xff]  }
 0xb42   :  { %24076 = vmatprep.subr.bf16.mxu0 %v28195_v33  ;;  %v28230_v9 = vld [vmem:[#allocation13 + $0xcf8] ss:$28 sps:$4 sm:$0xff]  }
 0xb43   :  { %v28235_v33 = vld [vmem:[#allocation13 + $0xd34] ss:$28 sps:$4 sm:$0xff]  }
 0xb44   :  { %20646 = vmatpush1.bf16.msra.mxu1 %v28192_v39  ;;  %v28233_v39 = vld [vmem:[#allocation13 + $0xd30] ss:$28 sps:$4 sm:$0xff]  }
 0xb45   :  { %24077 = vmatpush3.bf16.msra.mxu0 %v28196_v42  ;;  %20656 = vmatprep.subr.bf16.mxu1 %v28199_v48  ;;  %v28238_v42 = vld [vmem:[#allocation13 + $0xd6c] ss:$28 sps:$4 sm:$0xff]  }
 0xb47   :  { %20648 = vmatmul.mubr.bf16.vlgmr.msra.gmra.mrb[56].mxu1 %v29282_v50  ;;  %v28214_v50 = vld [vmem:[#allocation13 + $0xbac] ss:$28 sps:$4 sm:$0xff]  }
 0xb48   :  { %21012 = vmatmul.mubr.bf16.vlgmr.msra.gmra.mrb[56].mxu0 %v29327_v51  ;;  %20657 = vmatpush1.bf16.msra.mxu1 %v28197_v3 }
 0xb49   :  { %20688 = vmatprep.mubr.bf16.mxu1 %v29285_v31  ;;  %20658 = vmatprep.subr.bf16.mxu1 %v28202_v40  ;;  %v16561_v31 = vrot.slane %v29350_v23, %v29023_v1 }
 0xb4c   :  { %20659 = vmatpush1.bf16.msra.mxu1 %v28200_v41  ;;  %v28236_v41 = vld [vmem:[#allocation13 + $0xd68] ss:$28 sps:$4 sm:$0xff]  }
 0xb4d   :  { %20660 = vmatprep.subr.bf16.mxu1 %v28205_v59 }
 0xb50   :  { %20661 = vmatpush1.bf16.msra.mxu1 %v28203_v53  ;;  %v28241_v53 = vld [vmem:[#allocation13 + $0xda4] ss:$28 sps:$4 sm:$0xff]  }
 0xb51   :  { %20662 = vmatprep.subr.bf16.mxu1 %v28208_v32 }
 0xb54   :  { %20663 = vmatpush1.bf16.msra.mxu1 %v28206_v45 }
 0xb55   :  { %20664 = vmatprep.subr.bf16.mxu1 %v28211_v54  ;;  %v28239_v54 = vld [vmem:[#allocation13 + $0xda0] ss:$28 sps:$4 sm:$0xff]  }
 0xb58   :  { %20665 = vmatpush1.bf16.msra.mxu1 %v28209_v35 }
 0xb59   :  { %20666 = vmatprep.subr.bf16.mxu1 %v28214_v50 }
 0xb5a   :  { %v20280_v63 = vpop.f32.mrb[52].mxu1 }
 0xb5b   :  { %v24114_v43 = vadd.f32 %v20280_v63, %v16553_v7  ;;  %v20526_v11 = vpop.f32.mrb[32].mxu0  ;;  %v20282_v34 = vpop.f32.mrb[53].mxu1  ;;  %v28244_v7 = vld [vmem:[#allocation13 + $0xddc] ss:$28 sps:$4 sm:$0xff]   ;;  %v28248_v63 = vld [vmem:[#allocation13 + $0xe48] ss:$28 sps:$4 sm:$0xff]  }
 0xb5c   :  { %v24116_v12 = vadd.f32 %v20526_v11, %v16561_v31  ;;  %v24115_v0 = vadd.f32 %v20282_v34, %v16557_v58  ;;  %v20528_v15 = vpop.f32.mrb[33].mxu0  ;;  %v20284_v44 = vpop.f32.mrb[54].mxu1  ;;  %20667 = vmatpush1.bf16.msra.mxu1 %v28212_v38  ;;  %v28242_v58 = vld [vmem:[#allocation13 + $0xdd8] ss:$28 sps:$4 sm:$0xff]   ;;  %v28251_v11 = vld [vmem:[#allocation13 + $0xe80] ss:$28 sps:$4 sm:$0xff]  }
 0xb5d   :  { %v23813_v1 = vmul.f32 -1.442695, %v24114_v43  ;;  %v24117_v22 = vadd.f32 %v20528_v15, %v16565_v52  ;;  %v20530_v56 = vpop.f32.mrb[34].mxu0  ;;  %v20285_v14 = vpop.f32.mrb[55].mxu1  ;;  %20668 = vmatprep.subr.bf16.mxu1 %v28217_v46  ;;  %v28247_v38 = vld [vmem:[#allocation13 + $0xe14] ss:$28 sps:$4 sm:$0xff]  }
 0xb5e   :  { %v23815_v4 = vmul.f32 -1.442695, %v24116_v12  ;;  %v23814_v37 = vmul.f32 -1.442695, %v24115_v0  ;;  %v20531_v5 = vpop.f32.mrb[35].mxu0 }
 0xb5f   :  { %28465 = vpow2.f32 %v23813_v1  ;;  %v23816_v18 = vmul.f32 -1.442695, %v24117_v22  ;;  %v28245_v52 = vld [vmem:[#allocation13 + $0xe10] ss:$28 sps:$4 sm:$0xff]   ;;  %v28253_v43 = vld [vmem:[#allocation13 + $0xe84] ss:$28 sps:$4 sm:$0xff]  }
 0xb60   :  { %28467 = vpow2.f32 %v23815_v4  ;;  %20669 = vmatpush1.bf16.msra.mxu1 %v28215_v2  ;;  %v28250_v46 = vld [vmem:[#allocation13 + $0xe4c] ss:$28 sps:$4 sm:$0xff]   ;;  %v28256_v34 = vld [vmem:[#allocation13 + $0xebc] ss:$28 sps:$4 sm:$0xff]   ;;  %v28259_v0 = vld [vmem:[#allocation13 + $0xef4] ss:$28 sps:$4 sm:$0xff]  }
 0xb61   :  { %28469 = vpow2.f32 %v23814_v37  ;;  %20670 = vmatprep.subr.bf16.mxu1 %v28220_v61  ;;  %v28254_v12 = vld [vmem:[#allocation13 + $0xeb8] ss:$28 sps:$4 sm:$0xff]   ;;  %v28257_v15 = vld [vmem:[#allocation13 + $0xef0] ss:$28 sps:$4 sm:$0xff]   ;;  %v28265_v2 = vld [vmem:[#allocation13 + $0xf64] ss:$28 sps:$4 sm:$0xff]  }
 0xb62   :  { %28471 = vpow2.f32 %v23816_v18  ;;  %v28262_v44 = vld [vmem:[#allocation13 + $0xf2c] ss:$28 sps:$4 sm:$0xff]   ;;  %v28263_v56 = vld [vmem:[#allocation13 + $0xf60] ss:$28 sps:$4 sm:$0xff]  }
 0xb63   :  { %v28268_v37 = vld [vmem:[#allocation13 + $0xf9c] ss:$28 sps:$4 sm:$0xff]  }
 0xb64   :  { %20671 = vmatpush1.bf16.msra.mxu1 %v28218_v30  ;;  %v28266_v30 = vld [vmem:[#allocation13 + $0xf98] ss:$28 sps:$4 sm:$0xff]  }
 0xb65   :  { %20672 = vmatprep.subr.bf16.mxu1 %v28223_v29  ;;  %v28271_v29 = vld [vmem:[#allocation13 + $0xfd4] ss:$28 sps:$4 sm:$0xff]  }
 0xb68   :  { %20673 = vmatpush1.bf16.msra.mxu1 %v28221_v24  ;;  %v28269_v24 = vld [vmem:[#allocation13 + $0xfd0] ss:$28 sps:$4 sm:$0xff]  }
 0xb69   :  { %v28466_v60 = vpop.eup %28465  ;;  %20674 = vmatprep.subr.bf16.mxu1 %v28226_v49  ;;  %v28272_v49 = vld [vmem:[#allocation13 + $0x1008] ss:$28 sps:$4 sm:$0xff]  }
 0xb6a   :  { %v28468_v21 = vpop.eup %28467  ;;  %v21040_v62 = vadd.f32 1.0, %v28466_v60  ;;  %v28275_v60 = vld [vmem:[#allocation13 + $0x1040] ss:$28 sps:$4 sm:$0xff]  }
 0xb6b   :  { %v28470_v25 = vpop.eup %28469  ;;  %v21042_v13 = vadd.f32 1.0, %v28468_v21  ;;  %v28278_v21 = vld [vmem:[#allocation13 + $0x1078] ss:$28 sps:$4 sm:$0xff]  }
 0xb6c   :  { %v28472_v17 = vpop.eup %28471  ;;  %28473 = vrcp.f32 %v21040_v62  ;;  %v21041_v26 = vadd.f32 1.0, %v28470_v25  ;;  %20675 = vmatpush1.bf16.msra.mxu1 %v28224_v16  ;;  %v28277_v16 = vld [vmem:[#allocation13 + $0x1044] ss:$28 sps:$4 sm:$0xff]   ;;  %v28283_v62 = vld [vmem:[#allocation13 + $0x10b4] ss:$28 sps:$4 sm:$0xff]  }
 0xb6d   :  { %28475 = vrcp.f32 %v21042_v13  ;;  %v21043_v10 = vadd.f32 1.0, %v28472_v17  ;;  %20676 = vmatprep.subr.bf16.mxu1 %v28229_v57  ;;  %v28280_v57 = vld [vmem:[#allocation13 + $0x107c] ss:$28 sps:$4 sm:$0xff]   ;;  %v28281_v25 = vld [vmem:[#allocation13 + $0x10b0] ss:$28 sps:$4 sm:$0xff]  }
 0xb6e   :  { %28477 = vrcp.f32 %v21041_v26  ;;  %v28286_v13 = vld [vmem:[#allocation13 + $0x10ec] ss:$28 sps:$4 sm:$0xff]   ;;  %v28289_v26 = vld [vmem:[#allocation13 + $0x1124] ss:$28 sps:$4 sm:$0xff]  }
 0xb6f   :  { %28479 = vrcp.f32 %v21043_v10  ;;  %v28284_v17 = vld [vmem:[#allocation13 + $0x10e8] ss:$28 sps:$4 sm:$0xff]  }
 0xb70   :  { %20677 = vmatpush1.bf16.msra.mxu1 %v28227_v36 }
 0xb71   :  { %20678 = vmatprep.subr.bf16.mxu1 %v28232_v28  ;;  %v28287_v28 = vld [vmem:[#allocation13 + $0x1120] ss:$28 sps:$4 sm:$0xff]  }
 0xb74   :  { %20679 = vmatpush1.bf16.msra.mxu1 %v28230_v9 }
 0xb75   :  { %20680 = vmatprep.subr.bf16.mxu1 %v28235_v33 }
 0xb76   :  { %v28474_v48 = vpop.eup %28473 }
 0xb77   :  { %v28476_v3 = vpop.eup %28475  ;;  %21061 = vst [vmem:[#allocation16] sm:$0xff] %v28474_v48 }
 0xb78   :  { %v28478_v40 = vpop.eup %28477  ;;  %21063 = vst [vmem:[#allocation16 + $0x10] sm:$0xff] %v28476_v3  ;;  %20681 = vmatpush1.bf16.msra.mxu1 %v28233_v39  ;;  %v28292_v39 = vld [vmem:[#allocation13 + $0x115c] ss:$28 sps:$4 sm:$0xff]  }
 0xb79   :  { %v28480_v59 = vpop.eup %28479  ;;  %21062 = vst [vmem:[#allocation16 + $0x8] sm:$0xff] %v28478_v40  ;;  %20682 = vmatprep.subr.bf16.mxu1 %v28238_v42  ;;  %v28290_v3 = vld [vmem:[#allocation13 + $0x1158] ss:$28 sps:$4 sm:$0xff]  }
 0xb7a   :  { %21064 = vst [vmem:[#allocation16 + $0x18] sm:$0xff] %v28480_v59  ;;  %v28295_v40 = vld [vmem:[#allocation13 + $0x1194] ss:$28 sps:$4 sm:$0xff]   ;;  %v28298_v59 = vld [vmem:[#allocation13 + $0x11cc] ss:$28 sps:$4 sm:$0xff]  }
 0xb7b   :  { %v23968_v32 = vpop.f32.mrb[36].mxu0 }
 0xb7c   :  { %v23969_v45 = vpop.f32.mrb[37].mxu0  ;;  %20683 = vmatpush1.bf16.msra.mxu1 %v28236_v41  ;;  %v28293_v41 = vld [vmem:[#allocation13 + $0x1190] ss:$28 sps:$4 sm:$0xff]  }
 0xb7d   :  { %v23970_v35 = vadd.f32 %v23969_v45, %v23968_v32  ;;  %v23971_v50 = vpop.f32.mrb[38].mxu0  ;;  %20684 = vmatprep.subr.bf16.mxu1 %v28241_v53  ;;  %v28296_v53 = vld [vmem:[#allocation13 + $0x11c8] ss:$28 sps:$4 sm:$0xff]   ;;  %v28299_v45 = vld [vmem:[#allocation13 + $0x1200] ss:$28 sps:$4 sm:$0xff]  }
 0xb7e   :  { %v23972_v31 = vpop.f32.mrb[39].mxu0  ;;  %v28301_v32 = vld [vmem:[#allocation13 + $0x1204] ss:$28 sps:$4 sm:$0xff]   ;;  %v28307_v50 = vld [vmem:[#allocation13 + $0x1274] ss:$28 sps:$4 sm:$0xff]  }
 0xb7f   :  { %v28310_v31 = vld [vmem:[#allocation13 + $0x12ac] ss:$28 sps:$4 sm:$0xff]  }
 0xb80   :  { %20685 = vmatpush1.bf16.msra.mxu1 %v28239_v54  ;;  %v28304_v54 = vld [vmem:[#allocation13 + $0x123c] ss:$28 sps:$4 sm:$0xff]  }
 0xb81   :  { %20686 = vmatprep.subr.bf16.mxu1 %v28244_v7  ;;  %v28305_v7 = vld [vmem:[#allocation13 + $0x1270] ss:$28 sps:$4 sm:$0xff]  }
 0xb84   :  { %20687 = vmatpush1.bf16.msra.mxu1 %v28242_v58  ;;  %v28313_v58 = vld [vmem:[#allocation13 + $0x12e4] ss:$28 sps:$4 sm:$0xff]  }
 0xb85   :  { %20697 = vmatprep.subr.bf16.mxu1 %v28247_v38 }
 0xb87   :  { %20689 = vmatmul.mubr.bf16.vlgmr.msra.gmra.mrb[56].mxu1 %v29306_v55  ;;  %v28260_v55 = vld [vmem:[#allocation13 + $0xf28] ss:$28 sps:$4 sm:$0xff]  }
 0xb88   :  { %20698 = vmatpush1.bf16.msra.mxu1 %v28245_v52  ;;  %20729 = vmatprep.mubr.bf16.mxu1 %v29309_v47  ;;  %v16577_v47 = vrot.slane %v29350_v23, %v29066_v20  ;;  %v28274_v20 = vld [vmem:[#allocation13 + $0x100c] ss:$28 sps:$4 sm:$0xff]   ;;  %v28311_v52 = vld [vmem:[#allocation13 + $0x12e0] ss:$28 sps:$4 sm:$0xff]  }
 0xb89   :  { %20699 = vmatprep.subr.bf16.mxu1 %v28250_v46 }
 0xb8a   :  { %v20814_v14 = vadd.f32 %v23970_v35, %v16577_v47  ;;  %v28302_v35 = vld [vmem:[#allocation13 + $0x1238] ss:$28 sps:$4 sm:$0xff]   ;;  %v28325_v47 = vld [vmem:[#allocation13 + $0x13c4] ss:$28 sps:$4 sm:$0xff]  }
 0xb8c   :  { %20700 = vmatpush1.bf16.msra.mxu1 %v28248_v63 }
 0xb8d   :  { %20701 = vmatprep.subr.bf16.mxu1 %v28253_v43  ;;  %v28316_v43 = vld [vmem:[#allocation13 + $0x131c] ss:$28 sps:$4 sm:$0xff]  }
 0xb90   :  { %20702 = vmatpush1.bf16.msra.mxu1 %v28251_v11 }
 0xb91   :  { %20703 = vmatprep.subr.bf16.mxu1 %v28256_v34 }
 0xb94   :  { %20704 = vmatpush1.bf16.msra.mxu1 %v28254_v12  ;;  %v28314_v12 = vld [vmem:[#allocation13 + $0x1318] ss:$28 sps:$4 sm:$0xff]  }
 0xb95   :  { %20705 = vmatprep.subr.bf16.mxu1 %v28259_v0  ;;  %v28319_v0 = vld [vmem:[#allocation13 + $0x1354] ss:$28 sps:$4 sm:$0xff]  }
 0xb98   :  { %20706 = vmatpush1.bf16.msra.mxu1 %v28257_v15  ;;  %v28317_v15 = vld [vmem:[#allocation13 + $0x1350] ss:$28 sps:$4 sm:$0xff]  }
 0xb99   :  { %20707 = vmatprep.subr.bf16.mxu1 %v28262_v44  ;;  %v28322_v44 = vld [vmem:[#allocation13 + $0x138c] ss:$28 sps:$4 sm:$0xff]  }
 0xb9b   :  { %v23990_v1 = vpop.f32.mrb[40].mxu0 }
 0xb9c   :  { %v23991_v22 = vpop.f32.mrb[41].mxu0  ;;  %20708 = vmatpush1.bf16.msra.mxu1 %v28260_v55  ;;  %v28320_v55 = vld [vmem:[#allocation13 + $0x1388] ss:$28 sps:$4 sm:$0xff]  }
 0xb9d   :  { %v23992_v61 = vadd.f32 %v23991_v22, %v23990_v1  ;;  %v23993_v4 = vpop.f32.mrb[42].mxu0  ;;  %20709 = vmatprep.subr.bf16.mxu1 %v28265_v2  ;;  %v28323_v2 = vld [vmem:[#allocation13 + $0x13c0] ss:$28 sps:$4 sm:$0xff]   ;;  %v28326_v22 = vld [vmem:[#allocation13 + $0x13f8] ss:$28 sps:$4 sm:$0xff]  }
 0xb9e   :  { %v23994_v5 = vpop.f32.mrb[43].mxu0  ;;  %v28328_v1 = vld [vmem:[#allocation13 + $0x13fc] ss:$28 sps:$4 sm:$0xff]   ;;  %v28332_v4 = vld [vmem:[#allocation13 + $0x1468] ss:$28 sps:$4 sm:$0xff]  }
 0xb9f   :  { %v20854_v18 = vadd.f32 %v23992_v61, %v20814_v14  ;;  %v28329_v14 = vld [vmem:[#allocation13 + $0x1430] ss:$28 sps:$4 sm:$0xff]  }
 0xba0   :  { %20710 = vmatpush1.bf16.msra.mxu1 %v28263_v56  ;;  %v28331_v56 = vld [vmem:[#allocation13 + $0x1434] ss:$28 sps:$4 sm:$0xff]   ;;  %v28334_v61 = vld [vmem:[#allocation13 + $0x146c] ss:$28 sps:$4 sm:$0xff]  }
 0xba1   :  { %20711 = vmatprep.subr.bf16.mxu1 %v28268_v37  ;;  %v28337_v37 = vld [vmem:[#allocation13 + $0x14a4] ss:$28 sps:$4 sm:$0xff]  }
 0xba4   :  { %20712 = vmatpush1.bf16.msra.mxu1 %v28266_v30  ;;  %v28335_v30 = vld [vmem:[#allocation13 + $0x14a0] ss:$28 sps:$4 sm:$0xff]  }
 0xba5   :  { %20713 = vmatprep.subr.bf16.mxu1 %v28271_v29 }
 0xba8   :  { %20714 = vmatpush1.bf16.msra.mxu1 %v28269_v24 }
 0xba9   :  { %20715 = vmatprep.subr.bf16.mxu1 %v28274_v20  ;;  %v28340_v20 = vld [vmem:[#allocation13 + $0x14dc] ss:$28 sps:$4 sm:$0xff]  }
 0xbac   :  { %20716 = vmatpush1.bf16.msra.mxu1 %v28272_v49 }
 0xbad   :  { %20717 = vmatprep.subr.bf16.mxu1 %v28277_v16 }
 0xbb0   :  { %20718 = vmatpush1.bf16.msra.mxu1 %v28275_v60  ;;  %v28338_v60 = vld [vmem:[#allocation13 + $0x14d8] ss:$28 sps:$4 sm:$0xff]  }
 0xbb1   :  { %20719 = vmatprep.subr.bf16.mxu1 %v28280_v57 }
 0xbb4   :  { %20720 = vmatpush1.bf16.msra.mxu1 %v28278_v21 }
 0xbb5   :  { %20721 = vmatprep.subr.bf16.mxu1 %v28283_v62 }
 0xbb8   :  { %20722 = vmatpush1.bf16.msra.mxu1 %v28281_v25 }
 0xbb9   :  { %20723 = vmatprep.subr.bf16.mxu1 %v28286_v13 }
 0xbbb   :  { %v24012_v36 = vpop.f32.mrb[44].mxu0 }
 0xbbc   :  { %v24013_v10 = vpop.f32.mrb[45].mxu0  ;;  %20724 = vmatpush1.bf16.msra.mxu1 %v28284_v17 }
 0xbbd   :  { %v24014_v9 = vadd.f32 %v24013_v10, %v24012_v36  ;;  %v24015_v33 = vpop.f32.mrb[46].mxu0  ;;  %20725 = vmatprep.subr.bf16.mxu1 %v28289_v26 }
 0xbbe   :  { %v24016_v42 = vpop.f32.mrb[47].mxu0  ;;  %v16573_v33 = vrot.slane %v29350_v23, %v29026_v8 }
 0xbbf   :  { %v20894_v48 = vadd.f32 %v24014_v9, %v20854_v18  ;;  %v16569_v9 = vrot.slane %v29350_v23, %v29045_v19 }
 0xbc0   :  { %20726 = vmatpush1.bf16.msra.mxu1 %v28287_v28 }
 0xbc1   :  { %20727 = vmatprep.subr.bf16.mxu1 %v28292_v39 }
 0xbc4   :  { %20728 = vmatpush1.bf16.msra.mxu1 %v28290_v3 }
 0xbc5   :  { %20738 = vmatprep.subr.bf16.mxu1 %v28295_v40 }
 0xbc7   :  { %20730 = vmatmul.mubr.bf16.vlgmr.msra.gmra.mrb[56].mxu1 %v29318_v6  ;;  %v28308_v6 = vld [vmem:[#allocation13 + $0x12a8] ss:$28 sps:$4 sm:$0xff]  }
 0xbc8   :  { %20739 = vmatpush1.bf16.msra.mxu1 %v28293_v41  ;;  %20770 = vmatprep.mubr.bf16.mxu1 %v29321_v27 }
 0xbc9   :  { %20740 = vmatprep.subr.bf16.mxu1 %v28298_v59 }
 0xbcc   :  { %20741 = vmatpush1.bf16.msra.mxu1 %v28296_v53 }
 0xbcd   :  { %20742 = vmatprep.subr.bf16.mxu1 %v28301_v32 }
 0xbd0   :  { %20743 = vmatpush1.bf16.msra.mxu1 %v28299_v45 }
 0xbd1   :  { %20744 = vmatprep.subr.bf16.mxu1 %v28304_v54 }
 0xbd4   :  { %20745 = vmatpush1.bf16.msra.mxu1 %v28302_v35 }
 0xbd5   :  { %20746 = vmatprep.subr.bf16.mxu1 %v28307_v50 }
 0xbd8   :  { %20747 = vmatpush1.bf16.msra.mxu1 %v28305_v7 }
 0xbd9   :  { %20748 = vmatprep.subr.bf16.mxu1 %v28310_v31 }
 0xbdb   :  { %v24034_v27 = vpop.f32.mrb[48].mxu0 }
 0xbdc   :  { %v24035_v38 = vpop.f32.mrb[49].mxu0  ;;  %20749 = vmatpush1.bf16.msra.mxu1 %v28308_v6 }
 0xbdd   :  { %v24036_v46 = vadd.f32 %v24035_v38, %v24034_v27  ;;  %v24037_v63 = vpop.f32.mrb[50].mxu0  ;;  %20750 = vmatprep.subr.bf16.mxu1 %v28313_v58 }
 0xbde   :  { %v24038_v11 = vpop.f32.mrb[51].mxu0 }
 0xbdf   :  { %v20934_v34 = vadd.f32 %v24036_v46, %v20894_v48 }
 0xbe0   :  { %20751 = vmatpush1.bf16.msra.mxu1 %v28311_v52 }
 0xbe1   :  { %20752 = vmatprep.subr.bf16.mxu1 %v28316_v43 }
 0xbe4   :  { %20753 = vmatpush1.bf16.msra.mxu1 %v28314_v12 }
 0xbe5   :  { %20754 = vmatprep.subr.bf16.mxu1 %v28319_v0 }
 0xbe8   :  { %20755 = vmatpush1.bf16.msra.mxu1 %v28317_v15 }
 0xbe9   :  { %20756 = vmatprep.subr.bf16.mxu1 %v28322_v44 }
 0xbec   :  { %20757 = vmatpush1.bf16.msra.mxu1 %v28320_v55 }
 0xbed   :  { %20758 = vmatprep.subr.bf16.mxu1 %v28325_v47 }
 0xbf0   :  { %20759 = vmatpush1.bf16.msra.mxu1 %v28323_v2 }
 0xbf1   :  { %20760 = vmatprep.subr.bf16.mxu1 %v28328_v1 }
 0xbf4   :  { %20761 = vmatpush1.bf16.msra.mxu1 %v28326_v22 }
 0xbf5   :  { %20762 = vmatprep.subr.bf16.mxu1 %v28331_v56 }
 0xbf8   :  { %20763 = vmatpush1.bf16.msra.mxu1 %v28329_v14 }
 0xbf9   :  { %20764 = vmatprep.subr.bf16.mxu1 %v28334_v61 }
 0xbfb   :  { %v24056_v5 = vpop.f32.mrb[52].mxu0 }
 0xbfc   :  { %v24057_v18 = vpop.f32.mrb[53].mxu0  ;;  %20765 = vmatpush1.bf16.msra.mxu1 %v28332_v4 }
 0xbfd   :  { %v24058_v29 = vadd.f32 %v24057_v18, %v24056_v5  ;;  %v24059_v24 = vpop.f32.mrb[54].mxu0  ;;  %20766 = vmatprep.subr.bf16.mxu1 %v28337_v37 }
 0xbfe   :  { %v24060_v49 = vpop.f32.mrb[55].mxu0 }
 0xbff   :  { %v20974_v16 = vadd.f32 %v24058_v29, %v20934_v34 }
 0xc00   :  { %20767 = vmatpush1.bf16.msra.mxu1 %v28335_v30 }
 0xc01   :  { %20768 = vmatprep.subr.bf16.mxu1 %v28340_v20 }
 0xc04   :  { %20769 = vmatpush1.bf16.msra.mxu1 %v28338_v60 }
 0xc07   :  { %20771 = vmatmul.mubr.bf16.vlgmr.msra.gmra.mrb[56].mxu1 %v29327_v51 }
 0xc1b   :  { %v24078_v57 = vpop.f32.mrb[56].mxu0 }
 0xc1c   :  { %v24079_v21 = vpop.f32.mrb[57].mxu0 }
 0xc1d   :  { %v24080_v62 = vadd.f32 %v24079_v21, %v24078_v57  ;;  %v24081_v25 = vpop.f32.mrb[58].mxu0 }
 0xc1e   :  { %v24082_v13 = vpop.f32.mrb[59].mxu0 }
 0xc1f   :  { %v21014_v17 = vadd.f32 %v24080_v62, %v20974_v16 }
 0xc21   :  { %v23819_v26 = vmul.f32 -1.442695, %v21014_v17 }
 0xc23   :  { %28481 = vpow2.f32 %v23819_v26 }
 0xc2d   :  { %v28482_v36 = vpop.eup %28481 }
 0xc2e   :  { %v21046_v10 = vadd.f32 1.0, %v28482_v36 }
 0xc30   :  { %28483 = vrcp.f32 %v21046_v10 }
 0xc3a   :  { %v28484_v28 = vpop.eup %28483 }
 0xc3b   :  { %21067 = vst [vmem:[#allocation16 + $0x30] sm:$0xff] %v28484_v28 }
 0xcda   :  { %v20772_v51 = vpop.f32.mrb[56].mxu1 }
 0xcdb   :  { %v24118_v39 = vadd.f32 %v20772_v51, %v16569_v9  ;;  %v20774_v42 = vpop.f32.mrb[57].mxu1 }
 0xcdc   :  { %v24119_v48 = vadd.f32 %v20774_v42, %v16573_v33  ;;  %v20776_v3 = vpop.f32.mrb[58].mxu1 }
 0xcdd   :  { %v23817_v40 = vmul.f32 -1.442695, %v24118_v39  ;;  %v20777_v41 = vpop.f32.mrb[59].mxu1 }
 0xcde   :  { %v23818_v59 = vmul.f32 -1.442695, %v24119_v48 }
 0xcdf   :  { %28485 = vpow2.f32 %v23817_v40 }
 0xce0   :  { %28487 = vpow2.f32 %v23818_v59 }
 0xce9   :  { %v28486_v53 = vpop.eup %28485 }
 0xcea   :  { %v28488_v32 = vpop.eup %28487  ;;  %v21044_v45 = vadd.f32 1.0, %v28486_v53 }
 0xceb   :  { %v21045_v54 = vadd.f32 1.0, %v28488_v32 }
 0xcec   :  { %28489 = vrcp.f32 %v21044_v45 }
 0xced   :  { %28491 = vrcp.f32 %v21045_v54 }
 0xcf6   :  { %v28490_v19 = vpop.eup %28489 }
 0xcf7   :  { %v28492_v8 = vpop.eup %28491  ;;  %21065 = vst [vmem:[#allocation16 + $0x20] sm:$0xff] %v28490_v19 }
 0xcf8   :  { %21066 = vst [vmem:[#allocation16 + $0x28] sm:$0xff] %v28492_v8 }
 0xcf9   :  { %28686 = shalt.err (!%p28683_p12)
}
 0xcfa   :  { %s28687_s10 = scalar_lea.hbm %s29392_s9, 896 }
 0xcfb   :  { %p28688_p13 = scmp.ne.s32.totalorder %s29392_s9, %s28687_s10  ;;  %p28691_p0 = scmp.lt.u32.totalorder %s28687_s10, %s29392_s9 }
 0xcfd   :  { %p28693_p1 = pnand %p28691_p0, %p28688_p13 }
 0xcff   :  { %28696 = shalt.err (!%p28693_p1)
}
 0xd00   :  { %21077 = dma.vmem_to_hbm [thread:$0]  %s21075_s24, 896, %s29392_s9, [#allocation4]  }
 0xd01   :  { %28707 = dma.done.wait [#allocation4], 896  }
 0xd02   :  { %28708 = vsyncadd [#allocation4], 4294966400 }
 0xd03   :  { %21081 = vsyncpa [#allocation3], 1 }
 0xd04   :  { %21082 = vsyncpa [#allocation6], 1 }
 0xd05   :  { %21083 = vsyncpa [#allocation9], 1 }
 0xd06   :  { %21084 = vsyncpa [#allocation12], 1 }
 0xd07   :  { %21085 = vsyncpa [#allocation15], 1 }
 0xd08   :  { %21086 = vsyncpa [#allocation4], 1 }

</bundles_post_ra>
